<compile_context>
chip_gen: v7x
topology: tpu7x:2x2x1
jax: 0.10.0
libtpu: 0.0.40
codegen_flags: <defaults>
</compile_context>

<pallas_src>
import functools
import math

import jax
import jax.numpy as jnp
from jax import lax
from jax.experimental import pallas as pl
from jax.experimental.pallas import tpu as pltpu


# ----------------------------------------------------------------------------
# helpers
# ----------------------------------------------------------------------------
def _round_up(x, m):
    return ((x + m - 1) // m) * m


def _full_spec(shape):
    """BlockSpec covering the whole array (grid=(1,))."""
    n = len(shape)
    return pl.BlockSpec(tuple(int(s) for s in shape), lambda i, _n=n: (0,) * _n)


def _im2col_3x3(x_nhwc):
    """(B,H,W,C) -> (B*H*W, 9*C) patches, kernel order (kh, kw, cin)."""
    # TODO(synk): a direct halo-DMA conv (manual async copies of overlapping
    #             row tiles) would remove this 9x im2col HBM blow-up entirely;
    #             bf16 patches halve it for now.
    B, H, W, C = x_nhwc.shape
    xp = jnp.pad(x_nhwc, ((0, 0), (1, 1), (1, 1), (0, 0)))
    patches = jnp.stack(
        [xp[:, dy:dy + H, dx:dx + W, :] for dy in range(3) for dx in range(3)],
        axis=3,
    )  # (B, H, W, 9, C)
    return patches.reshape(B * H * W, 9 * C)


# ----------------------------------------------------------------------------
# Kernel 1: tiled  out = act(x @ w * scale + bias)   (conv-BN-ReLU, K/V, Q)
# ----------------------------------------------------------------------------
def _matmul_affine_kernel(x_ref, w_ref, scale_ref, bias_ref, o_ref, *, relu):
    y = jnp.dot(x_ref[...], w_ref[...], preferred_element_type=jnp.float32)
    y = y * scale_ref[...] + bias_ref[...]
    if relu:
        y = jnp.maximum(y, 0.0)
    o_ref[...] = y.astype(o_ref.dtype)


def _tiled_matmul_affine(x, w, scale, bias, *, relu, out_dtype=jnp.float32,
                         tile_m=512):
    """x:(M,K) @ w:(K,N) * scale:(N,) + bias:(N,); M-tiled, bf16 operands."""
    M, K = x.shape
    Kw, N = w.shape
    assert K == Kw
    Kp = _round_up(K, 128)
    M8 = _round_up(M, 8)
    tm = min(tile_m, M8)
    Mp = _round_up(M8, tm)

    xp = x.astype(jnp.bfloat16)
    if (Mp, Kp) != (M, K):
        xp = jnp.pad(xp, ((0, Mp - M), (0, Kp - K)))
    wp = w.astype(jnp.bfloat16)
    if Kp != K:
        wp = jnp.pad(wp, ((0, Kp - K), (0, 0)))
    scale2 = jnp.asarray(scale, jnp.float32).reshape(1, N)
    bias2 = jnp.asarray(bias, jnp.float32).reshape(1, N)

    out = pl.pallas_call(
        functools.partial(_matmul_affine_kernel, relu=relu),
        out_shape=jax.ShapeDtypeStruct((Mp, N), out_dtype),
        grid=(Mp // tm,),
        in_specs=[
            pl.BlockSpec((tm, Kp), lambda i: (i, 0)),
            pl.BlockSpec((Kp, N), lambda i: (0, 0)),   # resident weight
            pl.BlockSpec((1, N), lambda i: (0, 0)),
            pl.BlockSpec((1, N), lambda i: (0, 0)),
        ],
        out_specs=pl.BlockSpec((tm, N), lambda i: (i, 0)),
        compiler_params=pltpu.CompilerParams(
            dimension_semantics=("parallel",)),
    )(xp, wp, scale2, bias2)
    return out[:M]


def conv3x3_bn_relu(x_nhwc, w_kkio, bn_scale, bn_bias, *, tile_m=512):
    B, H, W, _ = x_nhwc.shape
    cout = w_kkio.shape[-1]
    patches = _im2col_3x3(x_nhwc.astype(jnp.bfloat16))     # (B*H*W, 9*Cin) bf16
    wmat = w_kkio.reshape(-1, cout)                        # (9*Cin, Cout)
    out = _tiled_matmul_affine(patches, wmat, bn_scale, bn_bias,
                               relu=True, out_dtype=jnp.bfloat16,
                               tile_m=tile_m)
    return out.reshape(B, H, W, cout)


# ----------------------------------------------------------------------------
# Kernel 2: spotlight attention core (per-batch grid; q/K/V already projected)
# ----------------------------------------------------------------------------
def _spotlight_attn_kernel(q_ref, kv_ref, sf_ref, am_ref, sim_ref, *, d):
    kv = kv_ref[...]                       # (HW, 2D) bf16
    k = kv[:, :d]                          # (HW, D)
    v = kv[:, d:]                          # (HW, D)
    q = q_ref[...]                         # (S, D) bf16

    # scores = q @ k^T expressed as a last-axis contraction (no .T / XLU copy)
    scores = lax.dot_general(q, k, (((1,), (1,)), ((), ())),
                             preferred_element_type=jnp.float32)
    scores = scores * (1.0 / math.sqrt(d))                     # (S, HW) f32
    m = jnp.max(scores, axis=-1, keepdims=True)
    e = jnp.exp(scores - m)
    attn = e * pl.reciprocal(jnp.sum(e, axis=-1, keepdims=True), approx=True)

    feats = jnp.dot(attn.astype(v.dtype), v,
                    preferred_element_type=jnp.float32)         # (S, D)

    # cosine similarity between spotlight attention maps (diversity term)
    nrm = jax.lax.rsqrt(jnp.sum(attn * attn, axis=-1, keepdims=True) + 1e-6)
    an = attn * nrm
    sim = lax.dot_general(an, an, (((1,), (1,)), ((), ())),
                          preferred_element_type=jnp.float32)   # (S, S)

    sf_ref[...] = feats
    am_ref[...] = attn
    sim_ref[...] = sim


def spotlight_attention(feat_nhwc, params, *, tile_m=512):
    B, H, W, D = feat_nhwc.shape
    HW = H * W
    S = params["query_embed"].shape[0]
    ones = jnp.ones((D,), jnp.float32)

    # Hoisted, batch-independent query projection (computed once, not per b).
    q = _tiled_matmul_affine(params["query_embed"], params["wq"], ones,
                             params["bq"], relu=False,
                             out_dtype=jnp.bfloat16)            # (S, D)

    # Batched K/V projection over all B*HW rows in one lane-dense matmul.
    feat = feat_nhwc.reshape(B * HW, D)
    wkv = jnp.concatenate([params["wk"], params["wv"]], axis=1)      # (D, 2D)
    bkv = jnp.concatenate([params["bk"].reshape(1, -1),
                           params["bv"].reshape(1, -1)], axis=1)     # (1, 2D)
    kv = _tiled_matmul_affine(feat, wkv, jnp.ones((2 * D,), jnp.float32), bkv,
                              relu=False, out_dtype=jnp.bfloat16,
                              tile_m=tile_m)
    kv = kv.reshape(B, HW, 2 * D)

    out_shapes = (
        jax.ShapeDtypeStruct((B, S, D), jnp.float32),    # spotlight features
        jax.ShapeDtypeStruct((B, S, HW), jnp.float32),   # attention maps
        jax.ShapeDtypeStruct((B, S, S), jnp.float32),    # similarity matrices
    )
    sf, am, sim = pl.pallas_call(
        functools.partial(_spotlight_attn_kernel, d=D),
        out_shape=out_shapes,
        grid=(B,),
        in_specs=[
            pl.BlockSpec((S, D), lambda b: (0, 0)),
            pl.BlockSpec((pl.Squeezed(), HW, 2 * D), lambda b: (b, 0, 0)),
        ],
        out_specs=[
            pl.BlockSpec((pl.Squeezed(), S, D), lambda b: (b, 0, 0)),
            pl.BlockSpec((pl.Squeezed(), S, HW), lambda b: (b, 0, 0)),
            pl.BlockSpec((pl.Squeezed(), S, S), lambda b: (b, 0, 0)),
        ],
        compiler_params=pltpu.CompilerParams(
            dimension_semantics=("parallel",)),
    )(q, kv)

    # diversity loss: mean cosine similarity between distinct spotlights (glue)
    eye = jnp.eye(S, dtype=sim.dtype)
    off = sim * (1.0 - eye)
    diversity_loss = jnp.sum(off) / (B * S * max(S - 1, 1))
    return sf, am.reshape(B, S, H, W), diversity_loss


# ----------------------------------------------------------------------------
# Kernel 3: prediction heads with a single lane-dense fused output
# ----------------------------------------------------------------------------
def _heads_kernel(x_ref,
                  wc1, bc1, gc1, hc1, wc2, bc2,
                  wo1, bo1, go1, ho1,
                  wb1, bb1,
                  wf, bf_ref,
                  out_ref):
    x = x_ref[...].astype(jnp.bfloat16)                     # (N, D)

    def ln(h, g, b):
        m = jnp.mean(h, axis=-1, keepdims=True)
        v = jnp.mean((h - m) * (h - m), axis=-1, keepdims=True)
        return (h - m) * jax.lax.rsqrt(v + 1e-5) * g[...] + b[...]

    def mm(a, w_ref_):
        return jnp.dot(a, w_ref_[...], preferred_element_type=jnp.float32)

    # class head: Linear -> LN -> ReLU -> (Dropout eval=id) -> Linear -> ReLU
    h = mm(x, wc1) + bc1[...]
    h = jnp.maximum(ln(h, gc1, hc1), 0.0)
    h = jnp.maximum(mm(h.astype(jnp.bfloat16), wc2) + bc2[...], 0.0)   # (N, D/2)

    # objectness head: Linear -> LN -> ReLU
    o = mm(x, wo1) + bo1[...]
    o = jnp.maximum(ln(o, go1, ho1), 0.0)                              # (N, D/2)

    # box head: Linear -> ReLU
    b2 = jnp.maximum(mm(x, wb1) + bb1[...], 0.0)                       # (N, D)

    # fused, lane-dense final projection: [wc3 | wo2 | wb2] packed into wf
    dh = h.shape[-1]
    wf_all = wf[...]
    out = jnp.dot(h.astype(jnp.bfloat16), wf_all[:dh],
                  preferred_element_type=jnp.float32)
    out = out + jnp.dot(o.astype(jnp.bfloat16), wf_all[dh:2 * dh],
                        preferred_element_type=jnp.float32)
    out = out + jnp.dot(b2.astype(jnp.bfloat16), wf_all[2 * dh:],
                        preferred_element_type=jnp.float32)
    out_ref[...] = out + bf_ref[...]


def prediction_heads(spotlight_features, params, num_classes):
    B, S, D = spotlight_features.shape
    N = B * S
    Dh = D // 2
    Wp = _round_up(num_classes + 5, 128)   # lane-dense fused output width
    bf16 = jnp.bfloat16

    # pack the three small final projections into one (D/2+D/2+D, Wp) weight:
    #   cols [0:nc)        -> class logits   (input: class-head hidden, D/2)
    #   col  [nc]          -> objectness     (input: obj-head hidden, D/2)
    #   cols [nc+1:nc+5)   -> boxes          (input: box-head hidden, D)
    wf = jnp.zeros((Dh + Dh + D, Wp), jnp.float32)
    wf = wf.at[:Dh, :num_classes].set(params["wc3"])
    wf = wf.at[Dh:2 * Dh, num_classes:num_classes + 1].set(params["wo2"])
    wf = wf.at[2 * Dh:, num_classes + 1:num_classes + 5].set(params["wb2"])
    bfin = jnp.zeros((1, Wp), jnp.float32)
    bfin = bfin.at[:, :num_classes].set(params["bc3"].reshape(1, -1))
    bfin = bfin.at[:, num_classes:num_classes + 1].set(
        params["bo2"].reshape(1, -1))
    bfin = bfin.at[:, num_classes + 1:num_classes + 5].set(
        params["bb2"].reshape(1, -1))

    x = spotlight_features.reshape(N, D)
    args = [
        x,
        params["wc1"].astype(bf16), params["bc1"], params["gc1"], params["hc1"],
        params["wc2"].astype(bf16), params["bc2"],
        params["wo1"].astype(bf16), params["bo1"], params["go1"], params["ho1"],
        params["wb1"].astype(bf16), params["bb1"],
        wf.astype(bf16), bfin,
    ]
    out = pl.pallas_call(
        _heads_kernel,
        out_shape=jax.ShapeDtypeStruct((N, Wp), jnp.float32),
        grid=(1,),
        in_specs=[_full_spec(a.shape) for a in args],
        out_specs=_full_spec((N, Wp)),
    )(*args)

    logits = out[:, :num_classes].reshape(B, S, num_classes)
    obj = jax.nn.sigmoid(out[:, num_classes:num_classes + 1]).reshape(B, S, 1)
    boxes = jax.nn.sigmoid(
        out[:, num_classes + 1:num_classes + 5]).reshape(B, S, 4)
    return logits, obj, boxes


# ----------------------------------------------------------------------------
# parameter construction (deterministic, synthetic; eval-mode BN folded)
# ----------------------------------------------------------------------------
def init_params(key, in_channels, num_classes, num_spotlights, hidden=256):
    def nrm(k, shape, scale=0.02):
        return scale * jax.random.normal(k, shape, jnp.float32)

    keys = iter(jax.random.split(key, 32))
    p = {}
    # feature enhancer: two 3x3 convs, BN folded to scale/bias (eval mode)
    p["conv1_w"] = nrm(next(keys), (3, 3, in_channels, hidden))
    p["conv2_w"] = nrm(next(keys), (3, 3, hidden, hidden))
    eps = 1e-5
    p["bn1_scale"] = jnp.ones((hidden,), jnp.float32) / jnp.sqrt(1.0 + eps)
    p["bn1_bias"] = jnp.zeros((hidden,), jnp.float32)
    p["bn2_scale"] = jnp.ones((hidden,), jnp.float32) / jnp.sqrt(1.0 + eps)
    p["bn2_bias"] = jnp.zeros((hidden,), jnp.float32)
    # spotlight attention
    p["query_embed"] = nrm(next(keys), (num_spotlights, hidden), 0.1)
    for name in ("q", "k", "v"):
        p[f"w{name}"] = nrm(next(keys), (hidden, hidden))
        p[f"b{name}"] = jnp.zeros((1, hidden), jnp.float32)
    # class head
    p["wc1"] = nrm(next(keys), (hidden, hidden))
    p["bc1"] = jnp.zeros((1, hidden), jnp.float32)
    p["gc1"] = jnp.ones((1, hidden), jnp.float32)
    p["hc1"] = jnp.zeros((1, hidden), jnp.float32)
    p["wc2"] = nrm(next(keys), (hidden, hidden // 2))
    p["bc2"] = jnp.zeros((1, hidden // 2), jnp.float32)
    # final class layer: xavier-like init, zero bias (per _initialize_balanced)
    lim = math.sqrt(6.0 / (hidden // 2 + num_classes))
    p["wc3"] = jax.random.uniform(next(keys), (hidden // 2, num_classes),
                                  jnp.float32, -lim, lim)
    p["bc3"] = jnp.zeros((1, num_classes), jnp.float32)
    # objectness head
    p["wo1"] = nrm(next(keys), (hidden, hidden // 2))
    p["bo1"] = jnp.zeros((1, hidden // 2), jnp.float32)
    p["go1"] = jnp.ones((1, hidden // 2), jnp.float32)
    p["ho1"] = jnp.zeros((1, hidden // 2), jnp.float32)
    p["wo2"] = nrm(next(keys), (hidden // 2, 1))
    p["bo2"] = jnp.zeros((1, 1), jnp.float32)
    # box head (part of the assumed SpotlightAttention module)
    p["wb1"] = nrm(next(keys), (hidden, hidden))
    p["bb1"] = jnp.zeros((1, hidden), jnp.float32)
    p["wb2"] = nrm(next(keys), (hidden, 4))
    p["bb2"] = jnp.zeros((1, 4), jnp.float32)
    return p


# ----------------------------------------------------------------------------
# full forward
# ----------------------------------------------------------------------------
@functools.partial(jax.jit, static_argnames=("num_classes",))
def spotlight_detection_head(x_nchw, params, num_classes):
    # NCHW (PyTorch) -> NHWC (kernel layout)
    x = jnp.transpose(x_nchw, (0, 2, 3, 1))
    # feature enhancer: conv3x3 + BN + ReLU, twice
    f = conv3x3_bn_relu(x, params["conv1_w"],
                        params["bn1_scale"], params["bn1_bias"])
    f = conv3x3_bn_relu(f, params["conv2_w"],
                        params["bn2_scale"], params["bn2_bias"])
    # spotlight attention
    sf, attn_maps, diversity_loss = spotlight_attention(f, params)
    # prediction heads (class / objectness / box) with fused lane-dense output
    logits, objectness, pred_boxes = prediction_heads(sf, params, num_classes)
    return {
        "pred_boxes": pred_boxes,
        "pred_logits": logits,
        "objectness": objectness,
        "attention_maps": attn_maps,
        "diversity_loss": diversity_loss,
        "spotlight_features": sf,
    }


if __name__ == "__main__":
    B, C_in, H, W = 2, 4, 16, 16
    num_classes = 8
    num_spotlights = 16

    key = jax.random.PRNGKey(0)
    kx, kp = jax.random.split(key)
    x = jax.random.normal(kx, (B, C_in, H, W), jnp.float32)
    params = init_params(kp, C_in, num_classes, num_spotlights)

    out = spotlight_detection_head(x, params, num_classes)
    jax.block_until_ready(out)

    assert out["pred_boxes"].shape == (B, num_spotlights, 4)
    assert out["pred_logits"].shape == (B, num_spotlights, num_classes)
    assert out["objectness"].shape == (B, num_spotlights, 1)
    assert out["attention_maps"].shape == (B, num_spotlights, H, W)
    assert out["spotlight_features"].shape == (B, num_spotlights, 256)
    print("KERNEL_OK")
</pallas_src>

<mosaic_0001>
module attributes {stable_mosaic.version = 11 : i64} {
  func.func @_matmul_affine_kernel(%arg0: i32, %arg1: memref<512x128xbf16, #tpu.memory_space<vmem>>, %arg2: memref<128x256xbf16, #tpu.memory_space<vmem>>, %arg3: memref<1x256xf32, #tpu.memory_space<vmem>>, %arg4: memref<1x256xf32, #tpu.memory_space<vmem>>, %arg5: memref<512x256xbf16, #tpu.memory_space<vmem>>) attributes {dimension_semantics = [#tpu.dimension_semantics<parallel>], iteration_bounds = array<i64: 1>, scalar_prefetch = 0 : i64, scratch_operands = 0 : i64, tpu.core_type = #tpu.core_type<tc>, window_params = [{transform_indices = @transform_0, window_bounds = array<i64: 512, 128>}, {pipeline_mode = #tpu.pipeline_mode<synchronous>, transform_indices = @transform_1, window_bounds = array<i64: 128, 256>}, {pipeline_mode = #tpu.pipeline_mode<synchronous>, transform_indices = @transform_2, window_bounds = array<i64: 1, 256>}, {pipeline_mode = #tpu.pipeline_mode<synchronous>, transform_indices = @transform_3, window_bounds = array<i64: 1, 256>}, {transform_indices = @transform_4, window_bounds = array<i64: 512, 256>}]} {
    %c0 = arith.constant 0 : index
    %c0_0 = arith.constant 0 : index
    %0 = vector.load %arg1[%c0, %c0_0] : memref<512x128xbf16, #tpu.memory_space<vmem>>, vector<512x128xbf16>
    %c0_1 = arith.constant 0 : index
    %c0_2 = arith.constant 0 : index
    %1 = vector.load %arg2[%c0_1, %c0_2] : memref<128x256xbf16, #tpu.memory_space<vmem>>, vector<128x256xbf16>
    %cst = arith.constant dense<0.000000e+00> : vector<512x256xf32>
    %2 = tpu.matmul %0, %1, %cst {dimension_numbers = #tpu.dot_dimension_numbers<[1], [0], [0], [1], [0, 0, 1, 1], [], []>} : vector<512x128xbf16>, vector<128x256xbf16>, vector<512x256xf32> -> vector<512x256xf32>
    %c0_3 = arith.constant 0 : index
    %c0_4 = arith.constant 0 : index
    %3 = vector.load %arg3[%c0_3, %c0_4] : memref<1x256xf32, #tpu.memory_space<vmem>>, vector<1x256xf32>
    %4 = vector.broadcast %3 : vector<1x256xf32> to vector<512x256xf32>
    %5 = arith.mulf %2, %4 : vector<512x256xf32>
    %c0_5 = arith.constant 0 : index
    %c0_6 = arith.constant 0 : index
    %6 = vector.load %arg4[%c0_5, %c0_6] : memref<1x256xf32, #tpu.memory_space<vmem>>, vector<1x256xf32>
    %7 = vector.broadcast %6 : vector<1x256xf32> to vector<512x256xf32>
    %8 = arith.addf %5, %7 : vector<512x256xf32>
    %cst_7 = arith.constant 0.000000e+00 : f32
    %9 = vector.broadcast %cst_7 : f32 to vector<512x256xf32>
    %10 = arith.maximumf %8, %9 : vector<512x256xf32>
    %11 = arith.truncf %10 : vector<512x256xf32> to vector<512x256xbf16>
    %c0_8 = arith.constant 0 : index
    %c0_9 = arith.constant 0 : index
    %12 = vector.load %arg5[%c0_8, %c0_9] : memref<512x256xbf16, #tpu.memory_space<vmem>>, vector<512x256xbf16>
    tpu.vector_store %arg5[%c0_8, %c0_9], %11 {strides = array<i32>} : memref<512x256xbf16, #tpu.memory_space<vmem>>, vector<512x256xbf16>,
    return
  }
  func.func @transform_0(%arg0: i32) -> (i32, i32) {
    %c0_i32 = arith.constant 0 : i32
    %c0_i32_0 = arith.constant 0 : i32
    return %arg0, %c0_i32 : i32, i32
  }
  func.func @transform_1(%arg0: i32) -> (i32, i32) {
    %c0_i32 = arith.constant 0 : i32
    %c0_i32_0 = arith.constant 0 : i32
    %c0_i32_1 = arith.constant 0 : i32
    return %c0_i32, %c0_i32_0 : i32, i32
  }
  func.func @transform_2(%arg0: i32) -> (i32, i32) {
    %c0_i32 = arith.constant 0 : i32
    %c0_i32_0 = arith.constant 0 : i32
    %c0_i32_1 = arith.constant 0 : i32
    return %c0_i32, %c0_i32_0 : i32, i32
  }
  func.func @transform_3(%arg0: i32) -> (i32, i32) {
    %c0_i32 = arith.constant 0 : i32
    %c0_i32_0 = arith.constant 0 : i32
    %c0_i32_1 = arith.constant 0 : i32
    return %c0_i32, %c0_i32_0 : i32, i32
  }
  func.func @transform_4(%arg0: i32) -> (i32, i32) {
    %c0_i32 = arith.constant 0 : i32
    %c0_i32_0 = arith.constant 0 : i32
    return %arg0, %c0_i32 : i32, i32
  }
}

module attributes {stable_mosaic.version = 11 : i64} {
  func.func @_matmul_affine_kernel(%arg0: i32, %arg1: memref<512x2304xbf16, #tpu.memory_space<vmem>>, %arg2: memref<2304x256xbf16, #tpu.memory_space<vmem>>, %arg3: memref<1x256xf32, #tpu.memory_space<vmem>>, %arg4: memref<1x256xf32, #tpu.memory_space<vmem>>, %arg5: memref<512x256xbf16, #tpu.memory_space<vmem>>) attributes {dimension_semantics = [#tpu.dimension_semantics<parallel>], iteration_bounds = array<i64: 1>, scalar_prefetch = 0 : i64, scratch_operands = 0 : i64, tpu.core_type = #tpu.core_type<tc>, window_params = [{transform_indices = @transform_0, window_bounds = array<i64: 512, 2304>}, {pipeline_mode = #tpu.pipeline_mode<synchronous>, transform_indices = @transform_1, window_bounds = array<i64: 2304, 256>}, {pipeline_mode = #tpu.pipeline_mode<synchronous>, transform_indices = @transform_2, window_bounds = array<i64: 1, 256>}, {pipeline_mode = #tpu.pipeline_mode<synchronous>, transform_indices = @transform_3, window_bounds = array<i64: 1, 256>}, {transform_indices = @transform_4, window_bounds = array<i64: 512, 256>}]} {
    %c0 = arith.constant 0 : index
    %c0_0 = arith.constant 0 : index
    %0 = vector.load %arg1[%c0, %c0_0] : memref<512x2304xbf16, #tpu.memory_space<vmem>>, vector<512x2304xbf16>
    %c0_1 = arith.constant 0 : index
    %c0_2 = arith.constant 0 : index
    %1 = vector.load %arg2[%c0_1, %c0_2] : memref<2304x256xbf16, #tpu.memory_space<vmem>>, vector<2304x256xbf16>
    %cst = arith.constant dense<0.000000e+00> : vector<512x256xf32>
    %2 = tpu.matmul %0, %1, %cst {dimension_numbers = #tpu.dot_dimension_numbers<[1], [0], [0], [1], [0, 0, 1, 1], [], []>} : vector<512x2304xbf16>, vector<2304x256xbf16>, vector<512x256xf32> -> vector<512x256xf32>
    %c0_3 = arith.constant 0 : index
    %c0_4 = arith.constant 0 : index
    %3 = vector.load %arg3[%c0_3, %c0_4] : memref<1x256xf32, #tpu.memory_space<vmem>>, vector<1x256xf32>
    %4 = vector.broadcast %3 : vector<1x256xf32> to vector<512x256xf32>
    %5 = arith.mulf %2, %4 : vector<512x256xf32>
    %c0_5 = arith.constant 0 : index
    %c0_6 = arith.constant 0 : index
    %6 = vector.load %arg4[%c0_5, %c0_6] : memref<1x256xf32, #tpu.memory_space<vmem>>, vector<1x256xf32>
    %7 = vector.broadcast %6 : vector<1x256xf32> to vector<512x256xf32>
    %8 = arith.addf %5, %7 : vector<512x256xf32>
    %cst_7 = arith.constant 0.000000e+00 : f32
    %9 = vector.broadcast %cst_7 : f32 to vector<512x256xf32>
    %10 = arith.maximumf %8, %9 : vector<512x256xf32>
    %11 = arith.truncf %10 : vector<512x256xf32> to vector<512x256xbf16>
    %c0_8 = arith.constant 0 : index
    %c0_9 = arith.constant 0 : index
    %12 = vector.load %arg5[%c0_8, %c0_9] : memref<512x256xbf16, #tpu.memory_space<vmem>>, vector<512x256xbf16>
    tpu.vector_store %arg5[%c0_8, %c0_9], %11 {strides = array<i32>} : memref<512x256xbf16, #tpu.memory_space<vmem>>, vector<512x256xbf16>,
    return
  }
  func.func @transform_0(%arg0: i32) -> (i32, i32) {
    %c0_i32 = arith.constant 0 : i32
    %c0_i32_0 = arith.constant 0 : i32
    return %arg0, %c0_i32 : i32, i32
  }
  func.func @transform_1(%arg0: i32) -> (i32, i32) {
    %c0_i32 = arith.constant 0 : i32
    %c0_i32_0 = arith.constant 0 : i32
    %c0_i32_1 = arith.constant 0 : i32
    return %c0_i32, %c0_i32_0 : i32, i32
  }
  func.func @transform_2(%arg0: i32) -> (i32, i32) {
    %c0_i32 = arith.constant 0 : i32
    %c0_i32_0 = arith.constant 0 : i32
    %c0_i32_1 = arith.constant 0 : i32
    return %c0_i32, %c0_i32_0 : i32, i32
  }
  func.func @transform_3(%arg0: i32) -> (i32, i32) {
    %c0_i32 = arith.constant 0 : i32
    %c0_i32_0 = arith.constant 0 : i32
    %c0_i32_1 = arith.constant 0 : i32
    return %c0_i32, %c0_i32_0 : i32, i32
  }
  func.func @transform_4(%arg0: i32) -> (i32, i32) {
    %c0_i32 = arith.constant 0 : i32
    %c0_i32_0 = arith.constant 0 : i32
    return %arg0, %c0_i32 : i32, i32
  }
}

module attributes {stable_mosaic.version = 11 : i64} {
  func.func @_matmul_affine_kernel(%arg0: i32, %arg1: memref<512x256xbf16, #tpu.memory_space<vmem>>, %arg2: memref<256x512xbf16, #tpu.memory_space<vmem>>, %arg3: memref<1x512xf32, #tpu.memory_space<vmem>>, %arg4: memref<1x512xf32, #tpu.memory_space<vmem>>, %arg5: memref<512x512xbf16, #tpu.memory_space<vmem>>) attributes {dimension_semantics = [#tpu.dimension_semantics<parallel>], iteration_bounds = array<i64: 1>, scalar_prefetch = 0 : i64, scratch_operands = 0 : i64, tpu.core_type = #tpu.core_type<tc>, window_params = [{transform_indices = @transform_0, window_bounds = array<i64: 512, 256>}, {pipeline_mode = #tpu.pipeline_mode<synchronous>, transform_indices = @transform_1, window_bounds = array<i64: 256, 512>}, {pipeline_mode = #tpu.pipeline_mode<synchronous>, transform_indices = @transform_2, window_bounds = array<i64: 1, 512>}, {pipeline_mode = #tpu.pipeline_mode<synchronous>, transform_indices = @transform_3, window_bounds = array<i64: 1, 512>}, {transform_indices = @transform_4, window_bounds = array<i64: 512, 512>}]} {
    %c0 = arith.constant 0 : index
    %c0_0 = arith.constant 0 : index
    %0 = vector.load %arg1[%c0, %c0_0] : memref<512x256xbf16, #tpu.memory_space<vmem>>, vector<512x256xbf16>
    %c0_1 = arith.constant 0 : index
    %c0_2 = arith.constant 0 : index
    %1 = vector.load %arg2[%c0_1, %c0_2] : memref<256x512xbf16, #tpu.memory_space<vmem>>, vector<256x512xbf16>
    %cst = arith.constant dense<0.000000e+00> : vector<512x512xf32>
    %2 = tpu.matmul %0, %1, %cst {dimension_numbers = #tpu.dot_dimension_numbers<[1], [0], [0], [1], [0, 0, 1, 1], [], []>} : vector<512x256xbf16>, vector<256x512xbf16>, vector<512x512xf32> -> vector<512x512xf32>
    %c0_3 = arith.constant 0 : index
    %c0_4 = arith.constant 0 : index
    %3 = vector.load %arg3[%c0_3, %c0_4] : memref<1x512xf32, #tpu.memory_space<vmem>>, vector<1x512xf32>
    %4 = vector.broadcast %3 : vector<1x512xf32> to vector<512x512xf32>
    %5 = arith.mulf %2, %4 : vector<512x512xf32>
    %c0_5 = arith.constant 0 : index
    %c0_6 = arith.constant 0 : index
    %6 = vector.load %arg4[%c0_5, %c0_6] : memref<1x512xf32, #tpu.memory_space<vmem>>, vector<1x512xf32>
    %7 = vector.broadcast %6 : vector<1x512xf32> to vector<512x512xf32>
    %8 = arith.addf %5, %7 : vector<512x512xf32>
    %9 = arith.truncf %8 : vector<512x512xf32> to vector<512x512xbf16>
    %c0_7 = arith.constant 0 : index
    %c0_8 = arith.constant 0 : index
    %10 = vector.load %arg5[%c0_7, %c0_8] : memref<512x512xbf16, #tpu.memory_space<vmem>>, vector<512x512xbf16>
    tpu.vector_store %arg5[%c0_7, %c0_8], %9 {strides = array<i32>} : memref<512x512xbf16, #tpu.memory_space<vmem>>, vector<512x512xbf16>,
    return
  }
  func.func @transform_0(%arg0: i32) -> (i32, i32) {
    %c0_i32 = arith.constant 0 : i32
    %c0_i32_0 = arith.constant 0 : i32
    return %arg0, %c0_i32 : i32, i32
  }
  func.func @transform_1(%arg0: i32) -> (i32, i32) {
    %c0_i32 = arith.constant 0 : i32
    %c0_i32_0 = arith.constant 0 : i32
    %c0_i32_1 = arith.constant 0 : i32
    return %c0_i32, %c0_i32_0 : i32, i32
  }
  func.func @transform_2(%arg0: i32) -> (i32, i32) {
    %c0_i32 = arith.constant 0 : i32
    %c0_i32_0 = arith.constant 0 : i32
    %c0_i32_1 = arith.constant 0 : i32
    return %c0_i32, %c0_i32_0 : i32, i32
  }
  func.func @transform_3(%arg0: i32) -> (i32, i32) {
    %c0_i32 = arith.constant 0 : i32
    %c0_i32_0 = arith.constant 0 : i32
    %c0_i32_1 = arith.constant 0 : i32
    return %c0_i32, %c0_i32_0 : i32, i32
  }
  func.func @transform_4(%arg0: i32) -> (i32, i32) {
    %c0_i32 = arith.constant 0 : i32
    %c0_i32_0 = arith.constant 0 : i32
    return %arg0, %c0_i32 : i32, i32
  }
}

module attributes {stable_mosaic.version = 11 : i64} {
  func.func @_matmul_affine_kernel(%arg0: i32, %arg1: memref<16x256xbf16, #tpu.memory_space<vmem>>, %arg2: memref<256x256xbf16, #tpu.memory_space<vmem>>, %arg3: memref<1x256xf32, #tpu.memory_space<vmem>>, %arg4: memref<1x256xf32, #tpu.memory_space<vmem>>, %arg5: memref<16x256xbf16, #tpu.memory_space<vmem>>) attributes {dimension_semantics = [#tpu.dimension_semantics<parallel>], iteration_bounds = array<i64: 1>, scalar_prefetch = 0 : i64, scratch_operands = 0 : i64, tpu.core_type = #tpu.core_type<tc>, window_params = [{transform_indices = @transform_0, window_bounds = array<i64: 16, 256>}, {pipeline_mode = #tpu.pipeline_mode<synchronous>, transform_indices = @transform_1, window_bounds = array<i64: 256, 256>}, {pipeline_mode = #tpu.pipeline_mode<synchronous>, transform_indices = @transform_2, window_bounds = array<i64: 1, 256>}, {pipeline_mode = #tpu.pipeline_mode<synchronous>, transform_indices = @transform_3, window_bounds = array<i64: 1, 256>}, {transform_indices = @transform_4, window_bounds = array<i64: 16, 256>}]} {
    %c0 = arith.constant 0 : index
    %c0_0 = arith.constant 0 : index
    %0 = vector.load %arg1[%c0, %c0_0] : memref<16x256xbf16, #tpu.memory_space<vmem>>, vector<16x256xbf16>
    %c0_1 = arith.constant 0 : index
    %c0_2 = arith.constant 0 : index
    %1 = vector.load %arg2[%c0_1, %c0_2] : memref<256x256xbf16, #tpu.memory_space<vmem>>, vector<256x256xbf16>
    %cst = arith.constant dense<0.000000e+00> : vector<16x256xf32>
    %2 = tpu.matmul %0, %1, %cst {dimension_numbers = #tpu.dot_dimension_numbers<[1], [0], [0], [1], [0, 0, 1, 1], [], []>} : vector<16x256xbf16>, vector<256x256xbf16>, vector<16x256xf32> -> vector<16x256xf32>
    %c0_3 = arith.constant 0 : index
    %c0_4 = arith.constant 0 : index
    %3 = vector.load %arg3[%c0_3, %c0_4] : memref<1x256xf32, #tpu.memory_space<vmem>>, vector<1x256xf32>
    %4 = vector.broadcast %3 : vector<1x256xf32> to vector<16x256xf32>
    %5 = arith.mulf %2, %4 : vector<16x256xf32>
    %c0_5 = arith.constant 0 : index
    %c0_6 = arith.constant 0 : index
    %6 = vector.load %arg4[%c0_5, %c0_6] : memref<1x256xf32, #tpu.memory_space<vmem>>, vector<1x256xf32>
    %7 = vector.broadcast %6 : vector<1x256xf32> to vector<16x256xf32>
    %8 = arith.addf %5, %7 : vector<16x256xf32>
    %9 = arith.truncf %8 : vector<16x256xf32> to vector<16x256xbf16>
    %c0_7 = arith.constant 0 : index
    %c0_8 = arith.constant 0 : index
    %10 = vector.load %arg5[%c0_7, %c0_8] : memref<16x256xbf16, #tpu.memory_space<vmem>>, vector<16x256xbf16>
    tpu.vector_store %arg5[%c0_7, %c0_8], %9 {strides = array<i32>} : memref<16x256xbf16, #tpu.memory_space<vmem>>, vector<16x256xbf16>,
    return
  }
  func.func @transform_0(%arg0: i32) -> (i32, i32) {
    %c0_i32 = arith.constant 0 : i32
    %c0_i32_0 = arith.constant 0 : i32
    return %arg0, %c0_i32 : i32, i32
  }
  func.func @transform_1(%arg0: i32) -> (i32, i32) {
    %c0_i32 = arith.constant 0 : i32
    %c0_i32_0 = arith.constant 0 : i32
    %c0_i32_1 = arith.constant 0 : i32
    return %c0_i32, %c0_i32_0 : i32, i32
  }
  func.func @transform_2(%arg0: i32) -> (i32, i32) {
    %c0_i32 = arith.constant 0 : i32
    %c0_i32_0 = arith.constant 0 : i32
    %c0_i32_1 = arith.constant 0 : i32
    return %c0_i32, %c0_i32_0 : i32, i32
  }
  func.func @transform_3(%arg0: i32) -> (i32, i32) {
    %c0_i32 = arith.constant 0 : i32
    %c0_i32_0 = arith.constant 0 : i32
    %c0_i32_1 = arith.constant 0 : i32
    return %c0_i32, %c0_i32_0 : i32, i32
  }
  func.func @transform_4(%arg0: i32) -> (i32, i32) {
    %c0_i32 = arith.constant 0 : i32
    %c0_i32_0 = arith.constant 0 : i32
    return %arg0, %c0_i32 : i32, i32
  }
}

module attributes {stable_mosaic.version = 11 : i64} {
  func.func @_spotlight_attn_kernel(%arg0: i32, %arg1: memref<16x256xbf16, #tpu.memory_space<vmem>>, %arg2: memref<1x256x512xbf16, #tpu.memory_space<vmem>>, %arg3: memref<1x16x256xf32, #tpu.memory_space<vmem>>, %arg4: memref<1x16x256xf32, #tpu.memory_space<vmem>>, %arg5: memref<1x16x16xf32, #tpu.memory_space<vmem>>) attributes {dimension_semantics = [#tpu.dimension_semantics<parallel>], iteration_bounds = array<i64: 2>, scalar_prefetch = 0 : i64, scratch_operands = 0 : i64, tpu.core_type = #tpu.core_type<tc>, window_params = [{pipeline_mode = #tpu.pipeline_mode<synchronous>, transform_indices = @transform_0, window_bounds = array<i64: 16, 256>}, {transform_indices = @transform_1, window_bounds = array<i64: 1, 256, 512>}, {transform_indices = @transform_2, window_bounds = array<i64: 1, 16, 256>}, {transform_indices = @transform_3, window_bounds = array<i64: 1, 16, 256>}, {transform_indices = @transform_4, window_bounds = array<i64: 1, 16, 16>}]} {
    %c0 = arith.constant 0 : index
    %c0_0 = arith.constant 0 : index
    %c0_1 = arith.constant 0 : index
    %0 = vector.load %arg2[%c0, %c0_0, %c0_1] : memref<1x256x512xbf16, #tpu.memory_space<vmem>>, vector<1x256x512xbf16>
    %1 = vector.shape_cast %0 : vector<1x256x512xbf16> to vector<256x512xbf16>
    %2 = vector.extract_strided_slice %1 {offsets = [0, 0], sizes = [256, 256], strides = [1, 1]} : vector<256x512xbf16> to vector<256x256xbf16>
    %3 = vector.extract_strided_slice %1 {offsets = [0, 256], sizes = [256, 256], strides = [1, 1]} : vector<256x512xbf16> to vector<256x256xbf16>
    %c0_2 = arith.constant 0 : index
    %c0_3 = arith.constant 0 : index
    %4 = vector.load %arg1[%c0_2, %c0_3] : memref<16x256xbf16, #tpu.memory_space<vmem>>, vector<16x256xbf16>
    %cst = arith.constant dense<0.000000e+00> : vector<16x256xf32>
    %5 = tpu.matmul %4, %2, %cst {dimension_numbers = #tpu.dot_dimension_numbers<[1], [1], [0], [0], [0, 0, 1, 0], [], []>} : vector<16x256xbf16>, vector<256x256xbf16>, vector<16x256xf32> -> vector<16x256xf32>
    %cst_4 = arith.constant 6.250000e-02 : f32
    %6 = vector.broadcast %cst_4 : f32 to vector<16x256xf32>
    %7 = arith.mulf %5, %6 : vector<16x256xf32>
    %cst_5 = arith.constant dense<0xFF800000> : vector<16xf32>
    %8 = vector.multi_reduction <maximumf>, %7, %cst_5 [1] : vector<16x256xf32> to vector<16xf32>
    %9 = vector.shape_cast %8 : vector<16xf32> to vector<16x1xf32>
    %10 = vector.broadcast %9 : vector<16x1xf32> to vector<16x256xf32>
    %11 = arith.subf %7, %10 : vector<16x256xf32>
    %12 = math.exp %11 : vector<16x256xf32>
    %cst_6 = arith.constant dense<0.000000e+00> : vector<16xf32>
    %13 = vector.multi_reduction <add>, %12, %cst_6 [1] : vector<16x256xf32> to vector<16xf32>
    %14 = vector.shape_cast %13 : vector<16xf32> to vector<16x1xf32>
    %15 = tpu.reciprocal %14 {approx = true} : vector<16x1xf32> -> vector<16x1xf32>
    %16 = vector.broadcast %15 : vector<16x1xf32> to vector<16x256xf32>
    %17 = arith.mulf %12, %16 : vector<16x256xf32>
    %18 = arith.truncf %17 : vector<16x256xf32> to vector<16x256xbf16>
    %cst_7 = arith.constant dense<0.000000e+00> : vector<16x256xf32>
    %19 = tpu.matmul %18, %3, %cst_7 {dimension_numbers = #tpu.dot_dimension_numbers<[1], [0], [0], [1], [0, 0, 1, 1], [], []>} : vector<16x256xbf16>, vector<256x256xbf16>, vector<16x256xf32> -> vector<16x256xf32>
    %20 = arith.mulf %17, %17 : vector<16x256xf32>
    %cst_8 = arith.constant dense<0.000000e+00> : vector<16xf32>
    %21 = vector.multi_reduction <add>, %20, %cst_8 [1] : vector<16x256xf32> to vector<16xf32>
    %22 = vector.shape_cast %21 : vector<16xf32> to vector<16x1xf32>
    %cst_9 = arith.constant 9.99999997E-7 : f32
    %23 = vector.broadcast %cst_9 : f32 to vector<16x1xf32>
    %24 = arith.addf %22, %23 : vector<16x1xf32>
    %25 = math.rsqrt %24 : vector<16x1xf32>
    %26 = vector.broadcast %25 : vector<16x1xf32> to vector<16x256xf32>
    %27 = arith.mulf %17, %26 : vector<16x256xf32>
    %cst_10 = arith.constant dense<0.000000e+00> : vector<16x16xf32>
    %28 = tpu.matmul %27, %27, %cst_10 {dimension_numbers = #tpu.dot_dimension_numbers<[1], [1], [0], [0], [0, 0, 1, 0], [], []>} : vector<16x256xf32>, vector<16x256xf32>, vector<16x16xf32> -> vector<16x16xf32>
    %c0_11 = arith.constant 0 : index
    %c0_12 = arith.constant 0 : index
    %c0_13 = arith.constant 0 : index
    %29 = vector.load %arg3[%c0_11, %c0_12, %c0_13] : memref<1x16x256xf32, #tpu.memory_space<vmem>>, vector<1x16x256xf32>
    %30 = vector.shape_cast %29 : vector<1x16x256xf32> to vector<16x256xf32>
    %31 = vector.shape_cast %19 : vector<16x256xf32> to vector<1x16x256xf32>
    tpu.vector_store %arg3[%c0_11, %c0_12, %c0_13], %31 {strides = array<i32>} : memref<1x16x256xf32, #tpu.memory_space<vmem>>, vector<1x16x256xf32>,
    %c0_14 = arith.constant 0 : index
    %c0_15 = arith.constant 0 : index
    %c0_16 = arith.constant 0 : index
    %32 = vector.load %arg4[%c0_14, %c0_15, %c0_16] : memref<1x16x256xf32, #tpu.memory_space<vmem>>, vector<1x16x256xf32>
    %33 = vector.shape_cast %32 : vector<1x16x256xf32> to vector<16x256xf32>
    %34 = vector.shape_cast %17 : vector<16x256xf32> to vector<1x16x256xf32>
    tpu.vector_store %arg4[%c0_14, %c0_15, %c0_16], %34 {strides = array<i32>} : memref<1x16x256xf32, #tpu.memory_space<vmem>>, vector<1x16x256xf32>,
    %c0_17 = arith.constant 0 : index
    %c0_18 = arith.constant 0 : index
    %c0_19 = arith.constant 0 : index
    %35 = vector.load %arg5[%c0_17, %c0_18, %c0_19] : memref<1x16x16xf32, #tpu.memory_space<vmem>>, vector<1x16x16xf32>
    %36 = vector.shape_cast %35 : vector<1x16x16xf32> to vector<16x16xf32>
    %37 = vector.shape_cast %28 : vector<16x16xf32> to vector<1x16x16xf32>
    tpu.vector_store %arg5[%c0_17, %c0_18, %c0_19], %37 {strides = array<i32>} : memref<1x16x16xf32, #tpu.memory_space<vmem>>, vector<1x16x16xf32>,
    return
  }
  func.func @transform_0(%arg0: i32) -> (i32, i32) {
    %c0_i32 = arith.constant 0 : i32
    %c0_i32_0 = arith.constant 0 : i32
    %c0_i32_1 = arith.constant 0 : i32
    return %c0_i32, %c0_i32_0 : i32, i32
  }
  func.func @transform_1(%arg0: i32) -> (i32, i32, i32) {
    %c0_i32 = arith.constant 0 : i32
    %c0_i32_0 = arith.constant 0 : i32
    %c0_i32_1 = arith.constant 0 : i32
    return %arg0, %c0_i32, %c0_i32_0 : i32, i32, i32
  }
  func.func @transform_2(%arg0: i32) -> (i32, i32, i32) {
    %c0_i32 = arith.constant 0 : i32
    %c0_i32_0 = arith.constant 0 : i32
    %c0_i32_1 = arith.constant 0 : i32
    return %arg0, %c0_i32, %c0_i32_0 : i32, i32, i32
  }
  func.func @transform_3(%arg0: i32) -> (i32, i32, i32) {
    %c0_i32 = arith.constant 0 : i32
    %c0_i32_0 = arith.constant 0 : i32
    %c0_i32_1 = arith.constant 0 : i32
    return %arg0, %c0_i32, %c0_i32_0 : i32, i32, i32
  }
  func.func @transform_4(%arg0: i32) -> (i32, i32, i32) {
    %c0_i32 = arith.constant 0 : i32
    %c0_i32_0 = arith.constant 0 : i32
    %c0_i32_1 = arith.constant 0 : i32
    return %arg0, %c0_i32, %c0_i32_0 : i32, i32, i32
  }
}

module attributes {stable_mosaic.version = 11 : i64} {
  func.func @_heads_kernel(%arg0: i32, %arg1: memref<32x256xf32, #tpu.memory_space<vmem>>, %arg2: memref<256x256xbf16, #tpu.memory_space<vmem>>, %arg3: memref<1x256xf32, #tpu.memory_space<vmem>>, %arg4: memref<1x256xf32, #tpu.memory_space<vmem>>, %arg5: memref<1x256xf32, #tpu.memory_space<vmem>>, %arg6: memref<256x128xbf16, #tpu.memory_space<vmem>>, %arg7: memref<1x128xf32, #tpu.memory_space<vmem>>, %arg8: memref<256x128xbf16, #tpu.memory_space<vmem>>, %arg9: memref<1x128xf32, #tpu.memory_space<vmem>>, %arg10: memref<1x128xf32, #tpu.memory_space<vmem>>, %arg11: memref<1x128xf32, #tpu.memory_space<vmem>>, %arg12: memref<256x256xbf16, #tpu.memory_space<vmem>>, %arg13: memref<1x256xf32, #tpu.memory_space<vmem>>, %arg14: memref<512x128xbf16, #tpu.memory_space<vmem>>, %arg15: memref<1x128xf32, #tpu.memory_space<vmem>>, %arg16: memref<32x128xf32, #tpu.memory_space<vmem>>) attributes {dimension_semantics = [#tpu.dimension_semantics<arbitrary>], iteration_bounds = array<i64: 1>, scalar_prefetch = 0 : i64, scratch_operands = 0 : i64, tpu.core_type = #tpu.core_type<tc>, window_params = [{pipeline_mode = #tpu.pipeline_mode<synchronous>, transform_indices = @transform_0, window_bounds = array<i64: 32, 256>}, {pipeline_mode = #tpu.pipeline_mode<synchronous>, transform_indices = @transform_1, window_bounds = array<i64: 256, 256>}, {pipeline_mode = #tpu.pipeline_mode<synchronous>, transform_indices = @transform_2, window_bounds = array<i64: 1, 256>}, {pipeline_mode = #tpu.pipeline_mode<synchronous>, transform_indices = @transform_3, window_bounds = array<i64: 1, 256>}, {pipeline_mode = #tpu.pipeline_mode<synchronous>, transform_indices = @transform_4, window_bounds = array<i64: 1, 256>}, {pipeline_mode = #tpu.pipeline_mode<synchronous>, transform_indices = @transform_5, window_bounds = array<i64: 256, 128>}, {pipeline_mode = #tpu.pipeline_mode<synchronous>, transform_indices = @transform_6, window_bounds = array<i64: 1, 128>}, {pipeline_mode = #tpu.pipeline_mode<synchronous>, transform_indices = @transform_7, window_bounds = array<i64: 256, 128>}, {pipeline_mode = #tpu.pipeline_mode<synchronous>, transform_indices = @transform_8, window_bounds = array<i64: 1, 128>}, {pipeline_mode = #tpu.pipeline_mode<synchronous>, transform_indices = @transform_9, window_bounds = array<i64: 1, 128>}, {pipeline_mode = #tpu.pipeline_mode<synchronous>, transform_indices = @transform_10, window_bounds = array<i64: 1, 128>}, {pipeline_mode = #tpu.pipeline_mode<synchronous>, transform_indices = @transform_11, window_bounds = array<i64: 256, 256>}, {pipeline_mode = #tpu.pipeline_mode<synchronous>, transform_indices = @transform_12, window_bounds = array<i64: 1, 256>}, {pipeline_mode = #tpu.pipeline_mode<synchronous>, transform_indices = @transform_13, window_bounds = array<i64: 512, 128>}, {pipeline_mode = #tpu.pipeline_mode<synchronous>, transform_indices = @transform_14, window_bounds = array<i64: 1, 128>}, {pipeline_mode = #tpu.pipeline_mode<synchronous>, transform_indices = @transform_15, window_bounds = array<i64: 32, 128>}]} {
    %c0 = arith.constant 0 : index
    %c0_0 = arith.constant 0 : index
    %0 = vector.load %arg1[%c0, %c0_0] : memref<32x256xf32, #tpu.memory_space<vmem>>, vector<32x256xf32>
    %1 = arith.truncf %0 : vector<32x256xf32> to vector<32x256xbf16>
    %c0_1 = arith.constant 0 : index
    %c0_2 = arith.constant 0 : index
    %2 = vector.load %arg2[%c0_1, %c0_2] : memref<256x256xbf16, #tpu.memory_space<vmem>>, vector<256x256xbf16>
    %cst = arith.constant dense<0.000000e+00> : vector<32x256xf32>
    %3 = tpu.matmul %1, %2, %cst {dimension_numbers = #tpu.dot_dimension_numbers<[1], [0], [0], [1], [0, 0, 1, 1], [], []>} : vector<32x256xbf16>, vector<256x256xbf16>, vector<32x256xf32> -> vector<32x256xf32>
    %c0_3 = arith.constant 0 : index
    %c0_4 = arith.constant 0 : index
    %4 = vector.load %arg3[%c0_3, %c0_4] : memref<1x256xf32, #tpu.memory_space<vmem>>, vector<1x256xf32>
    %5 = vector.broadcast %4 : vector<1x256xf32> to vector<32x256xf32>
    %6 = arith.addf %3, %5 : vector<32x256xf32>
    %cst_5 = arith.constant dense<0.000000e+00> : vector<32xf32>
    %7 = vector.multi_reduction <add>, %6, %cst_5 [1] : vector<32x256xf32> to vector<32xf32>
    %8 = vector.shape_cast %7 : vector<32xf32> to vector<32x1xf32>
    %cst_6 = arith.constant 2.560000e+02 : f32
    %9 = vector.broadcast %cst_6 : f32 to vector<32x1xf32>
    %10 = arith.divf %8, %9 : vector<32x1xf32>
    %11 = vector.broadcast %10 : vector<32x1xf32> to vector<32x256xf32>
    %12 = arith.subf %6, %11 : vector<32x256xf32>
    %13 = vector.broadcast %10 : vector<32x1xf32> to vector<32x256xf32>
    %14 = arith.subf %6, %13 : vector<32x256xf32>
    %15 = arith.mulf %12, %14 : vector<32x256xf32>
    %cst_7 = arith.constant dense<0.000000e+00> : vector<32xf32>
    %16 = vector.multi_reduction <add>, %15, %cst_7 [1] : vector<32x256xf32> to vector<32xf32>
    %17 = vector.shape_cast %16 : vector<32xf32> to vector<32x1xf32>
    %cst_8 = arith.constant 2.560000e+02 : f32
    %18 = vector.broadcast %cst_8 : f32 to vector<32x1xf32>
    %19 = arith.divf %17, %18 : vector<32x1xf32>
    %20 = vector.broadcast %10 : vector<32x1xf32> to vector<32x256xf32>
    %21 = arith.subf %6, %20 : vector<32x256xf32>
    %cst_9 = arith.constant 9.99999974E-6 : f32
    %22 = vector.broadcast %cst_9 : f32 to vector<32x1xf32>
    %23 = arith.addf %19, %22 : vector<32x1xf32>
    %24 = math.rsqrt %23 : vector<32x1xf32>
    %25 = vector.broadcast %24 : vector<32x1xf32> to vector<32x256xf32>
    %26 = arith.mulf %21, %25 : vector<32x256xf32>
    %c0_10 = arith.constant 0 : index
    %c0_11 = arith.constant 0 : index
    %27 = vector.load %arg4[%c0_10, %c0_11] : memref<1x256xf32, #tpu.memory_space<vmem>>, vector<1x256xf32>
    %28 = vector.broadcast %27 : vector<1x256xf32> to vector<32x256xf32>
    %29 = arith.mulf %26, %28 : vector<32x256xf32>
    %c0_12 = arith.constant 0 : index
    %c0_13 = arith.constant 0 : index
    %30 = vector.load %arg5[%c0_12, %c0_13] : memref<1x256xf32, #tpu.memory_space<vmem>>, vector<1x256xf32>
    %31 = vector.broadcast %30 : vector<1x256xf32> to vector<32x256xf32>
    %32 = arith.addf %29, %31 : vector<32x256xf32>
    %cst_14 = arith.constant 0.000000e+00 : f32
    %33 = vector.broadcast %cst_14 : f32 to vector<32x256xf32>
    %34 = arith.maximumf %32, %33 : vector<32x256xf32>
    %35 = arith.truncf %34 : vector<32x256xf32> to vector<32x256xbf16>
    %c0_15 = arith.constant 0 : index
    %c0_16 = arith.constant 0 : index
    %36 = vector.load %arg6[%c0_15, %c0_16] : memref<256x128xbf16, #tpu.memory_space<vmem>>, vector<256x128xbf16>
    %cst_17 = arith.constant dense<0.000000e+00> : vector<32x128xf32>
    %37 = tpu.matmul %35, %36, %cst_17 {dimension_numbers = #tpu.dot_dimension_numbers<[1], [0], [0], [1], [0, 0, 1, 1], [], []>} : vector<32x256xbf16>, vector<256x128xbf16>, vector<32x128xf32> -> vector<32x128xf32>
    %c0_18 = arith.constant 0 : index
    %c0_19 = arith.constant 0 : index
    %38 = vector.load %arg7[%c0_18, %c0_19] : memref<1x128xf32, #tpu.memory_space<vmem>>, vector<1x128xf32>
    %39 = vector.broadcast %38 : vector<1x128xf32> to vector<32x128xf32>
    %40 = arith.addf %37, %39 : vector<32x128xf32>
    %cst_20 = arith.constant 0.000000e+00 : f32
    %41 = vector.broadcast %cst_20 : f32 to vector<32x128xf32>
    %42 = arith.maximumf %40, %41 : vector<32x128xf32>
    %c0_21 = arith.constant 0 : index
    %c0_22 = arith.constant 0 : index
    %43 = vector.load %arg8[%c0_21, %c0_22] : memref<256x128xbf16, #tpu.memory_space<vmem>>, vector<256x128xbf16>
    %cst_23 = arith.constant dense<0.000000e+00> : vector<32x128xf32>
    %44 = tpu.matmul %1, %43, %cst_23 {dimension_numbers = #tpu.dot_dimension_numbers<[1], [0], [0], [1], [0, 0, 1, 1], [], []>} : vector<32x256xbf16>, vector<256x128xbf16>, vector<32x128xf32> -> vector<32x128xf32>
    %c0_24 = arith.constant 0 : index
    %c0_25 = arith.constant 0 : index
    %45 = vector.load %arg9[%c0_24, %c0_25] : memref<1x128xf32, #tpu.memory_space<vmem>>, vector<1x128xf32>
    %46 = vector.broadcast %45 : vector<1x128xf32> to vector<32x128xf32>
    %47 = arith.addf %44, %46 : vector<32x128xf32>
    %cst_26 = arith.constant dense<0.000000e+00> : vector<32xf32>
    %48 = vector.multi_reduction <add>, %47, %cst_26 [1] : vector<32x128xf32> to vector<32xf32>
    %49 = vector.shape_cast %48 : vector<32xf32> to vector<32x1xf32>
    %cst_27 = arith.constant 1.280000e+02 : f32
    %50 = vector.broadcast %cst_27 : f32 to vector<32x1xf32>
    %51 = arith.divf %49, %50 : vector<32x1xf32>
    %52 = vector.broadcast %51 : vector<32x1xf32> to vector<32x128xf32>
    %53 = arith.subf %47, %52 : vector<32x128xf32>
    %54 = vector.broadcast %51 : vector<32x1xf32> to vector<32x128xf32>
    %55 = arith.subf %47, %54 : vector<32x128xf32>
    %56 = arith.mulf %53, %55 : vector<32x128xf32>
    %cst_28 = arith.constant dense<0.000000e+00> : vector<32xf32>
    %57 = vector.multi_reduction <add>, %56, %cst_28 [1] : vector<32x128xf32> to vector<32xf32>
    %58 = vector.shape_cast %57 : vector<32xf32> to vector<32x1xf32>
    %cst_29 = arith.constant 1.280000e+02 : f32
    %59 = vector.broadcast %cst_29 : f32 to vector<32x1xf32>
    %60 = arith.divf %58, %59 : vector<32x1xf32>
    %61 = vector.broadcast %51 : vector<32x1xf32> to vector<32x128xf32>
    %62 = arith.subf %47, %61 : vector<32x128xf32>
    %cst_30 = arith.constant 9.99999974E-6 : f32
    %63 = vector.broadcast %cst_30 : f32 to vector<32x1xf32>
    %64 = arith.addf %60, %63 : vector<32x1xf32>
    %65 = math.rsqrt %64 : vector<32x1xf32>
    %66 = vector.broadcast %65 : vector<32x1xf32> to vector<32x128xf32>
    %67 = arith.mulf %62, %66 : vector<32x128xf32>
    %c0_31 = arith.constant 0 : index
    %c0_32 = arith.constant 0 : index
    %68 = vector.load %arg10[%c0_31, %c0_32] : memref<1x128xf32, #tpu.memory_space<vmem>>, vector<1x128xf32>
    %69 = vector.broadcast %68 : vector<1x128xf32> to vector<32x128xf32>
    %70 = arith.mulf %67, %69 : vector<32x128xf32>
    %c0_33 = arith.constant 0 : index
    %c0_34 = arith.constant 0 : index
    %71 = vector.load %arg11[%c0_33, %c0_34] : memref<1x128xf32, #tpu.memory_space<vmem>>, vector<1x128xf32>
    %72 = vector.broadcast %71 : vector<1x128xf32> to vector<32x128xf32>
    %73 = arith.addf %70, %72 : vector<32x128xf32>
    %cst_35 = arith.constant 0.000000e+00 : f32
    %74 = vector.broadcast %cst_35 : f32 to vector<32x128xf32>
    %75 = arith.maximumf %73, %74 : vector<32x128xf32>
    %c0_36 = arith.constant 0 : index
    %c0_37 = arith.constant 0 : index
    %76 = vector.load %arg12[%c0_36, %c0_37] : memref<256x256xbf16, #tpu.memory_space<vmem>>, vector<256x256xbf16>
    %cst_38 = arith.constant dense<0.000000e+00> : vector<32x256xf32>
    %77 = tpu.matmul %1, %76, %cst_38 {dimension_numbers = #tpu.dot_dimension_numbers<[1], [0], [0], [1], [0, 0, 1, 1], [], []>} : vector<32x256xbf16>, vector<256x256xbf16>, vector<32x256xf32> -> vector<32x256xf32>
    %c0_39 = arith.constant 0 : index
    %c0_40 = arith.constant 0 : index
    %78 = vector.load %arg13[%c0_39, %c0_40] : memref<1x256xf32, #tpu.memory_space<vmem>>, vector<1x256xf32>
    %79 = vector.broadcast %78 : vector<1x256xf32> to vector<32x256xf32>
    %80 = arith.addf %77, %79 : vector<32x256xf32>
    %cst_41 = arith.constant 0.000000e+00 : f32
    %81 = vector.broadcast %cst_41 : f32 to vector<32x256xf32>
    %82 = arith.maximumf %80, %81 : vector<32x256xf32>
    %c0_42 = arith.constant 0 : index
    %c0_43 = arith.constant 0 : index
    %83 = vector.load %arg14[%c0_42, %c0_43] : memref<512x128xbf16, #tpu.memory_space<vmem>>, vector<512x128xbf16>
    %84 = arith.truncf %42 : vector<32x128xf32> to vector<32x128xbf16>
    %85 = vector.extract_strided_slice %83 {offsets = [0, 0], sizes = [128, 128], strides = [1, 1]} : vector<512x128xbf16> to vector<128x128xbf16>
    %cst_44 = arith.constant dense<0.000000e+00> : vector<32x128xf32>
    %86 = tpu.matmul %84, %85, %cst_44 {dimension_numbers = #tpu.dot_dimension_numbers<[1], [0], [0], [1], [0, 0, 1, 1], [], []>} : vector<32x128xbf16>, vector<128x128xbf16>, vector<32x128xf32> -> vector<32x128xf32>
    %87 = arith.truncf %75 : vector<32x128xf32> to vector<32x128xbf16>
    %88 = vector.extract_strided_slice %83 {offsets = [128, 0], sizes = [128, 128], strides = [1, 1]} : vector<512x128xbf16> to vector<128x128xbf16>
    %cst_45 = arith.constant dense<0.000000e+00> : vector<32x128xf32>
    %89 = tpu.matmul %87, %88, %cst_45 {dimension_numbers = #tpu.dot_dimension_numbers<[1], [0], [0], [1], [0, 0, 1, 1], [], []>} : vector<32x128xbf16>, vector<128x128xbf16>, vector<32x128xf32> -> vector<32x128xf32>
    %90 = arith.addf %86, %89 : vector<32x128xf32>
    %91 = arith.truncf %82 : vector<32x256xf32> to vector<32x256xbf16>
    %92 = vector.extract_strided_slice %83 {offsets = [256, 0], sizes = [256, 128], strides = [1, 1]} : vector<512x128xbf16> to vector<256x128xbf16>
    %cst_46 = arith.constant dense<0.000000e+00> : vector<32x128xf32>
    %93 = tpu.matmul %91, %92, %cst_46 {dimension_numbers = #tpu.dot_dimension_numbers<[1], [0], [0], [1], [0, 0, 1, 1], [], []>} : vector<32x256xbf16>, vector<256x128xbf16>, vector<32x128xf32> -> vector<32x128xf32>
    %94 = arith.addf %90, %93 : vector<32x128xf32>
    %c0_47 = arith.constant 0 : index
    %c0_48 = arith.constant 0 : index
    %95 = vector.load %arg15[%c0_47, %c0_48] : memref<1x128xf32, #tpu.memory_space<vmem>>, vector<1x128xf32>
    %96 = vector.broadcast %95 : vector<1x128xf32> to vector<32x128xf32>
    %97 = arith.addf %94, %96 : vector<32x128xf32>
    %c0_49 = arith.constant 0 : index
    %c0_50 = arith.constant 0 : index
    %98 = vector.load %arg16[%c0_49, %c0_50] : memref<32x128xf32, #tpu.memory_space<vmem>>, vector<32x128xf32>
    tpu.vector_store %arg16[%c0_49, %c0_50], %97 {strides = array<i32>} : memref<32x128xf32, #tpu.memory_space<vmem>>, vector<32x128xf32>,
    return
  }
  func.func @transform_0(%arg0: i32) -> (i32, i32) {
    %c0_i32 = arith.constant 0 : i32
    %c0_i32_0 = arith.constant 0 : i32
    %c0_i32_1 = arith.constant 0 : i32
    return %c0_i32, %c0_i32_0 : i32, i32
  }
  func.func @transform_1(%arg0: i32) -> (i32, i32) {
    %c0_i32 = arith.constant 0 : i32
    %c0_i32_0 = arith.constant 0 : i32
    %c0_i32_1 = arith.constant 0 : i32
    return %c0_i32, %c0_i32_0 : i32, i32
  }
  func.func @transform_2(%arg0: i32) -> (i32, i32) {
    %c0_i32 = arith.constant 0 : i32
    %c0_i32_0 = arith.constant 0 : i32
    %c0_i32_1 = arith.constant 0 : i32
    return %c0_i32, %c0_i32_0 : i32, i32
  }
  func.func @transform_3(%arg0: i32) -> (i32, i32) {
    %c0_i32 = arith.constant 0 : i32
    %c0_i32_0 = arith.constant 0 : i32
    %c0_i32_1 = arith.constant 0 : i32
    return %c0_i32, %c0_i32_0 : i32, i32
  }
  func.func @transform_4(%arg0: i32) -> (i32, i32) {
    %c0_i32 = arith.constant 0 : i32
    %c0_i32_0 = arith.constant 0 : i32
    %c0_i32_1 = arith.constant 0 : i32
    return %c0_i32, %c0_i32_0 : i32, i32
  }
  func.func @transform_5(%arg0: i32) -> (i32, i32) {
    %c0_i32 = arith.constant 0 : i32
    %c0_i32_0 = arith.constant 0 : i32
    %c0_i32_1 = arith.constant 0 : i32
    return %c0_i32, %c0_i32_0 : i32, i32
  }
  func.func @transform_6(%arg0: i32) -> (i32, i32) {
    %c0_i32 = arith.constant 0 : i32
    %c0_i32_0 = arith.constant 0 : i32
    %c0_i32_1 = arith.constant 0 : i32
    return %c0_i32, %c0_i32_0 : i32, i32
  }
  func.func @transform_7(%arg0: i32) -> (i32, i32) {
    %c0_i32 = arith.constant 0 : i32
    %c0_i32_0 = arith.constant 0 : i32
    %c0_i32_1 = arith.constant 0 : i32
    return %c0_i32, %c0_i32_0 : i32, i32
  }
  func.func @transform_8(%arg0: i32) -> (i32, i32) {
    %c0_i32 = arith.constant 0 : i32
    %c0_i32_0 = arith.constant 0 : i32
    %c0_i32_1 = arith.constant 0 : i32
    return %c0_i32, %c0_i32_0 : i32, i32
  }
  func.func @transform_9(%arg0: i32) -> (i32, i32) {
    %c0_i32 = arith.constant 0 : i32
    %c0_i32_0 = arith.constant 0 : i32
    %c0_i32_1 = arith.constant 0 : i32
    return %c0_i32, %c0_i32_0 : i32, i32
  }
  func.func @transform_10(%arg0: i32) -> (i32, i32) {
    %c0_i32 = arith.constant 0 : i32
    %c0_i32_0 = arith.constant 0 : i32
    %c0_i32_1 = arith.constant 0 : i32
    return %c0_i32, %c0_i32_0 : i32, i32
  }
  func.func @transform_11(%arg0: i32) -> (i32, i32) {
    %c0_i32 = arith.constant 0 : i32
    %c0_i32_0 = arith.constant 0 : i32
    %c0_i32_1 = arith.constant 0 : i32
    return %c0_i32, %c0_i32_0 : i32, i32
  }
  func.func @transform_12(%arg0: i32) -> (i32, i32) {
    %c0_i32 = arith.constant 0 : i32
    %c0_i32_0 = arith.constant 0 : i32
    %c0_i32_1 = arith.constant 0 : i32
    return %c0_i32, %c0_i32_0 : i32, i32
  }
  func.func @transform_13(%arg0: i32) -> (i32, i32) {
    %c0_i32 = arith.constant 0 : i32
    %c0_i32_0 = arith.constant 0 : i32
    %c0_i32_1 = arith.constant 0 : i32
    return %c0_i32, %c0_i32_0 : i32, i32
  }
  func.func @transform_14(%arg0: i32) -> (i32, i32) {
    %c0_i32 = arith.constant 0 : i32
    %c0_i32_0 = arith.constant 0 : i32
    %c0_i32_1 = arith.constant 0 : i32
    return %c0_i32, %c0_i32_0 : i32, i32
  }
  func.func @transform_15(%arg0: i32) -> (i32, i32) {
    %c0_i32 = arith.constant 0 : i32
    %c0_i32_0 = arith.constant 0 : i32
    %c0_i32_1 = arith.constant 0 : i32
    return %c0_i32, %c0_i32_0 : i32, i32
  }
}

</mosaic_0001>

<bundles_post_ra>
// kernel: spotlight_detection_head.6
= control target key start
LH: loop header
LB: loop body
LE: loop exit
PB: predicated region body
PF: predicated region fallthrough
CT: control target
= control target key end

     0   :  { %9 = vsyncpa [#allocation3], 0  ;;  %s2592_s0 = inlined_call_operand.vmem [shape: bf16[512,128], index: 0, kind: input, shape index: {}]   ;;  %s2593_s1 = inlined_call_operand.vmem [shape: bf16[128,256], index: 1, kind: input, shape index: {}]   ;;  %s2594_s2 = inlined_call_operand.hbm [shape: f32[1,256], index: 2, kind: input, shape index: {}]   ;;  %s2595_s3 = inlined_call_operand.hbm [shape: f32[1,256], index: 3, kind: input, shape index: {}]   ;;  %s2596_s4 = inlined_call_operand.vmem [shape: bf16[512,256], index: 4, kind: output, shape index: {}]  }
   0x1   :  { %10 = vsyncpa [#allocation5], 0  ;;  %s1908_s15 = smov [#allocation2]   ;;  %s1909_s17 = smov [#allocation4]  }
   0x2   :  { %s21_s16 = sshll.u32 %s1908_s15, 4  ;;  %s31_s18 = sshll.u32 %s1909_s17, 4  ;;  %s22_s16 = int_to_ptr.vmem [resolvable:$true] %s21_s16  ;;  %s32_s18 = int_to_ptr.vmem [resolvable:$true] %s31_s18 }
   0x3   :  { %s1860_s21 = scalar_lea.hbm %s2594_s2, 32 }
   0x4   :  { %p1861_p0 = scmp.ne.s32.totalorder %s2594_s2, %s1860_s21  ;;  %p1864_p1 = scmp.lt.u32.totalorder %s1860_s21, %s2594_s2 }
   0x6   :  { %p1866_p2 = pnand %p1864_p1, %p1861_p0 }
   0x8   :  { %1869 = shalt.err (!%p1866_p2)
}
   0x9   :  { %s1870_s26 = scalar_lea.vmem %s22_s16, 32  ;;  %p1875_p4 = scmp.lt.s32.totalorder %s22_s16, %s22_s16 }
   0xa   :  { %p1871_p3 = scmp.ne.s32.totalorder %s22_s16, %s1870_s26  ;;  %p1876_p5 = scmp.lt.s32.totalorder %s1870_s26, %s1870_s26 }
   0xc   :  { %p1877_p6 = por %p1876_p5, %p1875_p4 }
   0xe   :  { %p1878_p7 = pnand %p1877_p6, %p1871_p3 }
  0x10   :  { %1881 = shalt.err (!%p1878_p7)
}
  0x11   :  { %24 = dma.hbm_to_vmem [thread:$0]  %s2594_s2, 32, %s22_s16, [#allocation3]  }
  0x12   :  { %s1882_s5 = scalar_lea.hbm %s2595_s3, 32 }
  0x13   :  { %p1883_p8 = scmp.ne.s32.totalorder %s2595_s3, %s1882_s5  ;;  %p1886_p9 = scmp.lt.u32.totalorder %s1882_s5, %s2595_s3 }
  0x15   :  { %p1888_p10 = pnand %p1886_p9, %p1883_p8 }
  0x17   :  { %1891 = shalt.err (!%p1888_p10)
}
  0x18   :  { %s1892_s10 = scalar_lea.vmem %s32_s18, 32  ;;  %p1897_p12 = scmp.lt.s32.totalorder %s32_s18, %s32_s18 }
  0x19   :  { %p1893_p11 = scmp.ne.s32.totalorder %s32_s18, %s1892_s10  ;;  %p1898_p13 = scmp.lt.s32.totalorder %s1892_s10, %s1892_s10 }
  0x1b   :  { %p1899_p0 = por %p1898_p13, %p1897_p12 }
  0x1d   :  { %p1900_p1 = pnand %p1899_p0, %p1893_p11 }
  0x1f   :  { %1903 = shalt.err (!%p1900_p1)
}
  0x20   :  { %34 = dma.hbm_to_vmem [thread:$0]  %s2595_s3, 32, %s32_s18, [#allocation5]  }
  0x21   :  { %1904 = dma.done.wait [#allocation3], 32  }
  0x22   :  { %1905 = vsyncadd [#allocation3], 4294967264 }
  0x23   :  { %1906 = dma.done.wait [#allocation5], 32  }
  0x24   :  { %1907 = vsyncadd [#allocation5], 4294967264  ;;  %v1910_v0 = vmov 0   ;;  %v1804_v1 = vld [vmem:[%s2593_s1 + $0x4] ss:$8 sps:$4 sm:$0xff]   ;;  %v1832_v21 = vld [vmem:[%s2592_s0 + $0x10] sm:$0xff]   ;;  %v749_v49 = vlaneseq }
  0x25   :  { %426 = vmatprep.mubr.bf16.mxu0 %v1910_v0  ;;  %586 = vmatprep.mubr.bf16.mxu1 %v1910_v0  ;;  %v1806_v2 = vld [vmem:[%s2593_s1] ss:$8 sps:$4 sm:$0xff]   ;;  %v1807_v3 = vld [vmem:[%s2593_s1 + $0x14] ss:$8 sps:$4 sm:$0xff]   ;;  %v1809_v4 = vld [vmem:[%s2593_s1 + $0x10] ss:$8 sps:$4 sm:$0xff]  }
  0x26   :  { %394 = vmatprep.subr.bf16.mxu0 %v1804_v1  ;;  %1785 = vmatprep.subr.bf16.mxu1 %v1804_v1  ;;  %v1810_v5 = vld [vmem:[%s2593_s1 + $0x24] ss:$8 sps:$4 sm:$0xff]   ;;  %v1812_v6 = vld [vmem:[%s2593_s1 + $0x20] ss:$8 sps:$4 sm:$0xff]   ;;  %v1813_v7 = vld [vmem:[%s2593_s1 + $0x34] ss:$8 sps:$4 sm:$0xff]  }
  0x27   :  { %395 = vmatpush1.bf16.msra.mxu0 %v1806_v2  ;;  %1793 = vmatpush1.bf16.msra.mxu1 %v1806_v2  ;;  %v1815_v8 = vld [vmem:[%s2593_s1 + $0x30] ss:$8 sps:$4 sm:$0xff]   ;;  %v1816_v9 = vld [vmem:[%s2593_s1 + $0x44] ss:$8 sps:$4 sm:$0xff]   ;;  %v1818_v10 = vld [vmem:[%s2593_s1 + $0x40] ss:$8 sps:$4 sm:$0xff]  }
  0x28   :  { %396 = vmatprep.subr.bf16.mxu0 %v1807_v3  ;;  %1786 = vmatprep.subr.bf16.mxu1 %v1807_v3  ;;  %v1819_v11 = vld [vmem:[%s2593_s1 + $0x54] ss:$8 sps:$4 sm:$0xff]   ;;  %v1821_v12 = vld [vmem:[%s2593_s1 + $0x50] ss:$8 sps:$4 sm:$0xff]   ;;  %v1822_v13 = vld [vmem:[%s2593_s1 + $0x64] ss:$8 sps:$4 sm:$0xff]  }
  0x29   :  { %v1824_v14 = vld [vmem:[%s2593_s1 + $0x60] ss:$8 sps:$4 sm:$0xff]   ;;  %v1825_v15 = vld [vmem:[%s2593_s1 + $0x74] ss:$8 sps:$4 sm:$0xff]   ;;  %v1827_v16 = vld [vmem:[%s2593_s1 + $0x70] ss:$8 sps:$4 sm:$0xff]  }
  0x2a   :  { %v1828_v17 = vld [vmem:[%s2592_s0] sm:$0xff]   ;;  %v1830_v19 = vld [vmem:[%s2592_s0 + $0x8] sm:$0xff]   ;;  %v1833_v22 = vld [vmem:[%s2592_s0 + $0x90] sm:$0xff]   ;;  %v750_v50 = vshrl.u32 %v749_v49, 7 }
  0x2b   :  { %397 = vmatpush1.bf16.msra.mxu0 %v1809_v4  ;;  %1794 = vmatpush1.bf16.msra.mxu1 %v1809_v4  ;;  %v1829_v18 = vld [vmem:[%s2592_s0 + $0x80] sm:$0xff]   ;;  %v1831_v20 = vld [vmem:[%s2592_s0 + $0x88] sm:$0xff]   ;;  %v1834_v23 = vld [vmem:[%s2592_s0 + $0x18] sm:$0xff]  }
  0x2c   :  { %398 = vmatprep.subr.bf16.mxu0 %v1810_v5  ;;  %1787 = vmatprep.subr.bf16.mxu1 %v1810_v5  ;;  %v1835_v24 = vld [vmem:[%s2592_s0 + $0x98] sm:$0xff]   ;;  %v1836_v25 = vld [vmem:[%s2592_s0 + $0x20] sm:$0xff]   ;;  %v1838_v27 = vld [vmem:[%s2592_s0 + $0x28] sm:$0xff]   ;;  %v751_v51 = vsub.s32 0, %v750_v50  ;;  %v755_v53 = vsub.s32 1, %v750_v50 }
  0x2d   :  { %v1837_v26 = vld [vmem:[%s2592_s0 + $0xa0] sm:$0xff]   ;;  %v1839_v28 = vld [vmem:[%s2592_s0 + $0xa8] sm:$0xff]   ;;  %v1840_v29 = vld [vmem:[%s2592_s0 + $0x30] sm:$0xff]  }
  0x2e   :  { %v1841_v30 = vld [vmem:[%s2592_s0 + $0xb0] sm:$0xff]   ;;  %v1842_v31 = vld [vmem:[%s2592_s0 + $0x38] sm:$0xff]   ;;  %v1844_v33 = vld [vmem:[%s2592_s0 + $0x40] sm:$0xff]  }
  0x2f   :  { %399 = vmatpush1.bf16.msra.mxu0 %v1812_v6  ;;  %1795 = vmatpush1.bf16.msra.mxu1 %v1812_v6  ;;  %v1843_v32 = vld [vmem:[%s2592_s0 + $0xb8] sm:$0xff]   ;;  %v1845_v34 = vld [vmem:[%s2592_s0 + $0xc0] sm:$0xff]   ;;  %v1846_v35 = vld [vmem:[%s2592_s0 + $0x48] sm:$0xff]  }
  0x30   :  { %400 = vmatprep.subr.bf16.mxu0 %v1813_v7  ;;  %1788 = vmatprep.subr.bf16.mxu1 %v1813_v7  ;;  %v1847_v36 = vld [vmem:[%s2592_s0 + $0xc8] sm:$0xff]   ;;  %v1848_v37 = vld [vmem:[%s2592_s0 + $0x50] sm:$0xff]   ;;  %v1850_v39 = vld [vmem:[%s2592_s0 + $0x58] sm:$0xff]  }
  0x31   :  { %v1849_v38 = vld [vmem:[%s2592_s0 + $0xd0] sm:$0xff]   ;;  %v1851_v40 = vld [vmem:[%s2592_s0 + $0xd8] sm:$0xff]   ;;  %v1852_v41 = vld [vmem:[%s2592_s0 + $0x60] sm:$0xff]  }
  0x32   :  { %v1853_v42 = vld [vmem:[%s2592_s0 + $0xe0] sm:$0xff]   ;;  %v1854_v43 = vld [vmem:[%s2592_s0 + $0x68] sm:$0xff]   ;;  %v1856_v45 = vld [vmem:[%s2592_s0 + $0x70] sm:$0xff]  }
  0x33   :  { %401 = vmatpush1.bf16.msra.mxu0 %v1815_v8  ;;  %1796 = vmatpush1.bf16.msra.mxu1 %v1815_v8  ;;  %v1855_v44 = vld [vmem:[%s2592_s0 + $0xe8] sm:$0xff]   ;;  %v1857_v46 = vld [vmem:[%s2592_s0 + $0xf0] sm:$0xff]   ;;  %v1858_v47 = vld [vmem:[%s2592_s0 + $0x78] sm:$0xff]  }
  0x34   :  { %402 = vmatprep.subr.bf16.mxu0 %v1816_v9  ;;  %1789 = vmatprep.subr.bf16.mxu1 %v1816_v9  ;;  %v1859_v48 = vld [vmem:[%s2592_s0 + $0xf8] sm:$0xff]   ;;  %v747_v52 = vld [vmem:[#allocation2] sm:$0x3]  ;;  %v887_v54 = vld [vmem:[#allocation4] sm:$0x3] }
  0x35   :  { %v2136_v55 = vrot.slane %v747_v52, %v751_v51  ;;  %v2138_v56 = vrot.slane %v747_v52, %v755_v53  ;;  %v2140_v57 = vrot.slane %v887_v54, %v751_v51  ;;  %v2142_v60 = vrot.slane %v887_v54, %v755_v53 }
  0x37   :  { %403 = vmatpush1.bf16.msra.mxu0 %v1818_v10  ;;  %1797 = vmatpush1.bf16.msra.mxu1 %v1818_v10 }
  0x38   :  { %404 = vmatprep.subr.bf16.mxu0 %v1819_v11  ;;  %1790 = vmatprep.subr.bf16.mxu1 %v1819_v11 }
  0x3b   :  { %405 = vmatpush1.bf16.msra.mxu0 %v1821_v12  ;;  %1798 = vmatpush1.bf16.msra.mxu1 %v1821_v12 }
  0x3c   :  { %406 = vmatprep.subr.bf16.mxu0 %v1822_v13  ;;  %1791 = vmatprep.subr.bf16.mxu1 %v1822_v13 }
  0x3f   :  { %407 = vmatpush1.bf16.msra.mxu0 %v1824_v14  ;;  %1799 = vmatpush1.bf16.msra.mxu1 %v1824_v14 }
  0x40   :  { %408 = vmatprep.subr.bf16.mxu0 %v1825_v15  ;;  %1792 = vmatprep.subr.bf16.mxu1 %v1825_v15 }
  0x43   :  { %409 = vmatpush1.bf16.msra.mxu0 %v1827_v16  ;;  %1800 = vmatpush1.bf16.msra.mxu1 %v1827_v16 }
  0x46   :  { %427 = vmatmul.mubr.bf16.vlgmr.msra.gmra.mrb[0].mxu0 %v1828_v17  ;;  %587 = vmatmul.mubr.bf16.vlgmr.msra.gmra.mrb[0].mxu1 %v1829_v18 }
  0x47   :  { %436 = vmatprep.mubr.bf16.mxu0 %v1910_v0  ;;  %596 = vmatprep.mubr.bf16.mxu1 %v1910_v0 }
  0x4e   :  { %437 = vmatmul.mubr.bf16.gmra.mrb[4].mxu0 %v1830_v19  ;;  %597 = vmatmul.mubr.bf16.gmra.mrb[4].mxu1 %v1831_v20 }
  0x4f   :  { %446 = vmatprep.mubr.bf16.mxu0 %v1910_v0  ;;  %606 = vmatprep.mubr.bf16.mxu1 %v1910_v0 }
  0x56   :  { %447 = vmatmul.mubr.bf16.gmra.mrb[8].mxu0 %v1832_v21  ;;  %607 = vmatmul.mubr.bf16.gmra.mrb[8].mxu1 %v1833_v22 }
  0x57   :  { %456 = vmatprep.mubr.bf16.mxu0 %v1910_v0  ;;  %616 = vmatprep.mubr.bf16.mxu1 %v1910_v0 }
  0x5e   :  { %457 = vmatmul.mubr.bf16.gmra.mrb[12].mxu0 %v1834_v23  ;;  %617 = vmatmul.mubr.bf16.gmra.mrb[12].mxu1 %v1835_v24 }
  0x5f   :  { %466 = vmatprep.mubr.bf16.mxu0 %v1910_v0  ;;  %626 = vmatprep.mubr.bf16.mxu1 %v1910_v0 }
  0x66   :  { %467 = vmatmul.mubr.bf16.gmra.mrb[16].mxu0 %v1836_v25  ;;  %627 = vmatmul.mubr.bf16.gmra.mrb[16].mxu1 %v1837_v26 }
  0x67   :  { %476 = vmatprep.mubr.bf16.mxu0 %v1910_v0  ;;  %636 = vmatprep.mubr.bf16.mxu1 %v1910_v0 }
  0x6e   :  { %477 = vmatmul.mubr.bf16.gmra.mrb[20].mxu0 %v1838_v27  ;;  %637 = vmatmul.mubr.bf16.gmra.mrb[20].mxu1 %v1839_v28 }
  0x6f   :  { %486 = vmatprep.mubr.bf16.mxu0 %v1910_v0  ;;  %646 = vmatprep.mubr.bf16.mxu1 %v1910_v0 }
  0x76   :  { %487 = vmatmul.mubr.bf16.gmra.mrb[24].mxu0 %v1840_v29  ;;  %647 = vmatmul.mubr.bf16.gmra.mrb[24].mxu1 %v1841_v30 }
  0x77   :  { %496 = vmatprep.mubr.bf16.mxu0 %v1910_v0  ;;  %656 = vmatprep.mubr.bf16.mxu1 %v1910_v0 }
  0x7e   :  { %497 = vmatmul.mubr.bf16.gmra.mrb[28].mxu0 %v1842_v31  ;;  %657 = vmatmul.mubr.bf16.gmra.mrb[28].mxu1 %v1843_v32 }
  0x7f   :  { %506 = vmatprep.mubr.bf16.mxu0 %v1910_v0  ;;  %666 = vmatprep.mubr.bf16.mxu1 %v1910_v0 }
  0x86   :  { %507 = vmatmul.mubr.bf16.gmra.mrb[32].mxu0 %v1844_v33  ;;  %667 = vmatmul.mubr.bf16.gmra.mrb[32].mxu1 %v1845_v34 }
  0x87   :  { %516 = vmatprep.mubr.bf16.mxu0 %v1910_v0  ;;  %676 = vmatprep.mubr.bf16.mxu1 %v1910_v0 }
  0x8e   :  { %517 = vmatmul.mubr.bf16.gmra.mrb[36].mxu0 %v1846_v35  ;;  %677 = vmatmul.mubr.bf16.gmra.mrb[36].mxu1 %v1847_v36 }
  0x8f   :  { %526 = vmatprep.mubr.bf16.mxu0 %v1910_v0  ;;  %686 = vmatprep.mubr.bf16.mxu1 %v1910_v0 }
  0x96   :  { %527 = vmatmul.mubr.bf16.gmra.mrb[40].mxu0 %v1848_v37  ;;  %687 = vmatmul.mubr.bf16.gmra.mrb[40].mxu1 %v1849_v38 }
  0x97   :  { %536 = vmatprep.mubr.bf16.mxu0 %v1910_v0  ;;  %696 = vmatprep.mubr.bf16.mxu1 %v1910_v0 }
  0x9e   :  { %537 = vmatmul.mubr.bf16.gmra.mrb[44].mxu0 %v1850_v39  ;;  %697 = vmatmul.mubr.bf16.gmra.mrb[44].mxu1 %v1851_v40 }
  0x9f   :  { %546 = vmatprep.mubr.bf16.mxu0 %v1910_v0  ;;  %706 = vmatprep.mubr.bf16.mxu1 %v1910_v0 }
  0xa6   :  { %547 = vmatmul.mubr.bf16.gmra.mrb[48].mxu0 %v1852_v41  ;;  %707 = vmatmul.mubr.bf16.gmra.mrb[48].mxu1 %v1853_v42 }
  0xa7   :  { %556 = vmatprep.mubr.bf16.mxu0 %v1910_v0  ;;  %716 = vmatprep.mubr.bf16.mxu1 %v1910_v0 }
  0xae   :  { %557 = vmatmul.mubr.bf16.gmra.mrb[52].mxu0 %v1854_v43  ;;  %717 = vmatmul.mubr.bf16.gmra.mrb[52].mxu1 %v1855_v44 }
  0xaf   :  { %566 = vmatprep.mubr.bf16.mxu0 %v1910_v0  ;;  %726 = vmatprep.mubr.bf16.mxu1 %v1910_v0 }
  0xb6   :  { %567 = vmatmul.mubr.bf16.gmra.mrb[56].mxu0 %v1856_v45  ;;  %727 = vmatmul.mubr.bf16.gmra.mrb[56].mxu1 %v1857_v46 }
  0xb7   :  { %576 = vmatprep.mubr.bf16.mxu0 %v1910_v0  ;;  %736 = vmatprep.mubr.bf16.mxu1 %v1910_v0 }
  0xbe   :  { %577 = vmatmul.mubr.bf16.gmra.mrb[60].mxu0 %v1858_v47  ;;  %737 = vmatmul.mubr.bf16.gmra.mrb[60].mxu1 %v1859_v48 }
 0x119   :  { %v428_v58 = vpop.f32.mrb[0].mxu0  ;;  %v588_v59 = vpop.f32.mrb[0].mxu1 }
 0x11a   :  { %v759_v61 = vmul.f32 %v2136_v55, %v428_v58  ;;  %v823_v62 = vmul.f32 %v2136_v55, %v588_v59  ;;  %v430_v63 = vpop.f32.mrb[1].mxu0  ;;  %v590_v0 = vpop.f32.mrb[1].mxu1 }
 0x11b   :  { %v760_v1 = vmul.f32 %v2138_v56, %v430_v63  ;;  %v824_v2 = vmul.f32 %v2138_v56, %v590_v0  ;;  %v432_v3 = vpop.f32.mrb[2].mxu0  ;;  %v592_v4 = vpop.f32.mrb[2].mxu1 }
 0x11c   :  { %v899_v5 = vadd.f32 %v2140_v57, %v759_v61  ;;  %v963_v6 = vadd.f32 %v2140_v57, %v823_v62  ;;  %v761_v7 = vmul.f32 %v2136_v55, %v432_v3  ;;  %v825_v8 = vmul.f32 %v2136_v55, %v592_v4  ;;  %v434_v9 = vpop.f32.mrb[3].mxu0  ;;  %v594_v10 = vpop.f32.mrb[3].mxu1 }
 0x11d   :  { %v900_v11 = vadd.f32 %v2142_v60, %v760_v1  ;;  %v964_v12 = vadd.f32 %v2142_v60, %v824_v2  ;;  %v762_v13 = vmul.f32 %v2138_v56, %v434_v9  ;;  %v826_v14 = vmul.f32 %v2138_v56, %v594_v10 }
 0x11e   :  { %v1027_v15 = vmax.f32 %v899_v5, 0.0  ;;  %v1091_v16 = vmax.f32 %v963_v6, 0.0  ;;  %v901_v17 = vadd.f32 %v2140_v57, %v761_v7  ;;  %v965_v18 = vadd.f32 %v2140_v57, %v825_v8 }
 0x11f   :  { %v1028_v19 = vmax.f32 %v900_v11, 0.0  ;;  %v1092_v20 = vmax.f32 %v964_v12, 0.0  ;;  %v902_v21 = vadd.f32 %v2142_v60, %v762_v13  ;;  %v966_v22 = vadd.f32 %v2142_v60, %v826_v14 }
 0x120   :  { %v1029_v23 = vmax.f32 %v901_v17, 0.0  ;;  %v1093_v24 = vmax.f32 %v965_v18, 0.0 }
 0x121   :  { %v1721_v25 = vpack.c.bf16 %v1028_v19, %v1027_v15  ;;  %v1753_v26 = vpack.c.bf16 %v1092_v20, %v1091_v16  ;;  %v1030_v27 = vmax.f32 %v902_v21, 0.0  ;;  %v1094_v28 = vmax.f32 %v966_v22, 0.0  ;;  %v438_v29 = vpop.f32.mrb[4].mxu0  ;;  %v598_v30 = vpop.f32.mrb[4].mxu1 }
 0x122   :  { %v763_v31 = vmul.f32 %v2136_v55, %v438_v29  ;;  %v827_v32 = vmul.f32 %v2136_v55, %v598_v30  ;;  %v440_v33 = vpop.f32.mrb[5].mxu0  ;;  %v600_v34 = vpop.f32.mrb[5].mxu1 }
 0x123   :  { %1539 = vst [vmem:[%s2596_s4] sm:$0xff] %v1721_v25  ;;  %1571 = vst [vmem:[%s2596_s4 + $0x100] sm:$0xff] %v1753_v26  ;;  %v1722_v35 = vpack.c.bf16 %v1030_v27, %v1029_v23  ;;  %v1754_v36 = vpack.c.bf16 %v1094_v28, %v1093_v24  ;;  %v764_v37 = vmul.f32 %v2138_v56, %v440_v33  ;;  %v442_v39 = vpop.f32.mrb[6].mxu0  ;;  %v602_v40 = vpop.f32.mrb[6].mxu1 }
 0x124   :  { %v828_v38 = vmul.f32 %v2138_v56, %v600_v34  ;;  %v903_v41 = vadd.f32 %v2140_v57, %v763_v31  ;;  %v967_v42 = vadd.f32 %v2140_v57, %v827_v32  ;;  %v765_v43 = vmul.f32 %v2136_v55, %v442_v39  ;;  %v444_v45 = vpop.f32.mrb[7].mxu0  ;;  %v604_v46 = vpop.f32.mrb[7].mxu1 }
 0x125   :  { %v829_v44 = vmul.f32 %v2136_v55, %v602_v40  ;;  %1540 = vst [vmem:[%s2596_s4 + $0x8] sm:$0xff] %v1722_v35  ;;  %1572 = vst [vmem:[%s2596_s4 + $0x108] sm:$0xff] %v1754_v36  ;;  %v904_v47 = vadd.f32 %v2142_v60, %v764_v37  ;;  %v766_v49 = vmul.f32 %v2138_v56, %v444_v45 }
 0x126   :  { %v968_v48 = vadd.f32 %v2142_v60, %v828_v38  ;;  %v830_v50 = vmul.f32 %v2138_v56, %v604_v46  ;;  %v1031_v51 = vmax.f32 %v903_v41, 0.0  ;;  %v1095_v52 = vmax.f32 %v967_v42, 0.0 }
 0x127   :  { %v905_v53 = vadd.f32 %v2140_v57, %v765_v43  ;;  %v969_v54 = vadd.f32 %v2140_v57, %v829_v44  ;;  %v1032_v58 = vmax.f32 %v904_v47, 0.0  ;;  %v906_v61 = vadd.f32 %v2142_v60, %v766_v49 }
 0x128   :  { %v1096_v59 = vmax.f32 %v968_v48, 0.0  ;;  %v970_v62 = vadd.f32 %v2142_v60, %v830_v50 }
 0x129   :  { %v1033_v63 = vmax.f32 %v905_v53, 0.0  ;;  %v1097_v0 = vmax.f32 %v969_v54, 0.0  ;;  %v1723_v1 = vpack.c.bf16 %v1032_v58, %v1031_v51  ;;  %v1034_v3 = vmax.f32 %v906_v61, 0.0  ;;  %v448_v5 = vpop.f32.mrb[8].mxu0  ;;  %v608_v6 = vpop.f32.mrb[8].mxu1 }
 0x12a   :  { %v1755_v2 = vpack.c.bf16 %v1096_v59, %v1095_v52  ;;  %v1098_v4 = vmax.f32 %v970_v62, 0.0  ;;  %v767_v7 = vmul.f32 %v2136_v55, %v448_v5  ;;  %v831_v8 = vmul.f32 %v2136_v55, %v608_v6  ;;  %v450_v9 = vpop.f32.mrb[9].mxu0  ;;  %v610_v10 = vpop.f32.mrb[9].mxu1 }
 0x12b   :  { %1541 = vst [vmem:[%s2596_s4 + $0x10] sm:$0xff] %v1723_v1  ;;  %v1724_v11 = vpack.c.bf16 %v1034_v3, %v1033_v63  ;;  %v768_v13 = vmul.f32 %v2138_v56, %v450_v9  ;;  %v832_v14 = vmul.f32 %v2138_v56, %v610_v10  ;;  %v452_v15 = vpop.f32.mrb[10].mxu0  ;;  %v612_v16 = vpop.f32.mrb[10].mxu1 }
 0x12c   :  { %1573 = vst [vmem:[%s2596_s4 + $0x110] sm:$0xff] %v1755_v2  ;;  %v1756_v12 = vpack.c.bf16 %v1098_v4, %v1097_v0  ;;  %v907_v17 = vadd.f32 %v2140_v57, %v767_v7  ;;  %v971_v18 = vadd.f32 %v2140_v57, %v831_v8  ;;  %v769_v19 = vmul.f32 %v2136_v55, %v452_v15  ;;  %v454_v21 = vpop.f32.mrb[11].mxu0  ;;  %v614_v22 = vpop.f32.mrb[11].mxu1 }
 0x12d   :  { %v833_v20 = vmul.f32 %v2136_v55, %v612_v16  ;;  %1542 = vst [vmem:[%s2596_s4 + $0x18] sm:$0xff] %v1724_v11  ;;  %v908_v23 = vadd.f32 %v2142_v60, %v768_v13  ;;  %v972_v24 = vadd.f32 %v2142_v60, %v832_v14  ;;  %v770_v25 = vmul.f32 %v2138_v56, %v454_v21 }
 0x12e   :  { %1574 = vst [vmem:[%s2596_s4 + $0x118] sm:$0xff] %v1756_v12  ;;  %v834_v26 = vmul.f32 %v2138_v56, %v614_v22  ;;  %v1035_v27 = vmax.f32 %v907_v17, 0.0  ;;  %v1099_v28 = vmax.f32 %v971_v18, 0.0  ;;  %v909_v29 = vadd.f32 %v2140_v57, %v769_v19 }
 0x12f   :  { %v973_v30 = vadd.f32 %v2140_v57, %v833_v20  ;;  %v1036_v31 = vmax.f32 %v908_v23, 0.0  ;;  %v1100_v32 = vmax.f32 %v972_v24, 0.0  ;;  %v910_v33 = vadd.f32 %v2142_v60, %v770_v25 }
 0x130   :  { %v974_v34 = vadd.f32 %v2142_v60, %v834_v26  ;;  %v1037_v35 = vmax.f32 %v909_v29, 0.0 }
 0x131   :  { %v1101_v36 = vmax.f32 %v973_v30, 0.0  ;;  %v1725_v37 = vpack.c.bf16 %v1036_v31, %v1035_v27  ;;  %v1757_v38 = vpack.c.bf16 %v1100_v32, %v1099_v28  ;;  %v1038_v39 = vmax.f32 %v910_v33, 0.0  ;;  %v458_v41 = vpop.f32.mrb[12].mxu0  ;;  %v618_v42 = vpop.f32.mrb[12].mxu1 }
 0x132   :  { %v1102_v40 = vmax.f32 %v974_v34, 0.0  ;;  %v771_v43 = vmul.f32 %v2136_v55, %v458_v41  ;;  %v835_v44 = vmul.f32 %v2136_v55, %v618_v42  ;;  %v460_v45 = vpop.f32.mrb[13].mxu0  ;;  %v620_v46 = vpop.f32.mrb[13].mxu1 }
 0x133   :  { %1543 = vst [vmem:[%s2596_s4 + $0x20] sm:$0xff] %v1725_v37  ;;  %1575 = vst [vmem:[%s2596_s4 + $0x120] sm:$0xff] %v1757_v38  ;;  %v1726_v47 = vpack.c.bf16 %v1038_v39, %v1037_v35  ;;  %v772_v49 = vmul.f32 %v2138_v56, %v460_v45  ;;  %v836_v50 = vmul.f32 %v2138_v56, %v620_v46  ;;  %v462_v51 = vpop.f32.mrb[14].mxu0  ;;  %v622_v52 = vpop.f32.mrb[14].mxu1 }
 0x134   :  { %v1758_v48 = vpack.c.bf16 %v1102_v40, %v1101_v36  ;;  %v911_v53 = vadd.f32 %v2140_v57, %v771_v43  ;;  %v975_v54 = vadd.f32 %v2140_v57, %v835_v44  ;;  %v773_v58 = vmul.f32 %v2136_v55, %v462_v51  ;;  %v464_v61 = vpop.f32.mrb[15].mxu0  ;;  %v624_v62 = vpop.f32.mrb[15].mxu1 }
 0x135   :  { %v837_v59 = vmul.f32 %v2136_v55, %v622_v52  ;;  %1544 = vst [vmem:[%s2596_s4 + $0x28] sm:$0xff] %v1726_v47  ;;  %v912_v63 = vadd.f32 %v2142_v60, %v772_v49  ;;  %v976_v0 = vadd.f32 %v2142_v60, %v836_v50  ;;  %v774_v1 = vmul.f32 %v2138_v56, %v464_v61 }
 0x136   :  { %1576 = vst [vmem:[%s2596_s4 + $0x128] sm:$0xff] %v1758_v48  ;;  %v838_v2 = vmul.f32 %v2138_v56, %v624_v62  ;;  %v1039_v3 = vmax.f32 %v911_v53, 0.0  ;;  %v1103_v4 = vmax.f32 %v975_v54, 0.0  ;;  %v913_v5 = vadd.f32 %v2140_v57, %v773_v58 }
 0x137   :  { %v977_v6 = vadd.f32 %v2140_v57, %v837_v59  ;;  %v1040_v7 = vmax.f32 %v912_v63, 0.0  ;;  %v1104_v8 = vmax.f32 %v976_v0, 0.0  ;;  %v914_v9 = vadd.f32 %v2142_v60, %v774_v1 }
 0x138   :  { %v978_v10 = vadd.f32 %v2142_v60, %v838_v2  ;;  %v1041_v11 = vmax.f32 %v913_v5, 0.0 }
 0x139   :  { %v1105_v12 = vmax.f32 %v977_v6, 0.0  ;;  %v1727_v13 = vpack.c.bf16 %v1040_v7, %v1039_v3  ;;  %v1759_v14 = vpack.c.bf16 %v1104_v8, %v1103_v4  ;;  %v1042_v15 = vmax.f32 %v914_v9, 0.0  ;;  %v468_v17 = vpop.f32.mrb[16].mxu0  ;;  %v628_v18 = vpop.f32.mrb[16].mxu1 }
 0x13a   :  { %v1106_v16 = vmax.f32 %v978_v10, 0.0  ;;  %v775_v19 = vmul.f32 %v2136_v55, %v468_v17  ;;  %v839_v20 = vmul.f32 %v2136_v55, %v628_v18  ;;  %v470_v21 = vpop.f32.mrb[17].mxu0  ;;  %v630_v22 = vpop.f32.mrb[17].mxu1 }
 0x13b   :  { %1545 = vst [vmem:[%s2596_s4 + $0x30] sm:$0xff] %v1727_v13  ;;  %1577 = vst [vmem:[%s2596_s4 + $0x130] sm:$0xff] %v1759_v14  ;;  %v1728_v23 = vpack.c.bf16 %v1042_v15, %v1041_v11  ;;  %v776_v25 = vmul.f32 %v2138_v56, %v470_v21  ;;  %v840_v26 = vmul.f32 %v2138_v56, %v630_v22  ;;  %v472_v27 = vpop.f32.mrb[18].mxu0  ;;  %v632_v28 = vpop.f32.mrb[18].mxu1 }
 0x13c   :  { %v1760_v24 = vpack.c.bf16 %v1106_v16, %v1105_v12  ;;  %v915_v29 = vadd.f32 %v2140_v57, %v775_v19  ;;  %v979_v30 = vadd.f32 %v2140_v57, %v839_v20  ;;  %v777_v31 = vmul.f32 %v2136_v55, %v472_v27  ;;  %v474_v33 = vpop.f32.mrb[19].mxu0  ;;  %v634_v34 = vpop.f32.mrb[19].mxu1 }
 0x13d   :  { %v841_v32 = vmul.f32 %v2136_v55, %v632_v28  ;;  %1546 = vst [vmem:[%s2596_s4 + $0x38] sm:$0xff] %v1728_v23  ;;  %v916_v35 = vadd.f32 %v2142_v60, %v776_v25  ;;  %v980_v36 = vadd.f32 %v2142_v60, %v840_v26  ;;  %v778_v37 = vmul.f32 %v2138_v56, %v474_v33 }
 0x13e   :  { %1578 = vst [vmem:[%s2596_s4 + $0x138] sm:$0xff] %v1760_v24  ;;  %v842_v38 = vmul.f32 %v2138_v56, %v634_v34  ;;  %v1043_v39 = vmax.f32 %v915_v29, 0.0  ;;  %v1107_v40 = vmax.f32 %v979_v30, 0.0  ;;  %v917_v41 = vadd.f32 %v2140_v57, %v777_v31 }
 0x13f   :  { %v981_v42 = vadd.f32 %v2140_v57, %v841_v32  ;;  %v1044_v43 = vmax.f32 %v916_v35, 0.0  ;;  %v1108_v44 = vmax.f32 %v980_v36, 0.0  ;;  %v918_v45 = vadd.f32 %v2142_v60, %v778_v37 }
 0x140   :  { %v982_v46 = vadd.f32 %v2142_v60, %v842_v38  ;;  %v1045_v47 = vmax.f32 %v917_v41, 0.0 }
 0x141   :  { %v1109_v48 = vmax.f32 %v981_v42, 0.0  ;;  %v1729_v49 = vpack.c.bf16 %v1044_v43, %v1043_v39  ;;  %v1761_v50 = vpack.c.bf16 %v1108_v44, %v1107_v40  ;;  %v1046_v51 = vmax.f32 %v918_v45, 0.0  ;;  %v478_v53 = vpop.f32.mrb[20].mxu0  ;;  %v638_v54 = vpop.f32.mrb[20].mxu1 }
 0x142   :  { %v1110_v52 = vmax.f32 %v982_v46, 0.0  ;;  %v779_v58 = vmul.f32 %v2136_v55, %v478_v53  ;;  %v843_v59 = vmul.f32 %v2136_v55, %v638_v54  ;;  %v480_v61 = vpop.f32.mrb[21].mxu0  ;;  %v640_v62 = vpop.f32.mrb[21].mxu1 }
 0x143   :  { %1547 = vst [vmem:[%s2596_s4 + $0x40] sm:$0xff] %v1729_v49  ;;  %1579 = vst [vmem:[%s2596_s4 + $0x140] sm:$0xff] %v1761_v50  ;;  %v1730_v63 = vpack.c.bf16 %v1046_v51, %v1045_v47  ;;  %v780_v1 = vmul.f32 %v2138_v56, %v480_v61  ;;  %v844_v2 = vmul.f32 %v2138_v56, %v640_v62  ;;  %v482_v3 = vpop.f32.mrb[22].mxu0  ;;  %v642_v4 = vpop.f32.mrb[22].mxu1 }
 0x144   :  { %v1762_v0 = vpack.c.bf16 %v1110_v52, %v1109_v48  ;;  %v919_v5 = vadd.f32 %v2140_v57, %v779_v58  ;;  %v983_v6 = vadd.f32 %v2140_v57, %v843_v59  ;;  %v781_v7 = vmul.f32 %v2136_v55, %v482_v3  ;;  %v484_v9 = vpop.f32.mrb[23].mxu0  ;;  %v644_v10 = vpop.f32.mrb[23].mxu1 }
 0x145   :  { %v845_v8 = vmul.f32 %v2136_v55, %v642_v4  ;;  %1548 = vst [vmem:[%s2596_s4 + $0x48] sm:$0xff] %v1730_v63  ;;  %v920_v11 = vadd.f32 %v2142_v60, %v780_v1  ;;  %v984_v12 = vadd.f32 %v2142_v60, %v844_v2  ;;  %v782_v13 = vmul.f32 %v2138_v56, %v484_v9 }
 0x146   :  { %1580 = vst [vmem:[%s2596_s4 + $0x148] sm:$0xff] %v1762_v0  ;;  %v846_v14 = vmul.f32 %v2138_v56, %v644_v10  ;;  %v1047_v15 = vmax.f32 %v919_v5, 0.0  ;;  %v1111_v16 = vmax.f32 %v983_v6, 0.0  ;;  %v921_v17 = vadd.f32 %v2140_v57, %v781_v7 }
 0x147   :  { %v985_v18 = vadd.f32 %v2140_v57, %v845_v8  ;;  %v1048_v19 = vmax.f32 %v920_v11, 0.0  ;;  %v1112_v20 = vmax.f32 %v984_v12, 0.0  ;;  %v922_v21 = vadd.f32 %v2142_v60, %v782_v13 }
 0x148   :  { %v986_v22 = vadd.f32 %v2142_v60, %v846_v14  ;;  %v1049_v23 = vmax.f32 %v921_v17, 0.0 }
 0x149   :  { %v1113_v24 = vmax.f32 %v985_v18, 0.0  ;;  %v1731_v25 = vpack.c.bf16 %v1048_v19, %v1047_v15  ;;  %v1763_v26 = vpack.c.bf16 %v1112_v20, %v1111_v16  ;;  %v1050_v27 = vmax.f32 %v922_v21, 0.0  ;;  %v488_v29 = vpop.f32.mrb[24].mxu0  ;;  %v648_v30 = vpop.f32.mrb[24].mxu1 }
 0x14a   :  { %v1114_v28 = vmax.f32 %v986_v22, 0.0  ;;  %v783_v31 = vmul.f32 %v2136_v55, %v488_v29  ;;  %v847_v32 = vmul.f32 %v2136_v55, %v648_v30  ;;  %v490_v33 = vpop.f32.mrb[25].mxu0  ;;  %v650_v34 = vpop.f32.mrb[25].mxu1 }
 0x14b   :  { %1549 = vst [vmem:[%s2596_s4 + $0x50] sm:$0xff] %v1731_v25  ;;  %1581 = vst [vmem:[%s2596_s4 + $0x150] sm:$0xff] %v1763_v26  ;;  %v1732_v35 = vpack.c.bf16 %v1050_v27, %v1049_v23  ;;  %v784_v37 = vmul.f32 %v2138_v56, %v490_v33  ;;  %v848_v38 = vmul.f32 %v2138_v56, %v650_v34  ;;  %v492_v39 = vpop.f32.mrb[26].mxu0  ;;  %v652_v40 = vpop.f32.mrb[26].mxu1 }
 0x14c   :  { %v1764_v36 = vpack.c.bf16 %v1114_v28, %v1113_v24  ;;  %v923_v41 = vadd.f32 %v2140_v57, %v783_v31  ;;  %v987_v42 = vadd.f32 %v2140_v57, %v847_v32  ;;  %v785_v43 = vmul.f32 %v2136_v55, %v492_v39  ;;  %v494_v45 = vpop.f32.mrb[27].mxu0  ;;  %v654_v46 = vpop.f32.mrb[27].mxu1 }
 0x14d   :  { %v849_v44 = vmul.f32 %v2136_v55, %v652_v40  ;;  %1550 = vst [vmem:[%s2596_s4 + $0x58] sm:$0xff] %v1732_v35  ;;  %v924_v47 = vadd.f32 %v2142_v60, %v784_v37  ;;  %v988_v48 = vadd.f32 %v2142_v60, %v848_v38  ;;  %v786_v49 = vmul.f32 %v2138_v56, %v494_v45 }
 0x14e   :  { %1582 = vst [vmem:[%s2596_s4 + $0x158] sm:$0xff] %v1764_v36  ;;  %v850_v50 = vmul.f32 %v2138_v56, %v654_v46  ;;  %v1051_v51 = vmax.f32 %v923_v41, 0.0  ;;  %v1115_v52 = vmax.f32 %v987_v42, 0.0  ;;  %v925_v53 = vadd.f32 %v2140_v57, %v785_v43 }
 0x14f   :  { %v989_v54 = vadd.f32 %v2140_v57, %v849_v44  ;;  %v1052_v58 = vmax.f32 %v924_v47, 0.0  ;;  %v1116_v59 = vmax.f32 %v988_v48, 0.0  ;;  %v926_v61 = vadd.f32 %v2142_v60, %v786_v49 }
 0x150   :  { %v990_v62 = vadd.f32 %v2142_v60, %v850_v50  ;;  %v1053_v63 = vmax.f32 %v925_v53, 0.0 }
 0x151   :  { %v1117_v0 = vmax.f32 %v989_v54, 0.0  ;;  %v1733_v1 = vpack.c.bf16 %v1052_v58, %v1051_v51  ;;  %v1765_v2 = vpack.c.bf16 %v1116_v59, %v1115_v52  ;;  %v1054_v3 = vmax.f32 %v926_v61, 0.0  ;;  %v498_v5 = vpop.f32.mrb[28].mxu0  ;;  %v658_v6 = vpop.f32.mrb[28].mxu1 }
 0x152   :  { %v1118_v4 = vmax.f32 %v990_v62, 0.0  ;;  %v787_v7 = vmul.f32 %v2136_v55, %v498_v5  ;;  %v851_v8 = vmul.f32 %v2136_v55, %v658_v6  ;;  %v500_v9 = vpop.f32.mrb[29].mxu0  ;;  %v660_v10 = vpop.f32.mrb[29].mxu1 }
 0x153   :  { %1551 = vst [vmem:[%s2596_s4 + $0x60] sm:$0xff] %v1733_v1  ;;  %1583 = vst [vmem:[%s2596_s4 + $0x160] sm:$0xff] %v1765_v2  ;;  %v1734_v11 = vpack.c.bf16 %v1054_v3, %v1053_v63  ;;  %v788_v13 = vmul.f32 %v2138_v56, %v500_v9  ;;  %v852_v14 = vmul.f32 %v2138_v56, %v660_v10  ;;  %v502_v15 = vpop.f32.mrb[30].mxu0  ;;  %v662_v16 = vpop.f32.mrb[30].mxu1 }
 0x154   :  { %v1766_v12 = vpack.c.bf16 %v1118_v4, %v1117_v0  ;;  %v927_v17 = vadd.f32 %v2140_v57, %v787_v7  ;;  %v991_v18 = vadd.f32 %v2140_v57, %v851_v8  ;;  %v789_v19 = vmul.f32 %v2136_v55, %v502_v15  ;;  %v504_v21 = vpop.f32.mrb[31].mxu0  ;;  %v664_v22 = vpop.f32.mrb[31].mxu1 }
 0x155   :  { %v853_v20 = vmul.f32 %v2136_v55, %v662_v16  ;;  %1552 = vst [vmem:[%s2596_s4 + $0x68] sm:$0xff] %v1734_v11  ;;  %v928_v23 = vadd.f32 %v2142_v60, %v788_v13  ;;  %v992_v24 = vadd.f32 %v2142_v60, %v852_v14  ;;  %v790_v25 = vmul.f32 %v2138_v56, %v504_v21 }
 0x156   :  { %1584 = vst [vmem:[%s2596_s4 + $0x168] sm:$0xff] %v1766_v12  ;;  %v854_v26 = vmul.f32 %v2138_v56, %v664_v22  ;;  %v1055_v27 = vmax.f32 %v927_v17, 0.0  ;;  %v1119_v28 = vmax.f32 %v991_v18, 0.0  ;;  %v929_v29 = vadd.f32 %v2140_v57, %v789_v19 }
 0x157   :  { %v993_v30 = vadd.f32 %v2140_v57, %v853_v20  ;;  %v1056_v31 = vmax.f32 %v928_v23, 0.0  ;;  %v1120_v32 = vmax.f32 %v992_v24, 0.0  ;;  %v930_v33 = vadd.f32 %v2142_v60, %v790_v25 }
 0x158   :  { %v994_v34 = vadd.f32 %v2142_v60, %v854_v26  ;;  %v1057_v35 = vmax.f32 %v929_v29, 0.0 }
 0x159   :  { %v1121_v36 = vmax.f32 %v993_v30, 0.0  ;;  %v1735_v37 = vpack.c.bf16 %v1056_v31, %v1055_v27  ;;  %v1767_v38 = vpack.c.bf16 %v1120_v32, %v1119_v28  ;;  %v1058_v39 = vmax.f32 %v930_v33, 0.0  ;;  %v508_v41 = vpop.f32.mrb[32].mxu0  ;;  %v668_v42 = vpop.f32.mrb[32].mxu1 }
 0x15a   :  { %v1122_v40 = vmax.f32 %v994_v34, 0.0  ;;  %v791_v43 = vmul.f32 %v2136_v55, %v508_v41  ;;  %v855_v44 = vmul.f32 %v2136_v55, %v668_v42  ;;  %v510_v45 = vpop.f32.mrb[33].mxu0  ;;  %v670_v46 = vpop.f32.mrb[33].mxu1 }
 0x15b   :  { %1553 = vst [vmem:[%s2596_s4 + $0x70] sm:$0xff] %v1735_v37  ;;  %1585 = vst [vmem:[%s2596_s4 + $0x170] sm:$0xff] %v1767_v38  ;;  %v1736_v47 = vpack.c.bf16 %v1058_v39, %v1057_v35  ;;  %v792_v49 = vmul.f32 %v2138_v56, %v510_v45  ;;  %v856_v50 = vmul.f32 %v2138_v56, %v670_v46  ;;  %v512_v51 = vpop.f32.mrb[34].mxu0  ;;  %v672_v52 = vpop.f32.mrb[34].mxu1 }
 0x15c   :  { %v1768_v48 = vpack.c.bf16 %v1122_v40, %v1121_v36  ;;  %v931_v53 = vadd.f32 %v2140_v57, %v791_v43  ;;  %v995_v54 = vadd.f32 %v2140_v57, %v855_v44  ;;  %v793_v58 = vmul.f32 %v2136_v55, %v512_v51  ;;  %v514_v61 = vpop.f32.mrb[35].mxu0  ;;  %v674_v62 = vpop.f32.mrb[35].mxu1 }
 0x15d   :  { %v857_v59 = vmul.f32 %v2136_v55, %v672_v52  ;;  %1554 = vst [vmem:[%s2596_s4 + $0x78] sm:$0xff] %v1736_v47  ;;  %v932_v63 = vadd.f32 %v2142_v60, %v792_v49  ;;  %v996_v0 = vadd.f32 %v2142_v60, %v856_v50  ;;  %v794_v1 = vmul.f32 %v2138_v56, %v514_v61 }
 0x15e   :  { %1586 = vst [vmem:[%s2596_s4 + $0x178] sm:$0xff] %v1768_v48  ;;  %v858_v2 = vmul.f32 %v2138_v56, %v674_v62  ;;  %v1059_v3 = vmax.f32 %v931_v53, 0.0  ;;  %v1123_v4 = vmax.f32 %v995_v54, 0.0  ;;  %v933_v5 = vadd.f32 %v2140_v57, %v793_v58 }
 0x15f   :  { %v997_v6 = vadd.f32 %v2140_v57, %v857_v59  ;;  %v1060_v7 = vmax.f32 %v932_v63, 0.0  ;;  %v1124_v8 = vmax.f32 %v996_v0, 0.0  ;;  %v934_v9 = vadd.f32 %v2142_v60, %v794_v1 }
 0x160   :  { %v998_v10 = vadd.f32 %v2142_v60, %v858_v2  ;;  %v1061_v11 = vmax.f32 %v933_v5, 0.0 }
 0x161   :  { %v1125_v12 = vmax.f32 %v997_v6, 0.0  ;;  %v1737_v13 = vpack.c.bf16 %v1060_v7, %v1059_v3  ;;  %v1769_v14 = vpack.c.bf16 %v1124_v8, %v1123_v4  ;;  %v1062_v15 = vmax.f32 %v934_v9, 0.0  ;;  %v518_v17 = vpop.f32.mrb[36].mxu0  ;;  %v678_v18 = vpop.f32.mrb[36].mxu1 }
 0x162   :  { %v1126_v16 = vmax.f32 %v998_v10, 0.0  ;;  %v795_v19 = vmul.f32 %v2136_v55, %v518_v17  ;;  %v859_v20 = vmul.f32 %v2136_v55, %v678_v18  ;;  %v520_v21 = vpop.f32.mrb[37].mxu0  ;;  %v680_v22 = vpop.f32.mrb[37].mxu1 }
 0x163   :  { %1555 = vst [vmem:[%s2596_s4 + $0x80] sm:$0xff] %v1737_v13  ;;  %1587 = vst [vmem:[%s2596_s4 + $0x180] sm:$0xff] %v1769_v14  ;;  %v1738_v23 = vpack.c.bf16 %v1062_v15, %v1061_v11  ;;  %v796_v25 = vmul.f32 %v2138_v56, %v520_v21  ;;  %v860_v26 = vmul.f32 %v2138_v56, %v680_v22  ;;  %v522_v27 = vpop.f32.mrb[38].mxu0  ;;  %v682_v28 = vpop.f32.mrb[38].mxu1 }
 0x164   :  { %v1770_v24 = vpack.c.bf16 %v1126_v16, %v1125_v12  ;;  %v935_v29 = vadd.f32 %v2140_v57, %v795_v19  ;;  %v999_v30 = vadd.f32 %v2140_v57, %v859_v20  ;;  %v797_v31 = vmul.f32 %v2136_v55, %v522_v27  ;;  %v524_v33 = vpop.f32.mrb[39].mxu0  ;;  %v684_v34 = vpop.f32.mrb[39].mxu1 }
 0x165   :  { %v861_v32 = vmul.f32 %v2136_v55, %v682_v28  ;;  %1556 = vst [vmem:[%s2596_s4 + $0x88] sm:$0xff] %v1738_v23  ;;  %v936_v35 = vadd.f32 %v2142_v60, %v796_v25  ;;  %v1000_v36 = vadd.f32 %v2142_v60, %v860_v26  ;;  %v798_v37 = vmul.f32 %v2138_v56, %v524_v33 }
 0x166   :  { %1588 = vst [vmem:[%s2596_s4 + $0x188] sm:$0xff] %v1770_v24  ;;  %v862_v38 = vmul.f32 %v2138_v56, %v684_v34  ;;  %v1063_v39 = vmax.f32 %v935_v29, 0.0  ;;  %v1127_v40 = vmax.f32 %v999_v30, 0.0  ;;  %v937_v41 = vadd.f32 %v2140_v57, %v797_v31 }
 0x167   :  { %v1001_v42 = vadd.f32 %v2140_v57, %v861_v32  ;;  %v1064_v43 = vmax.f32 %v936_v35, 0.0  ;;  %v1128_v44 = vmax.f32 %v1000_v36, 0.0  ;;  %v938_v45 = vadd.f32 %v2142_v60, %v798_v37 }
 0x168   :  { %v1002_v46 = vadd.f32 %v2142_v60, %v862_v38  ;;  %v1065_v47 = vmax.f32 %v937_v41, 0.0 }
 0x169   :  { %v1129_v48 = vmax.f32 %v1001_v42, 0.0  ;;  %v1739_v49 = vpack.c.bf16 %v1064_v43, %v1063_v39  ;;  %v1771_v50 = vpack.c.bf16 %v1128_v44, %v1127_v40  ;;  %v1066_v51 = vmax.f32 %v938_v45, 0.0  ;;  %v528_v53 = vpop.f32.mrb[40].mxu0  ;;  %v688_v54 = vpop.f32.mrb[40].mxu1 }
 0x16a   :  { %v1130_v52 = vmax.f32 %v1002_v46, 0.0  ;;  %v799_v58 = vmul.f32 %v2136_v55, %v528_v53  ;;  %v863_v59 = vmul.f32 %v2136_v55, %v688_v54  ;;  %v530_v61 = vpop.f32.mrb[41].mxu0  ;;  %v690_v62 = vpop.f32.mrb[41].mxu1 }
 0x16b   :  { %1557 = vst [vmem:[%s2596_s4 + $0x90] sm:$0xff] %v1739_v49  ;;  %1589 = vst [vmem:[%s2596_s4 + $0x190] sm:$0xff] %v1771_v50  ;;  %v1740_v63 = vpack.c.bf16 %v1066_v51, %v1065_v47  ;;  %v800_v1 = vmul.f32 %v2138_v56, %v530_v61  ;;  %v864_v2 = vmul.f32 %v2138_v56, %v690_v62  ;;  %v532_v3 = vpop.f32.mrb[42].mxu0  ;;  %v692_v4 = vpop.f32.mrb[42].mxu1 }
 0x16c   :  { %v1772_v0 = vpack.c.bf16 %v1130_v52, %v1129_v48  ;;  %v939_v5 = vadd.f32 %v2140_v57, %v799_v58  ;;  %v1003_v6 = vadd.f32 %v2140_v57, %v863_v59  ;;  %v801_v7 = vmul.f32 %v2136_v55, %v532_v3  ;;  %v534_v9 = vpop.f32.mrb[43].mxu0  ;;  %v694_v10 = vpop.f32.mrb[43].mxu1 }
 0x16d   :  { %v865_v8 = vmul.f32 %v2136_v55, %v692_v4  ;;  %1558 = vst [vmem:[%s2596_s4 + $0x98] sm:$0xff] %v1740_v63  ;;  %v940_v11 = vadd.f32 %v2142_v60, %v800_v1  ;;  %v1004_v12 = vadd.f32 %v2142_v60, %v864_v2  ;;  %v802_v13 = vmul.f32 %v2138_v56, %v534_v9 }
 0x16e   :  { %1590 = vst [vmem:[%s2596_s4 + $0x198] sm:$0xff] %v1772_v0  ;;  %v866_v14 = vmul.f32 %v2138_v56, %v694_v10  ;;  %v1067_v15 = vmax.f32 %v939_v5, 0.0  ;;  %v1131_v16 = vmax.f32 %v1003_v6, 0.0  ;;  %v941_v17 = vadd.f32 %v2140_v57, %v801_v7 }
 0x16f   :  { %v1005_v18 = vadd.f32 %v2140_v57, %v865_v8  ;;  %v1068_v19 = vmax.f32 %v940_v11, 0.0  ;;  %v1132_v20 = vmax.f32 %v1004_v12, 0.0  ;;  %v942_v21 = vadd.f32 %v2142_v60, %v802_v13 }
 0x170   :  { %v1006_v22 = vadd.f32 %v2142_v60, %v866_v14  ;;  %v1069_v23 = vmax.f32 %v941_v17, 0.0 }
 0x171   :  { %v1133_v24 = vmax.f32 %v1005_v18, 0.0  ;;  %v1741_v25 = vpack.c.bf16 %v1068_v19, %v1067_v15  ;;  %v1773_v26 = vpack.c.bf16 %v1132_v20, %v1131_v16  ;;  %v1070_v27 = vmax.f32 %v942_v21, 0.0  ;;  %v538_v29 = vpop.f32.mrb[44].mxu0  ;;  %v698_v30 = vpop.f32.mrb[44].mxu1 }
 0x172   :  { %v1134_v28 = vmax.f32 %v1006_v22, 0.0  ;;  %v803_v31 = vmul.f32 %v2136_v55, %v538_v29  ;;  %v867_v32 = vmul.f32 %v2136_v55, %v698_v30  ;;  %v540_v33 = vpop.f32.mrb[45].mxu0  ;;  %v700_v34 = vpop.f32.mrb[45].mxu1 }
 0x173   :  { %1559 = vst [vmem:[%s2596_s4 + $0xa0] sm:$0xff] %v1741_v25  ;;  %1591 = vst [vmem:[%s2596_s4 + $0x1a0] sm:$0xff] %v1773_v26  ;;  %v1742_v35 = vpack.c.bf16 %v1070_v27, %v1069_v23  ;;  %v804_v37 = vmul.f32 %v2138_v56, %v540_v33  ;;  %v868_v38 = vmul.f32 %v2138_v56, %v700_v34  ;;  %v542_v39 = vpop.f32.mrb[46].mxu0  ;;  %v702_v40 = vpop.f32.mrb[46].mxu1 }
 0x174   :  { %v1774_v36 = vpack.c.bf16 %v1134_v28, %v1133_v24  ;;  %v943_v41 = vadd.f32 %v2140_v57, %v803_v31  ;;  %v1007_v42 = vadd.f32 %v2140_v57, %v867_v32  ;;  %v805_v43 = vmul.f32 %v2136_v55, %v542_v39  ;;  %v544_v45 = vpop.f32.mrb[47].mxu0  ;;  %v704_v46 = vpop.f32.mrb[47].mxu1 }
 0x175   :  { %v869_v44 = vmul.f32 %v2136_v55, %v702_v40  ;;  %1560 = vst [vmem:[%s2596_s4 + $0xa8] sm:$0xff] %v1742_v35  ;;  %v944_v47 = vadd.f32 %v2142_v60, %v804_v37  ;;  %v1008_v48 = vadd.f32 %v2142_v60, %v868_v38  ;;  %v806_v49 = vmul.f32 %v2138_v56, %v544_v45 }
 0x176   :  { %1592 = vst [vmem:[%s2596_s4 + $0x1a8] sm:$0xff] %v1774_v36  ;;  %v870_v50 = vmul.f32 %v2138_v56, %v704_v46  ;;  %v1071_v51 = vmax.f32 %v943_v41, 0.0  ;;  %v1135_v52 = vmax.f32 %v1007_v42, 0.0  ;;  %v945_v53 = vadd.f32 %v2140_v57, %v805_v43 }
 0x177   :  { %v1009_v54 = vadd.f32 %v2140_v57, %v869_v44  ;;  %v1072_v58 = vmax.f32 %v944_v47, 0.0  ;;  %v1136_v59 = vmax.f32 %v1008_v48, 0.0  ;;  %v946_v61 = vadd.f32 %v2142_v60, %v806_v49 }
 0x178   :  { %v1010_v62 = vadd.f32 %v2142_v60, %v870_v50  ;;  %v1073_v63 = vmax.f32 %v945_v53, 0.0 }
 0x179   :  { %v1137_v0 = vmax.f32 %v1009_v54, 0.0  ;;  %v1743_v1 = vpack.c.bf16 %v1072_v58, %v1071_v51  ;;  %v1775_v2 = vpack.c.bf16 %v1136_v59, %v1135_v52  ;;  %v1074_v3 = vmax.f32 %v946_v61, 0.0  ;;  %v548_v5 = vpop.f32.mrb[48].mxu0  ;;  %v708_v6 = vpop.f32.mrb[48].mxu1 }
 0x17a   :  { %v1138_v4 = vmax.f32 %v1010_v62, 0.0  ;;  %v807_v7 = vmul.f32 %v2136_v55, %v548_v5  ;;  %v871_v8 = vmul.f32 %v2136_v55, %v708_v6  ;;  %v550_v9 = vpop.f32.mrb[49].mxu0  ;;  %v710_v10 = vpop.f32.mrb[49].mxu1 }
 0x17b   :  { %1561 = vst [vmem:[%s2596_s4 + $0xb0] sm:$0xff] %v1743_v1  ;;  %1593 = vst [vmem:[%s2596_s4 + $0x1b0] sm:$0xff] %v1775_v2  ;;  %v1744_v11 = vpack.c.bf16 %v1074_v3, %v1073_v63  ;;  %v808_v13 = vmul.f32 %v2138_v56, %v550_v9  ;;  %v872_v14 = vmul.f32 %v2138_v56, %v710_v10  ;;  %v552_v15 = vpop.f32.mrb[50].mxu0  ;;  %v712_v16 = vpop.f32.mrb[50].mxu1 }
 0x17c   :  { %v1776_v12 = vpack.c.bf16 %v1138_v4, %v1137_v0  ;;  %v947_v17 = vadd.f32 %v2140_v57, %v807_v7  ;;  %v1011_v18 = vadd.f32 %v2140_v57, %v871_v8  ;;  %v809_v19 = vmul.f32 %v2136_v55, %v552_v15  ;;  %v554_v21 = vpop.f32.mrb[51].mxu0  ;;  %v714_v22 = vpop.f32.mrb[51].mxu1 }
 0x17d   :  { %v873_v20 = vmul.f32 %v2136_v55, %v712_v16  ;;  %1562 = vst [vmem:[%s2596_s4 + $0xb8] sm:$0xff] %v1744_v11  ;;  %v948_v23 = vadd.f32 %v2142_v60, %v808_v13  ;;  %v1012_v24 = vadd.f32 %v2142_v60, %v872_v14  ;;  %v810_v25 = vmul.f32 %v2138_v56, %v554_v21 }
 0x17e   :  { %1594 = vst [vmem:[%s2596_s4 + $0x1b8] sm:$0xff] %v1776_v12  ;;  %v874_v26 = vmul.f32 %v2138_v56, %v714_v22  ;;  %v1075_v27 = vmax.f32 %v947_v17, 0.0  ;;  %v1139_v28 = vmax.f32 %v1011_v18, 0.0  ;;  %v949_v29 = vadd.f32 %v2140_v57, %v809_v19 }
 0x17f   :  { %v1013_v30 = vadd.f32 %v2140_v57, %v873_v20  ;;  %v1076_v31 = vmax.f32 %v948_v23, 0.0  ;;  %v1140_v32 = vmax.f32 %v1012_v24, 0.0  ;;  %v950_v33 = vadd.f32 %v2142_v60, %v810_v25 }
 0x180   :  { %v1014_v34 = vadd.f32 %v2142_v60, %v874_v26  ;;  %v1077_v35 = vmax.f32 %v949_v29, 0.0 }
 0x181   :  { %v1141_v36 = vmax.f32 %v1013_v30, 0.0  ;;  %v1745_v37 = vpack.c.bf16 %v1076_v31, %v1075_v27  ;;  %v1777_v38 = vpack.c.bf16 %v1140_v32, %v1139_v28  ;;  %v1078_v39 = vmax.f32 %v950_v33, 0.0  ;;  %v558_v41 = vpop.f32.mrb[52].mxu0  ;;  %v718_v42 = vpop.f32.mrb[52].mxu1 }
 0x182   :  { %v1142_v40 = vmax.f32 %v1014_v34, 0.0  ;;  %v811_v43 = vmul.f32 %v2136_v55, %v558_v41  ;;  %v875_v44 = vmul.f32 %v2136_v55, %v718_v42  ;;  %v560_v45 = vpop.f32.mrb[53].mxu0  ;;  %v720_v46 = vpop.f32.mrb[53].mxu1 }
 0x183   :  { %1563 = vst [vmem:[%s2596_s4 + $0xc0] sm:$0xff] %v1745_v37  ;;  %1595 = vst [vmem:[%s2596_s4 + $0x1c0] sm:$0xff] %v1777_v38  ;;  %v1746_v47 = vpack.c.bf16 %v1078_v39, %v1077_v35  ;;  %v812_v49 = vmul.f32 %v2138_v56, %v560_v45  ;;  %v876_v50 = vmul.f32 %v2138_v56, %v720_v46  ;;  %v562_v51 = vpop.f32.mrb[54].mxu0  ;;  %v722_v52 = vpop.f32.mrb[54].mxu1 }
 0x184   :  { %v1778_v48 = vpack.c.bf16 %v1142_v40, %v1141_v36  ;;  %v951_v53 = vadd.f32 %v2140_v57, %v811_v43  ;;  %v1015_v54 = vadd.f32 %v2140_v57, %v875_v44  ;;  %v813_v58 = vmul.f32 %v2136_v55, %v562_v51  ;;  %v564_v61 = vpop.f32.mrb[55].mxu0  ;;  %v724_v62 = vpop.f32.mrb[55].mxu1 }
 0x185   :  { %v877_v59 = vmul.f32 %v2136_v55, %v722_v52  ;;  %1564 = vst [vmem:[%s2596_s4 + $0xc8] sm:$0xff] %v1746_v47  ;;  %v952_v63 = vadd.f32 %v2142_v60, %v812_v49  ;;  %v1016_v0 = vadd.f32 %v2142_v60, %v876_v50  ;;  %v814_v1 = vmul.f32 %v2138_v56, %v564_v61 }
 0x186   :  { %1596 = vst [vmem:[%s2596_s4 + $0x1c8] sm:$0xff] %v1778_v48  ;;  %v878_v2 = vmul.f32 %v2138_v56, %v724_v62  ;;  %v1079_v3 = vmax.f32 %v951_v53, 0.0  ;;  %v1143_v4 = vmax.f32 %v1015_v54, 0.0  ;;  %v953_v5 = vadd.f32 %v2140_v57, %v813_v58 }
 0x187   :  { %v1017_v6 = vadd.f32 %v2140_v57, %v877_v59  ;;  %v1080_v7 = vmax.f32 %v952_v63, 0.0  ;;  %v1144_v8 = vmax.f32 %v1016_v0, 0.0  ;;  %v954_v9 = vadd.f32 %v2142_v60, %v814_v1 }
 0x188   :  { %v1018_v10 = vadd.f32 %v2142_v60, %v878_v2  ;;  %v1081_v11 = vmax.f32 %v953_v5, 0.0 }
 0x189   :  { %v1145_v12 = vmax.f32 %v1017_v6, 0.0  ;;  %v1747_v13 = vpack.c.bf16 %v1080_v7, %v1079_v3  ;;  %v1779_v14 = vpack.c.bf16 %v1144_v8, %v1143_v4  ;;  %v1082_v15 = vmax.f32 %v954_v9, 0.0  ;;  %v568_v17 = vpop.f32.mrb[56].mxu0  ;;  %v728_v18 = vpop.f32.mrb[56].mxu1 }
 0x18a   :  { %v1146_v16 = vmax.f32 %v1018_v10, 0.0  ;;  %v815_v19 = vmul.f32 %v2136_v55, %v568_v17  ;;  %v879_v20 = vmul.f32 %v2136_v55, %v728_v18  ;;  %v570_v21 = vpop.f32.mrb[57].mxu0  ;;  %v730_v22 = vpop.f32.mrb[57].mxu1 }
 0x18b   :  { %1565 = vst [vmem:[%s2596_s4 + $0xd0] sm:$0xff] %v1747_v13  ;;  %1597 = vst [vmem:[%s2596_s4 + $0x1d0] sm:$0xff] %v1779_v14  ;;  %v1748_v23 = vpack.c.bf16 %v1082_v15, %v1081_v11  ;;  %v816_v25 = vmul.f32 %v2138_v56, %v570_v21  ;;  %v880_v26 = vmul.f32 %v2138_v56, %v730_v22  ;;  %v572_v27 = vpop.f32.mrb[58].mxu0  ;;  %v732_v28 = vpop.f32.mrb[58].mxu1 }
 0x18c   :  { %v1780_v24 = vpack.c.bf16 %v1146_v16, %v1145_v12  ;;  %v955_v29 = vadd.f32 %v2140_v57, %v815_v19  ;;  %v1019_v30 = vadd.f32 %v2140_v57, %v879_v20  ;;  %v817_v31 = vmul.f32 %v2136_v55, %v572_v27  ;;  %v574_v33 = vpop.f32.mrb[59].mxu0  ;;  %v734_v34 = vpop.f32.mrb[59].mxu1 }
 0x18d   :  { %v881_v32 = vmul.f32 %v2136_v55, %v732_v28  ;;  %1566 = vst [vmem:[%s2596_s4 + $0xd8] sm:$0xff] %v1748_v23  ;;  %v956_v35 = vadd.f32 %v2142_v60, %v816_v25  ;;  %v1020_v36 = vadd.f32 %v2142_v60, %v880_v26  ;;  %v818_v37 = vmul.f32 %v2138_v56, %v574_v33 }
 0x18e   :  { %1598 = vst [vmem:[%s2596_s4 + $0x1d8] sm:$0xff] %v1780_v24  ;;  %v882_v38 = vmul.f32 %v2138_v56, %v734_v34  ;;  %v1083_v39 = vmax.f32 %v955_v29, 0.0  ;;  %v1147_v40 = vmax.f32 %v1019_v30, 0.0  ;;  %v957_v41 = vadd.f32 %v2140_v57, %v817_v31 }
 0x18f   :  { %v1021_v42 = vadd.f32 %v2140_v57, %v881_v32  ;;  %v1084_v43 = vmax.f32 %v956_v35, 0.0  ;;  %v1148_v44 = vmax.f32 %v1020_v36, 0.0  ;;  %v958_v45 = vadd.f32 %v2142_v60, %v818_v37 }
 0x190   :  { %v1022_v46 = vadd.f32 %v2142_v60, %v882_v38  ;;  %v1085_v47 = vmax.f32 %v957_v41, 0.0 }
 0x191   :  { %v1149_v48 = vmax.f32 %v1021_v42, 0.0  ;;  %v1749_v49 = vpack.c.bf16 %v1084_v43, %v1083_v39  ;;  %v1781_v50 = vpack.c.bf16 %v1148_v44, %v1147_v40  ;;  %v1086_v51 = vmax.f32 %v958_v45, 0.0  ;;  %v578_v53 = vpop.f32.mrb[60].mxu0  ;;  %v738_v54 = vpop.f32.mrb[60].mxu1 }
 0x192   :  { %v1150_v52 = vmax.f32 %v1022_v46, 0.0  ;;  %v819_v58 = vmul.f32 %v2136_v55, %v578_v53  ;;  %v883_v59 = vmul.f32 %v2136_v55, %v738_v54  ;;  %v580_v61 = vpop.f32.mrb[61].mxu0  ;;  %v740_v62 = vpop.f32.mrb[61].mxu1 }
 0x193   :  { %1567 = vst [vmem:[%s2596_s4 + $0xe0] sm:$0xff] %v1749_v49  ;;  %1599 = vst [vmem:[%s2596_s4 + $0x1e0] sm:$0xff] %v1781_v50  ;;  %v1750_v63 = vpack.c.bf16 %v1086_v51, %v1085_v47  ;;  %v820_v1 = vmul.f32 %v2138_v56, %v580_v61  ;;  %v884_v2 = vmul.f32 %v2138_v56, %v740_v62  ;;  %v582_v3 = vpop.f32.mrb[62].mxu0  ;;  %v742_v4 = vpop.f32.mrb[62].mxu1 }
 0x194   :  { %v1782_v0 = vpack.c.bf16 %v1150_v52, %v1149_v48  ;;  %v959_v5 = vadd.f32 %v2140_v57, %v819_v58  ;;  %v1023_v6 = vadd.f32 %v2140_v57, %v883_v59  ;;  %v821_v7 = vmul.f32 %v2136_v55, %v582_v3  ;;  %v584_v9 = vpop.f32.mrb[63].mxu0  ;;  %v744_v10 = vpop.f32.mrb[63].mxu1 }
 0x195   :  { %v885_v8 = vmul.f32 %v2136_v55, %v742_v4  ;;  %1568 = vst [vmem:[%s2596_s4 + $0xe8] sm:$0xff] %v1750_v63  ;;  %v960_v11 = vadd.f32 %v2142_v60, %v820_v1  ;;  %v1024_v12 = vadd.f32 %v2142_v60, %v884_v2  ;;  %v822_v13 = vmul.f32 %v2138_v56, %v584_v9 }
 0x196   :  { %1600 = vst [vmem:[%s2596_s4 + $0x1e8] sm:$0xff] %v1782_v0  ;;  %v886_v14 = vmul.f32 %v2138_v56, %v744_v10  ;;  %v1087_v15 = vmax.f32 %v959_v5, 0.0  ;;  %v1151_v55 = vmax.f32 %v1023_v6, 0.0  ;;  %v961_v16 = vadd.f32 %v2140_v57, %v821_v7 }
 0x197   :  { %v1025_v17 = vadd.f32 %v2140_v57, %v885_v8  ;;  %v1088_v18 = vmax.f32 %v960_v11, 0.0  ;;  %v1152_v19 = vmax.f32 %v1024_v12, 0.0  ;;  %v962_v20 = vadd.f32 %v2142_v60, %v822_v13 }
 0x198   :  { %v1026_v21 = vadd.f32 %v2142_v60, %v886_v14  ;;  %v1089_v22 = vmax.f32 %v961_v16, 0.0 }
 0x199   :  { %v1153_v23 = vmax.f32 %v1025_v17, 0.0  ;;  %v1751_v24 = vpack.c.bf16 %v1088_v18, %v1087_v15  ;;  %v1783_v25 = vpack.c.bf16 %v1152_v19, %v1151_v55  ;;  %v1090_v26 = vmax.f32 %v962_v20, 0.0 }
 0x19a   :  { %v1154_v27 = vmax.f32 %v1026_v21, 0.0 }
 0x19b   :  { %1569 = vst [vmem:[%s2596_s4 + $0xf0] sm:$0xff] %v1751_v24  ;;  %1601 = vst [vmem:[%s2596_s4 + $0x1f0] sm:$0xff] %v1783_v25  ;;  %v1752_v56 = vpack.c.bf16 %v1090_v26, %v1089_v22 }
 0x19c   :  { %v1784_v57 = vpack.c.bf16 %v1154_v27, %v1153_v23 }
 0x19d   :  { %1570 = vst [vmem:[%s2596_s4 + $0xf8] sm:$0xff] %v1752_v56 }
 0x19e   :  { %1602 = vst [vmem:[%s2596_s4 + $0x1f8] sm:$0xff] %v1784_v57 }
 0x19f   :  { %1607 = vsyncpa [#allocation3], 1 }
 0x1a0   :  { %1608 = vsyncpa [#allocation5], 1 }

// kernel: spotlight_detection_head.9
= control target key start
LH: loop header
LB: loop body
LE: loop exit
PB: predicated region body
PF: predicated region fallthrough
CT: control target
= control target key end

     0   :  { %s4850_s1 = inlined_call_operand.vmem [shape: bf16[256,512], index: 1, kind: input, shape index: {}]   ;;  %s4851_s0 = inlined_call_operand.vmem [shape: bf16[512,256], index: 0, kind: input, shape index: {}]   ;;  %s4852_s2 = inlined_call_operand.vmem [shape: f32[1,512], index: 2, kind: input, shape index: {}]   ;;  %s4853_s3 = inlined_call_operand.vmem [shape: f32[1,512], index: 3, kind: input, shape index: {}]   ;;  %s4854_s4 = inlined_call_operand.vmem [shape: bf16[512,512], index: 4, kind: output, shape index: {}]  }
   0x1   :  { %v3331_v0 = vld [vmem:[%s4850_s1 + $0x4] ss:$16 sps:$4 sm:$0xff]   ;;  %v3333_v1 = vld [vmem:[%s4850_s1 + $0xc] ss:$16 sps:$4 sm:$0xff]   ;;  %v3335_v2 = vld [vmem:[%s4850_s1] ss:$16 sps:$4 sm:$0xff]  }
   0x2   :  { %785 = vmatprep.subr.bf16.mxu0 %v3331_v0  ;;  %v3336_v3 = vld [vmem:[%s4850_s1 + $0x8] ss:$16 sps:$4 sm:$0xff]   ;;  %1138 = vmatprep.subr.bf16.mxu1 %v3333_v1  ;;  %v3337_v4 = vld [vmem:[%s4850_s1 + $0x24] ss:$16 sps:$4 sm:$0xff]   ;;  %v3339_v5 = vld [vmem:[%s4850_s1 + $0x2c] ss:$16 sps:$4 sm:$0xff]  }
   0x3   :  { %786 = vmatpush1.bf16.msra.mxu0 %v3335_v2  ;;  %1139 = vmatpush1.bf16.msra.mxu1 %v3336_v3  ;;  %v3341_v6 = vld [vmem:[%s4850_s1 + $0x20] ss:$16 sps:$4 sm:$0xff]   ;;  %v3342_v7 = vld [vmem:[%s4850_s1 + $0x28] ss:$16 sps:$4 sm:$0xff]   ;;  %v3343_v8 = vld [vmem:[%s4850_s1 + $0x44] ss:$16 sps:$4 sm:$0xff]  }
   0x4   :  { %787 = vmatprep.subr.bf16.mxu0 %v3337_v4  ;;  %1140 = vmatprep.subr.bf16.mxu1 %v3339_v5  ;;  %v3345_v9 = vld [vmem:[%s4850_s1 + $0x4c] ss:$16 sps:$4 sm:$0xff]   ;;  %v3347_v10 = vld [vmem:[%s4850_s1 + $0x40] ss:$16 sps:$4 sm:$0xff]   ;;  %v3348_v11 = vld [vmem:[%s4850_s1 + $0x48] ss:$16 sps:$4 sm:$0xff]  }
   0x5   :  { %v3349_v12 = vld [vmem:[%s4850_s1 + $0x64] ss:$16 sps:$4 sm:$0xff]   ;;  %v3351_v13 = vld [vmem:[%s4850_s1 + $0x6c] ss:$16 sps:$4 sm:$0xff]   ;;  %v3353_v14 = vld [vmem:[%s4850_s1 + $0x60] ss:$16 sps:$4 sm:$0xff]  }
   0x6   :  { %v3354_v15 = vld [vmem:[%s4850_s1 + $0x68] ss:$16 sps:$4 sm:$0xff]   ;;  %v3355_v16 = vld [vmem:[%s4850_s1 + $0x84] ss:$16 sps:$4 sm:$0xff]   ;;  %v3357_v17 = vld [vmem:[%s4850_s1 + $0x8c] ss:$16 sps:$4 sm:$0xff]  }
   0x7   :  { %788 = vmatpush1.bf16.msra.mxu0 %v3341_v6  ;;  %1141 = vmatpush1.bf16.msra.mxu1 %v3342_v7  ;;  %v3359_v18 = vld [vmem:[%s4850_s1 + $0x80] ss:$16 sps:$4 sm:$0xff]   ;;  %v3360_v19 = vld [vmem:[%s4850_s1 + $0x88] ss:$16 sps:$4 sm:$0xff]   ;;  %v3361_v20 = vld [vmem:[%s4850_s1 + $0xa4] ss:$16 sps:$4 sm:$0xff]  }
   0x8   :  { %789 = vmatprep.subr.bf16.mxu0 %v3343_v8  ;;  %1142 = vmatprep.subr.bf16.mxu1 %v3345_v9  ;;  %v3363_v21 = vld [vmem:[%s4850_s1 + $0xac] ss:$16 sps:$4 sm:$0xff]   ;;  %v3365_v22 = vld [vmem:[%s4850_s1 + $0xa0] ss:$16 sps:$4 sm:$0xff]   ;;  %v3366_v23 = vld [vmem:[%s4850_s1 + $0xa8] ss:$16 sps:$4 sm:$0xff]  }
   0x9   :  { %v3367_v24 = vld [vmem:[%s4850_s1 + $0xc4] ss:$16 sps:$4 sm:$0xff]   ;;  %v3369_v25 = vld [vmem:[%s4850_s1 + $0xcc] ss:$16 sps:$4 sm:$0xff]   ;;  %v3371_v26 = vld [vmem:[%s4850_s1 + $0xc0] ss:$16 sps:$4 sm:$0xff]  }
   0xa   :  { %v3372_v27 = vld [vmem:[%s4850_s1 + $0xc8] ss:$16 sps:$4 sm:$0xff]   ;;  %v3373_v28 = vld [vmem:[%s4850_s1 + $0xe4] ss:$16 sps:$4 sm:$0xff]   ;;  %v3375_v29 = vld [vmem:[%s4850_s1 + $0xec] ss:$16 sps:$4 sm:$0xff]  }
   0xb   :  { %790 = vmatpush1.bf16.msra.mxu0 %v3347_v10  ;;  %1143 = vmatpush1.bf16.msra.mxu1 %v3348_v11  ;;  %v3377_v30 = vld [vmem:[%s4850_s1 + $0xe0] ss:$16 sps:$4 sm:$0xff]   ;;  %v3378_v31 = vld [vmem:[%s4850_s1 + $0xe8] ss:$16 sps:$4 sm:$0xff]   ;;  %v3379_v32 = vld [vmem:[%s4850_s1 + $0x104] ss:$16 sps:$4 sm:$0xff]  }
   0xc   :  { %791 = vmatprep.subr.bf16.mxu0 %v3349_v12  ;;  %1144 = vmatprep.subr.bf16.mxu1 %v3351_v13  ;;  %v3381_v33 = vld [vmem:[%s4850_s1 + $0x10c] ss:$16 sps:$4 sm:$0xff]   ;;  %v3383_v34 = vld [vmem:[%s4850_s1 + $0x100] ss:$16 sps:$4 sm:$0xff]   ;;  %v3384_v35 = vld [vmem:[%s4850_s1 + $0x108] ss:$16 sps:$4 sm:$0xff]  }
   0xd   :  { %v3385_v36 = vld [vmem:[%s4850_s1 + $0x124] ss:$16 sps:$4 sm:$0xff]   ;;  %v3387_v37 = vld [vmem:[%s4850_s1 + $0x12c] ss:$16 sps:$4 sm:$0xff]   ;;  %v3389_v38 = vld [vmem:[%s4850_s1 + $0x120] ss:$16 sps:$4 sm:$0xff]  }
   0xe   :  { %v3390_v39 = vld [vmem:[%s4850_s1 + $0x128] ss:$16 sps:$4 sm:$0xff]   ;;  %v3391_v40 = vld [vmem:[%s4850_s1 + $0x144] ss:$16 sps:$4 sm:$0xff]   ;;  %v3393_v41 = vld [vmem:[%s4850_s1 + $0x14c] ss:$16 sps:$4 sm:$0xff]  }
   0xf   :  { %792 = vmatpush1.bf16.msra.mxu0 %v3353_v14  ;;  %1145 = vmatpush1.bf16.msra.mxu1 %v3354_v15  ;;  %v3395_v42 = vld [vmem:[%s4850_s1 + $0x140] ss:$16 sps:$4 sm:$0xff]   ;;  %v3396_v43 = vld [vmem:[%s4850_s1 + $0x148] ss:$16 sps:$4 sm:$0xff]   ;;  %v3397_v44 = vld [vmem:[%s4850_s1 + $0x164] ss:$16 sps:$4 sm:$0xff]  }
  0x10   :  { %793 = vmatprep.subr.bf16.mxu0 %v3355_v16  ;;  %1146 = vmatprep.subr.bf16.mxu1 %v3357_v17  ;;  %v3399_v45 = vld [vmem:[%s4850_s1 + $0x16c] ss:$16 sps:$4 sm:$0xff]   ;;  %v3401_v46 = vld [vmem:[%s4850_s1 + $0x160] ss:$16 sps:$4 sm:$0xff]   ;;  %v3402_v47 = vld [vmem:[%s4850_s1 + $0x168] ss:$16 sps:$4 sm:$0xff]  }
  0x11   :  { %v3429_v48 = vld [vmem:[%s4851_s0 + $0x4] ss:$8 sps:$4 sm:$0xff]   ;;  %v3407_v51 = vld [vmem:[%s4850_s1 + $0x180] ss:$16 sps:$4 sm:$0xff]   ;;  %v3408_v52 = vld [vmem:[%s4850_s1 + $0x188] ss:$16 sps:$4 sm:$0xff]  }
  0x12   :  { %v3403_v49 = vld [vmem:[%s4850_s1 + $0x184] ss:$16 sps:$4 sm:$0xff]   ;;  %v3405_v50 = vld [vmem:[%s4850_s1 + $0x18c] ss:$16 sps:$4 sm:$0xff]   ;;  %817 = vmatprep.mubr.bf16.mxu0 %v3429_v48  ;;  %1170 = vmatprep.mubr.bf16.mxu1 %v3429_v48  ;;  %v3413_v55 = vld [vmem:[%s4850_s1 + $0x1a0] ss:$16 sps:$4 sm:$0xff]  }
  0x13   :  { %794 = vmatpush1.bf16.msra.mxu0 %v3359_v18  ;;  %1147 = vmatpush1.bf16.msra.mxu1 %v3360_v19  ;;  %v3409_v53 = vld [vmem:[%s4850_s1 + $0x1a4] ss:$16 sps:$4 sm:$0xff]   ;;  %v3411_v54 = vld [vmem:[%s4850_s1 + $0x1ac] ss:$16 sps:$4 sm:$0xff]   ;;  %v3414_v56 = vld [vmem:[%s4850_s1 + $0x1a8] ss:$16 sps:$4 sm:$0xff]  }
  0x14   :  { %795 = vmatprep.subr.bf16.mxu0 %v3361_v20  ;;  %1148 = vmatprep.subr.bf16.mxu1 %v3363_v21  ;;  %v3415_v57 = vld [vmem:[%s4850_s1 + $0x1c4] ss:$16 sps:$4 sm:$0xff]   ;;  %v3417_v58 = vld [vmem:[%s4850_s1 + $0x1cc] ss:$16 sps:$4 sm:$0xff]   ;;  %v3419_v59 = vld [vmem:[%s4850_s1 + $0x1c0] ss:$16 sps:$4 sm:$0xff]  }
  0x15   :  { %v3420_v60 = vld [vmem:[%s4850_s1 + $0x1c8] ss:$16 sps:$4 sm:$0xff]   ;;  %v3421_v61 = vld [vmem:[%s4850_s1 + $0x1e4] ss:$16 sps:$4 sm:$0xff]   ;;  %v3423_v62 = vld [vmem:[%s4850_s1 + $0x1ec] ss:$16 sps:$4 sm:$0xff]  }
  0x16   :  { %v3425_v63 = vld [vmem:[%s4850_s1 + $0x1e0] ss:$16 sps:$4 sm:$0xff]   ;;  %v3426_v0 = vld [vmem:[%s4850_s1 + $0x1e8] ss:$16 sps:$4 sm:$0xff]   ;;  %v3430_v2 = vld [vmem:[%s4851_s0 + $0x14] ss:$8 sps:$4 sm:$0xff]  }
  0x17   :  { %796 = vmatpush1.bf16.msra.mxu0 %v3365_v22  ;;  %1149 = vmatpush1.bf16.msra.mxu1 %v3366_v23  ;;  %v3427_v1 = vld [vmem:[%s4851_s0] ss:$8 sps:$4 sm:$0xff]   ;;  %v3432_v3 = vld [vmem:[%s4851_s0 + $0x10] ss:$8 sps:$4 sm:$0xff]   ;;  %v3433_v4 = vld [vmem:[%s4851_s0 + $0x24] ss:$8 sps:$4 sm:$0xff]  }
  0x18   :  { %797 = vmatprep.subr.bf16.mxu0 %v3367_v24  ;;  %1150 = vmatprep.subr.bf16.mxu1 %v3369_v25  ;;  %v3435_v5 = vld [vmem:[%s4851_s0 + $0x20] ss:$8 sps:$4 sm:$0xff]   ;;  %v3436_v6 = vld [vmem:[%s4851_s0 + $0x34] ss:$8 sps:$4 sm:$0xff]   ;;  %v3438_v7 = vld [vmem:[%s4851_s0 + $0x30] ss:$8 sps:$4 sm:$0xff]  }
  0x19   :  { %v3439_v8 = vld [vmem:[%s4851_s0 + $0x44] ss:$8 sps:$4 sm:$0xff]   ;;  %v3441_v9 = vld [vmem:[%s4851_s0 + $0x40] ss:$8 sps:$4 sm:$0xff]   ;;  %v3442_v10 = vld [vmem:[%s4851_s0 + $0x54] ss:$8 sps:$4 sm:$0xff]  }
  0x1a   :  { %v3444_v11 = vld [vmem:[%s4851_s0 + $0x50] ss:$8 sps:$4 sm:$0xff]   ;;  %v3445_v12 = vld [vmem:[%s4851_s0 + $0x64] ss:$8 sps:$4 sm:$0xff]   ;;  %v3447_v13 = vld [vmem:[%s4851_s0 + $0x60] ss:$8 sps:$4 sm:$0xff]  }
  0x1b   :  { %798 = vmatpush1.bf16.msra.mxu0 %v3371_v26  ;;  %1151 = vmatpush1.bf16.msra.mxu1 %v3372_v27  ;;  %v3448_v14 = vld [vmem:[%s4851_s0 + $0x74] ss:$8 sps:$4 sm:$0xff]   ;;  %v3450_v15 = vld [vmem:[%s4851_s0 + $0x70] ss:$8 sps:$4 sm:$0xff]   ;;  %v3451_v16 = vld [vmem:[%s4851_s0 + $0x84] ss:$8 sps:$4 sm:$0xff]  }
  0x1c   :  { %799 = vmatprep.subr.bf16.mxu0 %v3373_v28  ;;  %1152 = vmatprep.subr.bf16.mxu1 %v3375_v29  ;;  %v3453_v17 = vld [vmem:[%s4851_s0 + $0x80] ss:$8 sps:$4 sm:$0xff]   ;;  %v3454_v18 = vld [vmem:[%s4851_s0 + $0x94] ss:$8 sps:$4 sm:$0xff]   ;;  %v3456_v19 = vld [vmem:[%s4851_s0 + $0x90] ss:$8 sps:$4 sm:$0xff]  }
  0x1d   :  { %v3457_v20 = vld [vmem:[%s4851_s0 + $0xa4] ss:$8 sps:$4 sm:$0xff]   ;;  %v3459_v21 = vld [vmem:[%s4851_s0 + $0xa0] ss:$8 sps:$4 sm:$0xff]   ;;  %v3460_v22 = vld [vmem:[%s4851_s0 + $0xb4] ss:$8 sps:$4 sm:$0xff]  }
  0x1e   :  { %v3462_v23 = vld [vmem:[%s4851_s0 + $0xb0] ss:$8 sps:$4 sm:$0xff]   ;;  %v3463_v24 = vld [vmem:[%s4851_s0 + $0xc4] ss:$8 sps:$4 sm:$0xff]   ;;  %v3465_v25 = vld [vmem:[%s4851_s0 + $0xc0] ss:$8 sps:$4 sm:$0xff]  }
  0x1f   :  { %800 = vmatpush1.bf16.msra.mxu0 %v3377_v30  ;;  %1153 = vmatpush1.bf16.msra.mxu1 %v3378_v31  ;;  %v3466_v26 = vld [vmem:[%s4851_s0 + $0xd4] ss:$8 sps:$4 sm:$0xff]   ;;  %v3468_v27 = vld [vmem:[%s4851_s0 + $0xd0] ss:$8 sps:$4 sm:$0xff]   ;;  %v3469_v28 = vld [vmem:[%s4851_s0 + $0xe4] ss:$8 sps:$4 sm:$0xff]  }
  0x20   :  { %801 = vmatprep.subr.bf16.mxu0 %v3379_v32  ;;  %1154 = vmatprep.subr.bf16.mxu1 %v3381_v33  ;;  %v3471_v29 = vld [vmem:[%s4851_s0 + $0xe0] ss:$8 sps:$4 sm:$0xff]   ;;  %v3472_v30 = vld [vmem:[%s4851_s0 + $0xf4] ss:$8 sps:$4 sm:$0xff]   ;;  %v3474_v31 = vld [vmem:[%s4851_s0 + $0xf0] ss:$8 sps:$4 sm:$0xff]  }
  0x21   :  { %v3475_v32 = vld [vmem:[%s4851_s0 + $0x104] ss:$8 sps:$4 sm:$0xff]   ;;  %v3477_v33 = vld [vmem:[%s4851_s0 + $0x100] ss:$8 sps:$4 sm:$0xff]  }
  0x22   :  { %v3499_v48 = vld [vmem:[%s4851_s0 + $0x184] ss:$8 sps:$4 sm:$0xff]  }
  0x23   :  { %802 = vmatpush1.bf16.msra.mxu0 %v3383_v34  ;;  %1155 = vmatpush1.bf16.msra.mxu1 %v3384_v35  ;;  %v3478_v34 = vld [vmem:[%s4851_s0 + $0x114] ss:$8 sps:$4 sm:$0xff]   ;;  %v3480_v35 = vld [vmem:[%s4851_s0 + $0x110] ss:$8 sps:$4 sm:$0xff]  }
  0x24   :  { %803 = vmatprep.subr.bf16.mxu0 %v3385_v36  ;;  %1156 = vmatprep.subr.bf16.mxu1 %v3387_v37  ;;  %v3481_v36 = vld [vmem:[%s4851_s0 + $0x124] ss:$8 sps:$4 sm:$0xff]   ;;  %v3483_v37 = vld [vmem:[%s4851_s0 + $0x120] ss:$8 sps:$4 sm:$0xff]  }
  0x27   :  { %804 = vmatpush1.bf16.msra.mxu0 %v3389_v38  ;;  %1157 = vmatpush1.bf16.msra.mxu1 %v3390_v39  ;;  %v3484_v38 = vld [vmem:[%s4851_s0 + $0x134] ss:$8 sps:$4 sm:$0xff]   ;;  %v3486_v39 = vld [vmem:[%s4851_s0 + $0x130] ss:$8 sps:$4 sm:$0xff]  }
  0x28   :  { %805 = vmatprep.subr.bf16.mxu0 %v3391_v40  ;;  %1158 = vmatprep.subr.bf16.mxu1 %v3393_v41  ;;  %v3487_v40 = vld [vmem:[%s4851_s0 + $0x144] ss:$8 sps:$4 sm:$0xff]   ;;  %v3489_v41 = vld [vmem:[%s4851_s0 + $0x140] ss:$8 sps:$4 sm:$0xff]  }
  0x2b   :  { %806 = vmatpush1.bf16.msra.mxu0 %v3395_v42  ;;  %1159 = vmatpush1.bf16.msra.mxu1 %v3396_v43  ;;  %v3490_v42 = vld [vmem:[%s4851_s0 + $0x154] ss:$8 sps:$4 sm:$0xff]   ;;  %v3492_v43 = vld [vmem:[%s4851_s0 + $0x150] ss:$8 sps:$4 sm:$0xff]  }
  0x2c   :  { %807 = vmatprep.subr.bf16.mxu0 %v3397_v44  ;;  %1160 = vmatprep.subr.bf16.mxu1 %v3399_v45  ;;  %v3493_v44 = vld [vmem:[%s4851_s0 + $0x164] ss:$8 sps:$4 sm:$0xff]   ;;  %v3495_v45 = vld [vmem:[%s4851_s0 + $0x160] ss:$8 sps:$4 sm:$0xff]  }
  0x2f   :  { %808 = vmatpush1.bf16.msra.mxu0 %v3401_v46  ;;  %1161 = vmatpush1.bf16.msra.mxu1 %v3402_v47  ;;  %v3496_v46 = vld [vmem:[%s4851_s0 + $0x174] ss:$8 sps:$4 sm:$0xff]   ;;  %v3498_v47 = vld [vmem:[%s4851_s0 + $0x170] ss:$8 sps:$4 sm:$0xff]  }
  0x30   :  { %809 = vmatprep.subr.bf16.mxu0 %v3403_v49  ;;  %1162 = vmatprep.subr.bf16.mxu1 %v3405_v50  ;;  %v3501_v49 = vld [vmem:[%s4851_s0 + $0x180] ss:$8 sps:$4 sm:$0xff]   ;;  %v3502_v50 = vld [vmem:[%s4851_s0 + $0x194] ss:$8 sps:$4 sm:$0xff]  }
  0x33   :  { %810 = vmatpush1.bf16.msra.mxu0 %v3407_v51  ;;  %1163 = vmatpush1.bf16.msra.mxu1 %v3408_v52  ;;  %v3504_v51 = vld [vmem:[%s4851_s0 + $0x190] ss:$8 sps:$4 sm:$0xff]   ;;  %v1493_v52 = vlaneseq }
  0x34   :  { %811 = vmatprep.subr.bf16.mxu0 %v3409_v53  ;;  %1164 = vmatprep.subr.bf16.mxu1 %v3411_v54  ;;  %v3505_v53 = vld [vmem:[%s4851_s0 + $0x1a4] ss:$8 sps:$4 sm:$0xff]  }
  0x35   :  { %v1494_v54 = vshrl.u32 %v1493_v52, 7 }
  0x37   :  { %812 = vmatpush1.bf16.msra.mxu0 %v3413_v55  ;;  %1165 = vmatpush1.bf16.msra.mxu1 %v3414_v56  ;;  %v3507_v55 = vld [vmem:[%s4851_s0 + $0x1a0] ss:$8 sps:$4 sm:$0xff]   ;;  %v1495_v56 = vsub.s32 0, %v1494_v54 }
  0x38   :  { %813 = vmatprep.subr.bf16.mxu0 %v3415_v57  ;;  %1166 = vmatprep.subr.bf16.mxu1 %v3417_v58  ;;  %v1503_v57 = vsub.s32 2, %v1494_v54  ;;  %v1491_v58 = vld [vmem:[%s4852_s2] sm:$0xf] }
  0x3b   :  { %814 = vmatpush1.bf16.msra.mxu0 %v3419_v59  ;;  %1167 = vmatpush1.bf16.msra.mxu1 %v3420_v60  ;;  %v1499_v59 = vsub.s32 1, %v1494_v54  ;;  %v1507_v60 = vsub.s32 3, %v1494_v54 }
  0x3c   :  { %815 = vmatprep.subr.bf16.mxu0 %v3421_v61  ;;  %1168 = vmatprep.subr.bf16.mxu1 %v3423_v62  ;;  %v3508_v61 = vld [vmem:[%s4851_s0 + $0x1b4] ss:$8 sps:$4 sm:$0xff]   ;;  %v1769_v62 = vld [vmem:[%s4853_s3] sm:$0xf] }
  0x3f   :  { %816 = vmatpush1.bf16.msra.mxu0 %v3425_v63  ;;  %1169 = vmatpush1.bf16.msra.mxu1 %v3426_v0  ;;  %v3911_v63 = vrot.slane %v1491_v58, %v1495_v56  ;;  %v3913_v0 = vrot.slane %v1491_v58, %v1503_v57 }
  0x42   :  { %818 = vmatmul.mubr.bf16.vlgmr.msra.gmra.mrb[0].mxu0 %v3427_v1  ;;  %1171 = vmatmul.mubr.bf16.vlgmr.msra.gmra.mrb[0].mxu1 %v3427_v1  ;;  %v3915_v1 = vrot.slane %v1491_v58, %v1499_v59 }
  0x43   :  { %827 = vmatprep.mubr.bf16.mxu0 %v3430_v2  ;;  %1180 = vmatprep.mubr.bf16.mxu1 %v3430_v2  ;;  %v3917_v2 = vrot.slane %v1491_v58, %v1507_v60 }
  0x4a   :  { %828 = vmatmul.mubr.bf16.gmra.mrb[4].mxu0 %v3432_v3  ;;  %1181 = vmatmul.mubr.bf16.gmra.mrb[4].mxu1 %v3432_v3  ;;  %v3919_v3 = vrot.slane %v1769_v62, %v1495_v56 }
  0x4b   :  { %837 = vmatprep.mubr.bf16.mxu0 %v3433_v4  ;;  %1190 = vmatprep.mubr.bf16.mxu1 %v3433_v4  ;;  %v3921_v4 = vrot.slane %v1769_v62, %v1503_v57 }
  0x52   :  { %838 = vmatmul.mubr.bf16.gmra.mrb[8].mxu0 %v3435_v5  ;;  %1191 = vmatmul.mubr.bf16.gmra.mrb[8].mxu1 %v3435_v5 }
  0x53   :  { %847 = vmatprep.mubr.bf16.mxu0 %v3436_v6  ;;  %1200 = vmatprep.mubr.bf16.mxu1 %v3436_v6 }
  0x5a   :  { %848 = vmatmul.mubr.bf16.gmra.mrb[12].mxu0 %v3438_v7  ;;  %1201 = vmatmul.mubr.bf16.gmra.mrb[12].mxu1 %v3438_v7  ;;  %v3923_v7 = vrot.slane %v1769_v62, %v1499_v59 }
  0x5b   :  { %857 = vmatprep.mubr.bf16.mxu0 %v3439_v8  ;;  %1210 = vmatprep.mubr.bf16.mxu1 %v3439_v8  ;;  %v3925_v8 = vrot.slane %v1769_v62, %v1507_v60 }
  0x62   :  { %858 = vmatmul.mubr.bf16.gmra.mrb[16].mxu0 %v3441_v9  ;;  %1211 = vmatmul.mubr.bf16.gmra.mrb[16].mxu1 %v3441_v9 }
  0x63   :  { %867 = vmatprep.mubr.bf16.mxu0 %v3442_v10  ;;  %1220 = vmatprep.mubr.bf16.mxu1 %v3442_v10 }
  0x6a   :  { %868 = vmatmul.mubr.bf16.gmra.mrb[20].mxu0 %v3444_v11  ;;  %1221 = vmatmul.mubr.bf16.gmra.mrb[20].mxu1 %v3444_v11 }
  0x6b   :  { %877 = vmatprep.mubr.bf16.mxu0 %v3445_v12  ;;  %1230 = vmatprep.mubr.bf16.mxu1 %v3445_v12 }
  0x72   :  { %878 = vmatmul.mubr.bf16.gmra.mrb[24].mxu0 %v3447_v13  ;;  %1231 = vmatmul.mubr.bf16.gmra.mrb[24].mxu1 %v3447_v13  ;;  %v3510_v13 = vld [vmem:[%s4851_s0 + $0x1b0] ss:$8 sps:$4 sm:$0xff]  }
  0x73   :  { %887 = vmatprep.mubr.bf16.mxu0 %v3448_v14  ;;  %1240 = vmatprep.mubr.bf16.mxu1 %v3448_v14 }
  0x7a   :  { %888 = vmatmul.mubr.bf16.gmra.mrb[28].mxu0 %v3450_v15  ;;  %1241 = vmatmul.mubr.bf16.gmra.mrb[28].mxu1 %v3450_v15 }
  0x7b   :  { %897 = vmatprep.mubr.bf16.mxu0 %v3451_v16  ;;  %1250 = vmatprep.mubr.bf16.mxu1 %v3451_v16 }
  0x82   :  { %898 = vmatmul.mubr.bf16.gmra.mrb[32].mxu0 %v3453_v17  ;;  %1251 = vmatmul.mubr.bf16.gmra.mrb[32].mxu1 %v3453_v17 }
  0x83   :  { %907 = vmatprep.mubr.bf16.mxu0 %v3454_v18  ;;  %1260 = vmatprep.mubr.bf16.mxu1 %v3454_v18  ;;  %v3511_v18 = vld [vmem:[%s4851_s0 + $0x1c4] ss:$8 sps:$4 sm:$0xff]  }
  0x8a   :  { %908 = vmatmul.mubr.bf16.gmra.mrb[36].mxu0 %v3456_v19  ;;  %1261 = vmatmul.mubr.bf16.gmra.mrb[36].mxu1 %v3456_v19 }
  0x8b   :  { %917 = vmatprep.mubr.bf16.mxu0 %v3457_v20  ;;  %1270 = vmatprep.mubr.bf16.mxu1 %v3457_v20 }
  0x92   :  { %918 = vmatmul.mubr.bf16.gmra.mrb[40].mxu0 %v3459_v21  ;;  %1271 = vmatmul.mubr.bf16.gmra.mrb[40].mxu1 %v3459_v21 }
  0x93   :  { %927 = vmatprep.mubr.bf16.mxu0 %v3460_v22  ;;  %1280 = vmatprep.mubr.bf16.mxu1 %v3460_v22 }
  0x9a   :  { %928 = vmatmul.mubr.bf16.gmra.mrb[44].mxu0 %v3462_v23  ;;  %1281 = vmatmul.mubr.bf16.gmra.mrb[44].mxu1 %v3462_v23 }
  0x9b   :  { %937 = vmatprep.mubr.bf16.mxu0 %v3463_v24  ;;  %1290 = vmatprep.mubr.bf16.mxu1 %v3463_v24 }
  0xa2   :  { %938 = vmatmul.mubr.bf16.gmra.mrb[48].mxu0 %v3465_v25  ;;  %1291 = vmatmul.mubr.bf16.gmra.mrb[48].mxu1 %v3465_v25 }
  0xa3   :  { %947 = vmatprep.mubr.bf16.mxu0 %v3466_v26  ;;  %1300 = vmatprep.mubr.bf16.mxu1 %v3466_v26 }
  0xaa   :  { %948 = vmatmul.mubr.bf16.gmra.mrb[52].mxu0 %v3468_v27  ;;  %1301 = vmatmul.mubr.bf16.gmra.mrb[52].mxu1 %v3468_v27 }
  0xab   :  { %957 = vmatprep.mubr.bf16.mxu0 %v3469_v28  ;;  %1310 = vmatprep.mubr.bf16.mxu1 %v3469_v28 }
  0xb2   :  { %958 = vmatmul.mubr.bf16.gmra.mrb[56].mxu0 %v3471_v29  ;;  %1311 = vmatmul.mubr.bf16.gmra.mrb[56].mxu1 %v3471_v29 }
  0xb3   :  { %967 = vmatprep.mubr.bf16.mxu0 %v3472_v30  ;;  %1320 = vmatprep.mubr.bf16.mxu1 %v3472_v30 }
  0xba   :  { %968 = vmatmul.mubr.bf16.gmra.mrb[60].mxu0 %v3474_v31  ;;  %1321 = vmatmul.mubr.bf16.gmra.mrb[60].mxu1 %v3474_v31 }
  0xbb   :  { %977 = vmatprep.mubr.bf16.mxu0 %v3475_v32  ;;  %1330 = vmatprep.mubr.bf16.mxu1 %v3475_v32 }
  0xc2   :  { %978 = vmatmul.mubr.bf16.gmra.mrb[64].mxu0 %v3477_v33  ;;  %1331 = vmatmul.mubr.bf16.gmra.mrb[64].mxu1 %v3477_v33 }
  0xc3   :  { %987 = vmatprep.mubr.bf16.mxu0 %v3478_v34  ;;  %1340 = vmatprep.mubr.bf16.mxu1 %v3478_v34 }
  0xca   :  { %988 = vmatmul.mubr.bf16.gmra.mrb[68].mxu0 %v3480_v35  ;;  %1341 = vmatmul.mubr.bf16.gmra.mrb[68].mxu1 %v3480_v35 }
  0xcb   :  { %997 = vmatprep.mubr.bf16.mxu0 %v3481_v36  ;;  %1350 = vmatprep.mubr.bf16.mxu1 %v3481_v36 }
  0xd2   :  { %998 = vmatmul.mubr.bf16.gmra.mrb[72].mxu0 %v3483_v37  ;;  %1351 = vmatmul.mubr.bf16.gmra.mrb[72].mxu1 %v3483_v37 }
  0xd3   :  { %1007 = vmatprep.mubr.bf16.mxu0 %v3484_v38  ;;  %1360 = vmatprep.mubr.bf16.mxu1 %v3484_v38 }
  0xda   :  { %1008 = vmatmul.mubr.bf16.gmra.mrb[76].mxu0 %v3486_v39  ;;  %1361 = vmatmul.mubr.bf16.gmra.mrb[76].mxu1 %v3486_v39 }
  0xdb   :  { %1017 = vmatprep.mubr.bf16.mxu0 %v3487_v40  ;;  %1370 = vmatprep.mubr.bf16.mxu1 %v3487_v40 }
  0xe2   :  { %1018 = vmatmul.mubr.bf16.gmra.mrb[80].mxu0 %v3489_v41  ;;  %1371 = vmatmul.mubr.bf16.gmra.mrb[80].mxu1 %v3489_v41 }
  0xe3   :  { %1027 = vmatprep.mubr.bf16.mxu0 %v3490_v42  ;;  %1380 = vmatprep.mubr.bf16.mxu1 %v3490_v42 }
  0xea   :  { %1028 = vmatmul.mubr.bf16.gmra.mrb[84].mxu0 %v3492_v43  ;;  %1381 = vmatmul.mubr.bf16.gmra.mrb[84].mxu1 %v3492_v43  ;;  %v3513_v43 = vld [vmem:[%s4851_s0 + $0x1c0] ss:$8 sps:$4 sm:$0xff]  }
  0xeb   :  { %1037 = vmatprep.mubr.bf16.mxu0 %v3493_v44  ;;  %1390 = vmatprep.mubr.bf16.mxu1 %v3493_v44 }
  0xf2   :  { %1038 = vmatmul.mubr.bf16.gmra.mrb[88].mxu0 %v3495_v45  ;;  %1391 = vmatmul.mubr.bf16.gmra.mrb[88].mxu1 %v3495_v45 }
  0xf3   :  { %1047 = vmatprep.mubr.bf16.mxu0 %v3496_v46  ;;  %1400 = vmatprep.mubr.bf16.mxu1 %v3496_v46 }
  0xfa   :  { %1048 = vmatmul.mubr.bf16.gmra.mrb[92].mxu0 %v3498_v47  ;;  %1401 = vmatmul.mubr.bf16.gmra.mrb[92].mxu1 %v3498_v47 }
  0xfb   :  { %1057 = vmatprep.mubr.bf16.mxu0 %v3499_v48  ;;  %1410 = vmatprep.mubr.bf16.mxu1 %v3499_v48  ;;  %v3514_v48 = vld [vmem:[%s4851_s0 + $0x1d4] ss:$8 sps:$4 sm:$0xff]  }
 0x102   :  { %1058 = vmatmul.mubr.bf16.gmra.mrb[96].mxu0 %v3501_v49  ;;  %1411 = vmatmul.mubr.bf16.gmra.mrb[96].mxu1 %v3501_v49 }
 0x103   :  { %1067 = vmatprep.mubr.bf16.mxu0 %v3502_v50  ;;  %1420 = vmatprep.mubr.bf16.mxu1 %v3502_v50 }
 0x10a   :  { %1068 = vmatmul.mubr.bf16.gmra.mrb[100].mxu0 %v3504_v51  ;;  %1421 = vmatmul.mubr.bf16.gmra.mrb[100].mxu1 %v3504_v51 }
 0x10b   :  { %1077 = vmatprep.mubr.bf16.mxu0 %v3505_v53  ;;  %1430 = vmatprep.mubr.bf16.mxu1 %v3505_v53 }
 0x112   :  { %1078 = vmatmul.mubr.bf16.gmra.mrb[104].mxu0 %v3507_v55  ;;  %1431 = vmatmul.mubr.bf16.gmra.mrb[104].mxu1 %v3507_v55 }
 0x113   :  { %1087 = vmatprep.mubr.bf16.mxu0 %v3508_v61  ;;  %1440 = vmatprep.mubr.bf16.mxu1 %v3508_v61 }
 0x115   :  { %v819_v5 = vpop.f32.mrb[0].mxu0  ;;  %v1172_v6 = vpop.f32.mrb[0].mxu1 }
 0x116   :  { %v1513_v9 = vmul.f32 %v3911_v63, %v819_v5  ;;  %v1515_v10 = vmul.f32 %v3913_v0, %v1172_v6  ;;  %v821_v11 = vpop.f32.mrb[1].mxu0  ;;  %v1174_v12 = vpop.f32.mrb[1].mxu1 }
 0x117   :  { %v1514_v14 = vmul.f32 %v3915_v1, %v821_v11  ;;  %v1516_v15 = vmul.f32 %v3917_v2, %v1174_v12  ;;  %v823_v16 = vpop.f32.mrb[2].mxu0  ;;  %v1176_v17 = vpop.f32.mrb[2].mxu1 }
 0x118   :  { %v1791_v19 = vadd.f32 %v3919_v3, %v1513_v9  ;;  %v1793_v20 = vadd.f32 %v3921_v4, %v1515_v10  ;;  %v1517_v21 = vmul.f32 %v3911_v63, %v823_v16  ;;  %v1519_v22 = vmul.f32 %v3913_v0, %v1176_v17  ;;  %v825_v23 = vpop.f32.mrb[3].mxu0  ;;  %v1178_v24 = vpop.f32.mrb[3].mxu1  ;;  %v3516_v17 = vld [vmem:[%s4851_s0 + $0x1d0] ss:$8 sps:$4 sm:$0xff]  }
 0x119   :  { %v1792_v25 = vadd.f32 %v3923_v7, %v1514_v14  ;;  %v1794_v26 = vadd.f32 %v3925_v8, %v1516_v15  ;;  %v1518_v27 = vmul.f32 %v3915_v1, %v825_v23  ;;  %v1520_v28 = vmul.f32 %v3917_v2, %v1178_v24 }
 0x11a   :  { %v1795_v29 = vadd.f32 %v3919_v3, %v1517_v21  ;;  %v1797_v30 = vadd.f32 %v3921_v4, %v1519_v22  ;;  %1088 = vmatmul.mubr.bf16.gmra.mrb[108].mxu0 %v3510_v13  ;;  %1441 = vmatmul.mubr.bf16.gmra.mrb[108].mxu1 %v3510_v13  ;;  %v3517_v22 = vld [vmem:[%s4851_s0 + $0x1e4] ss:$8 sps:$4 sm:$0xff]  }
 0x11b   :  { %v3203_v31 = vpack.c.bf16 %v1792_v25, %v1791_v19  ;;  %v3204_v32 = vpack.c.bf16 %v1794_v26, %v1793_v20  ;;  %v1796_v33 = vadd.f32 %v3923_v7, %v1518_v27  ;;  %v1798_v34 = vadd.f32 %v3925_v8, %v1520_v28  ;;  %1097 = vmatprep.mubr.bf16.mxu0 %v3511_v18 }
 0x11c   :  { %1450 = vmatprep.mubr.bf16.mxu1 %v3511_v18 }
 0x11d   :  { %2815 = vst [vmem:[%s4854_s4] sm:$0xff] %v3203_v31  ;;  %2816 = vst [vmem:[%s4854_s4 + $0x8] sm:$0xff] %v3204_v32  ;;  %v3205_v35 = vpack.c.bf16 %v1796_v33, %v1795_v29  ;;  %v3206_v36 = vpack.c.bf16 %v1798_v34, %v1797_v30  ;;  %v829_v37 = vpop.f32.mrb[4].mxu0  ;;  %v1182_v38 = vpop.f32.mrb[4].mxu1 }
 0x11e   :  { %v1521_v39 = vmul.f32 %v3911_v63, %v829_v37  ;;  %v1523_v40 = vmul.f32 %v3913_v0, %v1182_v38  ;;  %v831_v41 = vpop.f32.mrb[5].mxu0  ;;  %v1184_v42 = vpop.f32.mrb[5].mxu1 }
 0x11f   :  { %2817 = vst [vmem:[%s4854_s4 + $0x10] sm:$0xff] %v3205_v35  ;;  %2818 = vst [vmem:[%s4854_s4 + $0x18] sm:$0xff] %v3206_v36  ;;  %v1522_v44 = vmul.f32 %v3915_v1, %v831_v41  ;;  %v1524_v45 = vmul.f32 %v3917_v2, %v1184_v42  ;;  %v833_v46 = vpop.f32.mrb[6].mxu0  ;;  %v1186_v47 = vpop.f32.mrb[6].mxu1 }
 0x120   :  { %v1799_v49 = vadd.f32 %v3919_v3, %v1521_v39  ;;  %v1801_v50 = vadd.f32 %v3921_v4, %v1523_v40  ;;  %v1525_v51 = vmul.f32 %v3911_v63, %v833_v46  ;;  %v1527_v52 = vmul.f32 %v3913_v0, %v1186_v47  ;;  %v835_v53 = vpop.f32.mrb[7].mxu0  ;;  %v1188_v54 = vpop.f32.mrb[7].mxu1  ;;  %v3519_v47 = vld [vmem:[%s4851_s0 + $0x1e0] ss:$8 sps:$4 sm:$0xff]  }
 0x121   :  { %v1800_v55 = vadd.f32 %v3923_v7, %v1522_v44  ;;  %v1802_v56 = vadd.f32 %v3925_v8, %v1524_v45  ;;  %v1526_v57 = vmul.f32 %v3915_v1, %v835_v53  ;;  %v1528_v58 = vmul.f32 %v3917_v2, %v1188_v54 }
 0x122   :  { %v1803_v59 = vadd.f32 %v3919_v3, %v1525_v51  ;;  %v1805_v60 = vadd.f32 %v3921_v4, %v1527_v52  ;;  %1098 = vmatmul.mubr.bf16.gmra.mrb[112].mxu0 %v3513_v43  ;;  %1451 = vmatmul.mubr.bf16.gmra.mrb[112].mxu1 %v3513_v43  ;;  %v3520_v52 = vld [vmem:[%s4851_s0 + $0x1f4] ss:$8 sps:$4 sm:$0xff]  }
 0x123   :  { %v3207_v61 = vpack.c.bf16 %v1800_v55, %v1799_v49  ;;  %v3208_v62 = vpack.c.bf16 %v1802_v56, %v1801_v50  ;;  %v1804_v5 = vadd.f32 %v3923_v7, %v1526_v57  ;;  %v1806_v6 = vadd.f32 %v3925_v8, %v1528_v58  ;;  %1107 = vmatprep.mubr.bf16.mxu0 %v3514_v48 }
 0x124   :  { %1460 = vmatprep.mubr.bf16.mxu1 %v3514_v48 }
 0x125   :  { %2819 = vst [vmem:[%s4854_s4 + $0x20] sm:$0xff] %v3207_v61  ;;  %2820 = vst [vmem:[%s4854_s4 + $0x28] sm:$0xff] %v3208_v62  ;;  %v3209_v9 = vpack.c.bf16 %v1804_v5, %v1803_v59  ;;  %v3210_v10 = vpack.c.bf16 %v1806_v6, %v1805_v60  ;;  %v839_v11 = vpop.f32.mrb[8].mxu0  ;;  %v1192_v12 = vpop.f32.mrb[8].mxu1 }
 0x126   :  { %v1529_v13 = vmul.f32 %v3911_v63, %v839_v11  ;;  %v1531_v14 = vmul.f32 %v3913_v0, %v1192_v12  ;;  %v841_v15 = vpop.f32.mrb[9].mxu0  ;;  %v1194_v16 = vpop.f32.mrb[9].mxu1 }
 0x127   :  { %2821 = vst [vmem:[%s4854_s4 + $0x30] sm:$0xff] %v3209_v9  ;;  %2822 = vst [vmem:[%s4854_s4 + $0x38] sm:$0xff] %v3210_v10  ;;  %v1530_v18 = vmul.f32 %v3915_v1, %v841_v15  ;;  %v1532_v19 = vmul.f32 %v3917_v2, %v1194_v16  ;;  %v843_v20 = vpop.f32.mrb[10].mxu0  ;;  %v1196_v21 = vpop.f32.mrb[10].mxu1 }
 0x128   :  { %v1807_v23 = vadd.f32 %v3919_v3, %v1529_v13  ;;  %v1809_v24 = vadd.f32 %v3921_v4, %v1531_v14  ;;  %v1533_v25 = vmul.f32 %v3911_v63, %v843_v20  ;;  %v1535_v26 = vmul.f32 %v3913_v0, %v1196_v21  ;;  %v845_v27 = vpop.f32.mrb[11].mxu0  ;;  %v1198_v28 = vpop.f32.mrb[11].mxu1  ;;  %v3522_v21 = vld [vmem:[%s4851_s0 + $0x1f0] ss:$8 sps:$4 sm:$0xff]  }
 0x129   :  { %v1808_v29 = vadd.f32 %v3923_v7, %v1530_v18  ;;  %v1810_v30 = vadd.f32 %v3925_v8, %v1532_v19  ;;  %v1534_v31 = vmul.f32 %v3915_v1, %v845_v27  ;;  %v1536_v32 = vmul.f32 %v3917_v2, %v1198_v28 }
 0x12a   :  { %v1811_v33 = vadd.f32 %v3919_v3, %v1533_v25  ;;  %v1813_v34 = vadd.f32 %v3921_v4, %v1535_v26  ;;  %1108 = vmatmul.mubr.bf16.gmra.mrb[116].mxu0 %v3516_v17  ;;  %1461 = vmatmul.mubr.bf16.gmra.mrb[116].mxu1 %v3516_v17 }
 0x12b   :  { %v3211_v35 = vpack.c.bf16 %v1808_v29, %v1807_v23  ;;  %v3212_v36 = vpack.c.bf16 %v1810_v30, %v1809_v24  ;;  %v1812_v37 = vadd.f32 %v3923_v7, %v1534_v31  ;;  %v1814_v38 = vadd.f32 %v3925_v8, %v1536_v32  ;;  %1117 = vmatprep.mubr.bf16.mxu0 %v3517_v22 }
 0x12c   :  { %1470 = vmatprep.mubr.bf16.mxu1 %v3517_v22 }
 0x12d   :  { %2823 = vst [vmem:[%s4854_s4 + $0x40] sm:$0xff] %v3211_v35  ;;  %2824 = vst [vmem:[%s4854_s4 + $0x48] sm:$0xff] %v3212_v36  ;;  %v3213_v39 = vpack.c.bf16 %v1812_v37, %v1811_v33  ;;  %v3214_v40 = vpack.c.bf16 %v1814_v38, %v1813_v34  ;;  %v849_v41 = vpop.f32.mrb[12].mxu0  ;;  %v1202_v42 = vpop.f32.mrb[12].mxu1 }
 0x12e   :  { %v1537_v43 = vmul.f32 %v3911_v63, %v849_v41  ;;  %v1539_v44 = vmul.f32 %v3913_v0, %v1202_v42  ;;  %v851_v45 = vpop.f32.mrb[13].mxu0  ;;  %v1204_v46 = vpop.f32.mrb[13].mxu1 }
 0x12f   :  { %2825 = vst [vmem:[%s4854_s4 + $0x50] sm:$0xff] %v3213_v39  ;;  %2826 = vst [vmem:[%s4854_s4 + $0x58] sm:$0xff] %v3214_v40  ;;  %v1538_v48 = vmul.f32 %v3915_v1, %v851_v45  ;;  %v1540_v49 = vmul.f32 %v3917_v2, %v1204_v46  ;;  %v853_v50 = vpop.f32.mrb[14].mxu0  ;;  %v1206_v51 = vpop.f32.mrb[14].mxu1 }
 0x130   :  { %v1815_v53 = vadd.f32 %v3919_v3, %v1537_v43  ;;  %v1817_v54 = vadd.f32 %v3921_v4, %v1539_v44  ;;  %v1541_v55 = vmul.f32 %v3911_v63, %v853_v50  ;;  %v1543_v56 = vmul.f32 %v3913_v0, %v1206_v51  ;;  %v855_v57 = vpop.f32.mrb[15].mxu0  ;;  %v1208_v58 = vpop.f32.mrb[15].mxu1 }
 0x131   :  { %v1816_v59 = vadd.f32 %v3923_v7, %v1538_v48  ;;  %v1818_v60 = vadd.f32 %v3925_v8, %v1540_v49  ;;  %v1542_v61 = vmul.f32 %v3915_v1, %v855_v57  ;;  %v1544_v62 = vmul.f32 %v3917_v2, %v1208_v58 }
 0x132   :  { %v1819_v5 = vadd.f32 %v3919_v3, %v1541_v55  ;;  %v1821_v6 = vadd.f32 %v3921_v4, %v1543_v56  ;;  %1118 = vmatmul.mubr.bf16.gmra.mrb[120].mxu0 %v3519_v47  ;;  %1471 = vmatmul.mubr.bf16.gmra.mrb[120].mxu1 %v3519_v47 }
 0x133   :  { %v3215_v9 = vpack.c.bf16 %v1816_v59, %v1815_v53  ;;  %v3216_v10 = vpack.c.bf16 %v1818_v60, %v1817_v54  ;;  %v1820_v11 = vadd.f32 %v3923_v7, %v1542_v61  ;;  %v1822_v12 = vadd.f32 %v3925_v8, %v1544_v62  ;;  %1127 = vmatprep.mubr.bf16.mxu0 %v3520_v52 }
 0x134   :  { %1480 = vmatprep.mubr.bf16.mxu1 %v3520_v52 }
 0x135   :  { %2827 = vst [vmem:[%s4854_s4 + $0x60] sm:$0xff] %v3215_v9  ;;  %2828 = vst [vmem:[%s4854_s4 + $0x68] sm:$0xff] %v3216_v10  ;;  %v3217_v13 = vpack.c.bf16 %v1820_v11, %v1819_v5  ;;  %v3218_v14 = vpack.c.bf16 %v1822_v12, %v1821_v6  ;;  %v859_v15 = vpop.f32.mrb[16].mxu0  ;;  %v1212_v16 = vpop.f32.mrb[16].mxu1 }
 0x136   :  { %v1545_v17 = vmul.f32 %v3911_v63, %v859_v15  ;;  %v1547_v18 = vmul.f32 %v3913_v0, %v1212_v16  ;;  %v861_v19 = vpop.f32.mrb[17].mxu0  ;;  %v1214_v20 = vpop.f32.mrb[17].mxu1 }
 0x137   :  { %2829 = vst [vmem:[%s4854_s4 + $0x70] sm:$0xff] %v3217_v13  ;;  %2830 = vst [vmem:[%s4854_s4 + $0x78] sm:$0xff] %v3218_v14  ;;  %v1546_v22 = vmul.f32 %v3915_v1, %v861_v19  ;;  %v1548_v23 = vmul.f32 %v3917_v2, %v1214_v20  ;;  %v863_v24 = vpop.f32.mrb[18].mxu0  ;;  %v1216_v25 = vpop.f32.mrb[18].mxu1 }
 0x138   :  { %v1823_v26 = vadd.f32 %v3919_v3, %v1545_v17  ;;  %v1825_v27 = vadd.f32 %v3921_v4, %v1547_v18  ;;  %v1549_v28 = vmul.f32 %v3911_v63, %v863_v24  ;;  %v1551_v29 = vmul.f32 %v3913_v0, %v1216_v25  ;;  %v865_v30 = vpop.f32.mrb[19].mxu0  ;;  %v1218_v31 = vpop.f32.mrb[19].mxu1 }
 0x139   :  { %v1824_v32 = vadd.f32 %v3923_v7, %v1546_v22  ;;  %v1826_v33 = vadd.f32 %v3925_v8, %v1548_v23  ;;  %v1550_v34 = vmul.f32 %v3915_v1, %v865_v30  ;;  %v1552_v35 = vmul.f32 %v3917_v2, %v1218_v31 }
 0x13a   :  { %v1827_v36 = vadd.f32 %v3919_v3, %v1549_v28  ;;  %v1829_v37 = vadd.f32 %v3921_v4, %v1551_v29  ;;  %1128 = vmatmul.mubr.bf16.gmra.mrb[124].mxu0 %v3522_v21  ;;  %1481 = vmatmul.mubr.bf16.gmra.mrb[124].mxu1 %v3522_v21 }
 0x13b   :  { %v3219_v38 = vpack.c.bf16 %v1824_v32, %v1823_v26  ;;  %v3220_v39 = vpack.c.bf16 %v1826_v33, %v1825_v27  ;;  %v1828_v40 = vadd.f32 %v3923_v7, %v1550_v34  ;;  %v1830_v41 = vadd.f32 %v3925_v8, %v1552_v35 }
 0x13d   :  { %2831 = vst [vmem:[%s4854_s4 + $0x80] sm:$0xff] %v3219_v38  ;;  %2832 = vst [vmem:[%s4854_s4 + $0x88] sm:$0xff] %v3220_v39  ;;  %v3221_v42 = vpack.c.bf16 %v1828_v40, %v1827_v36  ;;  %v3222_v43 = vpack.c.bf16 %v1830_v41, %v1829_v37  ;;  %v869_v44 = vpop.f32.mrb[20].mxu0  ;;  %v1222_v45 = vpop.f32.mrb[20].mxu1 }
 0x13e   :  { %v1553_v46 = vmul.f32 %v3911_v63, %v869_v44  ;;  %v1555_v47 = vmul.f32 %v3913_v0, %v1222_v45  ;;  %v871_v48 = vpop.f32.mrb[21].mxu0  ;;  %v1224_v49 = vpop.f32.mrb[21].mxu1 }
 0x13f   :  { %2833 = vst [vmem:[%s4854_s4 + $0x90] sm:$0xff] %v3221_v42  ;;  %2834 = vst [vmem:[%s4854_s4 + $0x98] sm:$0xff] %v3222_v43  ;;  %v1554_v50 = vmul.f32 %v3915_v1, %v871_v48  ;;  %v1556_v51 = vmul.f32 %v3917_v2, %v1224_v49  ;;  %v873_v52 = vpop.f32.mrb[22].mxu0  ;;  %v1226_v53 = vpop.f32.mrb[22].mxu1 }
 0x140   :  { %v1831_v54 = vadd.f32 %v3919_v3, %v1553_v46  ;;  %v1833_v55 = vadd.f32 %v3921_v4, %v1555_v47  ;;  %v1557_v56 = vmul.f32 %v3911_v63, %v873_v52  ;;  %v1559_v57 = vmul.f32 %v3913_v0, %v1226_v53  ;;  %v875_v58 = vpop.f32.mrb[23].mxu0  ;;  %v1228_v59 = vpop.f32.mrb[23].mxu1 }
 0x141   :  { %v1832_v60 = vadd.f32 %v3923_v7, %v1554_v50  ;;  %v1834_v61 = vadd.f32 %v3925_v8, %v1556_v51  ;;  %v1558_v62 = vmul.f32 %v3915_v1, %v875_v58  ;;  %v1560_v5 = vmul.f32 %v3917_v2, %v1228_v59 }
 0x142   :  { %v1835_v6 = vadd.f32 %v3919_v3, %v1557_v56  ;;  %v1837_v9 = vadd.f32 %v3921_v4, %v1559_v57 }
 0x143   :  { %v3223_v10 = vpack.c.bf16 %v1832_v60, %v1831_v54  ;;  %v3224_v11 = vpack.c.bf16 %v1834_v61, %v1833_v55  ;;  %v1836_v12 = vadd.f32 %v3923_v7, %v1558_v62  ;;  %v1838_v13 = vadd.f32 %v3925_v8, %v1560_v5 }
 0x145   :  { %2835 = vst [vmem:[%s4854_s4 + $0xa0] sm:$0xff] %v3223_v10  ;;  %2836 = vst [vmem:[%s4854_s4 + $0xa8] sm:$0xff] %v3224_v11  ;;  %v3225_v14 = vpack.c.bf16 %v1836_v12, %v1835_v6  ;;  %v3226_v15 = vpack.c.bf16 %v1838_v13, %v1837_v9  ;;  %v879_v16 = vpop.f32.mrb[24].mxu0  ;;  %v1232_v17 = vpop.f32.mrb[24].mxu1 }
 0x146   :  { %v1561_v18 = vmul.f32 %v3911_v63, %v879_v16  ;;  %v1563_v19 = vmul.f32 %v3913_v0, %v1232_v17  ;;  %v881_v20 = vpop.f32.mrb[25].mxu0  ;;  %v1234_v21 = vpop.f32.mrb[25].mxu1 }
 0x147   :  { %2837 = vst [vmem:[%s4854_s4 + $0xb0] sm:$0xff] %v3225_v14  ;;  %2838 = vst [vmem:[%s4854_s4 + $0xb8] sm:$0xff] %v3226_v15  ;;  %v1562_v22 = vmul.f32 %v3915_v1, %v881_v20  ;;  %v1564_v23 = vmul.f32 %v3917_v2, %v1234_v21  ;;  %v883_v24 = vpop.f32.mrb[26].mxu0  ;;  %v1236_v25 = vpop.f32.mrb[26].mxu1 }
 0x148   :  { %v1839_v26 = vadd.f32 %v3919_v3, %v1561_v18  ;;  %v1841_v27 = vadd.f32 %v3921_v4, %v1563_v19  ;;  %v1565_v28 = vmul.f32 %v3911_v63, %v883_v24  ;;  %v1567_v29 = vmul.f32 %v3913_v0, %v1236_v25  ;;  %v885_v30 = vpop.f32.mrb[27].mxu0  ;;  %v1238_v31 = vpop.f32.mrb[27].mxu1 }
 0x149   :  { %v1840_v32 = vadd.f32 %v3923_v7, %v1562_v22  ;;  %v1842_v33 = vadd.f32 %v3925_v8, %v1564_v23  ;;  %v1566_v34 = vmul.f32 %v3915_v1, %v885_v30  ;;  %v1568_v35 = vmul.f32 %v3917_v2, %v1238_v31 }
 0x14a   :  { %v1843_v36 = vadd.f32 %v3919_v3, %v1565_v28  ;;  %v1845_v37 = vadd.f32 %v3921_v4, %v1567_v29 }
 0x14b   :  { %v3227_v38 = vpack.c.bf16 %v1840_v32, %v1839_v26  ;;  %v3228_v39 = vpack.c.bf16 %v1842_v33, %v1841_v27  ;;  %v1844_v40 = vadd.f32 %v3923_v7, %v1566_v34  ;;  %v1846_v41 = vadd.f32 %v3925_v8, %v1568_v35 }
 0x14d   :  { %2839 = vst [vmem:[%s4854_s4 + $0xc0] sm:$0xff] %v3227_v38  ;;  %2840 = vst [vmem:[%s4854_s4 + $0xc8] sm:$0xff] %v3228_v39  ;;  %v3229_v42 = vpack.c.bf16 %v1844_v40, %v1843_v36  ;;  %v3230_v43 = vpack.c.bf16 %v1846_v41, %v1845_v37  ;;  %v889_v44 = vpop.f32.mrb[28].mxu0  ;;  %v1242_v45 = vpop.f32.mrb[28].mxu1 }
 0x14e   :  { %v1569_v46 = vmul.f32 %v3911_v63, %v889_v44  ;;  %v1571_v47 = vmul.f32 %v3913_v0, %v1242_v45  ;;  %v891_v48 = vpop.f32.mrb[29].mxu0  ;;  %v1244_v49 = vpop.f32.mrb[29].mxu1 }
 0x14f   :  { %2841 = vst [vmem:[%s4854_s4 + $0xd0] sm:$0xff] %v3229_v42  ;;  %2842 = vst [vmem:[%s4854_s4 + $0xd8] sm:$0xff] %v3230_v43  ;;  %v1570_v50 = vmul.f32 %v3915_v1, %v891_v48  ;;  %v1572_v51 = vmul.f32 %v3917_v2, %v1244_v49  ;;  %v893_v52 = vpop.f32.mrb[30].mxu0  ;;  %v1246_v53 = vpop.f32.mrb[30].mxu1 }
 0x150   :  { %v1847_v54 = vadd.f32 %v3919_v3, %v1569_v46  ;;  %v1849_v55 = vadd.f32 %v3921_v4, %v1571_v47  ;;  %v1573_v56 = vmul.f32 %v3911_v63, %v893_v52  ;;  %v1575_v57 = vmul.f32 %v3913_v0, %v1246_v53  ;;  %v895_v58 = vpop.f32.mrb[31].mxu0  ;;  %v1248_v59 = vpop.f32.mrb[31].mxu1 }
 0x151   :  { %v1848_v60 = vadd.f32 %v3923_v7, %v1570_v50  ;;  %v1850_v61 = vadd.f32 %v3925_v8, %v1572_v51  ;;  %v1574_v62 = vmul.f32 %v3915_v1, %v895_v58  ;;  %v1576_v5 = vmul.f32 %v3917_v2, %v1248_v59 }
 0x152   :  { %v1851_v6 = vadd.f32 %v3919_v3, %v1573_v56  ;;  %v1853_v9 = vadd.f32 %v3921_v4, %v1575_v57 }
 0x153   :  { %v3231_v10 = vpack.c.bf16 %v1848_v60, %v1847_v54  ;;  %v3232_v11 = vpack.c.bf16 %v1850_v61, %v1849_v55  ;;  %v1852_v12 = vadd.f32 %v3923_v7, %v1574_v62  ;;  %v1854_v13 = vadd.f32 %v3925_v8, %v1576_v5 }
 0x155   :  { %2843 = vst [vmem:[%s4854_s4 + $0xe0] sm:$0xff] %v3231_v10  ;;  %2844 = vst [vmem:[%s4854_s4 + $0xe8] sm:$0xff] %v3232_v11  ;;  %v3233_v14 = vpack.c.bf16 %v1852_v12, %v1851_v6  ;;  %v3234_v15 = vpack.c.bf16 %v1854_v13, %v1853_v9  ;;  %v899_v16 = vpop.f32.mrb[32].mxu0  ;;  %v1252_v17 = vpop.f32.mrb[32].mxu1 }
 0x156   :  { %v1577_v18 = vmul.f32 %v3911_v63, %v899_v16  ;;  %v1579_v19 = vmul.f32 %v3913_v0, %v1252_v17  ;;  %v901_v20 = vpop.f32.mrb[33].mxu0  ;;  %v1254_v21 = vpop.f32.mrb[33].mxu1 }
 0x157   :  { %2845 = vst [vmem:[%s4854_s4 + $0xf0] sm:$0xff] %v3233_v14  ;;  %2846 = vst [vmem:[%s4854_s4 + $0xf8] sm:$0xff] %v3234_v15  ;;  %v1578_v22 = vmul.f32 %v3915_v1, %v901_v20  ;;  %v1580_v23 = vmul.f32 %v3917_v2, %v1254_v21  ;;  %v903_v24 = vpop.f32.mrb[34].mxu0  ;;  %v1256_v25 = vpop.f32.mrb[34].mxu1 }
 0x158   :  { %v1855_v26 = vadd.f32 %v3919_v3, %v1577_v18  ;;  %v1857_v27 = vadd.f32 %v3921_v4, %v1579_v19  ;;  %v1581_v28 = vmul.f32 %v3911_v63, %v903_v24  ;;  %v1583_v29 = vmul.f32 %v3913_v0, %v1256_v25  ;;  %v905_v30 = vpop.f32.mrb[35].mxu0  ;;  %v1258_v31 = vpop.f32.mrb[35].mxu1 }
 0x159   :  { %v1856_v32 = vadd.f32 %v3923_v7, %v1578_v22  ;;  %v1858_v33 = vadd.f32 %v3925_v8, %v1580_v23  ;;  %v1582_v34 = vmul.f32 %v3915_v1, %v905_v30  ;;  %v1584_v35 = vmul.f32 %v3917_v2, %v1258_v31 }
 0x15a   :  { %v1859_v36 = vadd.f32 %v3919_v3, %v1581_v28  ;;  %v1861_v37 = vadd.f32 %v3921_v4, %v1583_v29 }
 0x15b   :  { %v3235_v38 = vpack.c.bf16 %v1856_v32, %v1855_v26  ;;  %v3236_v39 = vpack.c.bf16 %v1858_v33, %v1857_v27  ;;  %v1860_v40 = vadd.f32 %v3923_v7, %v1582_v34  ;;  %v1862_v41 = vadd.f32 %v3925_v8, %v1584_v35 }
 0x15d   :  { %2847 = vst [vmem:[%s4854_s4 + $0x100] sm:$0xff] %v3235_v38  ;;  %2848 = vst [vmem:[%s4854_s4 + $0x108] sm:$0xff] %v3236_v39  ;;  %v3237_v42 = vpack.c.bf16 %v1860_v40, %v1859_v36  ;;  %v3238_v43 = vpack.c.bf16 %v1862_v41, %v1861_v37  ;;  %v909_v44 = vpop.f32.mrb[36].mxu0  ;;  %v1262_v45 = vpop.f32.mrb[36].mxu1 }
 0x15e   :  { %v1585_v46 = vmul.f32 %v3911_v63, %v909_v44  ;;  %v1587_v47 = vmul.f32 %v3913_v0, %v1262_v45  ;;  %v911_v48 = vpop.f32.mrb[37].mxu0  ;;  %v1264_v49 = vpop.f32.mrb[37].mxu1 }
 0x15f   :  { %2849 = vst [vmem:[%s4854_s4 + $0x110] sm:$0xff] %v3237_v42  ;;  %2850 = vst [vmem:[%s4854_s4 + $0x118] sm:$0xff] %v3238_v43  ;;  %v1586_v50 = vmul.f32 %v3915_v1, %v911_v48  ;;  %v1588_v51 = vmul.f32 %v3917_v2, %v1264_v49  ;;  %v913_v52 = vpop.f32.mrb[38].mxu0  ;;  %v1266_v53 = vpop.f32.mrb[38].mxu1 }
 0x160   :  { %v1863_v54 = vadd.f32 %v3919_v3, %v1585_v46  ;;  %v1865_v55 = vadd.f32 %v3921_v4, %v1587_v47  ;;  %v1589_v56 = vmul.f32 %v3911_v63, %v913_v52  ;;  %v1591_v57 = vmul.f32 %v3913_v0, %v1266_v53  ;;  %v915_v58 = vpop.f32.mrb[39].mxu0  ;;  %v1268_v59 = vpop.f32.mrb[39].mxu1 }
 0x161   :  { %v1864_v60 = vadd.f32 %v3923_v7, %v1586_v50  ;;  %v1866_v61 = vadd.f32 %v3925_v8, %v1588_v51  ;;  %v1590_v62 = vmul.f32 %v3915_v1, %v915_v58  ;;  %v1592_v5 = vmul.f32 %v3917_v2, %v1268_v59 }
 0x162   :  { %v1867_v6 = vadd.f32 %v3919_v3, %v1589_v56  ;;  %v1869_v9 = vadd.f32 %v3921_v4, %v1591_v57 }
 0x163   :  { %v3239_v10 = vpack.c.bf16 %v1864_v60, %v1863_v54  ;;  %v3240_v11 = vpack.c.bf16 %v1866_v61, %v1865_v55  ;;  %v1868_v12 = vadd.f32 %v3923_v7, %v1590_v62  ;;  %v1870_v13 = vadd.f32 %v3925_v8, %v1592_v5 }
 0x165   :  { %2851 = vst [vmem:[%s4854_s4 + $0x120] sm:$0xff] %v3239_v10  ;;  %2852 = vst [vmem:[%s4854_s4 + $0x128] sm:$0xff] %v3240_v11  ;;  %v3241_v14 = vpack.c.bf16 %v1868_v12, %v1867_v6  ;;  %v3242_v15 = vpack.c.bf16 %v1870_v13, %v1869_v9  ;;  %v919_v16 = vpop.f32.mrb[40].mxu0  ;;  %v1272_v17 = vpop.f32.mrb[40].mxu1 }
 0x166   :  { %v1593_v18 = vmul.f32 %v3911_v63, %v919_v16  ;;  %v1595_v19 = vmul.f32 %v3913_v0, %v1272_v17  ;;  %v921_v20 = vpop.f32.mrb[41].mxu0  ;;  %v1274_v21 = vpop.f32.mrb[41].mxu1 }
 0x167   :  { %2853 = vst [vmem:[%s4854_s4 + $0x130] sm:$0xff] %v3241_v14  ;;  %2854 = vst [vmem:[%s4854_s4 + $0x138] sm:$0xff] %v3242_v15  ;;  %v1594_v22 = vmul.f32 %v3915_v1, %v921_v20  ;;  %v1596_v23 = vmul.f32 %v3917_v2, %v1274_v21  ;;  %v923_v24 = vpop.f32.mrb[42].mxu0  ;;  %v1276_v25 = vpop.f32.mrb[42].mxu1 }
 0x168   :  { %v1871_v26 = vadd.f32 %v3919_v3, %v1593_v18  ;;  %v1873_v27 = vadd.f32 %v3921_v4, %v1595_v19  ;;  %v1597_v28 = vmul.f32 %v3911_v63, %v923_v24  ;;  %v1599_v29 = vmul.f32 %v3913_v0, %v1276_v25  ;;  %v925_v30 = vpop.f32.mrb[43].mxu0  ;;  %v1278_v31 = vpop.f32.mrb[43].mxu1 }
 0x169   :  { %v1872_v32 = vadd.f32 %v3923_v7, %v1594_v22  ;;  %v1874_v33 = vadd.f32 %v3925_v8, %v1596_v23  ;;  %v1598_v34 = vmul.f32 %v3915_v1, %v925_v30  ;;  %v1600_v35 = vmul.f32 %v3917_v2, %v1278_v31 }
 0x16a   :  { %v1875_v36 = vadd.f32 %v3919_v3, %v1597_v28  ;;  %v1877_v37 = vadd.f32 %v3921_v4, %v1599_v29 }
 0x16b   :  { %v3243_v38 = vpack.c.bf16 %v1872_v32, %v1871_v26  ;;  %v3244_v39 = vpack.c.bf16 %v1874_v33, %v1873_v27  ;;  %v1876_v40 = vadd.f32 %v3923_v7, %v1598_v34  ;;  %v1878_v41 = vadd.f32 %v3925_v8, %v1600_v35 }
 0x16d   :  { %2855 = vst [vmem:[%s4854_s4 + $0x140] sm:$0xff] %v3243_v38  ;;  %2856 = vst [vmem:[%s4854_s4 + $0x148] sm:$0xff] %v3244_v39  ;;  %v3245_v42 = vpack.c.bf16 %v1876_v40, %v1875_v36  ;;  %v3246_v43 = vpack.c.bf16 %v1878_v41, %v1877_v37  ;;  %v929_v44 = vpop.f32.mrb[44].mxu0  ;;  %v1282_v45 = vpop.f32.mrb[44].mxu1 }
 0x16e   :  { %v1601_v46 = vmul.f32 %v3911_v63, %v929_v44  ;;  %v1603_v47 = vmul.f32 %v3913_v0, %v1282_v45  ;;  %v931_v48 = vpop.f32.mrb[45].mxu0  ;;  %v1284_v49 = vpop.f32.mrb[45].mxu1 }
 0x16f   :  { %2857 = vst [vmem:[%s4854_s4 + $0x150] sm:$0xff] %v3245_v42  ;;  %2858 = vst [vmem:[%s4854_s4 + $0x158] sm:$0xff] %v3246_v43  ;;  %v1602_v50 = vmul.f32 %v3915_v1, %v931_v48  ;;  %v1604_v51 = vmul.f32 %v3917_v2, %v1284_v49  ;;  %v933_v52 = vpop.f32.mrb[46].mxu0  ;;  %v1286_v53 = vpop.f32.mrb[46].mxu1 }
 0x170   :  { %v1879_v54 = vadd.f32 %v3919_v3, %v1601_v46  ;;  %v1881_v55 = vadd.f32 %v3921_v4, %v1603_v47  ;;  %v1605_v56 = vmul.f32 %v3911_v63, %v933_v52  ;;  %v1607_v57 = vmul.f32 %v3913_v0, %v1286_v53  ;;  %v935_v58 = vpop.f32.mrb[47].mxu0  ;;  %v1288_v59 = vpop.f32.mrb[47].mxu1 }
 0x171   :  { %v1880_v60 = vadd.f32 %v3923_v7, %v1602_v50  ;;  %v1882_v61 = vadd.f32 %v3925_v8, %v1604_v51  ;;  %v1606_v62 = vmul.f32 %v3915_v1, %v935_v58  ;;  %v1608_v5 = vmul.f32 %v3917_v2, %v1288_v59 }
 0x172   :  { %v1883_v6 = vadd.f32 %v3919_v3, %v1605_v56  ;;  %v1885_v9 = vadd.f32 %v3921_v4, %v1607_v57 }
 0x173   :  { %v3247_v10 = vpack.c.bf16 %v1880_v60, %v1879_v54  ;;  %v3248_v11 = vpack.c.bf16 %v1882_v61, %v1881_v55  ;;  %v1884_v12 = vadd.f32 %v3923_v7, %v1606_v62  ;;  %v1886_v13 = vadd.f32 %v3925_v8, %v1608_v5 }
 0x175   :  { %2859 = vst [vmem:[%s4854_s4 + $0x160] sm:$0xff] %v3247_v10  ;;  %2860 = vst [vmem:[%s4854_s4 + $0x168] sm:$0xff] %v3248_v11  ;;  %v3249_v14 = vpack.c.bf16 %v1884_v12, %v1883_v6  ;;  %v3250_v15 = vpack.c.bf16 %v1886_v13, %v1885_v9  ;;  %v939_v16 = vpop.f32.mrb[48].mxu0  ;;  %v1292_v17 = vpop.f32.mrb[48].mxu1 }
 0x176   :  { %v1609_v18 = vmul.f32 %v3911_v63, %v939_v16  ;;  %v1611_v19 = vmul.f32 %v3913_v0, %v1292_v17  ;;  %v941_v20 = vpop.f32.mrb[49].mxu0  ;;  %v1294_v21 = vpop.f32.mrb[49].mxu1 }
 0x177   :  { %2861 = vst [vmem:[%s4854_s4 + $0x170] sm:$0xff] %v3249_v14  ;;  %2862 = vst [vmem:[%s4854_s4 + $0x178] sm:$0xff] %v3250_v15  ;;  %v1610_v22 = vmul.f32 %v3915_v1, %v941_v20  ;;  %v1612_v23 = vmul.f32 %v3917_v2, %v1294_v21  ;;  %v943_v24 = vpop.f32.mrb[50].mxu0  ;;  %v1296_v25 = vpop.f32.mrb[50].mxu1 }
 0x178   :  { %v1887_v26 = vadd.f32 %v3919_v3, %v1609_v18  ;;  %v1889_v27 = vadd.f32 %v3921_v4, %v1611_v19  ;;  %v1613_v28 = vmul.f32 %v3911_v63, %v943_v24  ;;  %v1615_v29 = vmul.f32 %v3913_v0, %v1296_v25  ;;  %v945_v30 = vpop.f32.mrb[51].mxu0  ;;  %v1298_v31 = vpop.f32.mrb[51].mxu1 }
 0x179   :  { %v1888_v32 = vadd.f32 %v3923_v7, %v1610_v22  ;;  %v1890_v33 = vadd.f32 %v3925_v8, %v1612_v23  ;;  %v1614_v34 = vmul.f32 %v3915_v1, %v945_v30  ;;  %v1616_v35 = vmul.f32 %v3917_v2, %v1298_v31 }
 0x17a   :  { %v1891_v36 = vadd.f32 %v3919_v3, %v1613_v28  ;;  %v1893_v37 = vadd.f32 %v3921_v4, %v1615_v29 }
 0x17b   :  { %v3251_v38 = vpack.c.bf16 %v1888_v32, %v1887_v26  ;;  %v3252_v39 = vpack.c.bf16 %v1890_v33, %v1889_v27  ;;  %v1892_v40 = vadd.f32 %v3923_v7, %v1614_v34  ;;  %v1894_v41 = vadd.f32 %v3925_v8, %v1616_v35 }
 0x17d   :  { %2863 = vst [vmem:[%s4854_s4 + $0x180] sm:$0xff] %v3251_v38  ;;  %2864 = vst [vmem:[%s4854_s4 + $0x188] sm:$0xff] %v3252_v39  ;;  %v3253_v42 = vpack.c.bf16 %v1892_v40, %v1891_v36  ;;  %v3254_v43 = vpack.c.bf16 %v1894_v41, %v1893_v37  ;;  %v949_v44 = vpop.f32.mrb[52].mxu0  ;;  %v1302_v45 = vpop.f32.mrb[52].mxu1 }
 0x17e   :  { %v1617_v46 = vmul.f32 %v3911_v63, %v949_v44  ;;  %v1619_v47 = vmul.f32 %v3913_v0, %v1302_v45  ;;  %v951_v48 = vpop.f32.mrb[53].mxu0  ;;  %v1304_v49 = vpop.f32.mrb[53].mxu1 }
 0x17f   :  { %2865 = vst [vmem:[%s4854_s4 + $0x190] sm:$0xff] %v3253_v42  ;;  %2866 = vst [vmem:[%s4854_s4 + $0x198] sm:$0xff] %v3254_v43  ;;  %v1618_v50 = vmul.f32 %v3915_v1, %v951_v48  ;;  %v1620_v51 = vmul.f32 %v3917_v2, %v1304_v49  ;;  %v953_v52 = vpop.f32.mrb[54].mxu0  ;;  %v1306_v53 = vpop.f32.mrb[54].mxu1 }
 0x180   :  { %v1895_v54 = vadd.f32 %v3919_v3, %v1617_v46  ;;  %v1897_v55 = vadd.f32 %v3921_v4, %v1619_v47  ;;  %v1621_v56 = vmul.f32 %v3911_v63, %v953_v52  ;;  %v1623_v57 = vmul.f32 %v3913_v0, %v1306_v53  ;;  %v955_v58 = vpop.f32.mrb[55].mxu0  ;;  %v1308_v59 = vpop.f32.mrb[55].mxu1 }
 0x181   :  { %v1896_v60 = vadd.f32 %v3923_v7, %v1618_v50  ;;  %v1898_v61 = vadd.f32 %v3925_v8, %v1620_v51  ;;  %v1622_v62 = vmul.f32 %v3915_v1, %v955_v58  ;;  %v1624_v5 = vmul.f32 %v3917_v2, %v1308_v59 }
 0x182   :  { %v1899_v6 = vadd.f32 %v3919_v3, %v1621_v56  ;;  %v1901_v9 = vadd.f32 %v3921_v4, %v1623_v57 }
 0x183   :  { %v3255_v10 = vpack.c.bf16 %v1896_v60, %v1895_v54  ;;  %v3256_v11 = vpack.c.bf16 %v1898_v61, %v1897_v55  ;;  %v1900_v12 = vadd.f32 %v3923_v7, %v1622_v62  ;;  %v1902_v13 = vadd.f32 %v3925_v8, %v1624_v5 }
 0x185   :  { %2867 = vst [vmem:[%s4854_s4 + $0x1a0] sm:$0xff] %v3255_v10  ;;  %2868 = vst [vmem:[%s4854_s4 + $0x1a8] sm:$0xff] %v3256_v11  ;;  %v3257_v14 = vpack.c.bf16 %v1900_v12, %v1899_v6  ;;  %v3258_v15 = vpack.c.bf16 %v1902_v13, %v1901_v9  ;;  %v959_v16 = vpop.f32.mrb[56].mxu0  ;;  %v1312_v17 = vpop.f32.mrb[56].mxu1 }
 0x186   :  { %v1625_v18 = vmul.f32 %v3911_v63, %v959_v16  ;;  %v1627_v19 = vmul.f32 %v3913_v0, %v1312_v17  ;;  %v961_v20 = vpop.f32.mrb[57].mxu0  ;;  %v1314_v21 = vpop.f32.mrb[57].mxu1 }
 0x187   :  { %2869 = vst [vmem:[%s4854_s4 + $0x1b0] sm:$0xff] %v3257_v14  ;;  %2870 = vst [vmem:[%s4854_s4 + $0x1b8] sm:$0xff] %v3258_v15  ;;  %v1626_v22 = vmul.f32 %v3915_v1, %v961_v20  ;;  %v1628_v23 = vmul.f32 %v3917_v2, %v1314_v21  ;;  %v963_v24 = vpop.f32.mrb[58].mxu0  ;;  %v1316_v25 = vpop.f32.mrb[58].mxu1 }
 0x188   :  { %v1903_v26 = vadd.f32 %v3919_v3, %v1625_v18  ;;  %v1905_v27 = vadd.f32 %v3921_v4, %v1627_v19  ;;  %v1629_v28 = vmul.f32 %v3911_v63, %v963_v24  ;;  %v1631_v29 = vmul.f32 %v3913_v0, %v1316_v25  ;;  %v965_v30 = vpop.f32.mrb[59].mxu0  ;;  %v1318_v31 = vpop.f32.mrb[59].mxu1 }
 0x189   :  { %v1904_v32 = vadd.f32 %v3923_v7, %v1626_v22  ;;  %v1906_v33 = vadd.f32 %v3925_v8, %v1628_v23  ;;  %v1630_v34 = vmul.f32 %v3915_v1, %v965_v30  ;;  %v1632_v35 = vmul.f32 %v3917_v2, %v1318_v31 }
 0x18a   :  { %v1907_v36 = vadd.f32 %v3919_v3, %v1629_v28  ;;  %v1909_v37 = vadd.f32 %v3921_v4, %v1631_v29 }
 0x18b   :  { %v3259_v38 = vpack.c.bf16 %v1904_v32, %v1903_v26  ;;  %v3260_v39 = vpack.c.bf16 %v1906_v33, %v1905_v27  ;;  %v1908_v40 = vadd.f32 %v3923_v7, %v1630_v34  ;;  %v1910_v41 = vadd.f32 %v3925_v8, %v1632_v35 }
 0x18d   :  { %2871 = vst [vmem:[%s4854_s4 + $0x1c0] sm:$0xff] %v3259_v38  ;;  %2872 = vst [vmem:[%s4854_s4 + $0x1c8] sm:$0xff] %v3260_v39  ;;  %v3261_v42 = vpack.c.bf16 %v1908_v40, %v1907_v36  ;;  %v3262_v43 = vpack.c.bf16 %v1910_v41, %v1909_v37  ;;  %v969_v44 = vpop.f32.mrb[60].mxu0  ;;  %v1322_v45 = vpop.f32.mrb[60].mxu1 }
 0x18e   :  { %v1633_v46 = vmul.f32 %v3911_v63, %v969_v44  ;;  %v1635_v47 = vmul.f32 %v3913_v0, %v1322_v45  ;;  %v971_v48 = vpop.f32.mrb[61].mxu0  ;;  %v1324_v49 = vpop.f32.mrb[61].mxu1 }
 0x18f   :  { %2873 = vst [vmem:[%s4854_s4 + $0x1d0] sm:$0xff] %v3261_v42  ;;  %2874 = vst [vmem:[%s4854_s4 + $0x1d8] sm:$0xff] %v3262_v43  ;;  %v1634_v50 = vmul.f32 %v3915_v1, %v971_v48  ;;  %v1636_v51 = vmul.f32 %v3917_v2, %v1324_v49  ;;  %v973_v52 = vpop.f32.mrb[62].mxu0  ;;  %v1326_v53 = vpop.f32.mrb[62].mxu1 }
 0x190   :  { %v1911_v54 = vadd.f32 %v3919_v3, %v1633_v46  ;;  %v1913_v55 = vadd.f32 %v3921_v4, %v1635_v47  ;;  %v1637_v56 = vmul.f32 %v3911_v63, %v973_v52  ;;  %v1639_v57 = vmul.f32 %v3913_v0, %v1326_v53  ;;  %v975_v58 = vpop.f32.mrb[63].mxu0  ;;  %v1328_v59 = vpop.f32.mrb[63].mxu1 }
 0x191   :  { %v1912_v60 = vadd.f32 %v3923_v7, %v1634_v50  ;;  %v1914_v61 = vadd.f32 %v3925_v8, %v1636_v51  ;;  %v1638_v62 = vmul.f32 %v3915_v1, %v975_v58  ;;  %v1640_v5 = vmul.f32 %v3917_v2, %v1328_v59 }
 0x192   :  { %v1915_v6 = vadd.f32 %v3919_v3, %v1637_v56  ;;  %v1917_v9 = vadd.f32 %v3921_v4, %v1639_v57 }
 0x193   :  { %v3263_v10 = vpack.c.bf16 %v1912_v60, %v1911_v54  ;;  %v3264_v11 = vpack.c.bf16 %v1914_v61, %v1913_v55  ;;  %v1916_v12 = vadd.f32 %v3923_v7, %v1638_v62  ;;  %v1918_v13 = vadd.f32 %v3925_v8, %v1640_v5 }
 0x195   :  { %2875 = vst [vmem:[%s4854_s4 + $0x1e0] sm:$0xff] %v3263_v10  ;;  %2876 = vst [vmem:[%s4854_s4 + $0x1e8] sm:$0xff] %v3264_v11  ;;  %v3265_v14 = vpack.c.bf16 %v1916_v12, %v1915_v6  ;;  %v3266_v15 = vpack.c.bf16 %v1918_v13, %v1917_v9  ;;  %v979_v16 = vpop.f32.mrb[64].mxu0  ;;  %v1332_v17 = vpop.f32.mrb[64].mxu1 }
 0x196   :  { %v1641_v18 = vmul.f32 %v3911_v63, %v979_v16  ;;  %v1643_v19 = vmul.f32 %v3913_v0, %v1332_v17  ;;  %v981_v20 = vpop.f32.mrb[65].mxu0  ;;  %v1334_v21 = vpop.f32.mrb[65].mxu1 }
 0x197   :  { %2877 = vst [vmem:[%s4854_s4 + $0x1f0] sm:$0xff] %v3265_v14  ;;  %2878 = vst [vmem:[%s4854_s4 + $0x1f8] sm:$0xff] %v3266_v15  ;;  %v1642_v22 = vmul.f32 %v3915_v1, %v981_v20  ;;  %v1644_v23 = vmul.f32 %v3917_v2, %v1334_v21  ;;  %v983_v24 = vpop.f32.mrb[66].mxu0  ;;  %v1336_v25 = vpop.f32.mrb[66].mxu1 }
 0x198   :  { %v1919_v26 = vadd.f32 %v3919_v3, %v1641_v18  ;;  %v1921_v27 = vadd.f32 %v3921_v4, %v1643_v19  ;;  %v1645_v28 = vmul.f32 %v3911_v63, %v983_v24  ;;  %v1647_v29 = vmul.f32 %v3913_v0, %v1336_v25  ;;  %v985_v30 = vpop.f32.mrb[67].mxu0  ;;  %v1338_v31 = vpop.f32.mrb[67].mxu1 }
 0x199   :  { %v1920_v32 = vadd.f32 %v3923_v7, %v1642_v22  ;;  %v1922_v33 = vadd.f32 %v3925_v8, %v1644_v23  ;;  %v1646_v34 = vmul.f32 %v3915_v1, %v985_v30  ;;  %v1648_v35 = vmul.f32 %v3917_v2, %v1338_v31 }
 0x19a   :  { %v1923_v36 = vadd.f32 %v3919_v3, %v1645_v28  ;;  %v1925_v37 = vadd.f32 %v3921_v4, %v1647_v29 }
 0x19b   :  { %v3267_v38 = vpack.c.bf16 %v1920_v32, %v1919_v26  ;;  %v3268_v39 = vpack.c.bf16 %v1922_v33, %v1921_v27  ;;  %v1924_v40 = vadd.f32 %v3923_v7, %v1646_v34  ;;  %v1926_v41 = vadd.f32 %v3925_v8, %v1648_v35 }
 0x19d   :  { %2879 = vst [vmem:[%s4854_s4 + $0x200] sm:$0xff] %v3267_v38  ;;  %2880 = vst [vmem:[%s4854_s4 + $0x208] sm:$0xff] %v3268_v39  ;;  %v3269_v42 = vpack.c.bf16 %v1924_v40, %v1923_v36  ;;  %v3270_v43 = vpack.c.bf16 %v1926_v41, %v1925_v37  ;;  %v989_v44 = vpop.f32.mrb[68].mxu0  ;;  %v1342_v45 = vpop.f32.mrb[68].mxu1 }
 0x19e   :  { %v1649_v46 = vmul.f32 %v3911_v63, %v989_v44  ;;  %v1651_v47 = vmul.f32 %v3913_v0, %v1342_v45  ;;  %v991_v48 = vpop.f32.mrb[69].mxu0  ;;  %v1344_v49 = vpop.f32.mrb[69].mxu1 }
 0x19f   :  { %2881 = vst [vmem:[%s4854_s4 + $0x210] sm:$0xff] %v3269_v42  ;;  %2882 = vst [vmem:[%s4854_s4 + $0x218] sm:$0xff] %v3270_v43  ;;  %v1650_v50 = vmul.f32 %v3915_v1, %v991_v48  ;;  %v1652_v51 = vmul.f32 %v3917_v2, %v1344_v49  ;;  %v993_v52 = vpop.f32.mrb[70].mxu0  ;;  %v1346_v53 = vpop.f32.mrb[70].mxu1 }
 0x1a0   :  { %v1927_v54 = vadd.f32 %v3919_v3, %v1649_v46  ;;  %v1929_v55 = vadd.f32 %v3921_v4, %v1651_v47  ;;  %v1653_v56 = vmul.f32 %v3911_v63, %v993_v52  ;;  %v1655_v57 = vmul.f32 %v3913_v0, %v1346_v53  ;;  %v995_v58 = vpop.f32.mrb[71].mxu0  ;;  %v1348_v59 = vpop.f32.mrb[71].mxu1 }
 0x1a1   :  { %v1928_v60 = vadd.f32 %v3923_v7, %v1650_v50  ;;  %v1930_v61 = vadd.f32 %v3925_v8, %v1652_v51  ;;  %v1654_v62 = vmul.f32 %v3915_v1, %v995_v58  ;;  %v1656_v5 = vmul.f32 %v3917_v2, %v1348_v59 }
 0x1a2   :  { %v1931_v6 = vadd.f32 %v3919_v3, %v1653_v56  ;;  %v1933_v9 = vadd.f32 %v3921_v4, %v1655_v57 }
 0x1a3   :  { %v3271_v10 = vpack.c.bf16 %v1928_v60, %v1927_v54  ;;  %v3272_v11 = vpack.c.bf16 %v1930_v61, %v1929_v55  ;;  %v1932_v12 = vadd.f32 %v3923_v7, %v1654_v62  ;;  %v1934_v13 = vadd.f32 %v3925_v8, %v1656_v5 }
 0x1a5   :  { %2883 = vst [vmem:[%s4854_s4 + $0x220] sm:$0xff] %v3271_v10  ;;  %2884 = vst [vmem:[%s4854_s4 + $0x228] sm:$0xff] %v3272_v11  ;;  %v3273_v14 = vpack.c.bf16 %v1932_v12, %v1931_v6  ;;  %v3274_v15 = vpack.c.bf16 %v1934_v13, %v1933_v9  ;;  %v999_v16 = vpop.f32.mrb[72].mxu0  ;;  %v1352_v17 = vpop.f32.mrb[72].mxu1 }
 0x1a6   :  { %v1657_v18 = vmul.f32 %v3911_v63, %v999_v16  ;;  %v1659_v19 = vmul.f32 %v3913_v0, %v1352_v17  ;;  %v1001_v20 = vpop.f32.mrb[73].mxu0  ;;  %v1354_v21 = vpop.f32.mrb[73].mxu1 }
 0x1a7   :  { %2885 = vst [vmem:[%s4854_s4 + $0x230] sm:$0xff] %v3273_v14  ;;  %2886 = vst [vmem:[%s4854_s4 + $0x238] sm:$0xff] %v3274_v15  ;;  %v1658_v22 = vmul.f32 %v3915_v1, %v1001_v20  ;;  %v1660_v23 = vmul.f32 %v3917_v2, %v1354_v21  ;;  %v1003_v24 = vpop.f32.mrb[74].mxu0  ;;  %v1356_v25 = vpop.f32.mrb[74].mxu1 }
 0x1a8   :  { %v1935_v26 = vadd.f32 %v3919_v3, %v1657_v18  ;;  %v1937_v27 = vadd.f32 %v3921_v4, %v1659_v19  ;;  %v1661_v28 = vmul.f32 %v3911_v63, %v1003_v24  ;;  %v1663_v29 = vmul.f32 %v3913_v0, %v1356_v25  ;;  %v1005_v30 = vpop.f32.mrb[75].mxu0  ;;  %v1358_v31 = vpop.f32.mrb[75].mxu1 }
 0x1a9   :  { %v1936_v32 = vadd.f32 %v3923_v7, %v1658_v22  ;;  %v1938_v33 = vadd.f32 %v3925_v8, %v1660_v23  ;;  %v1662_v34 = vmul.f32 %v3915_v1, %v1005_v30  ;;  %v1664_v35 = vmul.f32 %v3917_v2, %v1358_v31 }
 0x1aa   :  { %v1939_v36 = vadd.f32 %v3919_v3, %v1661_v28  ;;  %v1941_v37 = vadd.f32 %v3921_v4, %v1663_v29 }
 0x1ab   :  { %v3275_v38 = vpack.c.bf16 %v1936_v32, %v1935_v26  ;;  %v3276_v39 = vpack.c.bf16 %v1938_v33, %v1937_v27  ;;  %v1940_v40 = vadd.f32 %v3923_v7, %v1662_v34  ;;  %v1942_v41 = vadd.f32 %v3925_v8, %v1664_v35 }
 0x1ad   :  { %2887 = vst [vmem:[%s4854_s4 + $0x240] sm:$0xff] %v3275_v38  ;;  %2888 = vst [vmem:[%s4854_s4 + $0x248] sm:$0xff] %v3276_v39  ;;  %v3277_v42 = vpack.c.bf16 %v1940_v40, %v1939_v36  ;;  %v3278_v43 = vpack.c.bf16 %v1942_v41, %v1941_v37  ;;  %v1009_v44 = vpop.f32.mrb[76].mxu0  ;;  %v1362_v45 = vpop.f32.mrb[76].mxu1 }
 0x1ae   :  { %v1665_v46 = vmul.f32 %v3911_v63, %v1009_v44  ;;  %v1667_v47 = vmul.f32 %v3913_v0, %v1362_v45  ;;  %v1011_v48 = vpop.f32.mrb[77].mxu0  ;;  %v1364_v49 = vpop.f32.mrb[77].mxu1 }
 0x1af   :  { %2889 = vst [vmem:[%s4854_s4 + $0x250] sm:$0xff] %v3277_v42  ;;  %2890 = vst [vmem:[%s4854_s4 + $0x258] sm:$0xff] %v3278_v43  ;;  %v1666_v50 = vmul.f32 %v3915_v1, %v1011_v48  ;;  %v1668_v51 = vmul.f32 %v3917_v2, %v1364_v49  ;;  %v1013_v52 = vpop.f32.mrb[78].mxu0  ;;  %v1366_v53 = vpop.f32.mrb[78].mxu1 }
 0x1b0   :  { %v1943_v54 = vadd.f32 %v3919_v3, %v1665_v46  ;;  %v1945_v55 = vadd.f32 %v3921_v4, %v1667_v47  ;;  %v1669_v56 = vmul.f32 %v3911_v63, %v1013_v52  ;;  %v1671_v57 = vmul.f32 %v3913_v0, %v1366_v53  ;;  %v1015_v58 = vpop.f32.mrb[79].mxu0  ;;  %v1368_v59 = vpop.f32.mrb[79].mxu1 }
 0x1b1   :  { %v1944_v60 = vadd.f32 %v3923_v7, %v1666_v50  ;;  %v1946_v61 = vadd.f32 %v3925_v8, %v1668_v51  ;;  %v1670_v62 = vmul.f32 %v3915_v1, %v1015_v58  ;;  %v1672_v5 = vmul.f32 %v3917_v2, %v1368_v59 }
 0x1b2   :  { %v1947_v6 = vadd.f32 %v3919_v3, %v1669_v56  ;;  %v1949_v9 = vadd.f32 %v3921_v4, %v1671_v57 }
 0x1b3   :  { %v3279_v10 = vpack.c.bf16 %v1944_v60, %v1943_v54  ;;  %v3280_v11 = vpack.c.bf16 %v1946_v61, %v1945_v55  ;;  %v1948_v12 = vadd.f32 %v3923_v7, %v1670_v62  ;;  %v1950_v13 = vadd.f32 %v3925_v8, %v1672_v5 }
 0x1b5   :  { %2891 = vst [vmem:[%s4854_s4 + $0x260] sm:$0xff] %v3279_v10  ;;  %2892 = vst [vmem:[%s4854_s4 + $0x268] sm:$0xff] %v3280_v11  ;;  %v3281_v14 = vpack.c.bf16 %v1948_v12, %v1947_v6  ;;  %v3282_v15 = vpack.c.bf16 %v1950_v13, %v1949_v9  ;;  %v1019_v16 = vpop.f32.mrb[80].mxu0  ;;  %v1372_v17 = vpop.f32.mrb[80].mxu1 }
 0x1b6   :  { %v1673_v18 = vmul.f32 %v3911_v63, %v1019_v16  ;;  %v1675_v19 = vmul.f32 %v3913_v0, %v1372_v17  ;;  %v1021_v20 = vpop.f32.mrb[81].mxu0  ;;  %v1374_v21 = vpop.f32.mrb[81].mxu1 }
 0x1b7   :  { %2893 = vst [vmem:[%s4854_s4 + $0x270] sm:$0xff] %v3281_v14  ;;  %2894 = vst [vmem:[%s4854_s4 + $0x278] sm:$0xff] %v3282_v15  ;;  %v1674_v22 = vmul.f32 %v3915_v1, %v1021_v20  ;;  %v1676_v23 = vmul.f32 %v3917_v2, %v1374_v21  ;;  %v1023_v24 = vpop.f32.mrb[82].mxu0  ;;  %v1376_v25 = vpop.f32.mrb[82].mxu1 }
 0x1b8   :  { %v1951_v26 = vadd.f32 %v3919_v3, %v1673_v18  ;;  %v1953_v27 = vadd.f32 %v3921_v4, %v1675_v19  ;;  %v1677_v28 = vmul.f32 %v3911_v63, %v1023_v24  ;;  %v1679_v29 = vmul.f32 %v3913_v0, %v1376_v25  ;;  %v1025_v30 = vpop.f32.mrb[83].mxu0  ;;  %v1378_v31 = vpop.f32.mrb[83].mxu1 }
 0x1b9   :  { %v1952_v32 = vadd.f32 %v3923_v7, %v1674_v22  ;;  %v1954_v33 = vadd.f32 %v3925_v8, %v1676_v23  ;;  %v1678_v34 = vmul.f32 %v3915_v1, %v1025_v30  ;;  %v1680_v35 = vmul.f32 %v3917_v2, %v1378_v31 }
 0x1ba   :  { %v1955_v36 = vadd.f32 %v3919_v3, %v1677_v28  ;;  %v1957_v37 = vadd.f32 %v3921_v4, %v1679_v29 }
 0x1bb   :  { %v3283_v38 = vpack.c.bf16 %v1952_v32, %v1951_v26  ;;  %v3284_v39 = vpack.c.bf16 %v1954_v33, %v1953_v27  ;;  %v1956_v40 = vadd.f32 %v3923_v7, %v1678_v34  ;;  %v1958_v41 = vadd.f32 %v3925_v8, %v1680_v35 }
 0x1bd   :  { %2895 = vst [vmem:[%s4854_s4 + $0x280] sm:$0xff] %v3283_v38  ;;  %2896 = vst [vmem:[%s4854_s4 + $0x288] sm:$0xff] %v3284_v39  ;;  %v3285_v42 = vpack.c.bf16 %v1956_v40, %v1955_v36  ;;  %v3286_v43 = vpack.c.bf16 %v1958_v41, %v1957_v37  ;;  %v1029_v44 = vpop.f32.mrb[84].mxu0  ;;  %v1382_v45 = vpop.f32.mrb[84].mxu1 }
 0x1be   :  { %v1681_v46 = vmul.f32 %v3911_v63, %v1029_v44  ;;  %v1683_v47 = vmul.f32 %v3913_v0, %v1382_v45  ;;  %v1031_v48 = vpop.f32.mrb[85].mxu0  ;;  %v1384_v49 = vpop.f32.mrb[85].mxu1 }
 0x1bf   :  { %2897 = vst [vmem:[%s4854_s4 + $0x290] sm:$0xff] %v3285_v42  ;;  %2898 = vst [vmem:[%s4854_s4 + $0x298] sm:$0xff] %v3286_v43  ;;  %v1682_v50 = vmul.f32 %v3915_v1, %v1031_v48  ;;  %v1684_v51 = vmul.f32 %v3917_v2, %v1384_v49  ;;  %v1033_v52 = vpop.f32.mrb[86].mxu0  ;;  %v1386_v53 = vpop.f32.mrb[86].mxu1 }
 0x1c0   :  { %v1959_v54 = vadd.f32 %v3919_v3, %v1681_v46  ;;  %v1961_v55 = vadd.f32 %v3921_v4, %v1683_v47  ;;  %v1685_v56 = vmul.f32 %v3911_v63, %v1033_v52  ;;  %v1687_v57 = vmul.f32 %v3913_v0, %v1386_v53  ;;  %v1035_v58 = vpop.f32.mrb[87].mxu0  ;;  %v1388_v59 = vpop.f32.mrb[87].mxu1 }
 0x1c1   :  { %v1960_v60 = vadd.f32 %v3923_v7, %v1682_v50  ;;  %v1962_v61 = vadd.f32 %v3925_v8, %v1684_v51  ;;  %v1686_v62 = vmul.f32 %v3915_v1, %v1035_v58  ;;  %v1688_v5 = vmul.f32 %v3917_v2, %v1388_v59 }
 0x1c2   :  { %v1963_v6 = vadd.f32 %v3919_v3, %v1685_v56  ;;  %v1965_v9 = vadd.f32 %v3921_v4, %v1687_v57 }
 0x1c3   :  { %v3287_v10 = vpack.c.bf16 %v1960_v60, %v1959_v54  ;;  %v3288_v11 = vpack.c.bf16 %v1962_v61, %v1961_v55  ;;  %v1964_v12 = vadd.f32 %v3923_v7, %v1686_v62  ;;  %v1966_v13 = vadd.f32 %v3925_v8, %v1688_v5 }
 0x1c5   :  { %2899 = vst [vmem:[%s4854_s4 + $0x2a0] sm:$0xff] %v3287_v10  ;;  %2900 = vst [vmem:[%s4854_s4 + $0x2a8] sm:$0xff] %v3288_v11  ;;  %v3289_v14 = vpack.c.bf16 %v1964_v12, %v1963_v6  ;;  %v3290_v15 = vpack.c.bf16 %v1966_v13, %v1965_v9  ;;  %v1039_v16 = vpop.f32.mrb[88].mxu0  ;;  %v1392_v17 = vpop.f32.mrb[88].mxu1 }
 0x1c6   :  { %v1689_v18 = vmul.f32 %v3911_v63, %v1039_v16  ;;  %v1691_v19 = vmul.f32 %v3913_v0, %v1392_v17  ;;  %v1041_v20 = vpop.f32.mrb[89].mxu0  ;;  %v1394_v21 = vpop.f32.mrb[89].mxu1 }
 0x1c7   :  { %2901 = vst [vmem:[%s4854_s4 + $0x2b0] sm:$0xff] %v3289_v14  ;;  %2902 = vst [vmem:[%s4854_s4 + $0x2b8] sm:$0xff] %v3290_v15  ;;  %v1690_v22 = vmul.f32 %v3915_v1, %v1041_v20  ;;  %v1692_v23 = vmul.f32 %v3917_v2, %v1394_v21  ;;  %v1043_v24 = vpop.f32.mrb[90].mxu0  ;;  %v1396_v25 = vpop.f32.mrb[90].mxu1 }
 0x1c8   :  { %v1967_v26 = vadd.f32 %v3919_v3, %v1689_v18  ;;  %v1969_v27 = vadd.f32 %v3921_v4, %v1691_v19  ;;  %v1693_v28 = vmul.f32 %v3911_v63, %v1043_v24  ;;  %v1695_v29 = vmul.f32 %v3913_v0, %v1396_v25  ;;  %v1045_v30 = vpop.f32.mrb[91].mxu0  ;;  %v1398_v31 = vpop.f32.mrb[91].mxu1 }
 0x1c9   :  { %v1968_v32 = vadd.f32 %v3923_v7, %v1690_v22  ;;  %v1970_v33 = vadd.f32 %v3925_v8, %v1692_v23  ;;  %v1694_v34 = vmul.f32 %v3915_v1, %v1045_v30  ;;  %v1696_v35 = vmul.f32 %v3917_v2, %v1398_v31 }
 0x1ca   :  { %v1971_v36 = vadd.f32 %v3919_v3, %v1693_v28  ;;  %v1973_v37 = vadd.f32 %v3921_v4, %v1695_v29 }
 0x1cb   :  { %v3291_v38 = vpack.c.bf16 %v1968_v32, %v1967_v26  ;;  %v3292_v39 = vpack.c.bf16 %v1970_v33, %v1969_v27  ;;  %v1972_v40 = vadd.f32 %v3923_v7, %v1694_v34  ;;  %v1974_v41 = vadd.f32 %v3925_v8, %v1696_v35 }
 0x1cd   :  { %2903 = vst [vmem:[%s4854_s4 + $0x2c0] sm:$0xff] %v3291_v38  ;;  %2904 = vst [vmem:[%s4854_s4 + $0x2c8] sm:$0xff] %v3292_v39  ;;  %v3293_v42 = vpack.c.bf16 %v1972_v40, %v1971_v36  ;;  %v3294_v43 = vpack.c.bf16 %v1974_v41, %v1973_v37  ;;  %v1049_v44 = vpop.f32.mrb[92].mxu0  ;;  %v1402_v45 = vpop.f32.mrb[92].mxu1 }
 0x1ce   :  { %v1697_v46 = vmul.f32 %v3911_v63, %v1049_v44  ;;  %v1699_v47 = vmul.f32 %v3913_v0, %v1402_v45  ;;  %v1051_v48 = vpop.f32.mrb[93].mxu0  ;;  %v1404_v49 = vpop.f32.mrb[93].mxu1 }
 0x1cf   :  { %2905 = vst [vmem:[%s4854_s4 + $0x2d0] sm:$0xff] %v3293_v42  ;;  %2906 = vst [vmem:[%s4854_s4 + $0x2d8] sm:$0xff] %v3294_v43  ;;  %v1698_v50 = vmul.f32 %v3915_v1, %v1051_v48  ;;  %v1700_v51 = vmul.f32 %v3917_v2, %v1404_v49  ;;  %v1053_v52 = vpop.f32.mrb[94].mxu0  ;;  %v1406_v53 = vpop.f32.mrb[94].mxu1 }
 0x1d0   :  { %v1975_v54 = vadd.f32 %v3919_v3, %v1697_v46  ;;  %v1977_v55 = vadd.f32 %v3921_v4, %v1699_v47  ;;  %v1701_v56 = vmul.f32 %v3911_v63, %v1053_v52  ;;  %v1703_v57 = vmul.f32 %v3913_v0, %v1406_v53  ;;  %v1055_v58 = vpop.f32.mrb[95].mxu0  ;;  %v1408_v59 = vpop.f32.mrb[95].mxu1 }
 0x1d1   :  { %v1976_v60 = vadd.f32 %v3923_v7, %v1698_v50  ;;  %v1978_v61 = vadd.f32 %v3925_v8, %v1700_v51  ;;  %v1702_v62 = vmul.f32 %v3915_v1, %v1055_v58  ;;  %v1704_v5 = vmul.f32 %v3917_v2, %v1408_v59 }
 0x1d2   :  { %v1979_v6 = vadd.f32 %v3919_v3, %v1701_v56  ;;  %v1981_v9 = vadd.f32 %v3921_v4, %v1703_v57 }
 0x1d3   :  { %v3295_v10 = vpack.c.bf16 %v1976_v60, %v1975_v54  ;;  %v3296_v11 = vpack.c.bf16 %v1978_v61, %v1977_v55  ;;  %v1980_v12 = vadd.f32 %v3923_v7, %v1702_v62  ;;  %v1982_v13 = vadd.f32 %v3925_v8, %v1704_v5 }
 0x1d5   :  { %2907 = vst [vmem:[%s4854_s4 + $0x2e0] sm:$0xff] %v3295_v10  ;;  %2908 = vst [vmem:[%s4854_s4 + $0x2e8] sm:$0xff] %v3296_v11  ;;  %v3297_v14 = vpack.c.bf16 %v1980_v12, %v1979_v6  ;;  %v3298_v15 = vpack.c.bf16 %v1982_v13, %v1981_v9  ;;  %v1059_v16 = vpop.f32.mrb[96].mxu0  ;;  %v1412_v17 = vpop.f32.mrb[96].mxu1 }
 0x1d6   :  { %v1705_v18 = vmul.f32 %v3911_v63, %v1059_v16  ;;  %v1707_v19 = vmul.f32 %v3913_v0, %v1412_v17  ;;  %v1061_v20 = vpop.f32.mrb[97].mxu0  ;;  %v1414_v21 = vpop.f32.mrb[97].mxu1 }
 0x1d7   :  { %2909 = vst [vmem:[%s4854_s4 + $0x2f0] sm:$0xff] %v3297_v14  ;;  %2910 = vst [vmem:[%s4854_s4 + $0x2f8] sm:$0xff] %v3298_v15  ;;  %v1706_v22 = vmul.f32 %v3915_v1, %v1061_v20  ;;  %v1708_v23 = vmul.f32 %v3917_v2, %v1414_v21  ;;  %v1063_v24 = vpop.f32.mrb[98].mxu0  ;;  %v1416_v25 = vpop.f32.mrb[98].mxu1 }
 0x1d8   :  { %v1983_v26 = vadd.f32 %v3919_v3, %v1705_v18  ;;  %v1985_v27 = vadd.f32 %v3921_v4, %v1707_v19  ;;  %v1709_v28 = vmul.f32 %v3911_v63, %v1063_v24  ;;  %v1711_v29 = vmul.f32 %v3913_v0, %v1416_v25  ;;  %v1065_v30 = vpop.f32.mrb[99].mxu0  ;;  %v1418_v31 = vpop.f32.mrb[99].mxu1 }
 0x1d9   :  { %v1984_v32 = vadd.f32 %v3923_v7, %v1706_v22  ;;  %v1986_v33 = vadd.f32 %v3925_v8, %v1708_v23  ;;  %v1710_v34 = vmul.f32 %v3915_v1, %v1065_v30  ;;  %v1712_v35 = vmul.f32 %v3917_v2, %v1418_v31 }
 0x1da   :  { %v1987_v36 = vadd.f32 %v3919_v3, %v1709_v28  ;;  %v1989_v37 = vadd.f32 %v3921_v4, %v1711_v29 }
 0x1db   :  { %v3299_v38 = vpack.c.bf16 %v1984_v32, %v1983_v26  ;;  %v3300_v39 = vpack.c.bf16 %v1986_v33, %v1985_v27  ;;  %v1988_v40 = vadd.f32 %v3923_v7, %v1710_v34  ;;  %v1990_v41 = vadd.f32 %v3925_v8, %v1712_v35 }
 0x1dd   :  { %2911 = vst [vmem:[%s4854_s4 + $0x300] sm:$0xff] %v3299_v38  ;;  %2912 = vst [vmem:[%s4854_s4 + $0x308] sm:$0xff] %v3300_v39  ;;  %v3301_v42 = vpack.c.bf16 %v1988_v40, %v1987_v36  ;;  %v3302_v43 = vpack.c.bf16 %v1990_v41, %v1989_v37  ;;  %v1069_v44 = vpop.f32.mrb[100].mxu0  ;;  %v1422_v45 = vpop.f32.mrb[100].mxu1 }
 0x1de   :  { %v1713_v46 = vmul.f32 %v3911_v63, %v1069_v44  ;;  %v1715_v47 = vmul.f32 %v3913_v0, %v1422_v45  ;;  %v1071_v48 = vpop.f32.mrb[101].mxu0  ;;  %v1424_v49 = vpop.f32.mrb[101].mxu1 }
 0x1df   :  { %2913 = vst [vmem:[%s4854_s4 + $0x310] sm:$0xff] %v3301_v42  ;;  %2914 = vst [vmem:[%s4854_s4 + $0x318] sm:$0xff] %v3302_v43  ;;  %v1714_v50 = vmul.f32 %v3915_v1, %v1071_v48  ;;  %v1716_v51 = vmul.f32 %v3917_v2, %v1424_v49  ;;  %v1073_v52 = vpop.f32.mrb[102].mxu0  ;;  %v1426_v53 = vpop.f32.mrb[102].mxu1 }
 0x1e0   :  { %v1991_v54 = vadd.f32 %v3919_v3, %v1713_v46  ;;  %v1993_v55 = vadd.f32 %v3921_v4, %v1715_v47  ;;  %v1717_v56 = vmul.f32 %v3911_v63, %v1073_v52  ;;  %v1719_v57 = vmul.f32 %v3913_v0, %v1426_v53  ;;  %v1075_v58 = vpop.f32.mrb[103].mxu0  ;;  %v1428_v59 = vpop.f32.mrb[103].mxu1 }
 0x1e1   :  { %v1992_v60 = vadd.f32 %v3923_v7, %v1714_v50  ;;  %v1994_v61 = vadd.f32 %v3925_v8, %v1716_v51  ;;  %v1718_v62 = vmul.f32 %v3915_v1, %v1075_v58  ;;  %v1720_v5 = vmul.f32 %v3917_v2, %v1428_v59 }
 0x1e2   :  { %v1995_v6 = vadd.f32 %v3919_v3, %v1717_v56  ;;  %v1997_v9 = vadd.f32 %v3921_v4, %v1719_v57 }
 0x1e3   :  { %v3303_v10 = vpack.c.bf16 %v1992_v60, %v1991_v54  ;;  %v3304_v11 = vpack.c.bf16 %v1994_v61, %v1993_v55  ;;  %v1996_v12 = vadd.f32 %v3923_v7, %v1718_v62  ;;  %v1998_v13 = vadd.f32 %v3925_v8, %v1720_v5 }
 0x1e5   :  { %2915 = vst [vmem:[%s4854_s4 + $0x320] sm:$0xff] %v3303_v10  ;;  %2916 = vst [vmem:[%s4854_s4 + $0x328] sm:$0xff] %v3304_v11  ;;  %v3305_v14 = vpack.c.bf16 %v1996_v12, %v1995_v6  ;;  %v3306_v15 = vpack.c.bf16 %v1998_v13, %v1997_v9  ;;  %v1079_v16 = vpop.f32.mrb[104].mxu0  ;;  %v1432_v17 = vpop.f32.mrb[104].mxu1 }
 0x1e6   :  { %v1721_v18 = vmul.f32 %v3911_v63, %v1079_v16  ;;  %v1723_v19 = vmul.f32 %v3913_v0, %v1432_v17  ;;  %v1081_v20 = vpop.f32.mrb[105].mxu0  ;;  %v1434_v21 = vpop.f32.mrb[105].mxu1 }
 0x1e7   :  { %2917 = vst [vmem:[%s4854_s4 + $0x330] sm:$0xff] %v3305_v14  ;;  %2918 = vst [vmem:[%s4854_s4 + $0x338] sm:$0xff] %v3306_v15  ;;  %v1722_v22 = vmul.f32 %v3915_v1, %v1081_v20  ;;  %v1724_v23 = vmul.f32 %v3917_v2, %v1434_v21  ;;  %v1083_v24 = vpop.f32.mrb[106].mxu0  ;;  %v1436_v25 = vpop.f32.mrb[106].mxu1 }
 0x1e8   :  { %v1999_v26 = vadd.f32 %v3919_v3, %v1721_v18  ;;  %v2001_v27 = vadd.f32 %v3921_v4, %v1723_v19  ;;  %v1725_v28 = vmul.f32 %v3911_v63, %v1083_v24  ;;  %v1727_v29 = vmul.f32 %v3913_v0, %v1436_v25  ;;  %v1085_v30 = vpop.f32.mrb[107].mxu0  ;;  %v1438_v31 = vpop.f32.mrb[107].mxu1 }
 0x1e9   :  { %v2000_v32 = vadd.f32 %v3923_v7, %v1722_v22  ;;  %v2002_v33 = vadd.f32 %v3925_v8, %v1724_v23  ;;  %v1726_v34 = vmul.f32 %v3915_v1, %v1085_v30  ;;  %v1728_v35 = vmul.f32 %v3917_v2, %v1438_v31 }
 0x1ea   :  { %v2003_v36 = vadd.f32 %v3919_v3, %v1725_v28  ;;  %v2005_v37 = vadd.f32 %v3921_v4, %v1727_v29 }
 0x1eb   :  { %v3307_v38 = vpack.c.bf16 %v2000_v32, %v1999_v26  ;;  %v3308_v39 = vpack.c.bf16 %v2002_v33, %v2001_v27  ;;  %v2004_v40 = vadd.f32 %v3923_v7, %v1726_v34  ;;  %v2006_v41 = vadd.f32 %v3925_v8, %v1728_v35 }
 0x1ed   :  { %2919 = vst [vmem:[%s4854_s4 + $0x340] sm:$0xff] %v3307_v38  ;;  %2920 = vst [vmem:[%s4854_s4 + $0x348] sm:$0xff] %v3308_v39  ;;  %v3309_v42 = vpack.c.bf16 %v2004_v40, %v2003_v36  ;;  %v3310_v43 = vpack.c.bf16 %v2006_v41, %v2005_v37  ;;  %v1089_v44 = vpop.f32.mrb[108].mxu0  ;;  %v1442_v45 = vpop.f32.mrb[108].mxu1 }
 0x1ee   :  { %v1729_v46 = vmul.f32 %v3911_v63, %v1089_v44  ;;  %v1731_v47 = vmul.f32 %v3913_v0, %v1442_v45  ;;  %v1091_v48 = vpop.f32.mrb[109].mxu0  ;;  %v1444_v49 = vpop.f32.mrb[109].mxu1 }
 0x1ef   :  { %2921 = vst [vmem:[%s4854_s4 + $0x350] sm:$0xff] %v3309_v42  ;;  %2922 = vst [vmem:[%s4854_s4 + $0x358] sm:$0xff] %v3310_v43  ;;  %v1730_v50 = vmul.f32 %v3915_v1, %v1091_v48  ;;  %v1732_v51 = vmul.f32 %v3917_v2, %v1444_v49  ;;  %v1093_v52 = vpop.f32.mrb[110].mxu0  ;;  %v1446_v53 = vpop.f32.mrb[110].mxu1 }
 0x1f0   :  { %v2007_v54 = vadd.f32 %v3919_v3, %v1729_v46  ;;  %v2009_v55 = vadd.f32 %v3921_v4, %v1731_v47  ;;  %v1733_v56 = vmul.f32 %v3911_v63, %v1093_v52  ;;  %v1735_v57 = vmul.f32 %v3913_v0, %v1446_v53  ;;  %v1095_v58 = vpop.f32.mrb[111].mxu0  ;;  %v1448_v59 = vpop.f32.mrb[111].mxu1 }
 0x1f1   :  { %v2008_v60 = vadd.f32 %v3923_v7, %v1730_v50  ;;  %v2010_v61 = vadd.f32 %v3925_v8, %v1732_v51  ;;  %v1734_v62 = vmul.f32 %v3915_v1, %v1095_v58  ;;  %v1736_v5 = vmul.f32 %v3917_v2, %v1448_v59 }
 0x1f2   :  { %v2011_v6 = vadd.f32 %v3919_v3, %v1733_v56  ;;  %v2013_v9 = vadd.f32 %v3921_v4, %v1735_v57 }
 0x1f3   :  { %v3311_v10 = vpack.c.bf16 %v2008_v60, %v2007_v54  ;;  %v3312_v11 = vpack.c.bf16 %v2010_v61, %v2009_v55  ;;  %v2012_v12 = vadd.f32 %v3923_v7, %v1734_v62  ;;  %v2014_v13 = vadd.f32 %v3925_v8, %v1736_v5 }
 0x1f5   :  { %2923 = vst [vmem:[%s4854_s4 + $0x360] sm:$0xff] %v3311_v10  ;;  %2924 = vst [vmem:[%s4854_s4 + $0x368] sm:$0xff] %v3312_v11  ;;  %v3313_v14 = vpack.c.bf16 %v2012_v12, %v2011_v6  ;;  %v3314_v15 = vpack.c.bf16 %v2014_v13, %v2013_v9  ;;  %v1099_v16 = vpop.f32.mrb[112].mxu0  ;;  %v1452_v17 = vpop.f32.mrb[112].mxu1 }
 0x1f6   :  { %v1737_v18 = vmul.f32 %v3911_v63, %v1099_v16  ;;  %v1739_v19 = vmul.f32 %v3913_v0, %v1452_v17  ;;  %v1101_v20 = vpop.f32.mrb[113].mxu0  ;;  %v1454_v21 = vpop.f32.mrb[113].mxu1 }
 0x1f7   :  { %2925 = vst [vmem:[%s4854_s4 + $0x370] sm:$0xff] %v3313_v14  ;;  %2926 = vst [vmem:[%s4854_s4 + $0x378] sm:$0xff] %v3314_v15  ;;  %v1738_v22 = vmul.f32 %v3915_v1, %v1101_v20  ;;  %v1740_v23 = vmul.f32 %v3917_v2, %v1454_v21  ;;  %v1103_v24 = vpop.f32.mrb[114].mxu0  ;;  %v1456_v25 = vpop.f32.mrb[114].mxu1 }
 0x1f8   :  { %v2015_v26 = vadd.f32 %v3919_v3, %v1737_v18  ;;  %v2017_v27 = vadd.f32 %v3921_v4, %v1739_v19  ;;  %v1741_v28 = vmul.f32 %v3911_v63, %v1103_v24  ;;  %v1743_v29 = vmul.f32 %v3913_v0, %v1456_v25  ;;  %v1105_v30 = vpop.f32.mrb[115].mxu0  ;;  %v1458_v31 = vpop.f32.mrb[115].mxu1 }
 0x1f9   :  { %v2016_v32 = vadd.f32 %v3923_v7, %v1738_v22  ;;  %v2018_v33 = vadd.f32 %v3925_v8, %v1740_v23  ;;  %v1742_v34 = vmul.f32 %v3915_v1, %v1105_v30  ;;  %v1744_v35 = vmul.f32 %v3917_v2, %v1458_v31 }
 0x1fa   :  { %v2019_v36 = vadd.f32 %v3919_v3, %v1741_v28  ;;  %v2021_v37 = vadd.f32 %v3921_v4, %v1743_v29 }
 0x1fb   :  { %v3315_v38 = vpack.c.bf16 %v2016_v32, %v2015_v26  ;;  %v3316_v39 = vpack.c.bf16 %v2018_v33, %v2017_v27  ;;  %v2020_v40 = vadd.f32 %v3923_v7, %v1742_v34  ;;  %v2022_v41 = vadd.f32 %v3925_v8, %v1744_v35 }
 0x1fd   :  { %2927 = vst [vmem:[%s4854_s4 + $0x380] sm:$0xff] %v3315_v38  ;;  %2928 = vst [vmem:[%s4854_s4 + $0x388] sm:$0xff] %v3316_v39  ;;  %v3317_v42 = vpack.c.bf16 %v2020_v40, %v2019_v36  ;;  %v3318_v43 = vpack.c.bf16 %v2022_v41, %v2021_v37  ;;  %v1109_v44 = vpop.f32.mrb[116].mxu0  ;;  %v1462_v45 = vpop.f32.mrb[116].mxu1 }
 0x1fe   :  { %v1745_v46 = vmul.f32 %v3911_v63, %v1109_v44  ;;  %v1747_v47 = vmul.f32 %v3913_v0, %v1462_v45  ;;  %v1111_v48 = vpop.f32.mrb[117].mxu0  ;;  %v1464_v49 = vpop.f32.mrb[117].mxu1 }
 0x1ff   :  { %2929 = vst [vmem:[%s4854_s4 + $0x390] sm:$0xff] %v3317_v42  ;;  %2930 = vst [vmem:[%s4854_s4 + $0x398] sm:$0xff] %v3318_v43  ;;  %v1746_v50 = vmul.f32 %v3915_v1, %v1111_v48  ;;  %v1748_v51 = vmul.f32 %v3917_v2, %v1464_v49  ;;  %v1113_v52 = vpop.f32.mrb[118].mxu0  ;;  %v1466_v53 = vpop.f32.mrb[118].mxu1 }
 0x200   :  { %v2023_v54 = vadd.f32 %v3919_v3, %v1745_v46  ;;  %v2025_v55 = vadd.f32 %v3921_v4, %v1747_v47  ;;  %v1749_v56 = vmul.f32 %v3911_v63, %v1113_v52  ;;  %v1751_v57 = vmul.f32 %v3913_v0, %v1466_v53  ;;  %v1115_v58 = vpop.f32.mrb[119].mxu0  ;;  %v1468_v59 = vpop.f32.mrb[119].mxu1 }
 0x201   :  { %v2024_v60 = vadd.f32 %v3923_v7, %v1746_v50  ;;  %v2026_v61 = vadd.f32 %v3925_v8, %v1748_v51  ;;  %v1750_v62 = vmul.f32 %v3915_v1, %v1115_v58  ;;  %v1752_v5 = vmul.f32 %v3917_v2, %v1468_v59 }
 0x202   :  { %v2027_v6 = vadd.f32 %v3919_v3, %v1749_v56  ;;  %v2029_v9 = vadd.f32 %v3921_v4, %v1751_v57 }
 0x203   :  { %v3319_v10 = vpack.c.bf16 %v2024_v60, %v2023_v54  ;;  %v3320_v11 = vpack.c.bf16 %v2026_v61, %v2025_v55  ;;  %v2028_v12 = vadd.f32 %v3923_v7, %v1750_v62  ;;  %v2030_v13 = vadd.f32 %v3925_v8, %v1752_v5 }
 0x205   :  { %2931 = vst [vmem:[%s4854_s4 + $0x3a0] sm:$0xff] %v3319_v10  ;;  %2932 = vst [vmem:[%s4854_s4 + $0x3a8] sm:$0xff] %v3320_v11  ;;  %v3321_v14 = vpack.c.bf16 %v2028_v12, %v2027_v6  ;;  %v3322_v15 = vpack.c.bf16 %v2030_v13, %v2029_v9  ;;  %v1119_v16 = vpop.f32.mrb[120].mxu0  ;;  %v1472_v17 = vpop.f32.mrb[120].mxu1 }
 0x206   :  { %v1753_v18 = vmul.f32 %v3911_v63, %v1119_v16  ;;  %v1755_v19 = vmul.f32 %v3913_v0, %v1472_v17  ;;  %v1121_v20 = vpop.f32.mrb[121].mxu0  ;;  %v1474_v21 = vpop.f32.mrb[121].mxu1 }
 0x207   :  { %2933 = vst [vmem:[%s4854_s4 + $0x3b0] sm:$0xff] %v3321_v14  ;;  %2934 = vst [vmem:[%s4854_s4 + $0x3b8] sm:$0xff] %v3322_v15  ;;  %v1754_v22 = vmul.f32 %v3915_v1, %v1121_v20  ;;  %v1756_v23 = vmul.f32 %v3917_v2, %v1474_v21  ;;  %v1123_v24 = vpop.f32.mrb[122].mxu0  ;;  %v1476_v25 = vpop.f32.mrb[122].mxu1 }
 0x208   :  { %v2031_v26 = vadd.f32 %v3919_v3, %v1753_v18  ;;  %v2033_v27 = vadd.f32 %v3921_v4, %v1755_v19  ;;  %v1757_v28 = vmul.f32 %v3911_v63, %v1123_v24  ;;  %v1759_v29 = vmul.f32 %v3913_v0, %v1476_v25  ;;  %v1125_v30 = vpop.f32.mrb[123].mxu0  ;;  %v1478_v31 = vpop.f32.mrb[123].mxu1 }
 0x209   :  { %v2032_v32 = vadd.f32 %v3923_v7, %v1754_v22  ;;  %v2034_v33 = vadd.f32 %v3925_v8, %v1756_v23  ;;  %v1758_v34 = vmul.f32 %v3915_v1, %v1125_v30  ;;  %v1760_v35 = vmul.f32 %v3917_v2, %v1478_v31 }
 0x20a   :  { %v2035_v36 = vadd.f32 %v3919_v3, %v1757_v28  ;;  %v2037_v37 = vadd.f32 %v3921_v4, %v1759_v29 }
 0x20b   :  { %v3323_v38 = vpack.c.bf16 %v2032_v32, %v2031_v26  ;;  %v3324_v39 = vpack.c.bf16 %v2034_v33, %v2033_v27  ;;  %v2036_v40 = vadd.f32 %v3923_v7, %v1758_v34  ;;  %v2038_v41 = vadd.f32 %v3925_v8, %v1760_v35 }
 0x20d   :  { %2935 = vst [vmem:[%s4854_s4 + $0x3c0] sm:$0xff] %v3323_v38  ;;  %2936 = vst [vmem:[%s4854_s4 + $0x3c8] sm:$0xff] %v3324_v39  ;;  %v3325_v42 = vpack.c.bf16 %v2036_v40, %v2035_v36  ;;  %v3326_v43 = vpack.c.bf16 %v2038_v41, %v2037_v37  ;;  %v1129_v44 = vpop.f32.mrb[124].mxu0  ;;  %v1482_v45 = vpop.f32.mrb[124].mxu1 }
 0x20e   :  { %v1761_v46 = vmul.f32 %v3911_v63, %v1129_v44  ;;  %v1763_v47 = vmul.f32 %v3913_v0, %v1482_v45  ;;  %v1131_v48 = vpop.f32.mrb[125].mxu0  ;;  %v1484_v49 = vpop.f32.mrb[125].mxu1 }
 0x20f   :  { %2937 = vst [vmem:[%s4854_s4 + $0x3d0] sm:$0xff] %v3325_v42  ;;  %2938 = vst [vmem:[%s4854_s4 + $0x3d8] sm:$0xff] %v3326_v43  ;;  %v1762_v50 = vmul.f32 %v3915_v1, %v1131_v48  ;;  %v1764_v51 = vmul.f32 %v3917_v2, %v1484_v49  ;;  %v1133_v52 = vpop.f32.mrb[126].mxu0  ;;  %v1486_v53 = vpop.f32.mrb[126].mxu1 }
 0x210   :  { %v2039_v54 = vadd.f32 %v3919_v3, %v1761_v46  ;;  %v2041_v55 = vadd.f32 %v3921_v4, %v1763_v47  ;;  %v1765_v56 = vmul.f32 %v3911_v63, %v1133_v52  ;;  %v1767_v57 = vmul.f32 %v3913_v0, %v1486_v53  ;;  %v1135_v58 = vpop.f32.mrb[127].mxu0  ;;  %v1488_v59 = vpop.f32.mrb[127].mxu1 }
 0x211   :  { %v2040_v60 = vadd.f32 %v3923_v7, %v1762_v50  ;;  %v2042_v61 = vadd.f32 %v3925_v8, %v1764_v51  ;;  %v1766_v62 = vmul.f32 %v3915_v1, %v1135_v58  ;;  %v1768_v5 = vmul.f32 %v3917_v2, %v1488_v59 }
 0x212   :  { %v2043_v6 = vadd.f32 %v3919_v3, %v1765_v56  ;;  %v2045_v9 = vadd.f32 %v3921_v4, %v1767_v57 }
 0x213   :  { %v3327_v10 = vpack.c.bf16 %v2040_v60, %v2039_v54  ;;  %v3328_v11 = vpack.c.bf16 %v2042_v61, %v2041_v55  ;;  %v2044_v63 = vadd.f32 %v3923_v7, %v1766_v62  ;;  %v2046_v0 = vadd.f32 %v3925_v8, %v1768_v5 }
 0x215   :  { %2939 = vst [vmem:[%s4854_s4 + $0x3e0] sm:$0xff] %v3327_v10  ;;  %2940 = vst [vmem:[%s4854_s4 + $0x3e8] sm:$0xff] %v3328_v11  ;;  %v3329_v1 = vpack.c.bf16 %v2044_v63, %v2043_v6  ;;  %v3330_v2 = vpack.c.bf16 %v2046_v0, %v2045_v9 }
 0x217   :  { %2941 = vst [vmem:[%s4854_s4 + $0x3f0] sm:$0xff] %v3329_v1  ;;  %2942 = vst [vmem:[%s4854_s4 + $0x3f8] sm:$0xff] %v3330_v2 }

// kernel: spotlight_detection_head.7
= control target key start
LH: loop header
LB: loop body
LE: loop exit
PB: predicated region body
PF: predicated region fallthrough
CT: control target
= control target key end

     0   :  { %s15981_s1 = inlined_call_operand.vmem [shape: bf16[2304,256], index: 1, kind: input, shape index: {}]   ;;  %s15982_s0 = inlined_call_operand.vmem [shape: bf16[512,2304], index: 0, kind: input, shape index: {}]   ;;  %s15983_s2 = inlined_call_operand.vmem [shape: f32[1,256], index: 2, kind: input, shape index: {}]   ;;  %s15984_s3 = inlined_call_operand.vmem [shape: f32[1,256], index: 3, kind: input, shape index: {}]   ;;  %s15985_s4 = inlined_call_operand.vmem [shape: bf16[512,256], index: 4, kind: output, shape index: {}]  }
   0x1   :  { %v11286_v0 = vld [vmem:[%s15981_s1 + $0x4] ss:$8 sps:$4 sm:$0xff]   ;;  %v11290_v2 = vld [vmem:[%s15981_s1] ss:$8 sps:$4 sm:$0xff]   ;;  %v11292_v4 = vld [vmem:[%s15981_s1 + $0x14] ss:$8 sps:$4 sm:$0xff]  }
   0x2   :  { %v11288_v1 = vld [vmem:[%s15981_s1 + $0x404] ss:$8 sps:$4 sm:$0xff]   ;;  %5201 = vmatprep.subr.bf16.mxu1 %v11286_v0  ;;  %v11291_v3 = vld [vmem:[%s15981_s1 + $0x400] ss:$8 sps:$4 sm:$0xff]   ;;  %v11294_v5 = vld [vmem:[%s15981_s1 + $0x414] ss:$8 sps:$4 sm:$0xff]  }
   0x3   :  { %6613 = vmatprep.subr.bf16.mxu0 %v11288_v1  ;;  %5202 = vmatpush1.bf16.msra.mxu1 %v11290_v2  ;;  %v11296_v6 = vld [vmem:[%s15981_s1 + $0x10] ss:$8 sps:$4 sm:$0xff]   ;;  %v11298_v8 = vld [vmem:[%s15981_s1 + $0x24] ss:$8 sps:$4 sm:$0xff]   ;;  %v11302_v10 = vld [vmem:[%s15981_s1 + $0x20] ss:$8 sps:$4 sm:$0xff]  }
   0x4   :  { %6614 = vmatpush1.bf16.msra.mxu0 %v11291_v3  ;;  %5203 = vmatprep.subr.bf16.mxu1 %v11292_v4  ;;  %v11297_v7 = vld [vmem:[%s15981_s1 + $0x410] ss:$8 sps:$4 sm:$0xff]   ;;  %v11300_v9 = vld [vmem:[%s15981_s1 + $0x424] ss:$8 sps:$4 sm:$0xff]   ;;  %v11303_v11 = vld [vmem:[%s15981_s1 + $0x420] ss:$8 sps:$4 sm:$0xff]  }
   0x5   :  { %6615 = vmatprep.subr.bf16.mxu0 %v11294_v5  ;;  %v11304_v12 = vld [vmem:[%s15981_s1 + $0x34] ss:$8 sps:$4 sm:$0xff]   ;;  %v11308_v14 = vld [vmem:[%s15981_s1 + $0x30] ss:$8 sps:$4 sm:$0xff]   ;;  %v11310_v16 = vld [vmem:[%s15981_s1 + $0x44] ss:$8 sps:$4 sm:$0xff]  }
   0x6   :  { %v11306_v13 = vld [vmem:[%s15981_s1 + $0x434] ss:$8 sps:$4 sm:$0xff]   ;;  %v11309_v15 = vld [vmem:[%s15981_s1 + $0x430] ss:$8 sps:$4 sm:$0xff]   ;;  %v11312_v17 = vld [vmem:[%s15981_s1 + $0x444] ss:$8 sps:$4 sm:$0xff]  }
   0x7   :  { %5204 = vmatpush1.bf16.msra.mxu1 %v11296_v6  ;;  %v11314_v18 = vld [vmem:[%s15981_s1 + $0x40] ss:$8 sps:$4 sm:$0xff]   ;;  %v11316_v20 = vld [vmem:[%s15981_s1 + $0x54] ss:$8 sps:$4 sm:$0xff]   ;;  %v11320_v22 = vld [vmem:[%s15981_s1 + $0x50] ss:$8 sps:$4 sm:$0xff]  }
   0x8   :  { %6616 = vmatpush1.bf16.msra.mxu0 %v11297_v7  ;;  %5205 = vmatprep.subr.bf16.mxu1 %v11298_v8  ;;  %v11315_v19 = vld [vmem:[%s15981_s1 + $0x440] ss:$8 sps:$4 sm:$0xff]   ;;  %v11318_v21 = vld [vmem:[%s15981_s1 + $0x454] ss:$8 sps:$4 sm:$0xff]   ;;  %v11321_v23 = vld [vmem:[%s15981_s1 + $0x450] ss:$8 sps:$4 sm:$0xff]  }
   0x9   :  { %6617 = vmatprep.subr.bf16.mxu0 %v11300_v9  ;;  %v11322_v24 = vld [vmem:[%s15981_s1 + $0x64] ss:$8 sps:$4 sm:$0xff]   ;;  %v11326_v26 = vld [vmem:[%s15981_s1 + $0x60] ss:$8 sps:$4 sm:$0xff]   ;;  %v11328_v28 = vld [vmem:[%s15981_s1 + $0x74] ss:$8 sps:$4 sm:$0xff]  }
   0xa   :  { %v11324_v25 = vld [vmem:[%s15981_s1 + $0x464] ss:$8 sps:$4 sm:$0xff]   ;;  %v11327_v27 = vld [vmem:[%s15981_s1 + $0x460] ss:$8 sps:$4 sm:$0xff]   ;;  %v11330_v29 = vld [vmem:[%s15981_s1 + $0x474] ss:$8 sps:$4 sm:$0xff]  }
   0xb   :  { %5206 = vmatpush1.bf16.msra.mxu1 %v11302_v10  ;;  %v11332_v30 = vld [vmem:[%s15981_s1 + $0x70] ss:$8 sps:$4 sm:$0xff]   ;;  %v11334_v32 = vld [vmem:[%s15981_s1 + $0x84] ss:$8 sps:$4 sm:$0xff]   ;;  %v11338_v34 = vld [vmem:[%s15981_s1 + $0x80] ss:$8 sps:$4 sm:$0xff]  }
   0xc   :  { %6618 = vmatpush1.bf16.msra.mxu0 %v11303_v11  ;;  %5207 = vmatprep.subr.bf16.mxu1 %v11304_v12  ;;  %v11333_v31 = vld [vmem:[%s15981_s1 + $0x470] ss:$8 sps:$4 sm:$0xff]   ;;  %v11336_v33 = vld [vmem:[%s15981_s1 + $0x484] ss:$8 sps:$4 sm:$0xff]   ;;  %v11339_v35 = vld [vmem:[%s15981_s1 + $0x480] ss:$8 sps:$4 sm:$0xff]  }
   0xd   :  { %6619 = vmatprep.subr.bf16.mxu0 %v11306_v13  ;;  %v11340_v36 = vld [vmem:[%s15981_s1 + $0x94] ss:$8 sps:$4 sm:$0xff]   ;;  %v11344_v38 = vld [vmem:[%s15981_s1 + $0x90] ss:$8 sps:$4 sm:$0xff]   ;;  %v11346_v40 = vld [vmem:[%s15981_s1 + $0xa4] ss:$8 sps:$4 sm:$0xff]  }
   0xe   :  { %v11342_v37 = vld [vmem:[%s15981_s1 + $0x494] ss:$8 sps:$4 sm:$0xff]   ;;  %v11345_v39 = vld [vmem:[%s15981_s1 + $0x490] ss:$8 sps:$4 sm:$0xff]   ;;  %v11348_v41 = vld [vmem:[%s15981_s1 + $0x4a4] ss:$8 sps:$4 sm:$0xff]  }
   0xf   :  { %5208 = vmatpush1.bf16.msra.mxu1 %v11308_v14  ;;  %v11350_v42 = vld [vmem:[%s15981_s1 + $0xa0] ss:$8 sps:$4 sm:$0xff]   ;;  %v11352_v44 = vld [vmem:[%s15981_s1 + $0xb4] ss:$8 sps:$4 sm:$0xff]   ;;  %v11356_v46 = vld [vmem:[%s15981_s1 + $0xb0] ss:$8 sps:$4 sm:$0xff]  }
  0x10   :  { %6620 = vmatpush1.bf16.msra.mxu0 %v11309_v15  ;;  %5209 = vmatprep.subr.bf16.mxu1 %v11310_v16  ;;  %v11351_v43 = vld [vmem:[%s15981_s1 + $0x4a0] ss:$8 sps:$4 sm:$0xff]   ;;  %v11354_v45 = vld [vmem:[%s15981_s1 + $0x4b4] ss:$8 sps:$4 sm:$0xff]   ;;  %v11357_v47 = vld [vmem:[%s15981_s1 + $0x4b0] ss:$8 sps:$4 sm:$0xff]  }
  0x11   :  { %6621 = vmatprep.subr.bf16.mxu0 %v11312_v17  ;;  %v11358_v48 = vld [vmem:[%s15981_s1 + $0xc4] ss:$8 sps:$4 sm:$0xff]   ;;  %v11362_v52 = vld [vmem:[%s15981_s1 + $0xc0] ss:$8 sps:$4 sm:$0xff]   ;;  %v11364_v54 = vld [vmem:[%s15981_s1 + $0xd4] ss:$8 sps:$4 sm:$0xff]  }
  0x12   :  { %v11384_v49 = vld [vmem:[%s15982_s0 + $0x4] ss:$72 sps:$4 sm:$0xff]   ;;  %v11363_v53 = vld [vmem:[%s15981_s1 + $0x4c0] ss:$8 sps:$4 sm:$0xff]   ;;  %v11366_v55 = vld [vmem:[%s15981_s1 + $0x4d4] ss:$8 sps:$4 sm:$0xff]  }
  0x13   :  { %5210 = vmatpush1.bf16.msra.mxu1 %v11314_v18  ;;  %v11360_v50 = vld [vmem:[%s15981_s1 + $0x4c4] ss:$8 sps:$4 sm:$0xff]   ;;  %5233 = vmatprep.mubr.bf16.mxu1 %v11384_v49  ;;  %v11368_v56 = vld [vmem:[%s15981_s1 + $0xd0] ss:$8 sps:$4 sm:$0xff]   ;;  %v11374_v60 = vld [vmem:[%s15981_s1 + $0xe0] ss:$8 sps:$4 sm:$0xff]  }
  0x14   :  { %6622 = vmatpush1.bf16.msra.mxu0 %v11315_v19  ;;  %5211 = vmatprep.subr.bf16.mxu1 %v11316_v20  ;;  %v11387_v51 = vld [vmem:[%s15982_s0 + $0x24] ss:$72 sps:$4 sm:$0xff]   ;;  %v11369_v57 = vld [vmem:[%s15981_s1 + $0x4d0] ss:$8 sps:$4 sm:$0xff]   ;;  %v11375_v61 = vld [vmem:[%s15981_s1 + $0x4e0] ss:$8 sps:$4 sm:$0xff]  }
  0x15   :  { %6623 = vmatprep.subr.bf16.mxu0 %v11318_v21  ;;  %6645 = vmatprep.mubr.bf16.mxu0 %v11387_v51  ;;  %v11370_v58 = vld [vmem:[%s15981_s1 + $0xe4] ss:$8 sps:$4 sm:$0xff]   ;;  %v11376_v62 = vld [vmem:[%s15981_s1 + $0xf4] ss:$8 sps:$4 sm:$0xff]   ;;  %v11380_v0 = vld [vmem:[%s15981_s1 + $0xf0] ss:$8 sps:$4 sm:$0xff]  }
  0x16   :  { %v11372_v59 = vld [vmem:[%s15981_s1 + $0x4e4] ss:$8 sps:$4 sm:$0xff]   ;;  %v11378_v63 = vld [vmem:[%s15981_s1 + $0x4f4] ss:$8 sps:$4 sm:$0xff]   ;;  %v11381_v1 = vld [vmem:[%s15981_s1 + $0x4f0] ss:$8 sps:$4 sm:$0xff]  }
  0x17   :  { %5212 = vmatpush1.bf16.msra.mxu1 %v11320_v22  ;;  %v11390_v2 = vld [vmem:[%s15981_s1 + $0x104] ss:$8 sps:$4 sm:$0xff]   ;;  %v11382_v4 = vld [vmem:[%s15982_s0] ss:$72 sps:$4 sm:$0xff]   ;;  %v11394_v8 = vld [vmem:[%s15982_s0 + $0x94] ss:$72 sps:$4 sm:$0xff]  }
  0x18   :  { %6624 = vmatpush1.bf16.msra.mxu0 %v11321_v23  ;;  %5213 = vmatprep.subr.bf16.mxu1 %v11322_v24  ;;  %v11393_v3 = vld [vmem:[%s15981_s1 + $0x504] ss:$8 sps:$4 sm:$0xff]   ;;  %v11385_v5 = vld [vmem:[%s15982_s0 + $0x20] ss:$72 sps:$4 sm:$0xff]   ;;  %v11396_v9 = vld [vmem:[%s15982_s0 + $0xb4] ss:$72 sps:$4 sm:$0xff]  }
  0x19   :  { %6625 = vmatprep.subr.bf16.mxu0 %v11324_v25  ;;  %v11388_v6 = vld [vmem:[%s15981_s1 + $0x100] ss:$8 sps:$4 sm:$0xff]   ;;  %v11402_v10 = vld [vmem:[%s15981_s1 + $0x514] ss:$8 sps:$4 sm:$0xff]   ;;  %v11400_v12 = vld [vmem:[%s15981_s1 + $0x510] ss:$8 sps:$4 sm:$0xff]  }
  0x1a   :  { %v11391_v7 = vld [vmem:[%s15981_s1 + $0x500] ss:$8 sps:$4 sm:$0xff]   ;;  %v11410_v11 = vld [vmem:[%s15981_s1 + $0x114] ss:$8 sps:$4 sm:$0xff]   ;;  %v11408_v13 = vld [vmem:[%s15981_s1 + $0x110] ss:$8 sps:$4 sm:$0xff]  }
  0x1b   :  { %5214 = vmatpush1.bf16.msra.mxu1 %v11326_v26  ;;  %v11414_v14 = vld [vmem:[%s15981_s1 + $0x524] ss:$8 sps:$4 sm:$0xff]   ;;  %v11398_v16 = vld [vmem:[%s15982_s0 + $0x90] ss:$72 sps:$4 sm:$0xff]   ;;  %v11412_v20 = vld [vmem:[%s15981_s1 + $0x520] ss:$8 sps:$4 sm:$0xff]  }
  0x1c   :  { %6626 = vmatpush1.bf16.msra.mxu0 %v11327_v27  ;;  %5215 = vmatprep.subr.bf16.mxu1 %v11328_v28  ;;  %v11431_v15 = vld [vmem:[%s15981_s1 + $0x124] ss:$8 sps:$4 sm:$0xff]   ;;  %v11399_v17 = vld [vmem:[%s15982_s0 + $0xb0] ss:$72 sps:$4 sm:$0xff]   ;;  %v11429_v21 = vld [vmem:[%s15981_s1 + $0x120] ss:$8 sps:$4 sm:$0xff]  }
  0x1d   :  { %6627 = vmatprep.subr.bf16.mxu0 %v11330_v29  ;;  %v11403_v18 = vld [vmem:[%s15982_s0 + $0x124] ss:$72 sps:$4 sm:$0xff]   ;;  %v11423_v22 = vld [vmem:[%s15981_s1 + $0x534] ss:$8 sps:$4 sm:$0xff]   ;;  %v11421_v24 = vld [vmem:[%s15981_s1 + $0x530] ss:$8 sps:$4 sm:$0xff]  }
  0x1e   :  { %v11405_v19 = vld [vmem:[%s15982_s0 + $0x144] ss:$72 sps:$4 sm:$0xff]   ;;  %v11452_v23 = vld [vmem:[%s15981_s1 + $0x134] ss:$8 sps:$4 sm:$0xff]   ;;  %v11450_v25 = vld [vmem:[%s15981_s1 + $0x130] ss:$8 sps:$4 sm:$0xff]  }
  0x1f   :  { %5216 = vmatpush1.bf16.msra.mxu1 %v11332_v30  ;;  %v11407_v26 = vld [vmem:[%s15982_s0 + $0x120] ss:$72 sps:$4 sm:$0xff]   ;;  %v11435_v27 = vld [vmem:[%s15981_s1 + $0x544] ss:$8 sps:$4 sm:$0xff]   ;;  %v11415_v29 = vld [vmem:[%s15982_s0 + $0x1b4] ss:$72 sps:$4 sm:$0xff]  }
  0x20   :  { %6628 = vmatpush1.bf16.msra.mxu0 %v11333_v31  ;;  %5217 = vmatprep.subr.bf16.mxu1 %v11334_v32  ;;  %v11411_v28 = vld [vmem:[%s15982_s0 + $0x140] ss:$72 sps:$4 sm:$0xff]   ;;  %v11417_v30 = vld [vmem:[%s15982_s0 + $0x1d4] ss:$72 sps:$4 sm:$0xff]  }
  0x21   :  { %6629 = vmatprep.subr.bf16.mxu0 %v11336_v33  ;;  %v11433_v31 = vld [vmem:[%s15981_s1 + $0x540] ss:$8 sps:$4 sm:$0xff]   ;;  %v11444_v32 = vld [vmem:[%s15981_s1 + $0x554] ss:$8 sps:$4 sm:$0xff]  }
  0x22   :  { %v11471_v33 = vld [vmem:[%s15981_s1 + $0x140] ss:$8 sps:$4 sm:$0xff]   ;;  %v11436_v49 = vld [vmem:[%s15982_s0 + $0x2d4] ss:$72 sps:$4 sm:$0xff]  }
  0x23   :  { %5218 = vmatpush1.bf16.msra.mxu1 %v11338_v34  ;;  %v11473_v34 = vld [vmem:[%s15981_s1 + $0x144] ss:$8 sps:$4 sm:$0xff]   ;;  %v11475_v51 = vld [vmem:[%s15981_s1 + $0x580] ss:$8 sps:$4 sm:$0xff]  }
  0x24   :  { %6630 = vmatpush1.bf16.msra.mxu0 %v11339_v35  ;;  %5219 = vmatprep.subr.bf16.mxu1 %v11340_v36  ;;  %v11442_v35 = vld [vmem:[%s15981_s1 + $0x550] ss:$8 sps:$4 sm:$0xff]   ;;  %v11456_v36 = vld [vmem:[%s15981_s1 + $0x564] ss:$8 sps:$4 sm:$0xff]  }
  0x25   :  { %6631 = vmatprep.subr.bf16.mxu0 %v11342_v37  ;;  %v11419_v37 = vld [vmem:[%s15982_s0 + $0x1b0] ss:$72 sps:$4 sm:$0xff]  }
  0x27   :  { %5220 = vmatpush1.bf16.msra.mxu1 %v11344_v38  ;;  %v11420_v38 = vld [vmem:[%s15982_s0 + $0x1d0] ss:$72 sps:$4 sm:$0xff]  }
  0x28   :  { %6632 = vmatpush1.bf16.msra.mxu0 %v11345_v39  ;;  %5221 = vmatprep.subr.bf16.mxu1 %v11346_v40  ;;  %v11424_v39 = vld [vmem:[%s15982_s0 + $0x244] ss:$72 sps:$4 sm:$0xff]  }
  0x29   :  { %6633 = vmatprep.subr.bf16.mxu0 %v11348_v41  ;;  %v11426_v40 = vld [vmem:[%s15982_s0 + $0x264] ss:$72 sps:$4 sm:$0xff]   ;;  %v11454_v41 = vld [vmem:[%s15981_s1 + $0x560] ss:$8 sps:$4 sm:$0xff]  }
  0x2b   :  { %5222 = vmatpush1.bf16.msra.mxu1 %v11350_v42  ;;  %v11465_v42 = vld [vmem:[%s15981_s1 + $0x574] ss:$8 sps:$4 sm:$0xff]  }
  0x2c   :  { %6634 = vmatpush1.bf16.msra.mxu0 %v11351_v43  ;;  %5223 = vmatprep.subr.bf16.mxu1 %v11352_v44  ;;  %v11492_v43 = vld [vmem:[%s15981_s1 + $0x150] ss:$8 sps:$4 sm:$0xff]   ;;  %v11494_v44 = vld [vmem:[%s15981_s1 + $0x154] ss:$8 sps:$4 sm:$0xff]  }
  0x2d   :  { %6635 = vmatprep.subr.bf16.mxu0 %v11354_v45  ;;  %v11463_v45 = vld [vmem:[%s15981_s1 + $0x570] ss:$8 sps:$4 sm:$0xff]  }
  0x2f   :  { %5224 = vmatpush1.bf16.msra.mxu1 %v11356_v46  ;;  %v11428_v46 = vld [vmem:[%s15982_s0 + $0x240] ss:$72 sps:$4 sm:$0xff]  }
  0x30   :  { %6636 = vmatpush1.bf16.msra.mxu0 %v11357_v47  ;;  %5225 = vmatprep.subr.bf16.mxu1 %v11358_v48  ;;  %v11477_v47 = vld [vmem:[%s15981_s1 + $0x584] ss:$8 sps:$4 sm:$0xff]   ;;  %v11432_v48 = vld [vmem:[%s15982_s0 + $0x260] ss:$72 sps:$4 sm:$0xff]  }
  0x31   :  { %6637 = vmatprep.subr.bf16.mxu0 %v11360_v50  ;;  %v11438_v50 = vld [vmem:[%s15982_s0 + $0x2f4] ss:$72 sps:$4 sm:$0xff]  }
  0x33   :  { %5226 = vmatpush1.bf16.msra.mxu1 %v11362_v52  ;;  %v11486_v52 = vld [vmem:[%s15981_s1 + $0x594] ss:$8 sps:$4 sm:$0xff]  }
  0x34   :  { %6638 = vmatpush1.bf16.msra.mxu0 %v11363_v53  ;;  %5227 = vmatprep.subr.bf16.mxu1 %v11364_v54  ;;  %v11484_v53 = vld [vmem:[%s15981_s1 + $0x590] ss:$8 sps:$4 sm:$0xff]  }
  0x35   :  { %6639 = vmatprep.subr.bf16.mxu0 %v11366_v55  ;;  %v11440_v54 = vld [vmem:[%s15982_s0 + $0x2d0] ss:$72 sps:$4 sm:$0xff]   ;;  %v11513_v55 = vld [vmem:[%s15981_s1 + $0x160] ss:$8 sps:$4 sm:$0xff]  }
  0x37   :  { %5228 = vmatpush1.bf16.msra.mxu1 %v11368_v56  ;;  %v11498_v56 = vld [vmem:[%s15981_s1 + $0x5a4] ss:$8 sps:$4 sm:$0xff]  }
  0x38   :  { %6640 = vmatpush1.bf16.msra.mxu0 %v11369_v57  ;;  %5229 = vmatprep.subr.bf16.mxu1 %v11370_v58  ;;  %v11515_v57 = vld [vmem:[%s15981_s1 + $0x164] ss:$8 sps:$4 sm:$0xff]   ;;  %v11441_v58 = vld [vmem:[%s15982_s0 + $0x2f0] ss:$72 sps:$4 sm:$0xff]  }
  0x39   :  { %6641 = vmatprep.subr.bf16.mxu0 %v11372_v59  ;;  %v11445_v59 = vld [vmem:[%s15982_s0 + $0x364] ss:$72 sps:$4 sm:$0xff]  }
  0x3b   :  { %5230 = vmatpush1.bf16.msra.mxu1 %v11374_v60  ;;  %v11447_v60 = vld [vmem:[%s15982_s0 + $0x384] ss:$72 sps:$4 sm:$0xff]  }
  0x3c   :  { %6642 = vmatpush1.bf16.msra.mxu0 %v11375_v61  ;;  %5231 = vmatprep.subr.bf16.mxu1 %v11376_v62  ;;  %v11496_v61 = vld [vmem:[%s15981_s1 + $0x5a0] ss:$8 sps:$4 sm:$0xff]   ;;  %v11507_v62 = vld [vmem:[%s15981_s1 + $0x5b4] ss:$8 sps:$4 sm:$0xff]  }
  0x3d   :  { %6643 = vmatprep.subr.bf16.mxu0 %v11378_v63  ;;  %v11449_v63 = vld [vmem:[%s15982_s0 + $0x360] ss:$72 sps:$4 sm:$0xff]  }
  0x3f   :  { %5232 = vmatpush1.bf16.msra.mxu1 %v11380_v0  ;;  %v11453_v0 = vld [vmem:[%s15982_s0 + $0x380] ss:$72 sps:$4 sm:$0xff]  }
  0x40   :  { %6644 = vmatpush1.bf16.msra.mxu0 %v11381_v1  ;;  %5554 = vmatprep.subr.bf16.mxu1 %v11390_v2  ;;  %v11505_v1 = vld [vmem:[%s15981_s1 + $0x5b0] ss:$8 sps:$4 sm:$0xff]   ;;  %v11519_v2 = vld [vmem:[%s15981_s1 + $0x5c4] ss:$8 sps:$4 sm:$0xff]  }
  0x41   :  { %6966 = vmatprep.subr.bf16.mxu0 %v11393_v3  ;;  %v11457_v3 = vld [vmem:[%s15982_s0 + $0x3f4] ss:$72 sps:$4 sm:$0xff]  }
  0x42   :  { %5234 = vmatmul.mubr.bf16.vlgmr.msra.gmra.mrb[0].mxu1 %v11382_v4  ;;  %v11534_v4 = vld [vmem:[%s15981_s1 + $0x170] ss:$8 sps:$4 sm:$0xff]  }
  0x43   :  { %6646 = vmatmul.mubr.bf16.vlgmr.msra.gmra.mrb[0].mxu0 %v11385_v5  ;;  %5555 = vmatpush1.bf16.msra.mxu1 %v11388_v6  ;;  %v11536_v5 = vld [vmem:[%s15981_s1 + $0x174] ss:$8 sps:$4 sm:$0xff]  }
  0x44   :  { %6967 = vmatpush1.bf16.msra.mxu0 %v11391_v7  ;;  %5243 = vmatprep.mubr.bf16.mxu1 %v11394_v8  ;;  %v11459_v6 = vld [vmem:[%s15982_s0 + $0x414] ss:$72 sps:$4 sm:$0xff]   ;;  %v11517_v7 = vld [vmem:[%s15981_s1 + $0x5c0] ss:$8 sps:$4 sm:$0xff]  }
  0x45   :  { %6655 = vmatprep.mubr.bf16.mxu0 %v11396_v9  ;;  %6968 = vmatprep.subr.bf16.mxu0 %v11402_v10  ;;  %v11528_v8 = vld [vmem:[%s15981_s1 + $0x5d4] ss:$8 sps:$4 sm:$0xff]   ;;  %v11461_v9 = vld [vmem:[%s15982_s0 + $0x3f0] ss:$72 sps:$4 sm:$0xff]  }
  0x46   :  { %5556 = vmatprep.subr.bf16.mxu1 %v11410_v11  ;;  %v11526_v10 = vld [vmem:[%s15981_s1 + $0x5d0] ss:$8 sps:$4 sm:$0xff]   ;;  %v11540_v11 = vld [vmem:[%s15981_s1 + $0x5e4] ss:$8 sps:$4 sm:$0xff]  }
  0x47   :  { %5557 = vmatpush1.bf16.msra.mxu1 %v11408_v13  ;;  %v11466_v13 = vld [vmem:[%s15982_s0 + $0x484] ss:$72 sps:$4 sm:$0xff]  }
  0x48   :  { %6969 = vmatpush1.bf16.msra.mxu0 %v11400_v12  ;;  %5558 = vmatprep.subr.bf16.mxu1 %v11431_v15  ;;  %v11462_v12 = vld [vmem:[%s15982_s0 + $0x410] ss:$72 sps:$4 sm:$0xff]   ;;  %v11538_v15 = vld [vmem:[%s15981_s1 + $0x5e0] ss:$8 sps:$4 sm:$0xff]  }
  0x49   :  { %6970 = vmatprep.subr.bf16.mxu0 %v11414_v14  ;;  %v11468_v14 = vld [vmem:[%s15982_s0 + $0x4a4] ss:$72 sps:$4 sm:$0xff]  }
  0x4a   :  { %5244 = vmatmul.mubr.bf16.gmra.mrb[4].mxu1 %v11398_v16  ;;  %v11558_v16 = vld [vmem:[%s15981_s1 + $0x184] ss:$8 sps:$4 sm:$0xff]  }
  0x4b   :  { %6656 = vmatmul.mubr.bf16.gmra.mrb[4].mxu0 %v11399_v17  ;;  %5253 = vmatprep.mubr.bf16.mxu1 %v11403_v18  ;;  %v11549_v17 = vld [vmem:[%s15981_s1 + $0x5f4] ss:$8 sps:$4 sm:$0xff]   ;;  %v11556_v18 = vld [vmem:[%s15981_s1 + $0x180] ss:$8 sps:$4 sm:$0xff]  }
  0x4c   :  { %6665 = vmatprep.mubr.bf16.mxu0 %v11405_v19  ;;  %6971 = vmatpush1.bf16.msra.mxu0 %v11412_v20  ;;  %v11470_v19 = vld [vmem:[%s15982_s0 + $0x480] ss:$72 sps:$4 sm:$0xff]   ;;  %v11547_v20 = vld [vmem:[%s15981_s1 + $0x5f0] ss:$8 sps:$4 sm:$0xff]  }
  0x4d   :  { %5559 = vmatpush1.bf16.msra.mxu1 %v11429_v21  ;;  %6972 = vmatprep.subr.bf16.mxu0 %v11423_v22  ;;  %v11561_v21 = vld [vmem:[%s15981_s1 + $0x604] ss:$8 sps:$4 sm:$0xff]   ;;  %v11474_v22 = vld [vmem:[%s15982_s0 + $0x4a0] ss:$72 sps:$4 sm:$0xff]  }
  0x4e   :  { %5560 = vmatprep.subr.bf16.mxu1 %v11452_v23  ;;  %v11478_v23 = vld [vmem:[%s15982_s0 + $0x514] ss:$72 sps:$4 sm:$0xff]  }
  0x50   :  { %6973 = vmatpush1.bf16.msra.mxu0 %v11421_v24  ;;  %v11480_v24 = vld [vmem:[%s15982_s0 + $0x534] ss:$72 sps:$4 sm:$0xff]  }
  0x51   :  { %5561 = vmatpush1.bf16.msra.mxu1 %v11450_v25  ;;  %6974 = vmatprep.subr.bf16.mxu0 %v11435_v27  ;;  %v11575_v25 = vld [vmem:[%s15981_s1 + $0x194] ss:$8 sps:$4 sm:$0xff]   ;;  %v11482_v27 = vld [vmem:[%s15982_s0 + $0x510] ss:$72 sps:$4 sm:$0xff]  }
  0x52   :  { %5254 = vmatmul.mubr.bf16.gmra.mrb[8].mxu1 %v11407_v26  ;;  %5562 = vmatprep.subr.bf16.mxu1 %v11473_v34  ;;  %v11573_v26 = vld [vmem:[%s15981_s1 + $0x190] ss:$8 sps:$4 sm:$0xff]   ;;  %v11495_v34 = vld [vmem:[%s15982_s0 + $0x5c0] ss:$72 sps:$4 sm:$0xff]  }
  0x53   :  { %6666 = vmatmul.mubr.bf16.gmra.mrb[8].mxu0 %v11411_v28  ;;  %5263 = vmatprep.mubr.bf16.mxu1 %v11415_v29  ;;  %v11483_v28 = vld [vmem:[%s15982_s0 + $0x530] ss:$72 sps:$4 sm:$0xff]   ;;  %v11487_v29 = vld [vmem:[%s15982_s0 + $0x5a4] ss:$72 sps:$4 sm:$0xff]  }
  0x54   :  { %6675 = vmatprep.mubr.bf16.mxu0 %v11417_v30  ;;  %6975 = vmatpush1.bf16.msra.mxu0 %v11433_v31  ;;  %v11489_v30 = vld [vmem:[%s15982_s0 + $0x5c4] ss:$72 sps:$4 sm:$0xff]  }
  0x55   :  { %6976 = vmatprep.subr.bf16.mxu0 %v11444_v32  ;;  %5563 = vmatpush1.bf16.msra.mxu1 %v11471_v33  ;;  %v11593_v31 = vld [vmem:[%s15981_s1 + $0x1a4] ss:$8 sps:$4 sm:$0xff]   ;;  %v11591_v32 = vld [vmem:[%s15981_s1 + $0x1a0] ss:$8 sps:$4 sm:$0xff]  }
  0x56   :  { %5564 = vmatprep.subr.bf16.mxu1 %v11494_v44  ;;  %v11491_v33 = vld [vmem:[%s15982_s0 + $0x5a0] ss:$72 sps:$4 sm:$0xff]  }
  0x57   :  { %v11627_v44 = vld [vmem:[%s15981_s1 + $0x1c0] ss:$8 sps:$4 sm:$0xff]  }
  0x58   :  { %6977 = vmatpush1.bf16.msra.mxu0 %v11442_v35  ;;  %v11499_v35 = vld [vmem:[%s15982_s0 + $0x634] ss:$72 sps:$4 sm:$0xff]  }
  0x59   :  { %6978 = vmatprep.subr.bf16.mxu0 %v11456_v36  ;;  %5565 = vmatpush1.bf16.msra.mxu1 %v11492_v43  ;;  %v11501_v36 = vld [vmem:[%s15982_s0 + $0x654] ss:$72 sps:$4 sm:$0xff]   ;;  %v11629_v43 = vld [vmem:[%s15981_s1 + $0x1c4] ss:$8 sps:$4 sm:$0xff]  }
  0x5a   :  { %5264 = vmatmul.mubr.bf16.gmra.mrb[12].mxu1 %v11419_v37  ;;  %5566 = vmatprep.subr.bf16.mxu1 %v11515_v57  ;;  %v11611_v37 = vld [vmem:[%s15981_s1 + $0x1b4] ss:$8 sps:$4 sm:$0xff]   ;;  %v11533_v57 = vld [vmem:[%s15982_s0 + $0x7e0] ss:$72 sps:$4 sm:$0xff]  }
  0x5b   :  { %6676 = vmatmul.mubr.bf16.gmra.mrb[12].mxu0 %v11420_v38  ;;  %5273 = vmatprep.mubr.bf16.mxu1 %v11424_v39  ;;  %v11609_v38 = vld [vmem:[%s15981_s1 + $0x1b0] ss:$8 sps:$4 sm:$0xff]  }
  0x5c   :  { %6685 = vmatprep.mubr.bf16.mxu0 %v11426_v40  ;;  %6979 = vmatpush1.bf16.msra.mxu0 %v11454_v41  ;;  %v11503_v39 = vld [vmem:[%s15982_s0 + $0x630] ss:$72 sps:$4 sm:$0xff]   ;;  %v11508_v41 = vld [vmem:[%s15982_s0 + $0x6c4] ss:$72 sps:$4 sm:$0xff]  }
  0x5d   :  { %6980 = vmatprep.subr.bf16.mxu0 %v11465_v42  ;;  %5567 = vmatpush1.bf16.msra.mxu1 %v11513_v55  ;;  %v11504_v40 = vld [vmem:[%s15982_s0 + $0x650] ss:$72 sps:$4 sm:$0xff]   ;;  %v11510_v42 = vld [vmem:[%s15982_s0 + $0x6e4] ss:$72 sps:$4 sm:$0xff]  }
  0x5e   :  { %5568 = vmatprep.subr.bf16.mxu1 %v11536_v5  ;;  %v11665_v55 = vld [vmem:[%s15981_s1 + $0x1e4] ss:$8 sps:$4 sm:$0xff]   ;;  %v11559_v5 = vld [vmem:[%s15981_s1 + $0x600] ss:$8 sps:$4 sm:$0xff]  }
  0x60   :  { %6981 = vmatpush1.bf16.msra.mxu0 %v11463_v45  ;;  %v11512_v45 = vld [vmem:[%s15982_s0 + $0x6c0] ss:$72 sps:$4 sm:$0xff]  }
  0x61   :  { %6982 = vmatprep.subr.bf16.mxu0 %v11477_v47  ;;  %5569 = vmatpush1.bf16.msra.mxu1 %v11534_v4  ;;  %v11520_v47 = vld [vmem:[%s15982_s0 + $0x754] ss:$72 sps:$4 sm:$0xff]   ;;  %v11555_v4 = vld [vmem:[%s15982_s0 + $0x900] ss:$72 sps:$4 sm:$0xff]  }
  0x62   :  { %5274 = vmatmul.mubr.bf16.gmra.mrb[16].mxu1 %v11428_v46  ;;  %5570 = vmatprep.subr.bf16.mxu1 %v11558_v16  ;;  %v11516_v46 = vld [vmem:[%s15982_s0 + $0x6e0] ss:$72 sps:$4 sm:$0xff]  }
  0x63   :  { %6686 = vmatmul.mubr.bf16.gmra.mrb[16].mxu0 %v11432_v48  ;;  %5283 = vmatprep.mubr.bf16.mxu1 %v11436_v49  ;;  %v11522_v48 = vld [vmem:[%s15982_s0 + $0x774] ss:$72 sps:$4 sm:$0xff]   ;;  %v11595_v16 = vld [vmem:[%s15981_s1 + $0x620] ss:$8 sps:$4 sm:$0xff]  }
  0x64   :  { %6695 = vmatprep.mubr.bf16.mxu0 %v11438_v50  ;;  %6983 = vmatpush1.bf16.msra.mxu0 %v11475_v51  ;;  %v11647_v49 = vld [vmem:[%s15981_s1 + $0x1d4] ss:$8 sps:$4 sm:$0xff]   ;;  %v11645_v50 = vld [vmem:[%s15981_s1 + $0x1d0] ss:$8 sps:$4 sm:$0xff]  }
  0x65   :  { %6984 = vmatprep.subr.bf16.mxu0 %v11486_v52  ;;  %5571 = vmatpush1.bf16.msra.mxu1 %v11556_v18  ;;  %v11524_v51 = vld [vmem:[%s15982_s0 + $0x750] ss:$72 sps:$4 sm:$0xff]  }
  0x66   :  { %5572 = vmatprep.subr.bf16.mxu1 %v11575_v25  ;;  %v11525_v52 = vld [vmem:[%s15982_s0 + $0x770] ss:$72 sps:$4 sm:$0xff]   ;;  %v11651_v25 = vld [vmem:[%s15981_s1 + $0x654] ss:$8 sps:$4 sm:$0xff]  }
  0x67   :  { %v11613_v18 = vld [vmem:[%s15981_s1 + $0x630] ss:$8 sps:$4 sm:$0xff]  }
  0x68   :  { %6985 = vmatpush1.bf16.msra.mxu0 %v11484_v53  ;;  %v11529_v53 = vld [vmem:[%s15982_s0 + $0x7e4] ss:$72 sps:$4 sm:$0xff]  }
  0x69   :  { %6986 = vmatprep.subr.bf16.mxu0 %v11498_v56  ;;  %5573 = vmatpush1.bf16.msra.mxu1 %v11573_v26  ;;  %v11663_v56 = vld [vmem:[%s15981_s1 + $0x1e0] ss:$8 sps:$4 sm:$0xff]   ;;  %v11649_v26 = vld [vmem:[%s15981_s1 + $0x650] ss:$8 sps:$4 sm:$0xff]  }
  0x6a   :  { %5284 = vmatmul.mubr.bf16.gmra.mrb[20].mxu1 %v11440_v54  ;;  %5574 = vmatprep.subr.bf16.mxu1 %v11593_v31  ;;  %v11531_v54 = vld [vmem:[%s15982_s0 + $0x804] ss:$72 sps:$4 sm:$0xff]  }
  0x6b   :  { %6696 = vmatmul.mubr.bf16.gmra.mrb[20].mxu0 %v11441_v58  ;;  %5293 = vmatprep.mubr.bf16.mxu1 %v11445_v59  ;;  %v11537_v58 = vld [vmem:[%s15982_s0 + $0x800] ss:$72 sps:$4 sm:$0xff]   ;;  %v11541_v59 = vld [vmem:[%s15982_s0 + $0x874] ss:$72 sps:$4 sm:$0xff]  }
  0x6c   :  { %6705 = vmatprep.mubr.bf16.mxu0 %v11447_v60  ;;  %6987 = vmatpush1.bf16.msra.mxu0 %v11496_v61  ;;  %v11543_v60 = vld [vmem:[%s15982_s0 + $0x894] ss:$72 sps:$4 sm:$0xff]   ;;  %v11681_v61 = vld [vmem:[%s15981_s1 + $0x1f0] ss:$8 sps:$4 sm:$0xff]  }
  0x6d   :  { %6988 = vmatprep.subr.bf16.mxu0 %v11507_v62  ;;  %5575 = vmatpush1.bf16.msra.mxu1 %v11591_v32  ;;  %v11683_v62 = vld [vmem:[%s15981_s1 + $0x1f4] ss:$8 sps:$4 sm:$0xff]   ;;  %v11667_v32 = vld [vmem:[%s15981_s1 + $0x660] ss:$8 sps:$4 sm:$0xff]  }
  0x6e   :  { %5576 = vmatprep.subr.bf16.mxu1 %v11611_v37  ;;  %v11588_v31 = vld [vmem:[%s15982_s0 + $0x26c] ss:$72 sps:$4 sm:$0xff]   ;;  %v11594_v37 = vld [vmem:[%s15982_s0 + $0x268] ss:$72 sps:$4 sm:$0xff]  }
  0x70   :  { %6989 = vmatpush1.bf16.msra.mxu0 %v11505_v1  ;;  %v11550_v1 = vld [vmem:[%s15982_s0 + $0x904] ss:$72 sps:$4 sm:$0xff]  }
  0x71   :  { %6990 = vmatprep.subr.bf16.mxu0 %v11519_v2  ;;  %5577 = vmatpush1.bf16.msra.mxu1 %v11609_v38  ;;  %v11554_v2 = vld [vmem:[%s15982_s0 + $0x2c] ss:$72 sps:$4 sm:$0xff]  }
  0x72   :  { %5294 = vmatmul.mubr.bf16.gmra.mrb[24].mxu1 %v11449_v63  ;;  %5578 = vmatprep.subr.bf16.mxu1 %v11629_v43  ;;  %v11545_v63 = vld [vmem:[%s15982_s0 + $0x870] ss:$72 sps:$4 sm:$0xff]   ;;  %v11598_v38 = vld [vmem:[%s15982_s0 + $0xbd4] ss:$72 sps:$4 sm:$0xff]  }
  0x73   :  { %6706 = vmatmul.mubr.bf16.gmra.mrb[24].mxu0 %v11453_v0  ;;  %5303 = vmatprep.mubr.bf16.mxu1 %v11457_v3  ;;  %v11546_v0 = vld [vmem:[%s15982_s0 + $0x890] ss:$72 sps:$4 sm:$0xff]  }
  0x74   :  { %6715 = vmatprep.mubr.bf16.mxu0 %v11459_v6  ;;  %6991 = vmatpush1.bf16.msra.mxu0 %v11517_v7  ;;  %v11552_v3 = vld [vmem:[%s15982_s0 + $0x28] ss:$72 sps:$4 sm:$0xff]   ;;  %v11562_v6 = vld [vmem:[%s15982_s0 + $0x994] ss:$72 sps:$4 sm:$0xff]  }
  0x75   :  { %6992 = vmatprep.subr.bf16.mxu0 %v11528_v8  ;;  %5579 = vmatpush1.bf16.msra.mxu1 %v11627_v44  ;;  %v11564_v7 = vld [vmem:[%s15982_s0 + $0xbc] ss:$72 sps:$4 sm:$0xff]   ;;  %v11602_v43 = vld [vmem:[%s15982_s0 + $0xbd0] ss:$72 sps:$4 sm:$0xff]  }
  0x76   :  { %5580 = vmatprep.subr.bf16.mxu1 %v11647_v49  ;;  %v11579_v8 = vld [vmem:[%s15981_s1 + $0x614] ss:$8 sps:$4 sm:$0xff]   ;;  %v11603_v44 = vld [vmem:[%s15982_s0 + $0x2f8] ss:$72 sps:$4 sm:$0xff]  }
  0x77   :  { %v11608_v49 = vld [vmem:[%s15982_s0 + $0xc60] ss:$72 sps:$4 sm:$0xff]  }
  0x78   :  { %6993 = vmatpush1.bf16.msra.mxu0 %v11526_v10  ;;  %v11577_v10 = vld [vmem:[%s15981_s1 + $0x610] ss:$8 sps:$4 sm:$0xff]  }
  0x79   :  { %6994 = vmatprep.subr.bf16.mxu0 %v11540_v11  ;;  %5581 = vmatpush1.bf16.msra.mxu1 %v11645_v50  ;;  %v11566_v11 = vld [vmem:[%s15982_s0 + $0x990] ss:$72 sps:$4 sm:$0xff]  }
  0x7a   :  { %5304 = vmatmul.mubr.bf16.gmra.mrb[28].mxu1 %v11461_v9  ;;  %5582 = vmatprep.subr.bf16.mxu1 %v11665_v55  ;;  %v11701_v9 = vld [vmem:[%s15981_s1 + $0x204] ss:$8 sps:$4 sm:$0xff]   ;;  %v11612_v50 = vld [vmem:[%s15982_s0 + $0x388] ss:$72 sps:$4 sm:$0xff]  }
  0x7b   :  { %6716 = vmatmul.mubr.bf16.gmra.mrb[28].mxu0 %v11462_v12  ;;  %5313 = vmatprep.mubr.bf16.mxu1 %v11466_v13  ;;  %v11567_v12 = vld [vmem:[%s15982_s0 + $0xb8] ss:$72 sps:$4 sm:$0xff]   ;;  %v11597_v13 = vld [vmem:[%s15981_s1 + $0x624] ss:$8 sps:$4 sm:$0xff]  }
  0x7c   :  { %6725 = vmatprep.mubr.bf16.mxu0 %v11468_v14  ;;  %6995 = vmatpush1.bf16.msra.mxu0 %v11538_v15  ;;  %v11568_v14 = vld [vmem:[%s15982_s0 + $0xa24] ss:$72 sps:$4 sm:$0xff]   ;;  %v11620_v55 = vld [vmem:[%s15982_s0 + $0xcf0] ss:$72 sps:$4 sm:$0xff]  }
  0x7d   :  { %6996 = vmatprep.subr.bf16.mxu0 %v11549_v17  ;;  %5583 = vmatpush1.bf16.msra.mxu1 %v11663_v56  ;;  %v11570_v15 = vld [vmem:[%s15982_s0 + $0x14c] ss:$72 sps:$4 sm:$0xff]   ;;  %v11621_v56 = vld [vmem:[%s15982_s0 + $0x418] ss:$72 sps:$4 sm:$0xff]  }
  0x7e   :  { %5584 = vmatprep.subr.bf16.mxu1 %v11683_v62  ;;  %v11615_v17 = vld [vmem:[%s15981_s1 + $0x634] ss:$8 sps:$4 sm:$0xff]  }
  0x7f   :  { %v11636_v62 = vld [vmem:[%s15982_s0 + $0x53c] ss:$72 sps:$4 sm:$0xff]  }
  0x80   :  { %6997 = vmatpush1.bf16.msra.mxu0 %v11547_v20  ;;  %v11572_v20 = vld [vmem:[%s15982_s0 + $0xa20] ss:$72 sps:$4 sm:$0xff]  }
  0x81   :  { %7319 = vmatprep.subr.bf16.mxu0 %v11561_v21  ;;  %5585 = vmatpush1.bf16.msra.mxu1 %v11681_v61  ;;  %v11576_v21 = vld [vmem:[%s15982_s0 + $0x148] ss:$72 sps:$4 sm:$0xff]   ;;  %v11634_v61 = vld [vmem:[%s15982_s0 + $0xe14] ss:$72 sps:$4 sm:$0xff]  }
  0x82   :  { %5314 = vmatmul.mubr.bf16.gmra.mrb[32].mxu1 %v11470_v19  ;;  %5907 = vmatprep.subr.bf16.mxu1 %v11701_v9  ;;  %v11633_v19 = vld [vmem:[%s15981_s1 + $0x644] ss:$8 sps:$4 sm:$0xff]   ;;  %v11793_v9 = vld [vmem:[%s15981_s1 + $0x6d0] ss:$8 sps:$4 sm:$0xff]  }
  0x83   :  { %6726 = vmatmul.mubr.bf16.gmra.mrb[32].mxu0 %v11474_v22  ;;  %5323 = vmatprep.mubr.bf16.mxu1 %v11478_v23  ;;  %v11580_v22 = vld [vmem:[%s15982_s0 + $0xab4] ss:$72 sps:$4 sm:$0xff]  }
  0x84   :  { %6735 = vmatprep.mubr.bf16.mxu0 %v11480_v24  ;;  %v11582_v23 = vld [vmem:[%s15982_s0 + $0x1dc] ss:$72 sps:$4 sm:$0xff]   ;;  %v11631_v24 = vld [vmem:[%s15981_s1 + $0x640] ss:$8 sps:$4 sm:$0xff]  }
  0x8a   :  { %5324 = vmatmul.mubr.bf16.gmra.mrb[36].mxu1 %v11482_v27  ;;  %v11584_v27 = vld [vmem:[%s15982_s0 + $0xab0] ss:$72 sps:$4 sm:$0xff]  }
  0x8b   :  { %6736 = vmatmul.mubr.bf16.gmra.mrb[36].mxu0 %v11483_v28  ;;  %5333 = vmatprep.mubr.bf16.mxu1 %v11487_v29  ;;  %v11585_v28 = vld [vmem:[%s15982_s0 + $0x1d8] ss:$72 sps:$4 sm:$0xff]   ;;  %v11669_v29 = vld [vmem:[%s15981_s1 + $0x664] ss:$8 sps:$4 sm:$0xff]  }
  0x8c   :  { %6745 = vmatprep.mubr.bf16.mxu0 %v11489_v30  ;;  %v11586_v30 = vld [vmem:[%s15982_s0 + $0xb44] ss:$72 sps:$4 sm:$0xff]  }
  0x92   :  { %5334 = vmatmul.mubr.bf16.gmra.mrb[40].mxu1 %v11491_v33  ;;  %v11687_v33 = vld [vmem:[%s15981_s1 + $0x674] ss:$8 sps:$4 sm:$0xff]  }
  0x93   :  { %6746 = vmatmul.mubr.bf16.gmra.mrb[40].mxu0 %v11495_v34  ;;  %5343 = vmatprep.mubr.bf16.mxu1 %v11499_v35  ;;  %v11685_v34 = vld [vmem:[%s15981_s1 + $0x670] ss:$8 sps:$4 sm:$0xff]   ;;  %v11705_v35 = vld [vmem:[%s15981_s1 + $0x684] ss:$8 sps:$4 sm:$0xff]  }
  0x94   :  { %6755 = vmatprep.mubr.bf16.mxu0 %v11501_v36  ;;  %v11590_v36 = vld [vmem:[%s15982_s0 + $0xb40] ss:$72 sps:$4 sm:$0xff]  }
  0x9a   :  { %5344 = vmatmul.mubr.bf16.gmra.mrb[44].mxu1 %v11503_v39  ;;  %v11600_v39 = vld [vmem:[%s15982_s0 + $0x2fc] ss:$72 sps:$4 sm:$0xff]  }
  0x9b   :  { %6756 = vmatmul.mubr.bf16.gmra.mrb[44].mxu0 %v11504_v40  ;;  %5353 = vmatprep.mubr.bf16.mxu1 %v11508_v41  ;;  %v11703_v40 = vld [vmem:[%s15981_s1 + $0x680] ss:$8 sps:$4 sm:$0xff]   ;;  %v11723_v41 = vld [vmem:[%s15981_s1 + $0x694] ss:$8 sps:$4 sm:$0xff]  }
  0x9c   :  { %6765 = vmatprep.mubr.bf16.mxu0 %v11510_v42  ;;  %v11721_v42 = vld [vmem:[%s15981_s1 + $0x690] ss:$8 sps:$4 sm:$0xff]  }
  0xa2   :  { %5354 = vmatmul.mubr.bf16.gmra.mrb[48].mxu1 %v11512_v45  ;;  %v11741_v45 = vld [vmem:[%s15981_s1 + $0x6a4] ss:$8 sps:$4 sm:$0xff]  }
  0xa3   :  { %6766 = vmatmul.mubr.bf16.gmra.mrb[48].mxu0 %v11516_v46  ;;  %5363 = vmatprep.mubr.bf16.mxu1 %v11520_v47  ;;  %v11604_v46 = vld [vmem:[%s15982_s0 + $0xc64] ss:$72 sps:$4 sm:$0xff]  }
  0xa4   :  { %6775 = vmatprep.mubr.bf16.mxu0 %v11522_v48  ;;  %v11606_v47 = vld [vmem:[%s15982_s0 + $0x38c] ss:$72 sps:$4 sm:$0xff]   ;;  %v11739_v48 = vld [vmem:[%s15981_s1 + $0x6a0] ss:$8 sps:$4 sm:$0xff]  }
  0xaa   :  { %5364 = vmatmul.mubr.bf16.gmra.mrb[52].mxu1 %v11524_v51  ;;  %v11616_v51 = vld [vmem:[%s15982_s0 + $0xcf4] ss:$72 sps:$4 sm:$0xff]  }
  0xab   :  { %6776 = vmatmul.mubr.bf16.gmra.mrb[52].mxu0 %v11525_v52  ;;  %5373 = vmatprep.mubr.bf16.mxu1 %v11529_v53  ;;  %v11618_v52 = vld [vmem:[%s15982_s0 + $0x41c] ss:$72 sps:$4 sm:$0xff]   ;;  %v11757_v53 = vld [vmem:[%s15981_s1 + $0x6b0] ss:$8 sps:$4 sm:$0xff]  }
  0xac   :  { %6785 = vmatprep.mubr.bf16.mxu0 %v11531_v54  ;;  %v11759_v54 = vld [vmem:[%s15981_s1 + $0x6b4] ss:$8 sps:$4 sm:$0xff]  }
  0xb2   :  { %5374 = vmatmul.mubr.bf16.gmra.mrb[56].mxu1 %v11533_v57  ;;  %v11622_v57 = vld [vmem:[%s15982_s0 + $0xd84] ss:$72 sps:$4 sm:$0xff]  }
  0xb3   :  { %6786 = vmatmul.mubr.bf16.gmra.mrb[56].mxu0 %v11537_v58  ;;  %5383 = vmatprep.mubr.bf16.mxu1 %v11541_v59  ;;  %v11624_v58 = vld [vmem:[%s15982_s0 + $0x4ac] ss:$72 sps:$4 sm:$0xff]   ;;  %v11626_v59 = vld [vmem:[%s15982_s0 + $0xd80] ss:$72 sps:$4 sm:$0xff]  }
  0xb4   :  { %6795 = vmatprep.mubr.bf16.mxu0 %v11543_v60  ;;  %v11630_v60 = vld [vmem:[%s15982_s0 + $0x4a8] ss:$72 sps:$4 sm:$0xff]  }
  0xba   :  { %5384 = vmatmul.mubr.bf16.gmra.mrb[60].mxu1 %v11545_v63  ;;  %v11775_v63 = vld [vmem:[%s15981_s1 + $0x6c0] ss:$8 sps:$4 sm:$0xff]  }
  0xbb   :  { %6796 = vmatmul.mubr.bf16.gmra.mrb[60].mxu0 %v11546_v0  ;;  %5393 = vmatprep.mubr.bf16.mxu1 %v11550_v1  ;;  %v11777_v0 = vld [vmem:[%s15981_s1 + $0x6c4] ss:$8 sps:$4 sm:$0xff]   ;;  %v11638_v1 = vld [vmem:[%s15982_s0 + $0xe10] ss:$72 sps:$4 sm:$0xff]  }
  0xbc   :  { %6998 = vmatprep.mubr.bf16.mxu0 %v11554_v2  ;;  %v11639_v2 = vld [vmem:[%s15982_s0 + $0x538] ss:$72 sps:$4 sm:$0xff]  }
  0xc2   :  { %5394 = vmatmul.mubr.bf16.gmra.mrb[64].mxu1 %v11555_v4  ;;  %v11642_v4 = vld [vmem:[%s15982_s0 + $0x5cc] ss:$72 sps:$4 sm:$0xff]  }
  0xc3   :  { %6999 = vmatmul.mubr.bf16.vlgmr.msra.gmra.mrb[0].mxu0 %v11552_v3  ;;  %5403 = vmatprep.mubr.bf16.mxu1 %v11562_v6  ;;  %v11640_v3 = vld [vmem:[%s15982_s0 + $0xea4] ss:$72 sps:$4 sm:$0xff]   ;;  %v11648_v6 = vld [vmem:[%s15982_s0 + $0x5c8] ss:$72 sps:$4 sm:$0xff]  }
  0xc4   :  { %7320 = vmatpush1.bf16.msra.mxu0 %v11559_v5  ;;  %7008 = vmatprep.mubr.bf16.mxu0 %v11564_v7  ;;  %v11644_v5 = vld [vmem:[%s15982_s0 + $0xea0] ss:$72 sps:$4 sm:$0xff]   ;;  %v11652_v7 = vld [vmem:[%s15982_s0 + $0xf34] ss:$72 sps:$4 sm:$0xff]  }
  0xc5   :  { %7321 = vmatprep.subr.bf16.mxu0 %v11579_v8  ;;  %v11654_v8 = vld [vmem:[%s15982_s0 + $0x65c] ss:$72 sps:$4 sm:$0xff]  }
  0xc8   :  { %7322 = vmatpush1.bf16.msra.mxu0 %v11577_v10  ;;  %v11795_v10 = vld [vmem:[%s15981_s1 + $0x6d4] ss:$8 sps:$4 sm:$0xff]  }
  0xc9   :  { %7323 = vmatprep.subr.bf16.mxu0 %v11597_v13  ;;  %v11658_v13 = vld [vmem:[%s15982_s0 + $0xfc4] ss:$72 sps:$4 sm:$0xff]  }
  0xca   :  { %5404 = vmatmul.mubr.bf16.gmra.mrb[68].mxu1 %v11566_v11  ;;  %v11656_v11 = vld [vmem:[%s15982_s0 + $0xf30] ss:$72 sps:$4 sm:$0xff]  }
  0xcb   :  { %7009 = vmatmul.mubr.bf16.gmra.mrb[4].mxu0 %v11567_v12  ;;  %5413 = vmatprep.mubr.bf16.mxu1 %v11568_v14  ;;  %v11657_v12 = vld [vmem:[%s15982_s0 + $0x658] ss:$72 sps:$4 sm:$0xff]   ;;  %v11660_v14 = vld [vmem:[%s15982_s0 + $0x6ec] ss:$72 sps:$4 sm:$0xff]  }
  0xcc   :  { %7018 = vmatprep.mubr.bf16.mxu0 %v11570_v15  ;;  %7324 = vmatpush1.bf16.msra.mxu0 %v11595_v16  ;;  %v11662_v15 = vld [vmem:[%s15982_s0 + $0xfc0] ss:$72 sps:$4 sm:$0xff]  }
  0xcd   :  { %7325 = vmatprep.subr.bf16.mxu0 %v11615_v17  ;;  %v11666_v16 = vld [vmem:[%s15982_s0 + $0x6e8] ss:$72 sps:$4 sm:$0xff]   ;;  %v11670_v17 = vld [vmem:[%s15982_s0 + $0x1054] ss:$72 sps:$4 sm:$0xff]  }
  0xd0   :  { %7326 = vmatpush1.bf16.msra.mxu0 %v11613_v18  ;;  %v11672_v18 = vld [vmem:[%s15982_s0 + $0x77c] ss:$72 sps:$4 sm:$0xff]  }
  0xd1   :  { %7327 = vmatprep.subr.bf16.mxu0 %v11633_v19  ;;  %v11811_v19 = vld [vmem:[%s15981_s1 + $0x6e0] ss:$8 sps:$4 sm:$0xff]  }
  0xd2   :  { %5414 = vmatmul.mubr.bf16.gmra.mrb[72].mxu1 %v11572_v20  ;;  %v11813_v20 = vld [vmem:[%s15981_s1 + $0x6e4] ss:$8 sps:$4 sm:$0xff]  }
  0xd3   :  { %7019 = vmatmul.mubr.bf16.gmra.mrb[8].mxu0 %v11576_v21  ;;  %5423 = vmatprep.mubr.bf16.mxu1 %v11580_v22  ;;  %v11674_v21 = vld [vmem:[%s15982_s0 + $0x1050] ss:$72 sps:$4 sm:$0xff]  }
  0xd4   :  { %7028 = vmatprep.mubr.bf16.mxu0 %v11582_v23  ;;  %7328 = vmatpush1.bf16.msra.mxu0 %v11631_v24  ;;  %v11675_v22 = vld [vmem:[%s15982_s0 + $0x778] ss:$72 sps:$4 sm:$0xff]   ;;  %v11676_v23 = vld [vmem:[%s15982_s0 + $0x10e4] ss:$72 sps:$4 sm:$0xff]  }
  0xd5   :  { %7329 = vmatprep.subr.bf16.mxu0 %v11651_v25  ;;  %v11678_v24 = vld [vmem:[%s15982_s0 + $0x80c] ss:$72 sps:$4 sm:$0xff]   ;;  %v11680_v25 = vld [vmem:[%s15982_s0 + $0x10e0] ss:$72 sps:$4 sm:$0xff]  }
  0xd8   :  { %7330 = vmatpush1.bf16.msra.mxu0 %v11649_v26  ;;  %v11684_v26 = vld [vmem:[%s15982_s0 + $0x808] ss:$72 sps:$4 sm:$0xff]  }
  0xd9   :  { %7331 = vmatprep.subr.bf16.mxu0 %v11669_v29  ;;  %v11829_v29 = vld [vmem:[%s15981_s1 + $0x6f0] ss:$8 sps:$4 sm:$0xff]  }
  0xda   :  { %5424 = vmatmul.mubr.bf16.gmra.mrb[76].mxu1 %v11584_v27  ;;  %v11688_v27 = vld [vmem:[%s15982_s0 + $0x1174] ss:$72 sps:$4 sm:$0xff]  }
  0xdb   :  { %7029 = vmatmul.mubr.bf16.gmra.mrb[12].mxu0 %v11585_v28  ;;  %5433 = vmatprep.mubr.bf16.mxu1 %v11586_v30  ;;  %v11690_v28 = vld [vmem:[%s15982_s0 + $0x89c] ss:$72 sps:$4 sm:$0xff]  }
  0xdc   :  { %7038 = vmatprep.mubr.bf16.mxu0 %v11588_v31  ;;  %7332 = vmatpush1.bf16.msra.mxu0 %v11667_v32  ;;  %v11831_v30 = vld [vmem:[%s15981_s1 + $0x6f4] ss:$8 sps:$4 sm:$0xff]   ;;  %v11692_v31 = vld [vmem:[%s15982_s0 + $0x1170] ss:$72 sps:$4 sm:$0xff]  }
  0xdd   :  { %7333 = vmatprep.subr.bf16.mxu0 %v11687_v33  ;;  %v11693_v32 = vld [vmem:[%s15982_s0 + $0x898] ss:$72 sps:$4 sm:$0xff]   ;;  %v11696_v33 = vld [vmem:[%s15982_s0 + $0xc] ss:$72 sps:$4 sm:$0xff]  }
  0xe0   :  { %7334 = vmatpush1.bf16.msra.mxu0 %v11685_v34  ;;  %v11697_v34 = vld [vmem:[%s15982_s0 + $0x92c] ss:$72 sps:$4 sm:$0xff]  }
  0xe1   :  { %7335 = vmatprep.subr.bf16.mxu0 %v11705_v35  ;;  %v11694_v35 = vld [vmem:[%s15982_s0 + $0x8] ss:$72 sps:$4 sm:$0xff]  }
  0xe2   :  { %5434 = vmatmul.mubr.bf16.gmra.mrb[80].mxu1 %v11590_v36  ;;  %v11702_v36 = vld [vmem:[%s15982_s0 + $0x928] ss:$72 sps:$4 sm:$0xff]  }
  0xe3   :  { %7039 = vmatmul.mubr.bf16.gmra.mrb[16].mxu0 %v11594_v37  ;;  %5443 = vmatprep.mubr.bf16.mxu1 %v11598_v38  ;;  %v11699_v37 = vld [vmem:[%s15981_s1 + $0x200] ss:$8 sps:$4 sm:$0xff]   ;;  %v11706_v38 = vld [vmem:[%s15982_s0 + $0x9c] ss:$72 sps:$4 sm:$0xff]  }
  0xe4   :  { %7048 = vmatprep.mubr.bf16.mxu0 %v11600_v39  ;;  %7336 = vmatpush1.bf16.msra.mxu0 %v11703_v40  ;;  %v11708_v39 = vld [vmem:[%s15982_s0 + $0x9bc] ss:$72 sps:$4 sm:$0xff]  }
  0xe5   :  { %7337 = vmatprep.subr.bf16.mxu0 %v11723_v41  ;;  %v11719_v40 = vld [vmem:[%s15981_s1 + $0x214] ss:$8 sps:$4 sm:$0xff]   ;;  %v11717_v41 = vld [vmem:[%s15981_s1 + $0x210] ss:$8 sps:$4 sm:$0xff]  }
  0xe8   :  { %7338 = vmatpush1.bf16.msra.mxu0 %v11721_v42  ;;  %v11849_v42 = vld [vmem:[%s15981_s1 + $0x704] ss:$8 sps:$4 sm:$0xff]  }
  0xe9   :  { %7339 = vmatprep.subr.bf16.mxu0 %v11741_v45  ;;  %v11737_v45 = vld [vmem:[%s15981_s1 + $0x224] ss:$8 sps:$4 sm:$0xff]  }
  0xea   :  { %5444 = vmatmul.mubr.bf16.gmra.mrb[84].mxu1 %v11602_v43  ;;  %v11710_v43 = vld [vmem:[%s15982_s0 + $0x98] ss:$72 sps:$4 sm:$0xff]  }
  0xeb   :  { %7049 = vmatmul.mubr.bf16.gmra.mrb[20].mxu0 %v11603_v44  ;;  %5453 = vmatprep.mubr.bf16.mxu1 %v11604_v46  ;;  %v11711_v44 = vld [vmem:[%s15982_s0 + $0x9b8] ss:$72 sps:$4 sm:$0xff]   ;;  %v11712_v46 = vld [vmem:[%s15982_s0 + $0x12c] ss:$72 sps:$4 sm:$0xff]  }
  0xec   :  { %7058 = vmatprep.mubr.bf16.mxu0 %v11606_v47  ;;  %7340 = vmatpush1.bf16.msra.mxu0 %v11739_v48  ;;  %v11714_v47 = vld [vmem:[%s15982_s0 + $0xa4c] ss:$72 sps:$4 sm:$0xff]   ;;  %v11735_v48 = vld [vmem:[%s15981_s1 + $0x220] ss:$8 sps:$4 sm:$0xff]  }
  0xed   :  { %7341 = vmatprep.subr.bf16.mxu0 %v11759_v54  ;;  %v11724_v54 = vld [vmem:[%s15982_s0 + $0x1bc] ss:$72 sps:$4 sm:$0xff]  }
  0xf0   :  { %7342 = vmatpush1.bf16.msra.mxu0 %v11757_v53  ;;  %v11720_v53 = vld [vmem:[%s15982_s0 + $0xa48] ss:$72 sps:$4 sm:$0xff]  }
  0xf1   :  { %7343 = vmatprep.subr.bf16.mxu0 %v11777_v0  ;;  %v11807_v0 = vld [vmem:[%s15981_s1 + $0x260] ss:$8 sps:$4 sm:$0xff]  }
  0xf2   :  { %5454 = vmatmul.mubr.bf16.gmra.mrb[88].mxu1 %v11608_v49  ;;  %v11755_v49 = vld [vmem:[%s15981_s1 + $0x234] ss:$8 sps:$4 sm:$0xff]  }
  0xf3   :  { %7059 = vmatmul.mubr.bf16.gmra.mrb[24].mxu0 %v11612_v50  ;;  %5463 = vmatprep.mubr.bf16.mxu1 %v11616_v51  ;;  %v11753_v50 = vld [vmem:[%s15981_s1 + $0x230] ss:$8 sps:$4 sm:$0xff]   ;;  %v11773_v51 = vld [vmem:[%s15981_s1 + $0x244] ss:$8 sps:$4 sm:$0xff]  }
  0xf4   :  { %7068 = vmatprep.mubr.bf16.mxu0 %v11618_v52  ;;  %7344 = vmatpush1.bf16.msra.mxu0 %v11775_v63  ;;  %v11716_v52 = vld [vmem:[%s15982_s0 + $0x128] ss:$72 sps:$4 sm:$0xff]   ;;  %v11732_v63 = vld [vmem:[%s15982_s0 + $0xb6c] ss:$72 sps:$4 sm:$0xff]  }
  0xf5   :  { %7345 = vmatprep.subr.bf16.mxu0 %v11795_v10  ;;  %v11861_v10 = vld [vmem:[%s15981_s1 + $0x290] ss:$8 sps:$4 sm:$0xff]  }
  0xf8   :  { %7346 = vmatpush1.bf16.msra.mxu0 %v11793_v9  ;;  %v11863_v9 = vld [vmem:[%s15981_s1 + $0x294] ss:$8 sps:$4 sm:$0xff]  }
  0xf9   :  { %7347 = vmatprep.subr.bf16.mxu0 %v11813_v20  ;;  %v11762_v20 = vld [vmem:[%s15982_s0 + $0xd1c] ss:$72 sps:$4 sm:$0xff]  }
  0xfa   :  { %5464 = vmatmul.mubr.bf16.gmra.mrb[92].mxu1 %v11620_v55  ;;  %v11726_v55 = vld [vmem:[%s15982_s0 + $0xadc] ss:$72 sps:$4 sm:$0xff]  }
  0xfb   :  { %7069 = vmatmul.mubr.bf16.gmra.mrb[28].mxu0 %v11621_v56  ;;  %5473 = vmatprep.mubr.bf16.mxu1 %v11622_v57  ;;  %v11771_v56 = vld [vmem:[%s15981_s1 + $0x240] ss:$8 sps:$4 sm:$0xff]   ;;  %v11791_v57 = vld [vmem:[%s15981_s1 + $0x254] ss:$8 sps:$4 sm:$0xff]  }
  0xfc   :  { %7078 = vmatprep.mubr.bf16.mxu0 %v11624_v58  ;;  %7348 = vmatpush1.bf16.msra.mxu0 %v11811_v19  ;;  %v11789_v58 = vld [vmem:[%s15981_s1 + $0x250] ss:$8 sps:$4 sm:$0xff]   ;;  %v11760_v19 = vld [vmem:[%s15982_s0 + $0x3fc] ss:$72 sps:$4 sm:$0xff]  }
  0xfd   :  { %7349 = vmatprep.subr.bf16.mxu0 %v11831_v30  ;;  %v11780_v30 = vld [vmem:[%s15982_s0 + $0xe3c] ss:$72 sps:$4 sm:$0xff]  }
 0x100   :  { %7350 = vmatpush1.bf16.msra.mxu0 %v11829_v29  ;;  %v11778_v29 = vld [vmem:[%s15982_s0 + $0x51c] ss:$72 sps:$4 sm:$0xff]  }
 0x101   :  { %7672 = vmatprep.subr.bf16.mxu0 %v11849_v42  ;;  %v11935_v42 = vld [vmem:[%s15981_s1 + $0x2d4] ss:$8 sps:$4 sm:$0xff]  }
 0x102   :  { %5474 = vmatmul.mubr.bf16.gmra.mrb[96].mxu1 %v11626_v59  ;;  %v11728_v59 = vld [vmem:[%s15982_s0 + $0x1b8] ss:$72 sps:$4 sm:$0xff]  }
 0x103   :  { %7079 = vmatmul.mubr.bf16.gmra.mrb[32].mxu0 %v11630_v60  ;;  %5483 = vmatprep.mubr.bf16.mxu1 %v11634_v61  ;;  %v11729_v60 = vld [vmem:[%s15982_s0 + $0xad8] ss:$72 sps:$4 sm:$0xff]   ;;  %v11809_v61 = vld [vmem:[%s15981_s1 + $0x264] ss:$8 sps:$4 sm:$0xff]  }
 0x104   :  { %7088 = vmatprep.mubr.bf16.mxu0 %v11636_v62  ;;  %v11730_v62 = vld [vmem:[%s15982_s0 + $0x24c] ss:$72 sps:$4 sm:$0xff]  }
 0x10a   :  { %5484 = vmatmul.mubr.bf16.gmra.mrb[100].mxu1 %v11638_v1  ;;  %v11827_v1 = vld [vmem:[%s15981_s1 + $0x274] ss:$8 sps:$4 sm:$0xff]  }
 0x10b   :  { %7089 = vmatmul.mubr.bf16.gmra.mrb[36].mxu0 %v11639_v2  ;;  %5493 = vmatprep.mubr.bf16.mxu1 %v11640_v3  ;;  %v11825_v2 = vld [vmem:[%s15981_s1 + $0x270] ss:$8 sps:$4 sm:$0xff]   ;;  %v11846_v3 = vld [vmem:[%s15981_s1 + $0x284] ss:$8 sps:$4 sm:$0xff]  }
 0x10c   :  { %7098 = vmatprep.mubr.bf16.mxu0 %v11642_v4  ;;  %v11734_v4 = vld [vmem:[%s15982_s0 + $0x248] ss:$72 sps:$4 sm:$0xff]  }
 0x112   :  { %5494 = vmatmul.mubr.bf16.gmra.mrb[104].mxu1 %v11644_v5  ;;  %v11738_v5 = vld [vmem:[%s15982_s0 + $0xb68] ss:$72 sps:$4 sm:$0xff]  }
 0x113   :  { %7099 = vmatmul.mubr.bf16.gmra.mrb[40].mxu0 %v11648_v6  ;;  %5503 = vmatprep.mubr.bf16.mxu1 %v11652_v7  ;;  %v11742_v6 = vld [vmem:[%s15982_s0 + $0x2dc] ss:$72 sps:$4 sm:$0xff]  }
 0x114   :  { %7108 = vmatprep.mubr.bf16.mxu0 %v11654_v8  ;;  %v11744_v7 = vld [vmem:[%s15982_s0 + $0xbfc] ss:$72 sps:$4 sm:$0xff]   ;;  %v11844_v8 = vld [vmem:[%s15981_s1 + $0x280] ss:$8 sps:$4 sm:$0xff]  }
 0x11a   :  { %5504 = vmatmul.mubr.bf16.gmra.mrb[108].mxu1 %v11656_v11  ;;  %v11746_v11 = vld [vmem:[%s15982_s0 + $0x2d8] ss:$72 sps:$4 sm:$0xff]  }
 0x11b   :  { %7109 = vmatmul.mubr.bf16.gmra.mrb[44].mxu0 %v11657_v12  ;;  %5513 = vmatprep.mubr.bf16.mxu1 %v11658_v13  ;;  %v11747_v12 = vld [vmem:[%s15982_s0 + $0xbf8] ss:$72 sps:$4 sm:$0xff]   ;;  %v11881_v13 = vld [vmem:[%s15981_s1 + $0x2a4] ss:$8 sps:$4 sm:$0xff]  }
 0x11c   :  { %7118 = vmatprep.mubr.bf16.mxu0 %v11660_v14  ;;  %v11748_v14 = vld [vmem:[%s15982_s0 + $0x36c] ss:$72 sps:$4 sm:$0xff]  }
 0x122   :  { %5514 = vmatmul.mubr.bf16.gmra.mrb[112].mxu1 %v11662_v15  ;;  %v11750_v15 = vld [vmem:[%s15982_s0 + $0xc8c] ss:$72 sps:$4 sm:$0xff]  }
 0x123   :  { %7119 = vmatmul.mubr.bf16.gmra.mrb[48].mxu0 %v11666_v16  ;;  %5523 = vmatprep.mubr.bf16.mxu1 %v11670_v17  ;;  %v11879_v16 = vld [vmem:[%s15981_s1 + $0x2a0] ss:$8 sps:$4 sm:$0xff]  }
 0x124   :  { %7128 = vmatprep.mubr.bf16.mxu0 %v11672_v18  ;;  %v11752_v17 = vld [vmem:[%s15982_s0 + $0x368] ss:$72 sps:$4 sm:$0xff]  }
 0x125   :  { %v11756_v18 = vld [vmem:[%s15982_s0 + $0xc88] ss:$72 sps:$4 sm:$0xff]  }
 0x12a   :  { %5524 = vmatmul.mubr.bf16.gmra.mrb[116].mxu1 %v11674_v21  ;;  %v11897_v21 = vld [vmem:[%s15981_s1 + $0x2b0] ss:$8 sps:$4 sm:$0xff]  }
 0x12b   :  { %7129 = vmatmul.mubr.bf16.gmra.mrb[52].mxu0 %v11675_v22  ;;  %5533 = vmatprep.mubr.bf16.mxu1 %v11676_v23  ;;  %v11899_v22 = vld [vmem:[%s15981_s1 + $0x2b4] ss:$8 sps:$4 sm:$0xff]   ;;  %v11764_v23 = vld [vmem:[%s15982_s0 + $0x3f8] ss:$72 sps:$4 sm:$0xff]  }
 0x12c   :  { %7138 = vmatprep.mubr.bf16.mxu0 %v11678_v24  ;;  %v11765_v24 = vld [vmem:[%s15982_s0 + $0xd18] ss:$72 sps:$4 sm:$0xff]  }
 0x132   :  { %5534 = vmatmul.mubr.bf16.gmra.mrb[120].mxu1 %v11680_v25  ;;  %v11766_v25 = vld [vmem:[%s15982_s0 + $0x48c] ss:$72 sps:$4 sm:$0xff]  }
 0x133   :  { %7139 = vmatmul.mubr.bf16.gmra.mrb[56].mxu0 %v11684_v26  ;;  %5543 = vmatprep.mubr.bf16.mxu1 %v11688_v27  ;;  %v11768_v26 = vld [vmem:[%s15982_s0 + $0xdac] ss:$72 sps:$4 sm:$0xff]   ;;  %v11770_v27 = vld [vmem:[%s15982_s0 + $0x488] ss:$72 sps:$4 sm:$0xff]  }
 0x134   :  { %7148 = vmatprep.mubr.bf16.mxu0 %v11690_v28  ;;  %v11774_v28 = vld [vmem:[%s15982_s0 + $0xda8] ss:$72 sps:$4 sm:$0xff]  }
 0x13a   :  { %5544 = vmatmul.mubr.bf16.gmra.mrb[124].mxu1 %v11692_v31  ;;  %v11915_v31 = vld [vmem:[%s15981_s1 + $0x2c0] ss:$8 sps:$4 sm:$0xff]  }
 0x13b   :  { %7149 = vmatmul.mubr.bf16.gmra.mrb[60].mxu0 %v11693_v32  ;;  %5586 = vmatprep.mubr.bf16.mxu1 %v11696_v33  ;;  %v11917_v32 = vld [vmem:[%s15981_s1 + $0x2c4] ss:$8 sps:$4 sm:$0xff]   ;;  %v11782_v33 = vld [vmem:[%s15982_s0 + $0x518] ss:$72 sps:$4 sm:$0xff]  }
 0x13c   :  { %7158 = vmatprep.mubr.bf16.mxu0 %v11697_v34  ;;  %v11783_v34 = vld [vmem:[%s15982_s0 + $0xe38] ss:$72 sps:$4 sm:$0xff]  }
 0x142   :  { %5587 = vmatmul.mubr.bf16.vlgmr.msra.gmra.mrb[0].mxu1 %v11694_v35  ;;  %v11784_v35 = vld [vmem:[%s15982_s0 + $0x5ac] ss:$72 sps:$4 sm:$0xff]  }
 0x143   :  { %7159 = vmatmul.mubr.bf16.gmra.mrb[64].mxu0 %v11702_v36  ;;  %5908 = vmatpush1.bf16.msra.mxu1 %v11699_v37  ;;  %v11786_v36 = vld [vmem:[%s15982_s0 + $0xecc] ss:$72 sps:$4 sm:$0xff]   ;;  %v11788_v37 = vld [vmem:[%s15982_s0 + $0x5a8] ss:$72 sps:$4 sm:$0xff]  }
 0x144   :  { %5596 = vmatprep.mubr.bf16.mxu1 %v11706_v38  ;;  %7168 = vmatprep.mubr.bf16.mxu0 %v11708_v39  ;;  %v11792_v38 = vld [vmem:[%s15982_s0 + $0xec8] ss:$72 sps:$4 sm:$0xff]   ;;  %v11796_v39 = vld [vmem:[%s15982_s0 + $0x63c] ss:$72 sps:$4 sm:$0xff]  }
 0x145   :  { %5909 = vmatprep.subr.bf16.mxu1 %v11719_v40  ;;  %v11798_v40 = vld [vmem:[%s15982_s0 + $0xf5c] ss:$72 sps:$4 sm:$0xff]  }
 0x147   :  { %5910 = vmatpush1.bf16.msra.mxu1 %v11717_v41  ;;  %v11933_v41 = vld [vmem:[%s15981_s1 + $0x2d0] ss:$8 sps:$4 sm:$0xff]  }
 0x148   :  { %5911 = vmatprep.subr.bf16.mxu1 %v11737_v45  ;;  %v11802_v45 = vld [vmem:[%s15982_s0 + $0x6cc] ss:$72 sps:$4 sm:$0xff]  }
 0x14a   :  { %5597 = vmatmul.mubr.bf16.gmra.mrb[4].mxu1 %v11710_v43  ;;  %v11800_v43 = vld [vmem:[%s15982_s0 + $0x638] ss:$72 sps:$4 sm:$0xff]  }
 0x14b   :  { %7169 = vmatmul.mubr.bf16.gmra.mrb[68].mxu0 %v11711_v44  ;;  %5606 = vmatprep.mubr.bf16.mxu1 %v11712_v46  ;;  %v11801_v44 = vld [vmem:[%s15982_s0 + $0xf58] ss:$72 sps:$4 sm:$0xff]   ;;  %v11804_v46 = vld [vmem:[%s15982_s0 + $0xfec] ss:$72 sps:$4 sm:$0xff]  }
 0x14c   :  { %7178 = vmatprep.mubr.bf16.mxu0 %v11714_v47  ;;  %5912 = vmatpush1.bf16.msra.mxu1 %v11735_v48  ;;  %v11806_v47 = vld [vmem:[%s15982_s0 + $0x6c8] ss:$72 sps:$4 sm:$0xff]  }
 0x14d   :  { %5913 = vmatprep.subr.bf16.mxu1 %v11755_v49  ;;  %v11810_v48 = vld [vmem:[%s15982_s0 + $0xfe8] ss:$72 sps:$4 sm:$0xff]   ;;  %v11814_v49 = vld [vmem:[%s15982_s0 + $0x75c] ss:$72 sps:$4 sm:$0xff]  }
 0x150   :  { %5914 = vmatpush1.bf16.msra.mxu1 %v11753_v50  ;;  %v11816_v50 = vld [vmem:[%s15982_s0 + $0x107c] ss:$72 sps:$4 sm:$0xff]  }
 0x151   :  { %5915 = vmatprep.subr.bf16.mxu1 %v11773_v51  ;;  %v11951_v51 = vld [vmem:[%s15981_s1 + $0x2e0] ss:$8 sps:$4 sm:$0xff]  }
 0x152   :  { %5607 = vmatmul.mubr.bf16.gmra.mrb[8].mxu1 %v11716_v52  ;;  %v11953_v52 = vld [vmem:[%s15981_s1 + $0x2e4] ss:$8 sps:$4 sm:$0xff]  }
 0x153   :  { %7179 = vmatmul.mubr.bf16.gmra.mrb[72].mxu0 %v11720_v53  ;;  %5616 = vmatprep.mubr.bf16.mxu1 %v11724_v54  ;;  %v11818_v53 = vld [vmem:[%s15982_s0 + $0x758] ss:$72 sps:$4 sm:$0xff]  }
 0x154   :  { %7188 = vmatprep.mubr.bf16.mxu0 %v11726_v55  ;;  %5916 = vmatpush1.bf16.msra.mxu1 %v11771_v56  ;;  %v11819_v54 = vld [vmem:[%s15982_s0 + $0x1078] ss:$72 sps:$4 sm:$0xff]   ;;  %v11820_v55 = vld [vmem:[%s15982_s0 + $0x7ec] ss:$72 sps:$4 sm:$0xff]  }
 0x155   :  { %5917 = vmatprep.subr.bf16.mxu1 %v11791_v57  ;;  %v11822_v56 = vld [vmem:[%s15982_s0 + $0x110c] ss:$72 sps:$4 sm:$0xff]   ;;  %v11824_v57 = vld [vmem:[%s15982_s0 + $0x7e8] ss:$72 sps:$4 sm:$0xff]  }
 0x158   :  { %5918 = vmatpush1.bf16.msra.mxu1 %v11789_v58  ;;  %v11828_v58 = vld [vmem:[%s15982_s0 + $0x1108] ss:$72 sps:$4 sm:$0xff]  }
 0x159   :  { %5919 = vmatprep.subr.bf16.mxu1 %v11809_v61  ;;  %v11969_v61 = vld [vmem:[%s15981_s1 + $0x2f0] ss:$8 sps:$4 sm:$0xff]  }
 0x15a   :  { %5617 = vmatmul.mubr.bf16.gmra.mrb[12].mxu1 %v11728_v59  ;;  %v11832_v59 = vld [vmem:[%s15982_s0 + $0x87c] ss:$72 sps:$4 sm:$0xff]  }
 0x15b   :  { %7189 = vmatmul.mubr.bf16.gmra.mrb[76].mxu0 %v11729_v60  ;;  %5626 = vmatprep.mubr.bf16.mxu1 %v11730_v62  ;;  %v11834_v60 = vld [vmem:[%s15982_s0 + $0x119c] ss:$72 sps:$4 sm:$0xff]  }
 0x15c   :  { %7198 = vmatprep.mubr.bf16.mxu0 %v11732_v63  ;;  %5920 = vmatpush1.bf16.msra.mxu1 %v11807_v0  ;;  %v11971_v62 = vld [vmem:[%s15981_s1 + $0x2f4] ss:$8 sps:$4 sm:$0xff]   ;;  %v11836_v63 = vld [vmem:[%s15982_s0 + $0x878] ss:$72 sps:$4 sm:$0xff]  }
 0x15d   :  { %5921 = vmatprep.subr.bf16.mxu1 %v11827_v1  ;;  %v11837_v0 = vld [vmem:[%s15982_s0 + $0x1198] ss:$72 sps:$4 sm:$0xff]   ;;  %v11838_v1 = vld [vmem:[%s15982_s0 + $0x90c] ss:$72 sps:$4 sm:$0xff]  }
 0x160   :  { %5922 = vmatpush1.bf16.msra.mxu1 %v11825_v2  ;;  %v11842_v2 = vld [vmem:[%s15982_s0 + $0x34] ss:$72 sps:$4 sm:$0xff]  }
 0x161   :  { %5923 = vmatprep.subr.bf16.mxu1 %v11846_v3  ;;  %v11840_v3 = vld [vmem:[%s15982_s0 + $0x30] ss:$72 sps:$4 sm:$0xff]  }
 0x162   :  { %5627 = vmatmul.mubr.bf16.gmra.mrb[16].mxu1 %v11734_v4  ;;  %v11843_v4 = vld [vmem:[%s15982_s0 + $0x908] ss:$72 sps:$4 sm:$0xff]  }
 0x163   :  { %7199 = vmatmul.mubr.bf16.gmra.mrb[80].mxu0 %v11738_v5  ;;  %5636 = vmatprep.mubr.bf16.mxu1 %v11742_v6  ;;  %v11847_v5 = vld [vmem:[%s15981_s1 + $0x700] ss:$8 sps:$4 sm:$0xff]   ;;  %v11850_v6 = vld [vmem:[%s15982_s0 + $0x99c] ss:$72 sps:$4 sm:$0xff]  }
 0x164   :  { %7208 = vmatprep.mubr.bf16.mxu0 %v11744_v7  ;;  %5924 = vmatpush1.bf16.msra.mxu1 %v11844_v8  ;;  %v11852_v7 = vld [vmem:[%s15982_s0 + $0xc4] ss:$72 sps:$4 sm:$0xff]   ;;  %v11867_v8 = vld [vmem:[%s15981_s1 + $0x714] ss:$8 sps:$4 sm:$0xff]  }
 0x165   :  { %5925 = vmatprep.subr.bf16.mxu1 %v11863_v9  ;;  %v11989_v9 = vld [vmem:[%s15981_s1 + $0x304] ss:$8 sps:$4 sm:$0xff]  }
 0x168   :  { %5926 = vmatpush1.bf16.msra.mxu1 %v11861_v10  ;;  %v11865_v10 = vld [vmem:[%s15981_s1 + $0x710] ss:$8 sps:$4 sm:$0xff]  }
 0x169   :  { %5927 = vmatprep.subr.bf16.mxu1 %v11881_v13  ;;  %v11855_v13 = vld [vmem:[%s15982_s0 + $0xc0] ss:$72 sps:$4 sm:$0xff]  }
 0x16a   :  { %5637 = vmatmul.mubr.bf16.gmra.mrb[20].mxu1 %v11746_v11  ;;  %v11885_v11 = vld [vmem:[%s15981_s1 + $0x724] ss:$8 sps:$4 sm:$0xff]  }
 0x16b   :  { %7209 = vmatmul.mubr.bf16.gmra.mrb[84].mxu0 %v11747_v12  ;;  %5646 = vmatprep.mubr.bf16.mxu1 %v11748_v14  ;;  %v11854_v12 = vld [vmem:[%s15982_s0 + $0x998] ss:$72 sps:$4 sm:$0xff]   ;;  %v11856_v14 = vld [vmem:[%s15982_s0 + $0xa2c] ss:$72 sps:$4 sm:$0xff]  }
 0x16c   :  { %7218 = vmatprep.mubr.bf16.mxu0 %v11750_v15  ;;  %5928 = vmatpush1.bf16.msra.mxu1 %v11879_v16  ;;  %v11858_v15 = vld [vmem:[%s15982_s0 + $0x154] ss:$72 sps:$4 sm:$0xff]   ;;  %v11883_v16 = vld [vmem:[%s15981_s1 + $0x720] ss:$8 sps:$4 sm:$0xff]  }
 0x16d   :  { %5929 = vmatprep.subr.bf16.mxu1 %v11899_v22  ;;  %v11868_v22 = vld [vmem:[%s15982_s0 + $0xabc] ss:$72 sps:$4 sm:$0xff]  }
 0x170   :  { %5930 = vmatpush1.bf16.msra.mxu1 %v11897_v21  ;;  %v11864_v21 = vld [vmem:[%s15982_s0 + $0x150] ss:$72 sps:$4 sm:$0xff]  }
 0x171   :  { %5931 = vmatprep.subr.bf16.mxu1 %v11917_v32  ;;  %v11955_v32 = vld [vmem:[%s15981_s1 + $0x760] ss:$8 sps:$4 sm:$0xff]  }
 0x172   :  { %5647 = vmatmul.mubr.bf16.gmra.mrb[24].mxu1 %v11752_v17  ;;  %v11903_v17 = vld [vmem:[%s15981_s1 + $0x734] ss:$8 sps:$4 sm:$0xff]  }
 0x173   :  { %7219 = vmatmul.mubr.bf16.gmra.mrb[88].mxu0 %v11756_v18  ;;  %5656 = vmatprep.mubr.bf16.mxu1 %v11760_v19  ;;  %v11901_v18 = vld [vmem:[%s15981_s1 + $0x730] ss:$8 sps:$4 sm:$0xff]   ;;  %v11921_v19 = vld [vmem:[%s15981_s1 + $0x744] ss:$8 sps:$4 sm:$0xff]  }
 0x174   :  { %7228 = vmatprep.mubr.bf16.mxu0 %v11762_v20  ;;  %5932 = vmatpush1.bf16.msra.mxu1 %v11915_v31  ;;  %v11860_v20 = vld [vmem:[%s15982_s0 + $0xa28] ss:$72 sps:$4 sm:$0xff]   ;;  %v11876_v31 = vld [vmem:[%s15982_s0 + $0x274] ss:$72 sps:$4 sm:$0xff]  }
 0x175   :  { %5933 = vmatprep.subr.bf16.mxu1 %v11935_v42  ;;  %v12009_v42 = vld [vmem:[%s15981_s1 + $0x790] ss:$8 sps:$4 sm:$0xff]  }
 0x178   :  { %5934 = vmatpush1.bf16.msra.mxu1 %v11933_v41  ;;  %v12011_v41 = vld [vmem:[%s15981_s1 + $0x794] ss:$8 sps:$4 sm:$0xff]  }
 0x179   :  { %5935 = vmatprep.subr.bf16.mxu1 %v11953_v52  ;;  %v11906_v52 = vld [vmem:[%s15982_s0 + $0x424] ss:$72 sps:$4 sm:$0xff]  }
 0x17a   :  { %5657 = vmatmul.mubr.bf16.gmra.mrb[28].mxu1 %v11764_v23  ;;  %v11870_v23 = vld [vmem:[%s15982_s0 + $0x1e4] ss:$72 sps:$4 sm:$0xff]  }
 0x17b   :  { %7229 = vmatmul.mubr.bf16.gmra.mrb[92].mxu0 %v11765_v24  ;;  %5666 = vmatprep.mubr.bf16.mxu1 %v11766_v25  ;;  %v11919_v24 = vld [vmem:[%s15981_s1 + $0x740] ss:$8 sps:$4 sm:$0xff]   ;;  %v11939_v25 = vld [vmem:[%s15981_s1 + $0x754] ss:$8 sps:$4 sm:$0xff]  }
 0x17c   :  { %7238 = vmatprep.mubr.bf16.mxu0 %v11768_v26  ;;  %5936 = vmatpush1.bf16.msra.mxu1 %v11951_v51  ;;  %v11937_v26 = vld [vmem:[%s15981_s1 + $0x750] ss:$8 sps:$4 sm:$0xff]   ;;  %v11904_v51 = vld [vmem:[%s15982_s0 + $0xcfc] ss:$72 sps:$4 sm:$0xff]  }
 0x17d   :  { %5937 = vmatprep.subr.bf16.mxu1 %v11971_v62  ;;  %v11924_v62 = vld [vmem:[%s15982_s0 + $0x544] ss:$72 sps:$4 sm:$0xff]  }
 0x180   :  { %5938 = vmatpush1.bf16.msra.mxu1 %v11969_v61  ;;  %v11922_v61 = vld [vmem:[%s15982_s0 + $0xe1c] ss:$72 sps:$4 sm:$0xff]  }
 0x181   :  { %6260 = vmatprep.subr.bf16.mxu1 %v11989_v9  ;;  %v12081_v9 = vld [vmem:[%s15981_s1 + $0x7d0] ss:$8 sps:$4 sm:$0xff]  }
 0x182   :  { %5667 = vmatmul.mubr.bf16.gmra.mrb[32].mxu1 %v11770_v27  ;;  %v11957_v27 = vld [vmem:[%s15981_s1 + $0x764] ss:$8 sps:$4 sm:$0xff]  }
 0x183   :  { %7239 = vmatmul.mubr.bf16.gmra.mrb[96].mxu0 %v11774_v28  ;;  %5676 = vmatprep.mubr.bf16.mxu1 %v11778_v29  ;;  %v11872_v28 = vld [vmem:[%s15982_s0 + $0xab8] ss:$72 sps:$4 sm:$0xff]  }
 0x184   :  { %7248 = vmatprep.mubr.bf16.mxu0 %v11780_v30  ;;  %v11873_v29 = vld [vmem:[%s15982_s0 + $0x1e0] ss:$72 sps:$4 sm:$0xff]   ;;  %v11874_v30 = vld [vmem:[%s15982_s0 + $0xb4c] ss:$72 sps:$4 sm:$0xff]  }
 0x18a   :  { %5677 = vmatmul.mubr.bf16.gmra.mrb[36].mxu1 %v11782_v33  ;;  %v11975_v33 = vld [vmem:[%s15981_s1 + $0x774] ss:$8 sps:$4 sm:$0xff]  }
 0x18b   :  { %7249 = vmatmul.mubr.bf16.gmra.mrb[100].mxu0 %v11783_v34  ;;  %5686 = vmatprep.mubr.bf16.mxu1 %v11784_v35  ;;  %v11973_v34 = vld [vmem:[%s15981_s1 + $0x770] ss:$8 sps:$4 sm:$0xff]   ;;  %v11993_v35 = vld [vmem:[%s15981_s1 + $0x784] ss:$8 sps:$4 sm:$0xff]  }
 0x18c   :  { %7258 = vmatprep.mubr.bf16.mxu0 %v11786_v36  ;;  %v11878_v36 = vld [vmem:[%s15982_s0 + $0xb48] ss:$72 sps:$4 sm:$0xff]  }
 0x192   :  { %5687 = vmatmul.mubr.bf16.gmra.mrb[40].mxu1 %v11788_v37  ;;  %v11882_v37 = vld [vmem:[%s15982_s0 + $0x270] ss:$72 sps:$4 sm:$0xff]  }
 0x193   :  { %7259 = vmatmul.mubr.bf16.gmra.mrb[104].mxu0 %v11792_v38  ;;  %5696 = vmatprep.mubr.bf16.mxu1 %v11796_v39  ;;  %v11886_v38 = vld [vmem:[%s15982_s0 + $0xbdc] ss:$72 sps:$4 sm:$0xff]  }
 0x194   :  { %7268 = vmatprep.mubr.bf16.mxu0 %v11798_v40  ;;  %v11888_v39 = vld [vmem:[%s15982_s0 + $0x304] ss:$72 sps:$4 sm:$0xff]   ;;  %v11991_v40 = vld [vmem:[%s15981_s1 + $0x780] ss:$8 sps:$4 sm:$0xff]  }
 0x19a   :  { %5697 = vmatmul.mubr.bf16.gmra.mrb[44].mxu1 %v11800_v43  ;;  %v12029_v43 = vld [vmem:[%s15981_s1 + $0x7a4] ss:$8 sps:$4 sm:$0xff]  }
 0x19b   :  { %7269 = vmatmul.mubr.bf16.gmra.mrb[108].mxu0 %v11801_v44  ;;  %5706 = vmatprep.mubr.bf16.mxu1 %v11802_v45  ;;  %v11890_v44 = vld [vmem:[%s15982_s0 + $0xbd8] ss:$72 sps:$4 sm:$0xff]  }
 0x19c   :  { %7278 = vmatprep.mubr.bf16.mxu0 %v11804_v46  ;;  %v11891_v45 = vld [vmem:[%s15982_s0 + $0x300] ss:$72 sps:$4 sm:$0xff]   ;;  %v11892_v46 = vld [vmem:[%s15982_s0 + $0xc6c] ss:$72 sps:$4 sm:$0xff]  }
 0x1a2   :  { %5707 = vmatmul.mubr.bf16.gmra.mrb[48].mxu1 %v11806_v47  ;;  %v11894_v47 = vld [vmem:[%s15982_s0 + $0x394] ss:$72 sps:$4 sm:$0xff]  }
 0x1a3   :  { %7279 = vmatmul.mubr.bf16.gmra.mrb[112].mxu0 %v11810_v48  ;;  %5716 = vmatprep.mubr.bf16.mxu1 %v11814_v49  ;;  %v12027_v48 = vld [vmem:[%s15981_s1 + $0x7a0] ss:$8 sps:$4 sm:$0xff]  }
 0x1a4   :  { %7288 = vmatprep.mubr.bf16.mxu0 %v11816_v50  ;;  %v11896_v49 = vld [vmem:[%s15982_s0 + $0xc68] ss:$72 sps:$4 sm:$0xff]  }
 0x1a5   :  { %v11900_v50 = vld [vmem:[%s15982_s0 + $0x390] ss:$72 sps:$4 sm:$0xff]  }
 0x1aa   :  { %5717 = vmatmul.mubr.bf16.gmra.mrb[52].mxu1 %v11818_v53  ;;  %v12045_v53 = vld [vmem:[%s15981_s1 + $0x7b0] ss:$8 sps:$4 sm:$0xff]  }
 0x1ab   :  { %7289 = vmatmul.mubr.bf16.gmra.mrb[116].mxu0 %v11819_v54  ;;  %5726 = vmatprep.mubr.bf16.mxu1 %v11820_v55  ;;  %v12047_v54 = vld [vmem:[%s15981_s1 + $0x7b4] ss:$8 sps:$4 sm:$0xff]   ;;  %v11908_v55 = vld [vmem:[%s15982_s0 + $0xcf8] ss:$72 sps:$4 sm:$0xff]  }
 0x1ac   :  { %7298 = vmatprep.mubr.bf16.mxu0 %v11822_v56  ;;  %v11909_v56 = vld [vmem:[%s15982_s0 + $0x420] ss:$72 sps:$4 sm:$0xff]  }
 0x1b2   :  { %5727 = vmatmul.mubr.bf16.gmra.mrb[56].mxu1 %v11824_v57  ;;  %v11910_v57 = vld [vmem:[%s15982_s0 + $0xd8c] ss:$72 sps:$4 sm:$0xff]  }
 0x1b3   :  { %7299 = vmatmul.mubr.bf16.gmra.mrb[120].mxu0 %v11828_v58  ;;  %5736 = vmatprep.mubr.bf16.mxu1 %v11832_v59  ;;  %v11912_v58 = vld [vmem:[%s15982_s0 + $0x4b4] ss:$72 sps:$4 sm:$0xff]   ;;  %v11914_v59 = vld [vmem:[%s15982_s0 + $0xd88] ss:$72 sps:$4 sm:$0xff]  }
 0x1b4   :  { %7308 = vmatprep.mubr.bf16.mxu0 %v11834_v60  ;;  %v11918_v60 = vld [vmem:[%s15982_s0 + $0x4b0] ss:$72 sps:$4 sm:$0xff]  }
 0x1ba   :  { %5737 = vmatmul.mubr.bf16.gmra.mrb[60].mxu1 %v11836_v63  ;;  %v12063_v63 = vld [vmem:[%s15981_s1 + $0x7c0] ss:$8 sps:$4 sm:$0xff]  }
 0x1bb   :  { %7309 = vmatmul.mubr.bf16.gmra.mrb[124].mxu0 %v11837_v0  ;;  %5746 = vmatprep.mubr.bf16.mxu1 %v11838_v1  ;;  %v12065_v0 = vld [vmem:[%s15981_s1 + $0x7c4] ss:$8 sps:$4 sm:$0xff]   ;;  %v11926_v1 = vld [vmem:[%s15982_s0 + $0xe18] ss:$72 sps:$4 sm:$0xff]  }
 0x1bc   :  { %7351 = vmatprep.mubr.bf16.mxu0 %v11842_v2  ;;  %v11927_v2 = vld [vmem:[%s15982_s0 + $0x540] ss:$72 sps:$4 sm:$0xff]  }
 0x1c2   :  { %5747 = vmatmul.mubr.bf16.gmra.mrb[64].mxu1 %v11843_v4  ;;  %v11930_v4 = vld [vmem:[%s15982_s0 + $0x5d4] ss:$72 sps:$4 sm:$0xff]  }
 0x1c3   :  { %7352 = vmatmul.mubr.bf16.vlgmr.msra.gmra.mrb[0].mxu0 %v11840_v3  ;;  %5756 = vmatprep.mubr.bf16.mxu1 %v11850_v6  ;;  %v11928_v3 = vld [vmem:[%s15982_s0 + $0xeac] ss:$72 sps:$4 sm:$0xff]   ;;  %v11936_v6 = vld [vmem:[%s15982_s0 + $0x5d0] ss:$72 sps:$4 sm:$0xff]  }
 0x1c4   :  { %7673 = vmatpush1.bf16.msra.mxu0 %v11847_v5  ;;  %7361 = vmatprep.mubr.bf16.mxu0 %v11852_v7  ;;  %v11932_v5 = vld [vmem:[%s15982_s0 + $0xea8] ss:$72 sps:$4 sm:$0xff]   ;;  %v11940_v7 = vld [vmem:[%s15982_s0 + $0xf3c] ss:$72 sps:$4 sm:$0xff]  }
 0x1c5   :  { %7674 = vmatprep.subr.bf16.mxu0 %v11867_v8  ;;  %v11942_v8 = vld [vmem:[%s15982_s0 + $0x664] ss:$72 sps:$4 sm:$0xff]  }
 0x1c8   :  { %7675 = vmatpush1.bf16.msra.mxu0 %v11865_v10  ;;  %v12083_v10 = vld [vmem:[%s15981_s1 + $0x7d4] ss:$8 sps:$4 sm:$0xff]  }
 0x1c9   :  { %7676 = vmatprep.subr.bf16.mxu0 %v11885_v11  ;;  %v11944_v11 = vld [vmem:[%s15982_s0 + $0xf38] ss:$72 sps:$4 sm:$0xff]  }
 0x1ca   :  { %5757 = vmatmul.mubr.bf16.gmra.mrb[68].mxu1 %v11854_v12  ;;  %v11945_v12 = vld [vmem:[%s15982_s0 + $0x660] ss:$72 sps:$4 sm:$0xff]  }
 0x1cb   :  { %7362 = vmatmul.mubr.bf16.gmra.mrb[4].mxu0 %v11855_v13  ;;  %5766 = vmatprep.mubr.bf16.mxu1 %v11856_v14  ;;  %v11946_v13 = vld [vmem:[%s15982_s0 + $0xfcc] ss:$72 sps:$4 sm:$0xff]  }
 0x1cc   :  { %7371 = vmatprep.mubr.bf16.mxu0 %v11858_v15  ;;  %7677 = vmatpush1.bf16.msra.mxu0 %v11883_v16  ;;  %v11948_v14 = vld [vmem:[%s15982_s0 + $0x6f4] ss:$72 sps:$4 sm:$0xff]   ;;  %v11950_v15 = vld [vmem:[%s15982_s0 + $0xfc8] ss:$72 sps:$4 sm:$0xff]  }
 0x1cd   :  { %7678 = vmatprep.subr.bf16.mxu0 %v11903_v17  ;;  %v11954_v16 = vld [vmem:[%s15982_s0 + $0x6f0] ss:$72 sps:$4 sm:$0xff]   ;;  %v11958_v17 = vld [vmem:[%s15982_s0 + $0x105c] ss:$72 sps:$4 sm:$0xff]  }
 0x1d0   :  { %7679 = vmatpush1.bf16.msra.mxu0 %v11901_v18  ;;  %v11960_v18 = vld [vmem:[%s15982_s0 + $0x784] ss:$72 sps:$4 sm:$0xff]  }
 0x1d1   :  { %7680 = vmatprep.subr.bf16.mxu0 %v11921_v19  ;;  %v12099_v19 = vld [vmem:[%s15981_s1 + $0x7e0] ss:$8 sps:$4 sm:$0xff]  }
 0x1d2   :  { %5767 = vmatmul.mubr.bf16.gmra.mrb[72].mxu1 %v11860_v20  ;;  %v12101_v20 = vld [vmem:[%s15981_s1 + $0x7e4] ss:$8 sps:$4 sm:$0xff]  }
 0x1d3   :  { %7372 = vmatmul.mubr.bf16.gmra.mrb[8].mxu0 %v11864_v21  ;;  %5776 = vmatprep.mubr.bf16.mxu1 %v11868_v22  ;;  %v11962_v21 = vld [vmem:[%s15982_s0 + $0x1058] ss:$72 sps:$4 sm:$0xff]  }
 0x1d4   :  { %7381 = vmatprep.mubr.bf16.mxu0 %v11870_v23  ;;  %7681 = vmatpush1.bf16.msra.mxu0 %v11919_v24  ;;  %v11963_v22 = vld [vmem:[%s15982_s0 + $0x780] ss:$72 sps:$4 sm:$0xff]   ;;  %v11964_v23 = vld [vmem:[%s15982_s0 + $0x10ec] ss:$72 sps:$4 sm:$0xff]  }
 0x1d5   :  { %7682 = vmatprep.subr.bf16.mxu0 %v11939_v25  ;;  %v11966_v24 = vld [vmem:[%s15982_s0 + $0x814] ss:$72 sps:$4 sm:$0xff]   ;;  %v11968_v25 = vld [vmem:[%s15982_s0 + $0x10e8] ss:$72 sps:$4 sm:$0xff]  }
 0x1d8   :  { %7683 = vmatpush1.bf16.msra.mxu0 %v11937_v26  ;;  %v11972_v26 = vld [vmem:[%s15982_s0 + $0x810] ss:$72 sps:$4 sm:$0xff]  }
 0x1d9   :  { %7684 = vmatprep.subr.bf16.mxu0 %v11957_v27  ;;  %v11976_v27 = vld [vmem:[%s15982_s0 + $0x117c] ss:$72 sps:$4 sm:$0xff]  }
 0x1da   :  { %5777 = vmatmul.mubr.bf16.gmra.mrb[76].mxu1 %v11872_v28  ;;  %v11978_v28 = vld [vmem:[%s15982_s0 + $0x8a4] ss:$72 sps:$4 sm:$0xff]  }
 0x1db   :  { %7382 = vmatmul.mubr.bf16.gmra.mrb[12].mxu0 %v11873_v29  ;;  %5786 = vmatprep.mubr.bf16.mxu1 %v11874_v30  ;;  %v12117_v29 = vld [vmem:[%s15981_s1 + $0x7f0] ss:$8 sps:$4 sm:$0xff]   ;;  %v12119_v30 = vld [vmem:[%s15981_s1 + $0x7f4] ss:$8 sps:$4 sm:$0xff]  }
 0x1dc   :  { %7391 = vmatprep.mubr.bf16.mxu0 %v11876_v31  ;;  %7685 = vmatpush1.bf16.msra.mxu0 %v11955_v32  ;;  %v11980_v31 = vld [vmem:[%s15982_s0 + $0x1178] ss:$72 sps:$4 sm:$0xff]  }
 0x1dd   :  { %7686 = vmatprep.subr.bf16.mxu0 %v11975_v33  ;;  %v11981_v32 = vld [vmem:[%s15982_s0 + $0x8a0] ss:$72 sps:$4 sm:$0xff]   ;;  %v11984_v33 = vld [vmem:[%s15982_s0 + $0x14] ss:$72 sps:$4 sm:$0xff]  }
 0x1e0   :  { %7687 = vmatpush1.bf16.msra.mxu0 %v11973_v34  ;;  %v11985_v34 = vld [vmem:[%s15982_s0 + $0x934] ss:$72 sps:$4 sm:$0xff]  }
 0x1e1   :  { %7688 = vmatprep.subr.bf16.mxu0 %v11993_v35  ;;  %v11982_v35 = vld [vmem:[%s15982_s0 + $0x10] ss:$72 sps:$4 sm:$0xff]  }
 0x1e2   :  { %5787 = vmatmul.mubr.bf16.gmra.mrb[80].mxu1 %v11878_v36  ;;  %v11990_v36 = vld [vmem:[%s15982_s0 + $0x930] ss:$72 sps:$4 sm:$0xff]  }
 0x1e3   :  { %7392 = vmatmul.mubr.bf16.gmra.mrb[16].mxu0 %v11882_v37  ;;  %5796 = vmatprep.mubr.bf16.mxu1 %v11886_v38  ;;  %v11987_v37 = vld [vmem:[%s15981_s1 + $0x300] ss:$8 sps:$4 sm:$0xff]   ;;  %v11994_v38 = vld [vmem:[%s15982_s0 + $0xa4] ss:$72 sps:$4 sm:$0xff]  }
 0x1e4   :  { %7401 = vmatprep.mubr.bf16.mxu0 %v11888_v39  ;;  %7689 = vmatpush1.bf16.msra.mxu0 %v11991_v40  ;;  %v11996_v39 = vld [vmem:[%s15982_s0 + $0x9c4] ss:$72 sps:$4 sm:$0xff]   ;;  %v12007_v40 = vld [vmem:[%s15981_s1 + $0x314] ss:$8 sps:$4 sm:$0xff]  }
 0x1e5   :  { %7690 = vmatprep.subr.bf16.mxu0 %v12011_v41  ;;  %v12005_v41 = vld [vmem:[%s15981_s1 + $0x310] ss:$8 sps:$4 sm:$0xff]  }
 0x1e8   :  { %7691 = vmatpush1.bf16.msra.mxu0 %v12009_v42  ;;  %v12137_v42 = vld [vmem:[%s15981_s1 + $0x804] ss:$8 sps:$4 sm:$0xff]  }
 0x1e9   :  { %7692 = vmatprep.subr.bf16.mxu0 %v12029_v43  ;;  %v12025_v43 = vld [vmem:[%s15981_s1 + $0x324] ss:$8 sps:$4 sm:$0xff]  }
 0x1ea   :  { %5797 = vmatmul.mubr.bf16.gmra.mrb[84].mxu1 %v11890_v44  ;;  %v11998_v44 = vld [vmem:[%s15982_s0 + $0xa0] ss:$72 sps:$4 sm:$0xff]  }
 0x1eb   :  { %7402 = vmatmul.mubr.bf16.gmra.mrb[20].mxu0 %v11891_v45  ;;  %5806 = vmatprep.mubr.bf16.mxu1 %v11892_v46  ;;  %v11999_v45 = vld [vmem:[%s15982_s0 + $0x9c0] ss:$72 sps:$4 sm:$0xff]   ;;  %v12000_v46 = vld [vmem:[%s15982_s0 + $0x134] ss:$72 sps:$4 sm:$0xff]  }
 0x1ec   :  { %7411 = vmatprep.mubr.bf16.mxu0 %v11894_v47  ;;  %7693 = vmatpush1.bf16.msra.mxu0 %v12027_v48  ;;  %v12002_v47 = vld [vmem:[%s15982_s0 + $0xa54] ss:$72 sps:$4 sm:$0xff]   ;;  %v12023_v48 = vld [vmem:[%s15981_s1 + $0x320] ss:$8 sps:$4 sm:$0xff]  }
 0x1ed   :  { %7694 = vmatprep.subr.bf16.mxu0 %v12047_v54  ;;  %v12012_v54 = vld [vmem:[%s15982_s0 + $0x1c4] ss:$72 sps:$4 sm:$0xff]  }
 0x1f0   :  { %7695 = vmatpush1.bf16.msra.mxu0 %v12045_v53  ;;  %v12008_v53 = vld [vmem:[%s15982_s0 + $0xa50] ss:$72 sps:$4 sm:$0xff]  }
 0x1f1   :  { %7696 = vmatprep.subr.bf16.mxu0 %v12065_v0  ;;  %v12095_v0 = vld [vmem:[%s15981_s1 + $0x360] ss:$8 sps:$4 sm:$0xff]  }
 0x1f2   :  { %5807 = vmatmul.mubr.bf16.gmra.mrb[88].mxu1 %v11896_v49  ;;  %v12043_v49 = vld [vmem:[%s15981_s1 + $0x334] ss:$8 sps:$4 sm:$0xff]  }
 0x1f3   :  { %7412 = vmatmul.mubr.bf16.gmra.mrb[24].mxu0 %v11900_v50  ;;  %5816 = vmatprep.mubr.bf16.mxu1 %v11904_v51  ;;  %v12041_v50 = vld [vmem:[%s15981_s1 + $0x330] ss:$8 sps:$4 sm:$0xff]   ;;  %v12061_v51 = vld [vmem:[%s15981_s1 + $0x344] ss:$8 sps:$4 sm:$0xff]  }
 0x1f4   :  { %7421 = vmatprep.mubr.bf16.mxu0 %v11906_v52  ;;  %7697 = vmatpush1.bf16.msra.mxu0 %v12063_v63  ;;  %v12004_v52 = vld [vmem:[%s15982_s0 + $0x130] ss:$72 sps:$4 sm:$0xff]   ;;  %v12020_v63 = vld [vmem:[%s15982_s0 + $0xb74] ss:$72 sps:$4 sm:$0xff]  }
 0x1f5   :  { %7698 = vmatprep.subr.bf16.mxu0 %v12083_v10  ;;  %v12149_v10 = vld [vmem:[%s15981_s1 + $0x390] ss:$8 sps:$4 sm:$0xff]  }
 0x1f8   :  { %7699 = vmatpush1.bf16.msra.mxu0 %v12081_v9  ;;  %v12151_v9 = vld [vmem:[%s15981_s1 + $0x394] ss:$8 sps:$4 sm:$0xff]  }
 0x1f9   :  { %7700 = vmatprep.subr.bf16.mxu0 %v12101_v20  ;;  %v12050_v20 = vld [vmem:[%s15982_s0 + $0xd24] ss:$72 sps:$4 sm:$0xff]  }
 0x1fa   :  { %5817 = vmatmul.mubr.bf16.gmra.mrb[92].mxu1 %v11908_v55  ;;  %v12014_v55 = vld [vmem:[%s15982_s0 + $0xae4] ss:$72 sps:$4 sm:$0xff]  }
 0x1fb   :  { %7422 = vmatmul.mubr.bf16.gmra.mrb[28].mxu0 %v11909_v56  ;;  %5826 = vmatprep.mubr.bf16.mxu1 %v11910_v57  ;;  %v12059_v56 = vld [vmem:[%s15981_s1 + $0x340] ss:$8 sps:$4 sm:$0xff]   ;;  %v12079_v57 = vld [vmem:[%s15981_s1 + $0x354] ss:$8 sps:$4 sm:$0xff]  }
 0x1fc   :  { %7431 = vmatprep.mubr.bf16.mxu0 %v11912_v58  ;;  %7701 = vmatpush1.bf16.msra.mxu0 %v12099_v19  ;;  %v12077_v58 = vld [vmem:[%s15981_s1 + $0x350] ss:$8 sps:$4 sm:$0xff]   ;;  %v12048_v19 = vld [vmem:[%s15982_s0 + $0x404] ss:$72 sps:$4 sm:$0xff]  }
 0x1fd   :  { %7702 = vmatprep.subr.bf16.mxu0 %v12119_v30  ;;  %v12068_v30 = vld [vmem:[%s15982_s0 + $0xe44] ss:$72 sps:$4 sm:$0xff]  }
 0x200   :  { %7703 = vmatpush1.bf16.msra.mxu0 %v12117_v29  ;;  %v12066_v29 = vld [vmem:[%s15982_s0 + $0x524] ss:$72 sps:$4 sm:$0xff]  }
 0x201   :  { %8025 = vmatprep.subr.bf16.mxu0 %v12137_v42  ;;  %v12223_v42 = vld [vmem:[%s15981_s1 + $0x3d4] ss:$8 sps:$4 sm:$0xff]  }
 0x202   :  { %5827 = vmatmul.mubr.bf16.gmra.mrb[96].mxu1 %v11914_v59  ;;  %v12097_v59 = vld [vmem:[%s15981_s1 + $0x364] ss:$8 sps:$4 sm:$0xff]  }
 0x203   :  { %7432 = vmatmul.mubr.bf16.gmra.mrb[32].mxu0 %v11918_v60  ;;  %5836 = vmatprep.mubr.bf16.mxu1 %v11922_v61  ;;  %v12016_v60 = vld [vmem:[%s15982_s0 + $0x1c0] ss:$72 sps:$4 sm:$0xff]  }
 0x204   :  { %7441 = vmatprep.mubr.bf16.mxu0 %v11924_v62  ;;  %v12017_v61 = vld [vmem:[%s15982_s0 + $0xae0] ss:$72 sps:$4 sm:$0xff]   ;;  %v12018_v62 = vld [vmem:[%s15982_s0 + $0x254] ss:$72 sps:$4 sm:$0xff]  }
 0x20a   :  { %5837 = vmatmul.mubr.bf16.gmra.mrb[100].mxu1 %v11926_v1  ;;  %v12115_v1 = vld [vmem:[%s15981_s1 + $0x374] ss:$8 sps:$4 sm:$0xff]  }
 0x20b   :  { %7442 = vmatmul.mubr.bf16.gmra.mrb[36].mxu0 %v11927_v2  ;;  %5846 = vmatprep.mubr.bf16.mxu1 %v11928_v3  ;;  %v12113_v2 = vld [vmem:[%s15981_s1 + $0x370] ss:$8 sps:$4 sm:$0xff]   ;;  %v12134_v3 = vld [vmem:[%s15981_s1 + $0x384] ss:$8 sps:$4 sm:$0xff]  }
 0x20c   :  { %7451 = vmatprep.mubr.bf16.mxu0 %v11930_v4  ;;  %v12022_v4 = vld [vmem:[%s15982_s0 + $0x250] ss:$72 sps:$4 sm:$0xff]  }
 0x212   :  { %5847 = vmatmul.mubr.bf16.gmra.mrb[104].mxu1 %v11932_v5  ;;  %v12026_v5 = vld [vmem:[%s15982_s0 + $0xb70] ss:$72 sps:$4 sm:$0xff]  }
 0x213   :  { %7452 = vmatmul.mubr.bf16.gmra.mrb[40].mxu0 %v11936_v6  ;;  %5856 = vmatprep.mubr.bf16.mxu1 %v11940_v7  ;;  %v12030_v6 = vld [vmem:[%s15982_s0 + $0x2e4] ss:$72 sps:$4 sm:$0xff]  }
 0x214   :  { %7461 = vmatprep.mubr.bf16.mxu0 %v11942_v8  ;;  %v12032_v7 = vld [vmem:[%s15982_s0 + $0xc04] ss:$72 sps:$4 sm:$0xff]   ;;  %v12132_v8 = vld [vmem:[%s15981_s1 + $0x380] ss:$8 sps:$4 sm:$0xff]  }
 0x21a   :  { %5857 = vmatmul.mubr.bf16.gmra.mrb[108].mxu1 %v11944_v11  ;;  %v12169_v11 = vld [vmem:[%s15981_s1 + $0x3a4] ss:$8 sps:$4 sm:$0xff]  }
 0x21b   :  { %7462 = vmatmul.mubr.bf16.gmra.mrb[44].mxu0 %v11945_v12  ;;  %5866 = vmatprep.mubr.bf16.mxu1 %v11946_v13  ;;  %v12034_v12 = vld [vmem:[%s15982_s0 + $0x2e0] ss:$72 sps:$4 sm:$0xff]  }
 0x21c   :  { %7471 = vmatprep.mubr.bf16.mxu0 %v11948_v14  ;;  %v12035_v13 = vld [vmem:[%s15982_s0 + $0xc00] ss:$72 sps:$4 sm:$0xff]   ;;  %v12036_v14 = vld [vmem:[%s15982_s0 + $0x374] ss:$72 sps:$4 sm:$0xff]  }
 0x222   :  { %5867 = vmatmul.mubr.bf16.gmra.mrb[112].mxu1 %v11950_v15  ;;  %v12038_v15 = vld [vmem:[%s15982_s0 + $0xc94] ss:$72 sps:$4 sm:$0xff]  }
 0x223   :  { %7472 = vmatmul.mubr.bf16.gmra.mrb[48].mxu0 %v11954_v16  ;;  %5876 = vmatprep.mubr.bf16.mxu1 %v11958_v17  ;;  %v12167_v16 = vld [vmem:[%s15981_s1 + $0x3a0] ss:$8 sps:$4 sm:$0xff]   ;;  %v12040_v17 = vld [vmem:[%s15982_s0 + $0x370] ss:$72 sps:$4 sm:$0xff]  }
 0x224   :  { %7481 = vmatprep.mubr.bf16.mxu0 %v11960_v18  ;;  %v12044_v18 = vld [vmem:[%s15982_s0 + $0xc90] ss:$72 sps:$4 sm:$0xff]  }
 0x22a   :  { %5877 = vmatmul.mubr.bf16.gmra.mrb[116].mxu1 %v11962_v21  ;;  %v12185_v21 = vld [vmem:[%s15981_s1 + $0x3b0] ss:$8 sps:$4 sm:$0xff]  }
 0x22b   :  { %7482 = vmatmul.mubr.bf16.gmra.mrb[52].mxu0 %v11963_v22  ;;  %5886 = vmatprep.mubr.bf16.mxu1 %v11964_v23  ;;  %v12187_v22 = vld [vmem:[%s15981_s1 + $0x3b4] ss:$8 sps:$4 sm:$0xff]   ;;  %v12052_v23 = vld [vmem:[%s15982_s0 + $0x400] ss:$72 sps:$4 sm:$0xff]  }
 0x22c   :  { %7491 = vmatprep.mubr.bf16.mxu0 %v11966_v24  ;;  %v12053_v24 = vld [vmem:[%s15982_s0 + $0xd20] ss:$72 sps:$4 sm:$0xff]  }
 0x232   :  { %5887 = vmatmul.mubr.bf16.gmra.mrb[120].mxu1 %v11968_v25  ;;  %v12054_v25 = vld [vmem:[%s15982_s0 + $0x494] ss:$72 sps:$4 sm:$0xff]  }
 0x233   :  { %7492 = vmatmul.mubr.bf16.gmra.mrb[56].mxu0 %v11972_v26  ;;  %5896 = vmatprep.mubr.bf16.mxu1 %v11976_v27  ;;  %v12056_v26 = vld [vmem:[%s15982_s0 + $0xdb4] ss:$72 sps:$4 sm:$0xff]   ;;  %v12058_v27 = vld [vmem:[%s15982_s0 + $0x490] ss:$72 sps:$4 sm:$0xff]  }
 0x234   :  { %7501 = vmatprep.mubr.bf16.mxu0 %v11978_v28  ;;  %v12062_v28 = vld [vmem:[%s15982_s0 + $0xdb0] ss:$72 sps:$4 sm:$0xff]  }
 0x23a   :  { %5897 = vmatmul.mubr.bf16.gmra.mrb[124].mxu1 %v11980_v31  ;;  %v12203_v31 = vld [vmem:[%s15981_s1 + $0x3c0] ss:$8 sps:$4 sm:$0xff]  }
 0x23b   :  { %7502 = vmatmul.mubr.bf16.gmra.mrb[60].mxu0 %v11981_v32  ;;  %5939 = vmatprep.mubr.bf16.mxu1 %v11984_v33  ;;  %v12205_v32 = vld [vmem:[%s15981_s1 + $0x3c4] ss:$8 sps:$4 sm:$0xff]   ;;  %v12070_v33 = vld [vmem:[%s15982_s0 + $0x520] ss:$72 sps:$4 sm:$0xff]  }
 0x23c   :  { %7511 = vmatprep.mubr.bf16.mxu0 %v11985_v34  ;;  %v12071_v34 = vld [vmem:[%s15982_s0 + $0xe40] ss:$72 sps:$4 sm:$0xff]  }
 0x242   :  { %5940 = vmatmul.mubr.bf16.vlgmr.msra.gmra.mrb[0].mxu1 %v11982_v35  ;;  %v12072_v35 = vld [vmem:[%s15982_s0 + $0x5b4] ss:$72 sps:$4 sm:$0xff]  }
 0x243   :  { %7512 = vmatmul.mubr.bf16.gmra.mrb[64].mxu0 %v11990_v36  ;;  %6261 = vmatpush1.bf16.msra.mxu1 %v11987_v37  ;;  %v12074_v36 = vld [vmem:[%s15982_s0 + $0xed4] ss:$72 sps:$4 sm:$0xff]   ;;  %v12076_v37 = vld [vmem:[%s15982_s0 + $0x5b0] ss:$72 sps:$4 sm:$0xff]  }
 0x244   :  { %5949 = vmatprep.mubr.bf16.mxu1 %v11994_v38  ;;  %7521 = vmatprep.mubr.bf16.mxu0 %v11996_v39  ;;  %v12080_v38 = vld [vmem:[%s15982_s0 + $0xed0] ss:$72 sps:$4 sm:$0xff]   ;;  %v12084_v39 = vld [vmem:[%s15982_s0 + $0x644] ss:$72 sps:$4 sm:$0xff]  }
 0x245   :  { %6262 = vmatprep.subr.bf16.mxu1 %v12007_v40  ;;  %v12086_v40 = vld [vmem:[%s15982_s0 + $0xf64] ss:$72 sps:$4 sm:$0xff]  }
 0x247   :  { %6263 = vmatpush1.bf16.msra.mxu1 %v12005_v41  ;;  %v12221_v41 = vld [vmem:[%s15981_s1 + $0x3d0] ss:$8 sps:$4 sm:$0xff]  }
 0x248   :  { %6264 = vmatprep.subr.bf16.mxu1 %v12025_v43  ;;  %v12088_v43 = vld [vmem:[%s15982_s0 + $0x640] ss:$72 sps:$4 sm:$0xff]  }
 0x24a   :  { %5950 = vmatmul.mubr.bf16.gmra.mrb[4].mxu1 %v11998_v44  ;;  %v12089_v44 = vld [vmem:[%s15982_s0 + $0xf60] ss:$72 sps:$4 sm:$0xff]  }
 0x24b   :  { %7522 = vmatmul.mubr.bf16.gmra.mrb[68].mxu0 %v11999_v45  ;;  %5959 = vmatprep.mubr.bf16.mxu1 %v12000_v46  ;;  %v12090_v45 = vld [vmem:[%s15982_s0 + $0x6d4] ss:$72 sps:$4 sm:$0xff]  }
 0x24c   :  { %7531 = vmatprep.mubr.bf16.mxu0 %v12002_v47  ;;  %6265 = vmatpush1.bf16.msra.mxu1 %v12023_v48  ;;  %v12092_v46 = vld [vmem:[%s15982_s0 + $0xff4] ss:$72 sps:$4 sm:$0xff]   ;;  %v12094_v47 = vld [vmem:[%s15982_s0 + $0x6d0] ss:$72 sps:$4 sm:$0xff]  }
 0x24d   :  { %6266 = vmatprep.subr.bf16.mxu1 %v12043_v49  ;;  %v12098_v48 = vld [vmem:[%s15982_s0 + $0xff0] ss:$72 sps:$4 sm:$0xff]   ;;  %v12102_v49 = vld [vmem:[%s15982_s0 + $0x764] ss:$72 sps:$4 sm:$0xff]  }
 0x250   :  { %6267 = vmatpush1.bf16.msra.mxu1 %v12041_v50  ;;  %v12104_v50 = vld [vmem:[%s15982_s0 + $0x1084] ss:$72 sps:$4 sm:$0xff]  }
 0x251   :  { %6268 = vmatprep.subr.bf16.mxu1 %v12061_v51  ;;  %v12239_v51 = vld [vmem:[%s15981_s1 + $0x3e0] ss:$8 sps:$4 sm:$0xff]  }
 0x252   :  { %5960 = vmatmul.mubr.bf16.gmra.mrb[8].mxu1 %v12004_v52  ;;  %v12241_v52 = vld [vmem:[%s15981_s1 + $0x3e4] ss:$8 sps:$4 sm:$0xff]  }
 0x253   :  { %7532 = vmatmul.mubr.bf16.gmra.mrb[72].mxu0 %v12008_v53  ;;  %5969 = vmatprep.mubr.bf16.mxu1 %v12012_v54  ;;  %v12106_v53 = vld [vmem:[%s15982_s0 + $0x760] ss:$72 sps:$4 sm:$0xff]  }
 0x254   :  { %7541 = vmatprep.mubr.bf16.mxu0 %v12014_v55  ;;  %6269 = vmatpush1.bf16.msra.mxu1 %v12059_v56  ;;  %v12107_v54 = vld [vmem:[%s15982_s0 + $0x1080] ss:$72 sps:$4 sm:$0xff]   ;;  %v12108_v55 = vld [vmem:[%s15982_s0 + $0x7f4] ss:$72 sps:$4 sm:$0xff]  }
 0x255   :  { %6270 = vmatprep.subr.bf16.mxu1 %v12079_v57  ;;  %v12110_v56 = vld [vmem:[%s15982_s0 + $0x1114] ss:$72 sps:$4 sm:$0xff]   ;;  %v12112_v57 = vld [vmem:[%s15982_s0 + $0x7f0] ss:$72 sps:$4 sm:$0xff]  }
 0x258   :  { %6271 = vmatpush1.bf16.msra.mxu1 %v12077_v58  ;;  %v12116_v58 = vld [vmem:[%s15982_s0 + $0x1110] ss:$72 sps:$4 sm:$0xff]  }
 0x259   :  { %6272 = vmatprep.subr.bf16.mxu1 %v12097_v59  ;;  %v12120_v59 = vld [vmem:[%s15982_s0 + $0x884] ss:$72 sps:$4 sm:$0xff]  }
 0x25a   :  { %5970 = vmatmul.mubr.bf16.gmra.mrb[12].mxu1 %v12016_v60  ;;  %v12122_v60 = vld [vmem:[%s15982_s0 + $0x11a4] ss:$72 sps:$4 sm:$0xff]  }
 0x25b   :  { %7542 = vmatmul.mubr.bf16.gmra.mrb[76].mxu0 %v12017_v61  ;;  %5979 = vmatprep.mubr.bf16.mxu1 %v12018_v62  ;;  %v12257_v61 = vld [vmem:[%s15981_s1 + $0x3f0] ss:$8 sps:$4 sm:$0xff]   ;;  %v12259_v62 = vld [vmem:[%s15981_s1 + $0x3f4] ss:$8 sps:$4 sm:$0xff]  }
 0x25c   :  { %7551 = vmatprep.mubr.bf16.mxu0 %v12020_v63  ;;  %6273 = vmatpush1.bf16.msra.mxu1 %v12095_v0  ;;  %v12124_v63 = vld [vmem:[%s15982_s0 + $0x880] ss:$72 sps:$4 sm:$0xff]  }
 0x25d   :  { %6274 = vmatprep.subr.bf16.mxu1 %v12115_v1  ;;  %v12125_v0 = vld [vmem:[%s15982_s0 + $0x11a0] ss:$72 sps:$4 sm:$0xff]   ;;  %v12582_v1 = vld [vmem:[%s15981_s1 + $0x404] ss:$8 sps:$4 sm:$0xff]  }
 0x260   :  { %6275 = vmatpush1.bf16.msra.mxu1 %v12113_v2  ;;  %v12126_v2 = vld [vmem:[%s15982_s0 + $0x914] ss:$72 sps:$4 sm:$0xff]  }
 0x261   :  { %6276 = vmatprep.subr.bf16.mxu1 %v12134_v3  ;;  %v12130_v3 = vld [vmem:[%s15982_s0 + $0x3c] ss:$72 sps:$4 sm:$0xff]  }
 0x262   :  { %5980 = vmatmul.mubr.bf16.gmra.mrb[16].mxu1 %v12022_v4  ;;  %v12128_v4 = vld [vmem:[%s15982_s0 + $0x38] ss:$72 sps:$4 sm:$0xff]  }
 0x263   :  { %7552 = vmatmul.mubr.bf16.gmra.mrb[80].mxu0 %v12026_v5  ;;  %5989 = vmatprep.mubr.bf16.mxu1 %v12030_v6  ;;  %v12131_v5 = vld [vmem:[%s15982_s0 + $0x910] ss:$72 sps:$4 sm:$0xff]   ;;  %v12135_v6 = vld [vmem:[%s15981_s1 + $0x800] ss:$8 sps:$4 sm:$0xff]  }
 0x264   :  { %7561 = vmatprep.mubr.bf16.mxu0 %v12032_v7  ;;  %6277 = vmatpush1.bf16.msra.mxu1 %v12132_v8  ;;  %v12138_v7 = vld [vmem:[%s15982_s0 + $0x9a4] ss:$72 sps:$4 sm:$0xff]  }
 0x265   :  { %6278 = vmatprep.subr.bf16.mxu1 %v12151_v9  ;;  %v12140_v8 = vld [vmem:[%s15982_s0 + $0xcc] ss:$72 sps:$4 sm:$0xff]  }
 0x266   :  { %v12155_v9 = vld [vmem:[%s15981_s1 + $0x814] ss:$8 sps:$4 sm:$0xff]  }
 0x268   :  { %6279 = vmatpush1.bf16.msra.mxu1 %v12149_v10  ;;  %v12153_v10 = vld [vmem:[%s15981_s1 + $0x810] ss:$8 sps:$4 sm:$0xff]  }
 0x269   :  { %6280 = vmatprep.subr.bf16.mxu1 %v12169_v11  ;;  %v12173_v11 = vld [vmem:[%s15981_s1 + $0x824] ss:$8 sps:$4 sm:$0xff]  }
 0x26a   :  { %5990 = vmatmul.mubr.bf16.gmra.mrb[20].mxu1 %v12034_v12  ;;  %v12142_v12 = vld [vmem:[%s15982_s0 + $0x9a0] ss:$72 sps:$4 sm:$0xff]  }
 0x26b   :  { %7562 = vmatmul.mubr.bf16.gmra.mrb[84].mxu0 %v12035_v13  ;;  %5999 = vmatprep.mubr.bf16.mxu1 %v12036_v14  ;;  %v12143_v13 = vld [vmem:[%s15982_s0 + $0xc8] ss:$72 sps:$4 sm:$0xff]   ;;  %v12144_v14 = vld [vmem:[%s15982_s0 + $0xa34] ss:$72 sps:$4 sm:$0xff]  }
 0x26c   :  { %7571 = vmatprep.mubr.bf16.mxu0 %v12038_v15  ;;  %6281 = vmatpush1.bf16.msra.mxu1 %v12167_v16  ;;  %v12146_v15 = vld [vmem:[%s15982_s0 + $0x15c] ss:$72 sps:$4 sm:$0xff]   ;;  %v12171_v16 = vld [vmem:[%s15981_s1 + $0x820] ss:$8 sps:$4 sm:$0xff]  }
 0x26d   :  { %6282 = vmatprep.subr.bf16.mxu1 %v12187_v22  ;;  %v12156_v22 = vld [vmem:[%s15982_s0 + $0xac4] ss:$72 sps:$4 sm:$0xff]  }
 0x270   :  { %6283 = vmatpush1.bf16.msra.mxu1 %v12185_v21  ;;  %v12152_v21 = vld [vmem:[%s15982_s0 + $0x158] ss:$72 sps:$4 sm:$0xff]  }
 0x271   :  { %6284 = vmatprep.subr.bf16.mxu1 %v12205_v32  ;;  %v12243_v32 = vld [vmem:[%s15981_s1 + $0x860] ss:$8 sps:$4 sm:$0xff]  }
 0x272   :  { %6000 = vmatmul.mubr.bf16.gmra.mrb[24].mxu1 %v12040_v17  ;;  %v12191_v17 = vld [vmem:[%s15981_s1 + $0x834] ss:$8 sps:$4 sm:$0xff]  }
 0x273   :  { %7572 = vmatmul.mubr.bf16.gmra.mrb[88].mxu0 %v12044_v18  ;;  %6009 = vmatprep.mubr.bf16.mxu1 %v12048_v19  ;;  %v12189_v18 = vld [vmem:[%s15981_s1 + $0x830] ss:$8 sps:$4 sm:$0xff]   ;;  %v12209_v19 = vld [vmem:[%s15981_s1 + $0x844] ss:$8 sps:$4 sm:$0xff]  }
 0x274   :  { %7581 = vmatprep.mubr.bf16.mxu0 %v12050_v20  ;;  %6285 = vmatpush1.bf16.msra.mxu1 %v12203_v31  ;;  %v12148_v20 = vld [vmem:[%s15982_s0 + $0xa30] ss:$72 sps:$4 sm:$0xff]   ;;  %v12164_v31 = vld [vmem:[%s15982_s0 + $0x27c] ss:$72 sps:$4 sm:$0xff]  }
 0x275   :  { %6286 = vmatprep.subr.bf16.mxu1 %v12223_v42  ;;  %v12291_v42 = vld [vmem:[%s15981_s1 + $0x890] ss:$8 sps:$4 sm:$0xff]  }
 0x278   :  { %6287 = vmatpush1.bf16.msra.mxu1 %v12221_v41  ;;  %v12293_v41 = vld [vmem:[%s15981_s1 + $0x894] ss:$8 sps:$4 sm:$0xff]  }
 0x279   :  { %6288 = vmatprep.subr.bf16.mxu1 %v12241_v52  ;;  %v12194_v52 = vld [vmem:[%s15982_s0 + $0x42c] ss:$72 sps:$4 sm:$0xff]  }
 0x27a   :  { %6010 = vmatmul.mubr.bf16.gmra.mrb[28].mxu1 %v12052_v23  ;;  %v12158_v23 = vld [vmem:[%s15982_s0 + $0x1ec] ss:$72 sps:$4 sm:$0xff]  }
 0x27b   :  { %7582 = vmatmul.mubr.bf16.gmra.mrb[92].mxu0 %v12053_v24  ;;  %6019 = vmatprep.mubr.bf16.mxu1 %v12054_v25  ;;  %v12207_v24 = vld [vmem:[%s15981_s1 + $0x840] ss:$8 sps:$4 sm:$0xff]   ;;  %v12227_v25 = vld [vmem:[%s15981_s1 + $0x854] ss:$8 sps:$4 sm:$0xff]  }
 0x27c   :  { %7591 = vmatprep.mubr.bf16.mxu0 %v12056_v26  ;;  %6289 = vmatpush1.bf16.msra.mxu1 %v12239_v51  ;;  %v12225_v26 = vld [vmem:[%s15981_s1 + $0x850] ss:$8 sps:$4 sm:$0xff]   ;;  %v12192_v51 = vld [vmem:[%s15982_s0 + $0xd04] ss:$72 sps:$4 sm:$0xff]  }
 0x27d   :  { %6290 = vmatprep.subr.bf16.mxu1 %v12259_v62  ;;  %v12212_v62 = vld [vmem:[%s15982_s0 + $0x54c] ss:$72 sps:$4 sm:$0xff]  }
 0x280   :  { %6291 = vmatpush1.bf16.msra.mxu1 %v12257_v61  ;;  %v12210_v61 = vld [vmem:[%s15982_s0 + $0xe24] ss:$72 sps:$4 sm:$0xff]  }
 0x281   :  { %10230 = vmatprep.subr.bf16.mxu1 %v12582_v1  ;;  %v12214_v1 = vld [vmem:[%s15982_s0 + $0xe20] ss:$72 sps:$4 sm:$0xff]  }
 0x282   :  { %6020 = vmatmul.mubr.bf16.gmra.mrb[32].mxu1 %v12058_v27  ;;  %v12245_v27 = vld [vmem:[%s15981_s1 + $0x864] ss:$8 sps:$4 sm:$0xff]  }
 0x283   :  { %7592 = vmatmul.mubr.bf16.gmra.mrb[96].mxu0 %v12062_v28  ;;  %6029 = vmatprep.mubr.bf16.mxu1 %v12066_v29  ;;  %v12160_v28 = vld [vmem:[%s15982_s0 + $0xac0] ss:$72 sps:$4 sm:$0xff]  }
 0x284   :  { %7601 = vmatprep.mubr.bf16.mxu0 %v12068_v30  ;;  %v12161_v29 = vld [vmem:[%s15982_s0 + $0x1e8] ss:$72 sps:$4 sm:$0xff]   ;;  %v12162_v30 = vld [vmem:[%s15982_s0 + $0xb54] ss:$72 sps:$4 sm:$0xff]  }
 0x28a   :  { %6030 = vmatmul.mubr.bf16.gmra.mrb[36].mxu1 %v12070_v33  ;;  %v12263_v33 = vld [vmem:[%s15981_s1 + $0x874] ss:$8 sps:$4 sm:$0xff]  }
 0x28b   :  { %7602 = vmatmul.mubr.bf16.gmra.mrb[100].mxu0 %v12071_v34  ;;  %6039 = vmatprep.mubr.bf16.mxu1 %v12072_v35  ;;  %v12261_v34 = vld [vmem:[%s15981_s1 + $0x870] ss:$8 sps:$4 sm:$0xff]   ;;  %v12278_v35 = vld [vmem:[%s15981_s1 + $0x884] ss:$8 sps:$4 sm:$0xff]  }
 0x28c   :  { %7611 = vmatprep.mubr.bf16.mxu0 %v12074_v36  ;;  %v12166_v36 = vld [vmem:[%s15982_s0 + $0xb50] ss:$72 sps:$4 sm:$0xff]  }
 0x292   :  { %6040 = vmatmul.mubr.bf16.gmra.mrb[40].mxu1 %v12076_v37  ;;  %v12170_v37 = vld [vmem:[%s15982_s0 + $0x278] ss:$72 sps:$4 sm:$0xff]  }
 0x293   :  { %7612 = vmatmul.mubr.bf16.gmra.mrb[104].mxu0 %v12080_v38  ;;  %6049 = vmatprep.mubr.bf16.mxu1 %v12084_v39  ;;  %v12174_v38 = vld [vmem:[%s15982_s0 + $0xbe4] ss:$72 sps:$4 sm:$0xff]  }
 0x294   :  { %7621 = vmatprep.mubr.bf16.mxu0 %v12086_v40  ;;  %v12176_v39 = vld [vmem:[%s15982_s0 + $0x30c] ss:$72 sps:$4 sm:$0xff]   ;;  %v12276_v40 = vld [vmem:[%s15981_s1 + $0x880] ss:$8 sps:$4 sm:$0xff]  }
 0x29a   :  { %6050 = vmatmul.mubr.bf16.gmra.mrb[44].mxu1 %v12088_v43  ;;  %v12308_v43 = vld [vmem:[%s15981_s1 + $0x8a4] ss:$8 sps:$4 sm:$0xff]  }
 0x29b   :  { %7622 = vmatmul.mubr.bf16.gmra.mrb[108].mxu0 %v12089_v44  ;;  %6059 = vmatprep.mubr.bf16.mxu1 %v12090_v45  ;;  %v12178_v44 = vld [vmem:[%s15982_s0 + $0xbe0] ss:$72 sps:$4 sm:$0xff]  }
 0x29c   :  { %7631 = vmatprep.mubr.bf16.mxu0 %v12092_v46  ;;  %v12179_v45 = vld [vmem:[%s15982_s0 + $0x308] ss:$72 sps:$4 sm:$0xff]   ;;  %v12180_v46 = vld [vmem:[%s15982_s0 + $0xc74] ss:$72 sps:$4 sm:$0xff]  }
 0x2a2   :  { %6060 = vmatmul.mubr.bf16.gmra.mrb[48].mxu1 %v12094_v47  ;;  %v12182_v47 = vld [vmem:[%s15982_s0 + $0x39c] ss:$72 sps:$4 sm:$0xff]  }
 0x2a3   :  { %7632 = vmatmul.mubr.bf16.gmra.mrb[112].mxu0 %v12098_v48  ;;  %6069 = vmatprep.mubr.bf16.mxu1 %v12102_v49  ;;  %v12306_v48 = vld [vmem:[%s15981_s1 + $0x8a0] ss:$8 sps:$4 sm:$0xff]   ;;  %v12184_v49 = vld [vmem:[%s15982_s0 + $0xc70] ss:$72 sps:$4 sm:$0xff]  }
 0x2a4   :  { %7641 = vmatprep.mubr.bf16.mxu0 %v12104_v50  ;;  %v12188_v50 = vld [vmem:[%s15982_s0 + $0x398] ss:$72 sps:$4 sm:$0xff]  }
 0x2aa   :  { %6070 = vmatmul.mubr.bf16.gmra.mrb[52].mxu1 %v12106_v53  ;;  %v12321_v53 = vld [vmem:[%s15981_s1 + $0x8b0] ss:$8 sps:$4 sm:$0xff]  }
 0x2ab   :  { %7642 = vmatmul.mubr.bf16.gmra.mrb[116].mxu0 %v12107_v54  ;;  %6079 = vmatprep.mubr.bf16.mxu1 %v12108_v55  ;;  %v12323_v54 = vld [vmem:[%s15981_s1 + $0x8b4] ss:$8 sps:$4 sm:$0xff]   ;;  %v12196_v55 = vld [vmem:[%s15982_s0 + $0xd00] ss:$72 sps:$4 sm:$0xff]  }
 0x2ac   :  { %7651 = vmatprep.mubr.bf16.mxu0 %v12110_v56  ;;  %v12197_v56 = vld [vmem:[%s15982_s0 + $0x428] ss:$72 sps:$4 sm:$0xff]  }
 0x2b2   :  { %6080 = vmatmul.mubr.bf16.gmra.mrb[56].mxu1 %v12112_v57  ;;  %v12198_v57 = vld [vmem:[%s15982_s0 + $0xd94] ss:$72 sps:$4 sm:$0xff]  }
 0x2b3   :  { %7652 = vmatmul.mubr.bf16.gmra.mrb[120].mxu0 %v12116_v58  ;;  %6089 = vmatprep.mubr.bf16.mxu1 %v12120_v59  ;;  %v12200_v58 = vld [vmem:[%s15982_s0 + $0x4bc] ss:$72 sps:$4 sm:$0xff]   ;;  %v12202_v59 = vld [vmem:[%s15982_s0 + $0xd90] ss:$72 sps:$4 sm:$0xff]  }
 0x2b4   :  { %7661 = vmatprep.mubr.bf16.mxu0 %v12122_v60  ;;  %v12206_v60 = vld [vmem:[%s15982_s0 + $0x4b8] ss:$72 sps:$4 sm:$0xff]  }
 0x2ba   :  { %6090 = vmatmul.mubr.bf16.gmra.mrb[60].mxu1 %v12124_v63  ;;  %v12336_v63 = vld [vmem:[%s15981_s1 + $0x8c0] ss:$8 sps:$4 sm:$0xff]  }
 0x2bb   :  { %7662 = vmatmul.mubr.bf16.gmra.mrb[124].mxu0 %v12125_v0  ;;  %6099 = vmatprep.mubr.bf16.mxu1 %v12126_v2  ;;  %v12338_v0 = vld [vmem:[%s15981_s1 + $0x8c4] ss:$8 sps:$4 sm:$0xff]   ;;  %v12215_v2 = vld [vmem:[%s15982_s0 + $0x548] ss:$72 sps:$4 sm:$0xff]  }
 0x2bc   :  { %7704 = vmatprep.mubr.bf16.mxu0 %v12130_v3  ;;  %v12216_v3 = vld [vmem:[%s15982_s0 + $0xeb4] ss:$72 sps:$4 sm:$0xff]  }
 0x2c2   :  { %6100 = vmatmul.mubr.bf16.gmra.mrb[64].mxu1 %v12131_v5  ;;  %v12220_v5 = vld [vmem:[%s15982_s0 + $0xeb0] ss:$72 sps:$4 sm:$0xff]  }
 0x2c3   :  { %7705 = vmatmul.mubr.bf16.vlgmr.msra.gmra.mrb[0].mxu0 %v12128_v4  ;;  %6109 = vmatprep.mubr.bf16.mxu1 %v12138_v7  ;;  %v12218_v4 = vld [vmem:[%s15982_s0 + $0x5dc] ss:$72 sps:$4 sm:$0xff]  }
 0x2c4   :  { %8026 = vmatpush1.bf16.msra.mxu0 %v12135_v6  ;;  %7714 = vmatprep.mubr.bf16.mxu0 %v12140_v8  ;;  %v12224_v6 = vld [vmem:[%s15982_s0 + $0x5d8] ss:$72 sps:$4 sm:$0xff]   ;;  %v12228_v7 = vld [vmem:[%s15982_s0 + $0xf44] ss:$72 sps:$4 sm:$0xff]  }
 0x2c5   :  { %8027 = vmatprep.subr.bf16.mxu0 %v12155_v9  ;;  %v12230_v8 = vld [vmem:[%s15982_s0 + $0x66c] ss:$72 sps:$4 sm:$0xff]   ;;  %v12351_v9 = vld [vmem:[%s15981_s1 + $0x8d0] ss:$8 sps:$4 sm:$0xff]  }
 0x2c8   :  { %8028 = vmatpush1.bf16.msra.mxu0 %v12153_v10  ;;  %v12353_v10 = vld [vmem:[%s15981_s1 + $0x8d4] ss:$8 sps:$4 sm:$0xff]  }
 0x2c9   :  { %8029 = vmatprep.subr.bf16.mxu0 %v12173_v11  ;;  %v12232_v11 = vld [vmem:[%s15982_s0 + $0xf40] ss:$72 sps:$4 sm:$0xff]  }
 0x2ca   :  { %6110 = vmatmul.mubr.bf16.gmra.mrb[68].mxu1 %v12142_v12  ;;  %v12233_v12 = vld [vmem:[%s15982_s0 + $0x668] ss:$72 sps:$4 sm:$0xff]  }
 0x2cb   :  { %7715 = vmatmul.mubr.bf16.gmra.mrb[4].mxu0 %v12143_v13  ;;  %6119 = vmatprep.mubr.bf16.mxu1 %v12144_v14  ;;  %v12234_v13 = vld [vmem:[%s15982_s0 + $0xfd4] ss:$72 sps:$4 sm:$0xff]  }
 0x2cc   :  { %7724 = vmatprep.mubr.bf16.mxu0 %v12146_v15  ;;  %8030 = vmatpush1.bf16.msra.mxu0 %v12171_v16  ;;  %v12236_v14 = vld [vmem:[%s15982_s0 + $0x6fc] ss:$72 sps:$4 sm:$0xff]   ;;  %v12238_v15 = vld [vmem:[%s15982_s0 + $0xfd0] ss:$72 sps:$4 sm:$0xff]  }
 0x2cd   :  { %8031 = vmatprep.subr.bf16.mxu0 %v12191_v17  ;;  %v12242_v16 = vld [vmem:[%s15982_s0 + $0x6f8] ss:$72 sps:$4 sm:$0xff]   ;;  %v12246_v17 = vld [vmem:[%s15982_s0 + $0x1064] ss:$72 sps:$4 sm:$0xff]  }
 0x2d0   :  { %8032 = vmatpush1.bf16.msra.mxu0 %v12189_v18  ;;  %v12248_v18 = vld [vmem:[%s15982_s0 + $0x78c] ss:$72 sps:$4 sm:$0xff]  }
 0x2d1   :  { %8033 = vmatprep.subr.bf16.mxu0 %v12209_v19  ;;  %v12366_v19 = vld [vmem:[%s15981_s1 + $0x8e0] ss:$8 sps:$4 sm:$0xff]  }
 0x2d2   :  { %6120 = vmatmul.mubr.bf16.gmra.mrb[72].mxu1 %v12148_v20  ;;  %v12368_v20 = vld [vmem:[%s15981_s1 + $0x8e4] ss:$8 sps:$4 sm:$0xff]  }
 0x2d3   :  { %7725 = vmatmul.mubr.bf16.gmra.mrb[8].mxu0 %v12152_v21  ;;  %6129 = vmatprep.mubr.bf16.mxu1 %v12156_v22  ;;  %v12250_v21 = vld [vmem:[%s15982_s0 + $0x1060] ss:$72 sps:$4 sm:$0xff]  }
 0x2d4   :  { %7734 = vmatprep.mubr.bf16.mxu0 %v12158_v23  ;;  %8034 = vmatpush1.bf16.msra.mxu0 %v12207_v24  ;;  %v12251_v22 = vld [vmem:[%s15982_s0 + $0x788] ss:$72 sps:$4 sm:$0xff]   ;;  %v12252_v23 = vld [vmem:[%s15982_s0 + $0x10f4] ss:$72 sps:$4 sm:$0xff]  }
 0x2d5   :  { %8035 = vmatprep.subr.bf16.mxu0 %v12227_v25  ;;  %v12254_v24 = vld [vmem:[%s15982_s0 + $0x81c] ss:$72 sps:$4 sm:$0xff]   ;;  %v12256_v25 = vld [vmem:[%s15982_s0 + $0x10f0] ss:$72 sps:$4 sm:$0xff]  }
 0x2d8   :  { %8036 = vmatpush1.bf16.msra.mxu0 %v12225_v26  ;;  %v12260_v26 = vld [vmem:[%s15982_s0 + $0x818] ss:$72 sps:$4 sm:$0xff]  }
 0x2d9   :  { %8037 = vmatprep.subr.bf16.mxu0 %v12245_v27  ;;  %v12264_v27 = vld [vmem:[%s15982_s0 + $0x1184] ss:$72 sps:$4 sm:$0xff]  }
 0x2da   :  { %6130 = vmatmul.mubr.bf16.gmra.mrb[76].mxu1 %v12160_v28  ;;  %v12266_v28 = vld [vmem:[%s15982_s0 + $0x8ac] ss:$72 sps:$4 sm:$0xff]  }
 0x2db   :  { %7735 = vmatmul.mubr.bf16.gmra.mrb[12].mxu0 %v12161_v29  ;;  %6139 = vmatprep.mubr.bf16.mxu1 %v12162_v30  ;;  %v12381_v29 = vld [vmem:[%s15981_s1 + $0x8f0] ss:$8 sps:$4 sm:$0xff]   ;;  %v12383_v30 = vld [vmem:[%s15981_s1 + $0x8f4] ss:$8 sps:$4 sm:$0xff]  }
 0x2dc   :  { %7744 = vmatprep.mubr.bf16.mxu0 %v12164_v31  ;;  %8038 = vmatpush1.bf16.msra.mxu0 %v12243_v32  ;;  %v12268_v31 = vld [vmem:[%s15982_s0 + $0x1180] ss:$72 sps:$4 sm:$0xff]  }
 0x2dd   :  { %8039 = vmatprep.subr.bf16.mxu0 %v12263_v33  ;;  %v12269_v32 = vld [vmem:[%s15982_s0 + $0x8a8] ss:$72 sps:$4 sm:$0xff]   ;;  %v12272_v33 = vld [vmem:[%s15982_s0 + $0x1c] ss:$72 sps:$4 sm:$0xff]  }
 0x2e0   :  { %8040 = vmatpush1.bf16.msra.mxu0 %v12261_v34  ;;  %v12273_v34 = vld [vmem:[%s15982_s0 + $0x93c] ss:$72 sps:$4 sm:$0xff]  }
 0x2e1   :  { %8041 = vmatprep.subr.bf16.mxu0 %v12278_v35  ;;  %v12270_v35 = vld [vmem:[%s15982_s0 + $0x18] ss:$72 sps:$4 sm:$0xff]  }
 0x2e2   :  { %6140 = vmatmul.mubr.bf16.gmra.mrb[80].mxu1 %v12166_v36  ;;  %v12275_v36 = vld [vmem:[%s15982_s0 + $0x938] ss:$72 sps:$4 sm:$0xff]  }
 0x2e3   :  { %7745 = vmatmul.mubr.bf16.gmra.mrb[16].mxu0 %v12170_v37  ;;  %6149 = vmatprep.mubr.bf16.mxu1 %v12174_v38  ;;  %v12279_v37 = vld [vmem:[%s15982_s0 + $0xac] ss:$72 sps:$4 sm:$0xff]  }
 0x2e4   :  { %7754 = vmatprep.mubr.bf16.mxu0 %v12176_v39  ;;  %8042 = vmatpush1.bf16.msra.mxu0 %v12276_v40  ;;  %v12281_v38 = vld [vmem:[%s15982_s0 + $0x9cc] ss:$72 sps:$4 sm:$0xff]   ;;  %v12583_v39 = vld [vmem:[%s15981_s1 + $0x400] ss:$8 sps:$4 sm:$0xff]  }
 0x2e5   :  { %8043 = vmatprep.subr.bf16.mxu0 %v12293_v41  ;;  %v12584_v40 = vld [vmem:[%s15981_s1 + $0x414] ss:$8 sps:$4 sm:$0xff]   ;;  %v12283_v41 = vld [vmem:[%s15982_s0 + $0xa8] ss:$72 sps:$4 sm:$0xff]  }
 0x2e8   :  { %8044 = vmatpush1.bf16.msra.mxu0 %v12291_v42  ;;  %v12284_v42 = vld [vmem:[%s15982_s0 + $0x9c8] ss:$72 sps:$4 sm:$0xff]  }
 0x2e9   :  { %8045 = vmatprep.subr.bf16.mxu0 %v12308_v43  ;;  %v12285_v43 = vld [vmem:[%s15982_s0 + $0x13c] ss:$72 sps:$4 sm:$0xff]  }
 0x2ea   :  { %6150 = vmatmul.mubr.bf16.gmra.mrb[84].mxu1 %v12178_v44  ;;  %v12287_v44 = vld [vmem:[%s15982_s0 + $0xa5c] ss:$72 sps:$4 sm:$0xff]  }
 0x2eb   :  { %7755 = vmatmul.mubr.bf16.gmra.mrb[20].mxu0 %v12179_v45  ;;  %6159 = vmatprep.mubr.bf16.mxu1 %v12180_v46  ;;  %v12585_v45 = vld [vmem:[%s15981_s1 + $0x410] ss:$8 sps:$4 sm:$0xff]   ;;  %v12586_v46 = vld [vmem:[%s15981_s1 + $0x424] ss:$8 sps:$4 sm:$0xff]  }
 0x2ec   :  { %7764 = vmatprep.mubr.bf16.mxu0 %v12182_v47  ;;  %8046 = vmatpush1.bf16.msra.mxu0 %v12306_v48  ;;  %v12587_v47 = vld [vmem:[%s15981_s1 + $0x420] ss:$8 sps:$4 sm:$0xff]   ;;  %v12588_v48 = vld [vmem:[%s15981_s1 + $0x434] ss:$8 sps:$4 sm:$0xff]  }
 0x2ed   :  { %8047 = vmatprep.subr.bf16.mxu0 %v12323_v54  ;;  %v12590_v54 = vld [vmem:[%s15981_s1 + $0x444] ss:$8 sps:$4 sm:$0xff]  }
 0x2f0   :  { %8048 = vmatpush1.bf16.msra.mxu0 %v12321_v53  ;;  %v12589_v53 = vld [vmem:[%s15981_s1 + $0x430] ss:$8 sps:$4 sm:$0xff]  }
 0x2f1   :  { %8049 = vmatprep.subr.bf16.mxu0 %v12338_v0  ;;  %v12596_v0 = vld [vmem:[%s15981_s1 + $0x474] ss:$8 sps:$4 sm:$0xff]  }
 0x2f2   :  { %6160 = vmatmul.mubr.bf16.gmra.mrb[88].mxu1 %v12184_v49  ;;  %v12289_v49 = vld [vmem:[%s15982_s0 + $0x138] ss:$72 sps:$4 sm:$0xff]  }
 0x2f3   :  { %7765 = vmatmul.mubr.bf16.gmra.mrb[24].mxu0 %v12188_v50  ;;  %6169 = vmatprep.mubr.bf16.mxu1 %v12192_v51  ;;  %v12290_v50 = vld [vmem:[%s15982_s0 + $0xa58] ss:$72 sps:$4 sm:$0xff]   ;;  %v12294_v51 = vld [vmem:[%s15982_s0 + $0x1cc] ss:$72 sps:$4 sm:$0xff]  }
 0x2f4   :  { %7774 = vmatprep.mubr.bf16.mxu0 %v12194_v52  ;;  %8050 = vmatpush1.bf16.msra.mxu0 %v12336_v63  ;;  %v12296_v52 = vld [vmem:[%s15982_s0 + $0xaec] ss:$72 sps:$4 sm:$0xff]   ;;  %v12595_v63 = vld [vmem:[%s15981_s1 + $0x460] ss:$8 sps:$4 sm:$0xff]  }
 0x2f5   :  { %8051 = vmatprep.subr.bf16.mxu0 %v12353_v10  ;;  %v12314_v10 = vld [vmem:[%s15982_s0 + $0xc08] ss:$72 sps:$4 sm:$0xff]  }
 0x2f8   :  { %8052 = vmatpush1.bf16.msra.mxu0 %v12351_v9  ;;  %v12313_v9 = vld [vmem:[%s15982_s0 + $0x2e8] ss:$72 sps:$4 sm:$0xff]  }
 0x2f9   :  { %8053 = vmatprep.subr.bf16.mxu0 %v12368_v20  ;;  %v12326_v20 = vld [vmem:[%s15982_s0 + $0xd2c] ss:$72 sps:$4 sm:$0xff]  }
 0x2fa   :  { %6170 = vmatmul.mubr.bf16.gmra.mrb[92].mxu1 %v12196_v55  ;;  %v12591_v55 = vld [vmem:[%s15981_s1 + $0x440] ss:$8 sps:$4 sm:$0xff]  }
 0x2fb   :  { %7775 = vmatmul.mubr.bf16.gmra.mrb[28].mxu0 %v12197_v56  ;;  %6179 = vmatprep.mubr.bf16.mxu1 %v12198_v57  ;;  %v12592_v56 = vld [vmem:[%s15981_s1 + $0x454] ss:$8 sps:$4 sm:$0xff]   ;;  %v12298_v57 = vld [vmem:[%s15982_s0 + $0x1c8] ss:$72 sps:$4 sm:$0xff]  }
 0x2fc   :  { %7784 = vmatprep.mubr.bf16.mxu0 %v12200_v58  ;;  %8054 = vmatpush1.bf16.msra.mxu0 %v12366_v19  ;;  %v12299_v58 = vld [vmem:[%s15982_s0 + $0xae8] ss:$72 sps:$4 sm:$0xff]   ;;  %v12324_v19 = vld [vmem:[%s15982_s0 + $0x40c] ss:$72 sps:$4 sm:$0xff]  }
 0x2fd   :  { %8055 = vmatprep.subr.bf16.mxu0 %v12383_v30  ;;  %v12610_v30 = vld [vmem:[%s15981_s1 + $0x4e4] ss:$8 sps:$4 sm:$0xff]  }
 0x300   :  { %8056 = vmatpush1.bf16.msra.mxu0 %v12381_v29  ;;  %v12609_v29 = vld [vmem:[%s15981_s1 + $0x4d0] ss:$8 sps:$4 sm:$0xff]  }
 0x302   :  { %6180 = vmatmul.mubr.bf16.gmra.mrb[96].mxu1 %v12202_v59  ;;  %v12300_v59 = vld [vmem:[%s15982_s0 + $0x25c] ss:$72 sps:$4 sm:$0xff]  }
 0x303   :  { %7785 = vmatmul.mubr.bf16.gmra.mrb[32].mxu0 %v12206_v60  ;;  %6189 = vmatprep.mubr.bf16.mxu1 %v12210_v61  ;;  %v12302_v60 = vld [vmem:[%s15982_s0 + $0xb7c] ss:$72 sps:$4 sm:$0xff]   ;;  %v12593_v61 = vld [vmem:[%s15981_s1 + $0x450] ss:$8 sps:$4 sm:$0xff]  }
 0x304   :  { %7794 = vmatprep.mubr.bf16.mxu0 %v12212_v62  ;;  %v12594_v62 = vld [vmem:[%s15981_s1 + $0x464] ss:$8 sps:$4 sm:$0xff]  }
 0x30a   :  { %6190 = vmatmul.mubr.bf16.gmra.mrb[100].mxu1 %v12214_v1  ;;  %v12304_v1 = vld [vmem:[%s15982_s0 + $0x258] ss:$72 sps:$4 sm:$0xff]  }
 0x30b   :  { %7795 = vmatmul.mubr.bf16.gmra.mrb[36].mxu0 %v12215_v2  ;;  %6199 = vmatprep.mubr.bf16.mxu1 %v12216_v3  ;;  %v12305_v2 = vld [vmem:[%s15982_s0 + $0xb78] ss:$72 sps:$4 sm:$0xff]   ;;  %v12309_v3 = vld [vmem:[%s15982_s0 + $0x2ec] ss:$72 sps:$4 sm:$0xff]  }
 0x30c   :  { %7804 = vmatprep.mubr.bf16.mxu0 %v12218_v4  ;;  %v12311_v4 = vld [vmem:[%s15982_s0 + $0xc0c] ss:$72 sps:$4 sm:$0xff]  }
 0x312   :  { %6200 = vmatmul.mubr.bf16.gmra.mrb[104].mxu1 %v12220_v5  ;;  %v12597_v5 = vld [vmem:[%s15981_s1 + $0x470] ss:$8 sps:$4 sm:$0xff]  }
 0x313   :  { %7805 = vmatmul.mubr.bf16.gmra.mrb[40].mxu0 %v12224_v6  ;;  %6209 = vmatprep.mubr.bf16.mxu1 %v12228_v7  ;;  %v12598_v6 = vld [vmem:[%s15981_s1 + $0x484] ss:$8 sps:$4 sm:$0xff]   ;;  %v12599_v7 = vld [vmem:[%s15981_s1 + $0x480] ss:$8 sps:$4 sm:$0xff]  }
 0x314   :  { %7814 = vmatprep.mubr.bf16.mxu0 %v12230_v8  ;;  %v12600_v8 = vld [vmem:[%s15981_s1 + $0x494] ss:$8 sps:$4 sm:$0xff]  }
 0x31a   :  { %6210 = vmatmul.mubr.bf16.gmra.mrb[108].mxu1 %v12232_v11  ;;  %v12315_v11 = vld [vmem:[%s15982_s0 + $0x37c] ss:$72 sps:$4 sm:$0xff]  }
 0x31b   :  { %7815 = vmatmul.mubr.bf16.gmra.mrb[44].mxu0 %v12233_v12  ;;  %6219 = vmatprep.mubr.bf16.mxu1 %v12234_v13  ;;  %v12317_v12 = vld [vmem:[%s15982_s0 + $0xc9c] ss:$72 sps:$4 sm:$0xff]   ;;  %v12601_v13 = vld [vmem:[%s15981_s1 + $0x490] ss:$8 sps:$4 sm:$0xff]  }
 0x31c   :  { %7824 = vmatprep.mubr.bf16.mxu0 %v12236_v14  ;;  %v12602_v14 = vld [vmem:[%s15981_s1 + $0x4a4] ss:$8 sps:$4 sm:$0xff]  }
 0x322   :  { %6220 = vmatmul.mubr.bf16.gmra.mrb[112].mxu1 %v12238_v15  ;;  %v12603_v15 = vld [vmem:[%s15981_s1 + $0x4a0] ss:$8 sps:$4 sm:$0xff]  }
 0x323   :  { %7825 = vmatmul.mubr.bf16.gmra.mrb[48].mxu0 %v12242_v16  ;;  %6229 = vmatprep.mubr.bf16.mxu1 %v12246_v17  ;;  %v12604_v16 = vld [vmem:[%s15981_s1 + $0x4b4] ss:$8 sps:$4 sm:$0xff]   ;;  %v12319_v17 = vld [vmem:[%s15982_s0 + $0x378] ss:$72 sps:$4 sm:$0xff]  }
 0x324   :  { %7834 = vmatprep.mubr.bf16.mxu0 %v12248_v18  ;;  %v12320_v18 = vld [vmem:[%s15982_s0 + $0xc98] ss:$72 sps:$4 sm:$0xff]  }
 0x32a   :  { %6230 = vmatmul.mubr.bf16.gmra.mrb[116].mxu1 %v12250_v21  ;;  %v12605_v21 = vld [vmem:[%s15981_s1 + $0x4b0] ss:$8 sps:$4 sm:$0xff]  }
 0x32b   :  { %7835 = vmatmul.mubr.bf16.gmra.mrb[52].mxu0 %v12251_v22  ;;  %6239 = vmatprep.mubr.bf16.mxu1 %v12252_v23  ;;  %v12606_v22 = vld [vmem:[%s15981_s1 + $0x4c4] ss:$8 sps:$4 sm:$0xff]   ;;  %v12607_v23 = vld [vmem:[%s15981_s1 + $0x4c0] ss:$8 sps:$4 sm:$0xff]  }
 0x32c   :  { %7844 = vmatprep.mubr.bf16.mxu0 %v12254_v24  ;;  %v12608_v24 = vld [vmem:[%s15981_s1 + $0x4d4] ss:$8 sps:$4 sm:$0xff]  }
 0x332   :  { %6240 = vmatmul.mubr.bf16.gmra.mrb[120].mxu1 %v12256_v25  ;;  %v12328_v25 = vld [vmem:[%s15982_s0 + $0x408] ss:$72 sps:$4 sm:$0xff]  }
 0x333   :  { %7845 = vmatmul.mubr.bf16.gmra.mrb[56].mxu0 %v12260_v26  ;;  %6249 = vmatprep.mubr.bf16.mxu1 %v12264_v27  ;;  %v12329_v26 = vld [vmem:[%s15982_s0 + $0xd28] ss:$72 sps:$4 sm:$0xff]   ;;  %v12330_v27 = vld [vmem:[%s15982_s0 + $0x49c] ss:$72 sps:$4 sm:$0xff]  }
 0x334   :  { %7854 = vmatprep.mubr.bf16.mxu0 %v12266_v28  ;;  %v12332_v28 = vld [vmem:[%s15982_s0 + $0xdbc] ss:$72 sps:$4 sm:$0xff]  }
 0x33a   :  { %6250 = vmatmul.mubr.bf16.gmra.mrb[124].mxu1 %v12268_v31  ;;  %v12611_v31 = vld [vmem:[%s15981_s1 + $0x4e0] ss:$8 sps:$4 sm:$0xff]  }
 0x33b   :  { %7855 = vmatmul.mubr.bf16.gmra.mrb[60].mxu0 %v12269_v32  ;;  %6292 = vmatprep.mubr.bf16.mxu1 %v12272_v33  ;;  %v12612_v32 = vld [vmem:[%s15981_s1 + $0x4f4] ss:$8 sps:$4 sm:$0xff]   ;;  %v12334_v33 = vld [vmem:[%s15982_s0 + $0x498] ss:$72 sps:$4 sm:$0xff]  }
 0x33c   :  { %7864 = vmatprep.mubr.bf16.mxu0 %v12273_v34  ;;  %v12335_v34 = vld [vmem:[%s15982_s0 + $0xdb8] ss:$72 sps:$4 sm:$0xff]  }
 0x342   :  { %6293 = vmatmul.mubr.bf16.vlgmr.msra.gmra.mrb[0].mxu1 %v12270_v35  ;;  %v12339_v35 = vld [vmem:[%s15982_s0 + $0x52c] ss:$72 sps:$4 sm:$0xff]  }
 0x343   :  { %7865 = vmatmul.mubr.bf16.gmra.mrb[64].mxu0 %v12275_v36  ;;  %10246 = vmatpush1.bf16.msra.mxu1 %v12583_v39  ;;  %v12341_v36 = vld [vmem:[%s15982_s0 + $0xe4c] ss:$72 sps:$4 sm:$0xff]   ;;  %v12344_v39 = vld [vmem:[%s15982_s0 + $0xe48] ss:$72 sps:$4 sm:$0xff]  }
 0x344   :  { %6302 = vmatprep.mubr.bf16.mxu1 %v12279_v37  ;;  %7874 = vmatprep.mubr.bf16.mxu0 %v12281_v38  ;;  %v12613_v37 = vld [vmem:[%s15981_s1 + $0x4f0] ss:$8 sps:$4 sm:$0xff]  }
 0x345   :  { %10231 = vmatprep.subr.bf16.mxu1 %v12584_v40  ;;  %v12343_v38 = vld [vmem:[%s15982_s0 + $0x528] ss:$72 sps:$4 sm:$0xff]   ;;  %v12345_v40 = vld [vmem:[%s15982_s0 + $0x5bc] ss:$72 sps:$4 sm:$0xff]  }
 0x347   :  { %10247 = vmatpush1.bf16.msra.mxu1 %v12585_v45  ;;  %v12356_v45 = vld [vmem:[%s15982_s0 + $0xf6c] ss:$72 sps:$4 sm:$0xff]  }
 0x348   :  { %10232 = vmatprep.subr.bf16.mxu1 %v12586_v46  ;;  %v12358_v46 = vld [vmem:[%s15982_s0 + $0x648] ss:$72 sps:$4 sm:$0xff]  }
 0x34a   :  { %6303 = vmatmul.mubr.bf16.gmra.mrb[4].mxu1 %v12283_v41  ;;  %v12347_v41 = vld [vmem:[%s15982_s0 + $0xedc] ss:$72 sps:$4 sm:$0xff]  }
 0x34b   :  { %7875 = vmatmul.mubr.bf16.gmra.mrb[68].mxu0 %v12284_v42  ;;  %6312 = vmatprep.mubr.bf16.mxu1 %v12285_v43  ;;  %v12349_v42 = vld [vmem:[%s15982_s0 + $0x5b8] ss:$72 sps:$4 sm:$0xff]  }
 0x34c   :  { %7884 = vmatprep.mubr.bf16.mxu0 %v12287_v44  ;;  %10248 = vmatpush1.bf16.msra.mxu1 %v12587_v47  ;;  %v12350_v43 = vld [vmem:[%s15982_s0 + $0xed8] ss:$72 sps:$4 sm:$0xff]   ;;  %v12354_v44 = vld [vmem:[%s15982_s0 + $0x64c] ss:$72 sps:$4 sm:$0xff]   ;;  %v12359_v47 = vld [vmem:[%s15982_s0 + $0xf68] ss:$72 sps:$4 sm:$0xff]  }
 0x34d   :  { %10233 = vmatprep.subr.bf16.mxu1 %v12588_v48  ;;  %v12360_v48 = vld [vmem:[%s15982_s0 + $0x6dc] ss:$72 sps:$4 sm:$0xff]  }
 0x350   :  { %10249 = vmatpush1.bf16.msra.mxu1 %v12589_v53  ;;  %v12371_v53 = vld [vmem:[%s15982_s0 + $0x108c] ss:$72 sps:$4 sm:$0xff]  }
 0x351   :  { %10234 = vmatprep.subr.bf16.mxu1 %v12590_v54  ;;  %v12373_v54 = vld [vmem:[%s15982_s0 + $0x768] ss:$72 sps:$4 sm:$0xff]  }
 0x352   :  { %6313 = vmatmul.mubr.bf16.gmra.mrb[8].mxu1 %v12289_v49  ;;  %v12362_v49 = vld [vmem:[%s15982_s0 + $0xffc] ss:$72 sps:$4 sm:$0xff]  }
 0x353   :  { %7885 = vmatmul.mubr.bf16.gmra.mrb[72].mxu0 %v12290_v50  ;;  %6322 = vmatprep.mubr.bf16.mxu1 %v12294_v51  ;;  %v12364_v50 = vld [vmem:[%s15982_s0 + $0x6d8] ss:$72 sps:$4 sm:$0xff]  }
 0x354   :  { %7894 = vmatprep.mubr.bf16.mxu0 %v12296_v52  ;;  %10250 = vmatpush1.bf16.msra.mxu1 %v12591_v55  ;;  %v12365_v51 = vld [vmem:[%s15982_s0 + $0xff8] ss:$72 sps:$4 sm:$0xff]   ;;  %v12369_v52 = vld [vmem:[%s15982_s0 + $0x76c] ss:$72 sps:$4 sm:$0xff]   ;;  %v12374_v55 = vld [vmem:[%s15982_s0 + $0x1088] ss:$72 sps:$4 sm:$0xff]  }
 0x355   :  { %10235 = vmatprep.subr.bf16.mxu1 %v12592_v56  ;;  %v12375_v56 = vld [vmem:[%s15982_s0 + $0x7fc] ss:$72 sps:$4 sm:$0xff]  }
 0x358   :  { %10251 = vmatpush1.bf16.msra.mxu1 %v12593_v61  ;;  %v12386_v61 = vld [vmem:[%s15982_s0 + $0x11ac] ss:$72 sps:$4 sm:$0xff]  }
 0x359   :  { %10236 = vmatprep.subr.bf16.mxu1 %v12594_v62  ;;  %v12388_v62 = vld [vmem:[%s15982_s0 + $0x888] ss:$72 sps:$4 sm:$0xff]  }
 0x35a   :  { %6323 = vmatmul.mubr.bf16.gmra.mrb[12].mxu1 %v12298_v57  ;;  %v12377_v57 = vld [vmem:[%s15982_s0 + $0x111c] ss:$72 sps:$4 sm:$0xff]  }
 0x35b   :  { %7895 = vmatmul.mubr.bf16.gmra.mrb[76].mxu0 %v12299_v58  ;;  %6332 = vmatprep.mubr.bf16.mxu1 %v12300_v59  ;;  %v12379_v58 = vld [vmem:[%s15982_s0 + $0x7f8] ss:$72 sps:$4 sm:$0xff]  }
 0x35c   :  { %7904 = vmatprep.mubr.bf16.mxu0 %v12302_v60  ;;  %10252 = vmatpush1.bf16.msra.mxu1 %v12595_v63  ;;  %v12380_v59 = vld [vmem:[%s15982_s0 + $0x1118] ss:$72 sps:$4 sm:$0xff]   ;;  %v12384_v60 = vld [vmem:[%s15982_s0 + $0x88c] ss:$72 sps:$4 sm:$0xff]   ;;  %v12389_v63 = vld [vmem:[%s15982_s0 + $0x11a8] ss:$72 sps:$4 sm:$0xff]  }
 0x35d   :  { %10237 = vmatprep.subr.bf16.mxu1 %v12596_v0  ;;  %v12390_v0 = vld [vmem:[%s15982_s0 + $0x91c] ss:$72 sps:$4 sm:$0xff]  }
 0x360   :  { %10253 = vmatpush1.bf16.msra.mxu1 %v12597_v5  ;;  %v12398_v5 = vld [vmem:[%s15982_s0 + $0xd4] ss:$72 sps:$4 sm:$0xff]  }
 0x361   :  { %10238 = vmatprep.subr.bf16.mxu1 %v12598_v6  ;;  %v12400_v6 = vld [vmem:[%s15982_s0 + $0x9a8] ss:$72 sps:$4 sm:$0xff]  }
 0x362   :  { %6333 = vmatmul.mubr.bf16.gmra.mrb[16].mxu1 %v12304_v1  ;;  %v12394_v1 = vld [vmem:[%s15982_s0 + $0x44] ss:$72 sps:$4 sm:$0xff]  }
 0x363   :  { %7905 = vmatmul.mubr.bf16.gmra.mrb[80].mxu0 %v12305_v2  ;;  %6342 = vmatprep.mubr.bf16.mxu1 %v12309_v3  ;;  %v12392_v2 = vld [vmem:[%s15982_s0 + $0x40] ss:$72 sps:$4 sm:$0xff]  }
 0x364   :  { %7914 = vmatprep.mubr.bf16.mxu0 %v12311_v4  ;;  %10254 = vmatpush1.bf16.msra.mxu1 %v12599_v7  ;;  %v12395_v3 = vld [vmem:[%s15982_s0 + $0x918] ss:$72 sps:$4 sm:$0xff]   ;;  %v12396_v4 = vld [vmem:[%s15982_s0 + $0x9ac] ss:$72 sps:$4 sm:$0xff]  }
 0x365   :  { %10239 = vmatprep.subr.bf16.mxu1 %v12600_v8  ;;  %v12401_v7 = vld [vmem:[%s15982_s0 + $0xd0] ss:$72 sps:$4 sm:$0xff]   ;;  %v12402_v8 = vld [vmem:[%s15982_s0 + $0xa3c] ss:$72 sps:$4 sm:$0xff]  }
 0x368   :  { %10255 = vmatpush1.bf16.msra.mxu1 %v12601_v13  ;;  %v12410_v13 = vld [vmem:[%s15982_s0 + $0x1f4] ss:$72 sps:$4 sm:$0xff]  }
 0x369   :  { %10240 = vmatprep.subr.bf16.mxu1 %v12602_v14  ;;  %v12412_v14 = vld [vmem:[%s15982_s0 + $0xac8] ss:$72 sps:$4 sm:$0xff]  }
 0x36a   :  { %6343 = vmatmul.mubr.bf16.gmra.mrb[20].mxu1 %v12313_v9  ;;  %v12404_v9 = vld [vmem:[%s15982_s0 + $0x164] ss:$72 sps:$4 sm:$0xff]  }
 0x36b   :  { %7915 = vmatmul.mubr.bf16.gmra.mrb[84].mxu0 %v12314_v10  ;;  %6352 = vmatprep.mubr.bf16.mxu1 %v12315_v11  ;;  %v12406_v10 = vld [vmem:[%s15982_s0 + $0xa38] ss:$72 sps:$4 sm:$0xff]  }
 0x36c   :  { %7924 = vmatprep.mubr.bf16.mxu0 %v12317_v12  ;;  %10256 = vmatpush1.bf16.msra.mxu1 %v12603_v15  ;;  %v12407_v11 = vld [vmem:[%s15982_s0 + $0x160] ss:$72 sps:$4 sm:$0xff]   ;;  %v12408_v12 = vld [vmem:[%s15982_s0 + $0xacc] ss:$72 sps:$4 sm:$0xff]   ;;  %v12413_v15 = vld [vmem:[%s15982_s0 + $0x1f0] ss:$72 sps:$4 sm:$0xff]  }
 0x36d   :  { %10241 = vmatprep.subr.bf16.mxu1 %v12604_v16  ;;  %v12414_v16 = vld [vmem:[%s15982_s0 + $0xb5c] ss:$72 sps:$4 sm:$0xff]  }
 0x370   :  { %10257 = vmatpush1.bf16.msra.mxu1 %v12605_v21  ;;  %v12422_v21 = vld [vmem:[%s15982_s0 + $0x314] ss:$72 sps:$4 sm:$0xff]  }
 0x371   :  { %10242 = vmatprep.subr.bf16.mxu1 %v12606_v22  ;;  %v12424_v22 = vld [vmem:[%s15982_s0 + $0xbe8] ss:$72 sps:$4 sm:$0xff]  }
 0x372   :  { %6353 = vmatmul.mubr.bf16.gmra.mrb[24].mxu1 %v12319_v17  ;;  %v12416_v17 = vld [vmem:[%s15982_s0 + $0x284] ss:$72 sps:$4 sm:$0xff]  }
 0x373   :  { %7925 = vmatmul.mubr.bf16.gmra.mrb[88].mxu0 %v12320_v18  ;;  %6362 = vmatprep.mubr.bf16.mxu1 %v12324_v19  ;;  %v12418_v18 = vld [vmem:[%s15982_s0 + $0xb58] ss:$72 sps:$4 sm:$0xff]  }
 0x374   :  { %7934 = vmatprep.mubr.bf16.mxu0 %v12326_v20  ;;  %10258 = vmatpush1.bf16.msra.mxu1 %v12607_v23  ;;  %v12419_v19 = vld [vmem:[%s15982_s0 + $0x280] ss:$72 sps:$4 sm:$0xff]   ;;  %v12420_v20 = vld [vmem:[%s15982_s0 + $0xbec] ss:$72 sps:$4 sm:$0xff]   ;;  %v12425_v23 = vld [vmem:[%s15982_s0 + $0x310] ss:$72 sps:$4 sm:$0xff]  }
 0x375   :  { %10243 = vmatprep.subr.bf16.mxu1 %v12608_v24  ;;  %v12426_v24 = vld [vmem:[%s15982_s0 + $0xc7c] ss:$72 sps:$4 sm:$0xff]  }
 0x378   :  { %10259 = vmatpush1.bf16.msra.mxu1 %v12609_v29  ;;  %v12434_v29 = vld [vmem:[%s15982_s0 + $0x434] ss:$72 sps:$4 sm:$0xff]  }
 0x379   :  { %10244 = vmatprep.subr.bf16.mxu1 %v12610_v30  ;;  %v12436_v30 = vld [vmem:[%s15982_s0 + $0xd08] ss:$72 sps:$4 sm:$0xff]  }
 0x37a   :  { %6363 = vmatmul.mubr.bf16.gmra.mrb[28].mxu1 %v12328_v25  ;;  %v12428_v25 = vld [vmem:[%s15982_s0 + $0x3a4] ss:$72 sps:$4 sm:$0xff]  }
 0x37b   :  { %7935 = vmatmul.mubr.bf16.gmra.mrb[92].mxu0 %v12329_v26  ;;  %6372 = vmatprep.mubr.bf16.mxu1 %v12330_v27  ;;  %v12430_v26 = vld [vmem:[%s15982_s0 + $0xc78] ss:$72 sps:$4 sm:$0xff]  }
 0x37c   :  { %7944 = vmatprep.mubr.bf16.mxu0 %v12332_v28  ;;  %10260 = vmatpush1.bf16.msra.mxu1 %v12611_v31  ;;  %v12431_v27 = vld [vmem:[%s15982_s0 + $0x3a0] ss:$72 sps:$4 sm:$0xff]   ;;  %v12432_v28 = vld [vmem:[%s15982_s0 + $0xd0c] ss:$72 sps:$4 sm:$0xff]   ;;  %v12437_v31 = vld [vmem:[%s15982_s0 + $0x430] ss:$72 sps:$4 sm:$0xff]  }
 0x37d   :  { %10245 = vmatprep.subr.bf16.mxu1 %v12612_v32  ;;  %v12438_v32 = vld [vmem:[%s15982_s0 + $0xd9c] ss:$72 sps:$4 sm:$0xff]  }
 0x380   :  { %10261 = vmatpush1.bf16.msra.mxu1 %v12613_v37  ;;  %v12446_v37 = vld [vmem:[%s15982_s0 + $0x554] ss:$72 sps:$4 sm:$0xff]  }
 0x382   :  { %6373 = vmatmul.mubr.bf16.gmra.mrb[32].mxu1 %v12334_v33  ;;  %v12440_v33 = vld [vmem:[%s15982_s0 + $0x4c4] ss:$72 sps:$4 sm:$0xff]  }
 0x383   :  { %7945 = vmatmul.mubr.bf16.gmra.mrb[96].mxu0 %v12335_v34  ;;  %6382 = vmatprep.mubr.bf16.mxu1 %v12339_v35  ;;  %v12442_v34 = vld [vmem:[%s15982_s0 + $0xd98] ss:$72 sps:$4 sm:$0xff]  }
 0x384   :  { %7954 = vmatprep.mubr.bf16.mxu0 %v12341_v36  ;;  %v12443_v35 = vld [vmem:[%s15982_s0 + $0x4c0] ss:$72 sps:$4 sm:$0xff]   ;;  %v12444_v36 = vld [vmem:[%s15982_s0 + $0xe2c] ss:$72 sps:$4 sm:$0xff]  }
 0x38a   :  { %6383 = vmatmul.mubr.bf16.gmra.mrb[36].mxu1 %v12343_v38  ;;  %v12448_v38 = vld [vmem:[%s15982_s0 + $0xe28] ss:$72 sps:$4 sm:$0xff]  }
 0x38b   :  { %7955 = vmatmul.mubr.bf16.gmra.mrb[100].mxu0 %v12344_v39  ;;  %6392 = vmatprep.mubr.bf16.mxu1 %v12345_v40  ;;  %v12449_v39 = vld [vmem:[%s15982_s0 + $0x550] ss:$72 sps:$4 sm:$0xff]   ;;  %v12450_v40 = vld [vmem:[%s15982_s0 + $0xebc] ss:$72 sps:$4 sm:$0xff]  }
 0x38c   :  { %7964 = vmatprep.mubr.bf16.mxu0 %v12347_v41  ;;  %v12452_v41 = vld [vmem:[%s15982_s0 + $0x5e4] ss:$72 sps:$4 sm:$0xff]  }
 0x392   :  { %6393 = vmatmul.mubr.bf16.gmra.mrb[40].mxu1 %v12349_v42  ;;  %v12454_v42 = vld [vmem:[%s15982_s0 + $0xeb8] ss:$72 sps:$4 sm:$0xff]  }
 0x393   :  { %7965 = vmatmul.mubr.bf16.gmra.mrb[104].mxu0 %v12350_v43  ;;  %6402 = vmatprep.mubr.bf16.mxu1 %v12354_v44  ;;  %v12455_v43 = vld [vmem:[%s15982_s0 + $0x5e0] ss:$72 sps:$4 sm:$0xff]   ;;  %v12456_v44 = vld [vmem:[%s15982_s0 + $0xf4c] ss:$72 sps:$4 sm:$0xff]  }
 0x394   :  { %7974 = vmatprep.mubr.bf16.mxu0 %v12356_v45  ;;  %v12458_v45 = vld [vmem:[%s15982_s0 + $0x674] ss:$72 sps:$4 sm:$0xff]  }
 0x39a   :  { %6403 = vmatmul.mubr.bf16.gmra.mrb[44].mxu1 %v12358_v46 }
 0x39b   :  { %7975 = vmatmul.mubr.bf16.gmra.mrb[108].mxu0 %v12359_v47  ;;  %6412 = vmatprep.mubr.bf16.mxu1 %v12360_v48  ;;  %v12460_v48 = vld [vmem:[%s15982_s0 + $0xf48] ss:$72 sps:$4 sm:$0xff]  }
 0x39c   :  { %7984 = vmatprep.mubr.bf16.mxu0 %v12362_v49  ;;  %v12461_v49 = vld [vmem:[%s15982_s0 + $0x670] ss:$72 sps:$4 sm:$0xff]  }
 0x3a2   :  { %6413 = vmatmul.mubr.bf16.gmra.mrb[48].mxu1 %v12364_v50 }
 0x3a3   :  { %7985 = vmatmul.mubr.bf16.gmra.mrb[112].mxu0 %v12365_v51  ;;  %6422 = vmatprep.mubr.bf16.mxu1 %v12369_v52  ;;  %v12462_v51 = vld [vmem:[%s15982_s0 + $0xfdc] ss:$72 sps:$4 sm:$0xff]  }
 0x3a4   :  { %7994 = vmatprep.mubr.bf16.mxu0 %v12371_v53  ;;  %v12464_v52 = vld [vmem:[%s15982_s0 + $0x704] ss:$72 sps:$4 sm:$0xff]  }
 0x3aa   :  { %6423 = vmatmul.mubr.bf16.gmra.mrb[52].mxu1 %v12373_v54 }
 0x3ab   :  { %7995 = vmatmul.mubr.bf16.gmra.mrb[116].mxu0 %v12374_v55  ;;  %6432 = vmatprep.mubr.bf16.mxu1 %v12375_v56  ;;  %v12466_v56 = vld [vmem:[%s15982_s0 + $0xfd8] ss:$72 sps:$4 sm:$0xff]  }
 0x3ac   :  { %8004 = vmatprep.mubr.bf16.mxu0 %v12377_v57  ;;  %v12467_v57 = vld [vmem:[%s15982_s0 + $0x700] ss:$72 sps:$4 sm:$0xff]  }
 0x3b2   :  { %6433 = vmatmul.mubr.bf16.gmra.mrb[56].mxu1 %v12379_v58 }
 0x3b3   :  { %8005 = vmatmul.mubr.bf16.gmra.mrb[120].mxu0 %v12380_v59  ;;  %6442 = vmatprep.mubr.bf16.mxu1 %v12384_v60  ;;  %v12468_v59 = vld [vmem:[%s15982_s0 + $0x106c] ss:$72 sps:$4 sm:$0xff]  }
 0x3b4   :  { %8014 = vmatprep.mubr.bf16.mxu0 %v12386_v61  ;;  %v12470_v60 = vld [vmem:[%s15982_s0 + $0x794] ss:$72 sps:$4 sm:$0xff]  }
 0x3ba   :  { %6443 = vmatmul.mubr.bf16.gmra.mrb[60].mxu1 %v12388_v62 }
 0x3bb   :  { %8015 = vmatmul.mubr.bf16.gmra.mrb[124].mxu0 %v12389_v63  ;;  %6452 = vmatprep.mubr.bf16.mxu1 %v12390_v0  ;;  %v12472_v0 = vld [vmem:[%s15982_s0 + $0x1068] ss:$72 sps:$4 sm:$0xff]  }
 0x3bc   :  { %8057 = vmatprep.mubr.bf16.mxu0 %v12394_v1  ;;  %v12473_v1 = vld [vmem:[%s15982_s0 + $0x790] ss:$72 sps:$4 sm:$0xff]  }
 0x3c2   :  { %6453 = vmatmul.mubr.bf16.gmra.mrb[64].mxu1 %v12395_v3  ;;  %v12474_v3 = vld [vmem:[%s15982_s0 + $0x10fc] ss:$72 sps:$4 sm:$0xff]  }
 0x3c3   :  { %8058 = vmatmul.mubr.bf16.vlgmr.msra.gmra.mrb[0].mxu0 %v12392_v2  ;;  %6462 = vmatprep.mubr.bf16.mxu1 %v12396_v4  ;;  %v12476_v4 = vld [vmem:[%s15982_s0 + $0x824] ss:$72 sps:$4 sm:$0xff]  }
 0x3c4   :  { %8067 = vmatprep.mubr.bf16.mxu0 %v12398_v5 }
 0x3ca   :  { %6463 = vmatmul.mubr.bf16.gmra.mrb[68].mxu1 %v12400_v6 }
 0x3cb   :  { %8068 = vmatmul.mubr.bf16.gmra.mrb[4].mxu0 %v12401_v7  ;;  %6472 = vmatprep.mubr.bf16.mxu1 %v12402_v8  ;;  %v12478_v8 = vld [vmem:[%s15982_s0 + $0x10f8] ss:$72 sps:$4 sm:$0xff]  }
 0x3cc   :  { %8077 = vmatprep.mubr.bf16.mxu0 %v12404_v9  ;;  %v12479_v9 = vld [vmem:[%s15982_s0 + $0x820] ss:$72 sps:$4 sm:$0xff]  }
 0x3d2   :  { %6473 = vmatmul.mubr.bf16.gmra.mrb[72].mxu1 %v12406_v10 }
 0x3d3   :  { %8078 = vmatmul.mubr.bf16.gmra.mrb[8].mxu0 %v12407_v11  ;;  %6482 = vmatprep.mubr.bf16.mxu1 %v12408_v12  ;;  %v12480_v11 = vld [vmem:[%s15982_s0 + $0x118c] ss:$72 sps:$4 sm:$0xff]  }
 0x3d4   :  { %8087 = vmatprep.mubr.bf16.mxu0 %v12410_v13  ;;  %v12482_v12 = vld [vmem:[%s15982_s0 + $0x8b4] ss:$72 sps:$4 sm:$0xff]  }
 0x3da   :  { %6483 = vmatmul.mubr.bf16.gmra.mrb[76].mxu1 %v12412_v14 }
 0x3db   :  { %8088 = vmatmul.mubr.bf16.gmra.mrb[12].mxu0 %v12413_v15  ;;  %6492 = vmatprep.mubr.bf16.mxu1 %v12414_v16  ;;  %v12484_v16 = vld [vmem:[%s15982_s0 + $0x1188] ss:$72 sps:$4 sm:$0xff]  }
 0x3dc   :  { %8097 = vmatprep.mubr.bf16.mxu0 %v12416_v17  ;;  %v12485_v17 = vld [vmem:[%s15982_s0 + $0x8b0] ss:$72 sps:$4 sm:$0xff]  }
 0x3e2   :  { %6493 = vmatmul.mubr.bf16.gmra.mrb[80].mxu1 %v12418_v18 }
 0x3e3   :  { %8098 = vmatmul.mubr.bf16.gmra.mrb[16].mxu0 %v12419_v19  ;;  %6502 = vmatprep.mubr.bf16.mxu1 %v12420_v20  ;;  %v12488_v19 = vld [vmem:[%s15982_s0 + $0x924] ss:$72 sps:$4 sm:$0xff]  }
 0x3e4   :  { %8107 = vmatprep.mubr.bf16.mxu0 %v12422_v21  ;;  %v12489_v20 = vld [vmem:[%s15982_s0 + $0x944] ss:$72 sps:$4 sm:$0xff]  }
 0x3ea   :  { %6503 = vmatmul.mubr.bf16.gmra.mrb[84].mxu1 %v12424_v22 }
 0x3eb   :  { %8108 = vmatmul.mubr.bf16.gmra.mrb[20].mxu0 %v12425_v23  ;;  %6512 = vmatprep.mubr.bf16.mxu1 %v12426_v24  ;;  %v12486_v24 = vld [vmem:[%s15982_s0 + $0x920] ss:$72 sps:$4 sm:$0xff]  }
 0x3ec   :  { %8117 = vmatprep.mubr.bf16.mxu0 %v12428_v25  ;;  %v12491_v25 = vld [vmem:[%s15982_s0 + $0x940] ss:$72 sps:$4 sm:$0xff]  }
 0x3f2   :  { %6513 = vmatmul.mubr.bf16.gmra.mrb[88].mxu1 %v12430_v26 }
 0x3f3   :  { %8118 = vmatmul.mubr.bf16.gmra.mrb[24].mxu0 %v12431_v27  ;;  %6522 = vmatprep.mubr.bf16.mxu1 %v12432_v28  ;;  %v12492_v27 = vld [vmem:[%s15982_s0 + $0x9b4] ss:$72 sps:$4 sm:$0xff]  }
 0x3f4   :  { %8127 = vmatprep.mubr.bf16.mxu0 %v12434_v29  ;;  %v12494_v28 = vld [vmem:[%s15982_s0 + $0x9d4] ss:$72 sps:$4 sm:$0xff]  }
 0x3fa   :  { %6523 = vmatmul.mubr.bf16.gmra.mrb[92].mxu1 %v12436_v30 }
 0x3fb   :  { %8128 = vmatmul.mubr.bf16.gmra.mrb[28].mxu0 %v12437_v31  ;;  %6532 = vmatprep.mubr.bf16.mxu1 %v12438_v32  ;;  %v12496_v32 = vld [vmem:[%s15982_s0 + $0x9b0] ss:$72 sps:$4 sm:$0xff]  }
 0x3fc   :  { %8137 = vmatprep.mubr.bf16.mxu0 %v12440_v33  ;;  %v12497_v33 = vld [vmem:[%s15982_s0 + $0x9d0] ss:$72 sps:$4 sm:$0xff]  }
 0x402   :  { %6533 = vmatmul.mubr.bf16.gmra.mrb[96].mxu1 %v12442_v34 }
 0x403   :  { %8138 = vmatmul.mubr.bf16.gmra.mrb[32].mxu0 %v12443_v35  ;;  %6542 = vmatprep.mubr.bf16.mxu1 %v12444_v36  ;;  %v12498_v35 = vld [vmem:[%s15982_s0 + $0xa44] ss:$72 sps:$4 sm:$0xff]  }
 0x404   :  { %8147 = vmatprep.mubr.bf16.mxu0 %v12446_v37  ;;  %v12500_v36 = vld [vmem:[%s15982_s0 + $0xa64] ss:$72 sps:$4 sm:$0xff]  }
 0x40a   :  { %6543 = vmatmul.mubr.bf16.gmra.mrb[100].mxu1 %v12448_v38 }
 0x40b   :  { %8148 = vmatmul.mubr.bf16.gmra.mrb[36].mxu0 %v12449_v39  ;;  %6552 = vmatprep.mubr.bf16.mxu1 %v12450_v40  ;;  %v12502_v40 = vld [vmem:[%s15982_s0 + $0xa40] ss:$72 sps:$4 sm:$0xff]  }
 0x40c   :  { %8157 = vmatprep.mubr.bf16.mxu0 %v12452_v41  ;;  %v12503_v41 = vld [vmem:[%s15982_s0 + $0xa60] ss:$72 sps:$4 sm:$0xff]  }
 0x412   :  { %6553 = vmatmul.mubr.bf16.gmra.mrb[104].mxu1 %v12454_v42 }
 0x413   :  { %8158 = vmatmul.mubr.bf16.gmra.mrb[40].mxu0 %v12455_v43  ;;  %6562 = vmatprep.mubr.bf16.mxu1 %v12456_v44  ;;  %v12504_v43 = vld [vmem:[%s15982_s0 + $0xad4] ss:$72 sps:$4 sm:$0xff]  }
 0x414   :  { %8167 = vmatprep.mubr.bf16.mxu0 %v12458_v45  ;;  %v12506_v44 = vld [vmem:[%s15982_s0 + $0xaf4] ss:$72 sps:$4 sm:$0xff]  }
 0x415   :  { %v15081_v46 = vpop.f32.mrb[0].mxu1 }
 0x416   :  { %v15083_v47 = vpop.f32.mrb[1].mxu1 }
 0x417   :  { %v15091_v50 = vpop.f32.mrb[2].mxu1 }
 0x418   :  { %v15099_v53 = vpop.f32.mrb[3].mxu1 }
 0x41a   :  { %6563 = vmatmul.mubr.bf16.gmra.mrb[108].mxu1 %v12460_v48 }
 0x41b   :  { %8168 = vmatmul.mubr.bf16.gmra.mrb[44].mxu0 %v12461_v49  ;;  %6572 = vmatprep.mubr.bf16.mxu1 %v12462_v51  ;;  %v12508_v51 = vld [vmem:[%s15982_s0 + $0xad0] ss:$72 sps:$4 sm:$0xff]  }
 0x41c   :  { %8177 = vmatprep.mubr.bf16.mxu0 %v12464_v52  ;;  %v12509_v52 = vld [vmem:[%s15982_s0 + $0xaf0] ss:$72 sps:$4 sm:$0xff]  }
 0x41d   :  { %v15101_v54 = vpop.f32.mrb[4].mxu1 }
 0x41e   :  { %v15103_v55 = vpop.f32.mrb[5].mxu1 }
 0x41f   :  { %v15111_v58 = vpop.f32.mrb[6].mxu1 }
 0x420   :  { %v15119_v61 = vpop.f32.mrb[7].mxu1 }
 0x422   :  { %6573 = vmatmul.mubr.bf16.gmra.mrb[112].mxu1 %v12466_v56 }
 0x423   :  { %8178 = vmatmul.mubr.bf16.gmra.mrb[48].mxu0 %v12467_v57  ;;  %6582 = vmatprep.mubr.bf16.mxu1 %v12468_v59  ;;  %v12510_v57 = vld [vmem:[%s15982_s0 + $0xb64] ss:$72 sps:$4 sm:$0xff]  }
 0x424   :  { %8187 = vmatprep.mubr.bf16.mxu0 %v12470_v60  ;;  %v12512_v59 = vld [vmem:[%s15982_s0 + $0xb84] ss:$72 sps:$4 sm:$0xff]  }
 0x425   :  { %v15121_v62 = vpop.f32.mrb[8].mxu1 }
 0x426   :  { %v15123_v63 = vpop.f32.mrb[9].mxu1 }
 0x427   :  { %v15131_v2 = vpop.f32.mrb[10].mxu1 }
 0x428   :  { %v15139_v5 = vpop.f32.mrb[11].mxu1 }
 0x42a   :  { %6583 = vmatmul.mubr.bf16.gmra.mrb[116].mxu1 %v12472_v0 }
 0x42b   :  { %8188 = vmatmul.mubr.bf16.gmra.mrb[52].mxu0 %v12473_v1  ;;  %6592 = vmatprep.mubr.bf16.mxu1 %v12474_v3  ;;  %v12514_v3 = vld [vmem:[%s15982_s0 + $0xb60] ss:$72 sps:$4 sm:$0xff]  }
 0x42c   :  { %8197 = vmatprep.mubr.bf16.mxu0 %v12476_v4  ;;  %v12515_v4 = vld [vmem:[%s15982_s0 + $0xb80] ss:$72 sps:$4 sm:$0xff]  }
 0x42d   :  { %v15141_v6 = vpop.f32.mrb[12].mxu1 }
 0x42e   :  { %v15143_v7 = vpop.f32.mrb[13].mxu1 }
 0x42f   :  { %v15151_v10 = vpop.f32.mrb[14].mxu1 }
 0x430   :  { %v15159_v13 = vpop.f32.mrb[15].mxu1 }
 0x432   :  { %6593 = vmatmul.mubr.bf16.gmra.mrb[120].mxu1 %v12478_v8 }
 0x433   :  { %8198 = vmatmul.mubr.bf16.gmra.mrb[56].mxu0 %v12479_v9  ;;  %6602 = vmatprep.mubr.bf16.mxu1 %v12480_v11  ;;  %v12516_v9 = vld [vmem:[%s15982_s0 + $0xbf4] ss:$72 sps:$4 sm:$0xff]  }
 0x434   :  { %8207 = vmatprep.mubr.bf16.mxu0 %v12482_v12  ;;  %v12518_v11 = vld [vmem:[%s15982_s0 + $0xc14] ss:$72 sps:$4 sm:$0xff]  }
 0x435   :  { %v15161_v14 = vpop.f32.mrb[16].mxu1 }
 0x436   :  { %v15163_v15 = vpop.f32.mrb[17].mxu1 }
 0x437   :  { %v15171_v18 = vpop.f32.mrb[18].mxu1 }
 0x438   :  { %v15179_v21 = vpop.f32.mrb[19].mxu1 }
 0x43a   :  { %6603 = vmatmul.mubr.bf16.gmra.mrb[124].mxu1 %v12484_v16 }
 0x43b   :  { %8208 = vmatmul.mubr.bf16.gmra.mrb[60].mxu0 %v12485_v17  ;;  %6805 = vmatprep.mubr.bf16.mxu1 %v12488_v19  ;;  %v12520_v19 = vld [vmem:[%s15982_s0 + $0xbf0] ss:$72 sps:$4 sm:$0xff]  }
 0x43c   :  { %8217 = vmatprep.mubr.bf16.mxu0 %v12489_v20  ;;  %v12521_v20 = vld [vmem:[%s15982_s0 + $0xc10] ss:$72 sps:$4 sm:$0xff]  }
 0x43d   :  { %v15181_v22 = vpop.f32.mrb[20].mxu1 }
 0x43e   :  { %v15183_v23 = vpop.f32.mrb[21].mxu1 }
 0x43f   :  { %v15191_v26 = vpop.f32.mrb[22].mxu1 }
 0x440   :  { %v15199_v29 = vpop.f32.mrb[23].mxu1 }
 0x442   :  { %6806 = vmatmul.mubr.bf16.vlgmr.msra.gmra.mrb[64].mxu1 %v12486_v24 }
 0x443   :  { %8218 = vmatmul.mubr.bf16.gmra.mrb[64].mxu0 %v12491_v25  ;;  %6815 = vmatprep.mubr.bf16.mxu1 %v12492_v27  ;;  %v12522_v25 = vld [vmem:[%s15982_s0 + $0xc84] ss:$72 sps:$4 sm:$0xff]  }
 0x444   :  { %8227 = vmatprep.mubr.bf16.mxu0 %v12494_v28  ;;  %v12524_v27 = vld [vmem:[%s15982_s0 + $0xca4] ss:$72 sps:$4 sm:$0xff]  }
 0x445   :  { %v15201_v30 = vpop.f32.mrb[24].mxu1 }
 0x446   :  { %v15203_v31 = vpop.f32.mrb[25].mxu1 }
 0x447   :  { %v15211_v34 = vpop.f32.mrb[26].mxu1 }
 0x448   :  { %v15219_v37 = vpop.f32.mrb[27].mxu1 }
 0x44a   :  { %6816 = vmatmul.mubr.bf16.gmra.mrb[68].mxu1 %v12496_v32 }
 0x44b   :  { %8228 = vmatmul.mubr.bf16.gmra.mrb[68].mxu0 %v12497_v33  ;;  %6825 = vmatprep.mubr.bf16.mxu1 %v12498_v35  ;;  %v12526_v35 = vld [vmem:[%s15982_s0 + $0xc80] ss:$72 sps:$4 sm:$0xff]  }
 0x44c   :  { %8237 = vmatprep.mubr.bf16.mxu0 %v12500_v36  ;;  %v12527_v36 = vld [vmem:[%s15982_s0 + $0xca0] ss:$72 sps:$4 sm:$0xff]  }
 0x44d   :  { %v15221_v38 = vpop.f32.mrb[28].mxu1 }
 0x44e   :  { %v15223_v39 = vpop.f32.mrb[29].mxu1 }
 0x44f   :  { %v15231_v42 = vpop.f32.mrb[30].mxu1 }
 0x450   :  { %v15239_v45 = vpop.f32.mrb[31].mxu1 }
 0x452   :  { %6826 = vmatmul.mubr.bf16.gmra.mrb[72].mxu1 %v12502_v40 }
 0x453   :  { %8238 = vmatmul.mubr.bf16.gmra.mrb[72].mxu0 %v12503_v41  ;;  %6835 = vmatprep.mubr.bf16.mxu1 %v12504_v43  ;;  %v12528_v41 = vld [vmem:[%s15982_s0 + $0xd14] ss:$72 sps:$4 sm:$0xff]  }
 0x454   :  { %8247 = vmatprep.mubr.bf16.mxu0 %v12506_v44  ;;  %v12530_v43 = vld [vmem:[%s15982_s0 + $0xd34] ss:$72 sps:$4 sm:$0xff]  }
 0x455   :  { %v15241_v48 = vpop.f32.mrb[32].mxu1 }
 0x456   :  { %v15243_v49 = vpop.f32.mrb[33].mxu1 }
 0x457   :  { %v15251_v56 = vpop.f32.mrb[34].mxu1 }
 0x458   :  { %v15259_v60 = vpop.f32.mrb[35].mxu1 }
 0x45a   :  { %6836 = vmatmul.mubr.bf16.gmra.mrb[76].mxu1 %v12508_v51 }
 0x45b   :  { %8248 = vmatmul.mubr.bf16.gmra.mrb[76].mxu0 %v12509_v52  ;;  %6845 = vmatprep.mubr.bf16.mxu1 %v12510_v57  ;;  %v12532_v57 = vld [vmem:[%s15982_s0 + $0xd10] ss:$72 sps:$4 sm:$0xff]  }
 0x45c   :  { %8257 = vmatprep.mubr.bf16.mxu0 %v12512_v59  ;;  %v12533_v59 = vld [vmem:[%s15982_s0 + $0xd30] ss:$72 sps:$4 sm:$0xff]  }
 0x45d   :  { %v15261_v0 = vpop.f32.mrb[36].mxu1 }
 0x45e   :  { %v15263_v1 = vpop.f32.mrb[37].mxu1 }
 0x45f   :  { %v15271_v8 = vpop.f32.mrb[38].mxu1 }
 0x460   :  { %v15279_v12 = vpop.f32.mrb[39].mxu1 }
 0x462   :  { %6846 = vmatmul.mubr.bf16.gmra.mrb[80].mxu1 %v12514_v3 }
 0x463   :  { %8258 = vmatmul.mubr.bf16.gmra.mrb[80].mxu0 %v12515_v4  ;;  %6855 = vmatprep.mubr.bf16.mxu1 %v12516_v9  ;;  %v12534_v4 = vld [vmem:[%s15982_s0 + $0xda4] ss:$72 sps:$4 sm:$0xff]  }
 0x464   :  { %8267 = vmatprep.mubr.bf16.mxu0 %v12518_v11  ;;  %v12536_v9 = vld [vmem:[%s15982_s0 + $0xdc4] ss:$72 sps:$4 sm:$0xff]  }
 0x465   :  { %v15281_v16 = vpop.f32.mrb[40].mxu1 }
 0x466   :  { %v15283_v17 = vpop.f32.mrb[41].mxu1 }
 0x467   :  { %v15291_v24 = vpop.f32.mrb[42].mxu1 }
 0x468   :  { %v15299_v28 = vpop.f32.mrb[43].mxu1 }
 0x46a   :  { %6856 = vmatmul.mubr.bf16.gmra.mrb[84].mxu1 %v12520_v19 }
 0x46b   :  { %8268 = vmatmul.mubr.bf16.gmra.mrb[84].mxu0 %v12521_v20  ;;  %6865 = vmatprep.mubr.bf16.mxu1 %v12522_v25  ;;  %v12538_v25 = vld [vmem:[%s15982_s0 + $0xda0] ss:$72 sps:$4 sm:$0xff]  }
 0x46c   :  { %8277 = vmatprep.mubr.bf16.mxu0 %v12524_v27  ;;  %v12539_v27 = vld [vmem:[%s15982_s0 + $0xdc0] ss:$72 sps:$4 sm:$0xff]  }
 0x46d   :  { %v15301_v32 = vpop.f32.mrb[44].mxu1 }
 0x46e   :  { %v15303_v33 = vpop.f32.mrb[45].mxu1 }
 0x46f   :  { %15986 = vst [vmem:[#allocation2_spill] sm:$0xff] %v15303_v33  ;;  %v15311_v40 = vpop.f32.mrb[46].mxu1 }
 0x470   :  { %15987 = vst [vmem:[#allocation3_spill] sm:$0xff] %v15311_v40  ;;  %v15319_v44 = vpop.f32.mrb[47].mxu1 }
 0x471   :  { %15988 = vst [vmem:[#allocation4_spill] sm:$0xff] %v15319_v44 }
 0x472   :  { %6866 = vmatmul.mubr.bf16.gmra.mrb[88].mxu1 %v12526_v35 }
 0x473   :  { %8278 = vmatmul.mubr.bf16.gmra.mrb[88].mxu0 %v12527_v36  ;;  %6875 = vmatprep.mubr.bf16.mxu1 %v12528_v41  ;;  %v12540_v36 = vld [vmem:[%s15982_s0 + $0xe34] ss:$72 sps:$4 sm:$0xff]  }
 0x474   :  { %8287 = vmatprep.mubr.bf16.mxu0 %v12530_v43  ;;  %v12542_v41 = vld [vmem:[%s15982_s0 + $0xe54] ss:$72 sps:$4 sm:$0xff]  }
 0x475   :  { %v15321_v51 = vpop.f32.mrb[48].mxu1 }
 0x476   :  { %15989 = vst [vmem:[#allocation5_spill] sm:$0xff] %v15321_v51  ;;  %v15323_v52 = vpop.f32.mrb[49].mxu1 }
 0x477   :  { %15990 = vst [vmem:[#allocation6_spill] sm:$0xff] %v15323_v52  ;;  %v15331_v3 = vpop.f32.mrb[50].mxu1 }
 0x478   :  { %15991 = vst [vmem:[#allocation7_spill] sm:$0xff] %v15331_v3  ;;  %v15339_v11 = vpop.f32.mrb[51].mxu1 }
 0x479   :  { %15992 = vst [vmem:[#allocation8_spill] sm:$0xff] %v15339_v11 }
 0x47a   :  { %6876 = vmatmul.mubr.bf16.gmra.mrb[92].mxu1 %v12532_v57 }
 0x47b   :  { %8288 = vmatmul.mubr.bf16.gmra.mrb[92].mxu0 %v12533_v59  ;;  %6885 = vmatprep.mubr.bf16.mxu1 %v12534_v4  ;;  %v12544_v4 = vld [vmem:[%s15982_s0 + $0xe30] ss:$72 sps:$4 sm:$0xff]  }
 0x47c   :  { %8297 = vmatprep.mubr.bf16.mxu0 %v12536_v9  ;;  %v12545_v9 = vld [vmem:[%s15982_s0 + $0xe50] ss:$72 sps:$4 sm:$0xff]  }
 0x47d   :  { %v15341_v19 = vpop.f32.mrb[52].mxu1 }
 0x47e   :  { %15993 = vst [vmem:[#allocation9_spill] sm:$0xff] %v15341_v19  ;;  %v15343_v20 = vpop.f32.mrb[53].mxu1 }
 0x47f   :  { %15994 = vst [vmem:[#allocation10_spill] sm:$0xff] %v15343_v20  ;;  %v15351_v35 = vpop.f32.mrb[54].mxu1  ;;  %v12551_v20 = vld [vmem:[%s15982_s0 + $0xee0] ss:$72 sps:$4 sm:$0xff]  }
 0x480   :  { %15995 = vst [vmem:[#allocation11_spill] sm:$0xff] %v15351_v35  ;;  %v15359_v43 = vpop.f32.mrb[55].mxu1 }
 0x481   :  { %15996 = vst [vmem:[#allocation12_spill] sm:$0xff] %v15359_v43 }
 0x482   :  { %6886 = vmatmul.mubr.bf16.gmra.mrb[96].mxu1 %v12538_v25  ;;  %v12546_v25 = vld [vmem:[%s15982_s0 + $0xec4] ss:$72 sps:$4 sm:$0xff]  }
 0x483   :  { %8298 = vmatmul.mubr.bf16.gmra.mrb[96].mxu0 %v12539_v27  ;;  %6895 = vmatprep.mubr.bf16.mxu1 %v12540_v36  ;;  %v12548_v27 = vld [vmem:[%s15982_s0 + $0xee4] ss:$72 sps:$4 sm:$0xff]  }
 0x484   :  { %8307 = vmatprep.mubr.bf16.mxu0 %v12542_v41  ;;  %v8380_v41 = vlaneseq }
 0x485   :  { %v15361_v57 = vpop.f32.mrb[56].mxu1 }
 0x486   :  { %15997 = vst [vmem:[#allocation13_spill] sm:$0xff] %v15361_v57  ;;  %v15363_v59 = vpop.f32.mrb[57].mxu1 }
 0x487   :  { %15998 = vst [vmem:[#allocation14_spill] sm:$0xff] %v15363_v59  ;;  %v15371_v35 = vpop.f32.mrb[58].mxu1  ;;  %v8381_v59 = vshrl.u32 %v8380_v41, 7  ;;  %v8378_v41 = vld [vmem:[%s15983_s2] sm:$0x3] }
 0x488   :  { %15999 = vst [vmem:[#allocation15_spill] sm:$0xff] %v15371_v35  ;;  %v15379_v36 = vpop.f32.mrb[59].mxu1  ;;  %v12550_v35 = vld [vmem:[%s15982_s0 + $0xec0] ss:$72 sps:$4 sm:$0xff]  }
 0x489   :  { %16000 = vst [vmem:[#allocation16_spill] sm:$0xff] %v15379_v36 }
 0x48a   :  { %6896 = vmatmul.mubr.bf16.gmra.mrb[100].mxu1 %v12544_v4  ;;  %v12552_v4 = vld [vmem:[%s15982_s0 + $0xf54] ss:$72 sps:$4 sm:$0xff]  }
 0x48b   :  { %8308 = vmatmul.mubr.bf16.gmra.mrb[100].mxu0 %v12545_v9  ;;  %6905 = vmatprep.mubr.bf16.mxu1 %v12546_v25  ;;  %v12554_v9 = vld [vmem:[%s15982_s0 + $0xf74] ss:$72 sps:$4 sm:$0xff]  }
 0x48c   :  { %8317 = vmatprep.mubr.bf16.mxu0 %v12548_v27  ;;  %v8382_v27 = vsub.s32 0, %v8381_v59 }
 0x48d   :  { %v15381_v57 = vpop.f32.mrb[60].mxu1 }
 0x48e   :  { %16001 = vst [vmem:[#allocation17_spill] sm:$0xff] %v15381_v57  ;;  %v15383_v43 = vpop.f32.mrb[61].mxu1  ;;  %v15407_v57 = vrot.slane %v8378_v41, %v8382_v27 }
 0x48f   :  { %16002 = vst [vmem:[#allocation18_spill] sm:$0xff] %v15383_v43  ;;  %v15391_v19 = vpop.f32.mrb[62].mxu1  ;;  %v8386_v43 = vsub.s32 1, %v8381_v59 }
 0x490   :  { %16003 = vst [vmem:[#allocation19_spill] sm:$0xff] %v15391_v19  ;;  %v15399_v25 = vpop.f32.mrb[63].mxu1  ;;  %v8518_v19 = vld [vmem:[%s15984_s3] sm:$0x3] }
 0x491   :  { %16004 = vst [vmem:[#allocation20_spill] sm:$0xff] %v15399_v25  ;;  %v15409_v11 = vrot.slane %v8378_v41, %v8386_v43  ;;  %v15412_v3 = vrot.slane %v8518_v19, %v8382_v27 }
 0x492   :  { %6906 = vmatmul.mubr.bf16.gmra.mrb[104].mxu1 %v12550_v35  ;;  %v12557_v35 = vld [vmem:[%s15982_s0 + $0xf70] ss:$72 sps:$4 sm:$0xff]  }
 0x493   :  { %8318 = vmatmul.mubr.bf16.gmra.mrb[104].mxu0 %v12551_v20  ;;  %6915 = vmatprep.mubr.bf16.mxu1 %v12552_v4  ;;  %v12556_v20 = vld [vmem:[%s15982_s0 + $0xf50] ss:$72 sps:$4 sm:$0xff]   ;;  %v15421_v4 = vrot.slane %v8518_v19, %v8386_v43 }
 0x494   :  { %8327 = vmatprep.mubr.bf16.mxu0 %v12554_v9 }
 0x496   :  { %v8059_v36 = vpop.f32.mrb[0].mxu0 }
 0x497   :  { %v10262_v25 = vadd.f32 %v8059_v36, %v15081_v46  ;;  %v8061_v52 = vpop.f32.mrb[1].mxu0  ;;  %v12558_v46 = vld [vmem:[%s15982_s0 + $0xfe4] ss:$72 sps:$4 sm:$0xff]  }
 0x498   :  { %v10263_v59 = vadd.f32 %v8061_v52, %v15083_v47  ;;  %v8063_v9 = vpop.f32.mrb[2].mxu0  ;;  %v12560_v36 = vld [vmem:[%s15982_s0 + $0x1004] ss:$72 sps:$4 sm:$0xff]  }
 0x499   :  { %v8390_v27 = vmul.f32 %v10262_v25, %v15407_v57  ;;  %v10264_v41 = vadd.f32 %v8063_v9, %v15091_v50  ;;  %v8065_v51 = vpop.f32.mrb[3].mxu0 }
 0x49a   :  { %v8391_v44 = vmul.f32 %v10263_v59, %v15409_v11  ;;  %v10265_v47 = vadd.f32 %v8065_v51, %v15099_v53  ;;  %6916 = vmatmul.mubr.bf16.gmra.mrb[108].mxu1 %v12556_v20  ;;  %v12562_v20 = vld [vmem:[%s15982_s0 + $0xfe0] ss:$72 sps:$4 sm:$0xff]  }
 0x49b   :  { %v8530_v52 = vadd.f32 %v15412_v3, %v8390_v27  ;;  %v8392_v19 = vmul.f32 %v10264_v41, %v15407_v57  ;;  %8328 = vmatmul.mubr.bf16.gmra.mrb[108].mxu0 %v12557_v35  ;;  %6925 = vmatprep.mubr.bf16.mxu1 %v12558_v46 }
 0x49c   :  { %v8531_v43 = vadd.f32 %v15421_v4, %v8391_v44  ;;  %v8393_v40 = vmul.f32 %v10265_v47, %v15409_v11  ;;  %8337 = vmatprep.mubr.bf16.mxu0 %v12560_v36  ;;  %v12563_v44 = vld [vmem:[%s15982_s0 + $0x1000] ss:$72 sps:$4 sm:$0xff]  }
 0x49d   :  { %v8658_v25 = vmax.f32 %v8530_v52, 0.0  ;;  %v8532_v50 = vadd.f32 %v15412_v3, %v8392_v19 }
 0x49e   :  { %v8659_v9 = vmax.f32 %v8531_v43, 0.0  ;;  %v8533_v59 = vadd.f32 %v15421_v4, %v8393_v40  ;;  %v8069_v33 = vpop.f32.mrb[4].mxu0  ;;  %v12564_v40 = vld [vmem:[%s15982_s0 + $0x1074] ss:$72 sps:$4 sm:$0xff]  }
 0x49f   :  { %v8660_v53 = vmax.f32 %v8532_v50, 0.0  ;;  %v10266_v51 = vadd.f32 %v8069_v33, %v15101_v54  ;;  %v8071_v27 = vpop.f32.mrb[5].mxu0  ;;  %v12566_v54 = vld [vmem:[%s15982_s0 + $0x1094] ss:$72 sps:$4 sm:$0xff]  }
 0x4a0   :  { %v10166_v35 = vpack.c.bf16 %v8659_v9, %v8658_v25  ;;  %v8661_v46 = vmax.f32 %v8533_v59, 0.0  ;;  %v10267_v36 = vadd.f32 %v8071_v27, %v15103_v55  ;;  %v8073_v41 = vpop.f32.mrb[6].mxu0 }
 0x4a1   :  { %v8394_v33 = vmul.f32 %v10266_v51, %v15407_v57  ;;  %v10268_v47 = vadd.f32 %v8073_v41, %v15111_v58  ;;  %v8075_v52 = vpop.f32.mrb[7].mxu0 }
 0x4a2   :  { %9170 = vst [vmem:[%s15985_s4] sm:$0xff] %v10166_v35  ;;  %v10167_v19 = vpack.c.bf16 %v8661_v46, %v8660_v53  ;;  %v8395_v55 = vmul.f32 %v10267_v36, %v15409_v11  ;;  %v10269_v43 = vadd.f32 %v8075_v52, %v15119_v61  ;;  %6926 = vmatmul.mubr.bf16.gmra.mrb[112].mxu1 %v12562_v20  ;;  %v12568_v46 = vld [vmem:[%s15982_s0 + $0x1070] ss:$72 sps:$4 sm:$0xff]  }
 0x4a3   :  { %v8534_v25 = vadd.f32 %v15412_v3, %v8394_v33  ;;  %v8396_v50 = vmul.f32 %v10268_v47, %v15407_v57  ;;  %8338 = vmatmul.mubr.bf16.gmra.mrb[112].mxu0 %v12563_v44  ;;  %6935 = vmatprep.mubr.bf16.mxu1 %v12564_v40  ;;  %v12569_v36 = vld [vmem:[%s15982_s0 + $0x1090] ss:$72 sps:$4 sm:$0xff]   ;;  %v12570_v47 = vld [vmem:[%s15982_s0 + $0x1104] ss:$72 sps:$4 sm:$0xff]  }
 0x4a4   :  { %9171 = vst [vmem:[%s15985_s4 + $0x8] sm:$0xff] %v10167_v19  ;;  %v8535_v58 = vadd.f32 %v15421_v4, %v8395_v55  ;;  %v8397_v9 = vmul.f32 %v10269_v43, %v15409_v11  ;;  %8347 = vmatprep.mubr.bf16.mxu0 %v12566_v54 }
 0x4a5   :  { %v8662_v59 = vmax.f32 %v8534_v25, 0.0  ;;  %v8536_v53 = vadd.f32 %v15412_v3, %v8396_v50 }
 0x4a6   :  { %v8663_v61 = vmax.f32 %v8535_v58, 0.0  ;;  %v8537_v51 = vadd.f32 %v15421_v4, %v8397_v9  ;;  %v8079_v27 = vpop.f32.mrb[8].mxu0 }
 0x4a7   :  { %v8664_v35 = vmax.f32 %v8536_v53, 0.0  ;;  %v10270_v20 = vadd.f32 %v8079_v27, %v15121_v62  ;;  %v8081_v44 = vpop.f32.mrb[9].mxu0  ;;  %v12572_v62 = vld [vmem:[%s15982_s0 + $0x1124] ss:$72 sps:$4 sm:$0xff]  }
 0x4a8   :  { %v10168_v41 = vpack.c.bf16 %v8663_v61, %v8662_v59  ;;  %v8665_v40 = vmax.f32 %v8537_v51, 0.0  ;;  %v10271_v54 = vadd.f32 %v8081_v44, %v15123_v63  ;;  %v8083_v33 = vpop.f32.mrb[10].mxu0  ;;  %v12574_v44 = vld [vmem:[%s15982_s0 + $0x1100] ss:$72 sps:$4 sm:$0xff]  }
 0x4a9   :  { %v8398_v52 = vmul.f32 %v10270_v20, %v15407_v57  ;;  %v10272_v19 = vadd.f32 %v8083_v33, %v15131_v2  ;;  %v8085_v55 = vpop.f32.mrb[11].mxu0  ;;  %v12576_v33 = vld [vmem:[%s15982_s0 + $0x1194] ss:$72 sps:$4 sm:$0xff]  }
 0x4aa   :  { %9172 = vst [vmem:[%s15985_s4 + $0x10] sm:$0xff] %v10168_v41  ;;  %v10169_v43 = vpack.c.bf16 %v8665_v40, %v8664_v35  ;;  %v8399_v63 = vmul.f32 %v10271_v54, %v15409_v11  ;;  %v10273_v25 = vadd.f32 %v8085_v55, %v15139_v5  ;;  %6936 = vmatmul.mubr.bf16.gmra.mrb[116].mxu1 %v12568_v46  ;;  %v12575_v46 = vld [vmem:[%s15982_s0 + $0x1120] ss:$72 sps:$4 sm:$0xff]  }
 0x4ab   :  { %v8538_v50 = vadd.f32 %v15412_v3, %v8398_v52  ;;  %v8400_v58 = vmul.f32 %v10272_v19, %v15407_v57  ;;  %8348 = vmatmul.mubr.bf16.gmra.mrb[116].mxu0 %v12569_v36  ;;  %6945 = vmatprep.mubr.bf16.mxu1 %v12570_v47 }
 0x4ac   :  { %9173 = vst [vmem:[%s15985_s4 + $0x18] sm:$0xff] %v10169_v43  ;;  %v8539_v2 = vadd.f32 %v15421_v4, %v8399_v63  ;;  %v8401_v9 = vmul.f32 %v10273_v25, %v15409_v11  ;;  %8357 = vmatprep.mubr.bf16.mxu0 %v12572_v62 }
 0x4ad   :  { %v8666_v59 = vmax.f32 %v8538_v50, 0.0  ;;  %v8540_v53 = vadd.f32 %v15412_v3, %v8400_v58 }
 0x4ae   :  { %v8667_v5 = vmax.f32 %v8539_v2, 0.0  ;;  %v8541_v61 = vadd.f32 %v15421_v4, %v8401_v9  ;;  %v8089_v51 = vpop.f32.mrb[12].mxu0 }
 0x4af   :  { %v8668_v27 = vmax.f32 %v8540_v53, 0.0  ;;  %v10274_v35 = vadd.f32 %v8089_v51, %v15141_v6  ;;  %v8091_v20 = vpop.f32.mrb[13].mxu0  ;;  %v12578_v6 = vld [vmem:[%s15982_s0 + $0x11b4] ss:$72 sps:$4 sm:$0xff]   ;;  %v12581_v51 = vld [vmem:[%s15982_s0 + $0x11b0] ss:$72 sps:$4 sm:$0xff]  }
 0x4b0   :  { %v10170_v36 = vpack.c.bf16 %v8667_v5, %v8666_v59  ;;  %v8669_v41 = vmax.f32 %v8541_v61, 0.0  ;;  %v10275_v40 = vadd.f32 %v8091_v20, %v15143_v7  ;;  %v8093_v54 = vpop.f32.mrb[14].mxu0  ;;  %v12580_v61 = vld [vmem:[%s15982_s0 + $0x1190] ss:$72 sps:$4 sm:$0xff]  }
 0x4b1   :  { %v8402_v47 = vmul.f32 %v10274_v35, %v15407_v57  ;;  %v10276_v62 = vadd.f32 %v8093_v54, %v15151_v10  ;;  %v8095_v52 = vpop.f32.mrb[15].mxu0 }
 0x4b2   :  { %9174 = vst [vmem:[%s15985_s4 + $0x20] sm:$0xff] %v10170_v36  ;;  %v10171_v19 = vpack.c.bf16 %v8669_v41, %v8668_v27  ;;  %v8403_v7 = vmul.f32 %v10275_v40, %v15409_v11  ;;  %v10277_v55 = vadd.f32 %v8095_v52, %v15159_v13  ;;  %6946 = vmatmul.mubr.bf16.gmra.mrb[120].mxu1 %v12574_v44 }
 0x4b3   :  { %v8542_v43 = vadd.f32 %v15412_v3, %v8402_v47  ;;  %v8404_v63 = vmul.f32 %v10276_v62, %v15407_v57  ;;  %8358 = vmatmul.mubr.bf16.gmra.mrb[120].mxu0 %v12575_v46  ;;  %6955 = vmatprep.mubr.bf16.mxu1 %v12576_v33 }
 0x4b4   :  { %9175 = vst [vmem:[%s15985_s4 + $0x28] sm:$0xff] %v10171_v19  ;;  %v8543_v10 = vadd.f32 %v15421_v4, %v8403_v7  ;;  %v8405_v25 = vmul.f32 %v10277_v55, %v15409_v11  ;;  %8367 = vmatprep.mubr.bf16.mxu0 %v12578_v6 }
 0x4b5   :  { %v8670_v50 = vmax.f32 %v8542_v43, 0.0  ;;  %v8544_v58 = vadd.f32 %v15412_v3, %v8404_v63 }
 0x4b6   :  { %v8671_v13 = vmax.f32 %v8543_v10, 0.0  ;;  %v8545_v2 = vadd.f32 %v15421_v4, %v8405_v25  ;;  %v8099_v9 = vpop.f32.mrb[16].mxu0 }
 0x4b7   :  { %v8672_v59 = vmax.f32 %v8544_v58, 0.0  ;;  %v10278_v53 = vadd.f32 %v8099_v9, %v15161_v14  ;;  %v8101_v5 = vpop.f32.mrb[17].mxu0 }
 0x4b8   :  { %v10172_v27 = vpack.c.bf16 %v8671_v13, %v8670_v50  ;;  %v8673_v35 = vmax.f32 %v8545_v2, 0.0  ;;  %v10279_v20 = vadd.f32 %v8101_v5, %v15163_v15  ;;  %v8103_v44 = vpop.f32.mrb[18].mxu0 }
 0x4b9   :  { %v8406_v46 = vmul.f32 %v10278_v53, %v15407_v57  ;;  %v10280_v36 = vadd.f32 %v8103_v44, %v15171_v18  ;;  %v8105_v41 = vpop.f32.mrb[19].mxu0 }
 0x4ba   :  { %9176 = vst [vmem:[%s15985_s4 + $0x30] sm:$0xff] %v10172_v27  ;;  %v10173_v14 = vpack.c.bf16 %v8673_v35, %v8672_v59  ;;  %v8407_v40 = vmul.f32 %v10279_v20, %v15409_v11  ;;  %v10281_v54 = vadd.f32 %v8105_v41, %v15179_v21  ;;  %6956 = vmatmul.mubr.bf16.gmra.mrb[124].mxu1 %v12580_v61 }
 0x4bb   :  { %v8546_v33 = vadd.f32 %v15412_v3, %v8406_v46  ;;  %v8408_v6 = vmul.f32 %v10280_v36, %v15407_v57  ;;  %8368 = vmatmul.mubr.bf16.gmra.mrb[124].mxu0 %v12581_v51 }
 0x4bc   :  { %9177 = vst [vmem:[%s15985_s4 + $0x38] sm:$0xff] %v10173_v14  ;;  %v8547_v15 = vadd.f32 %v15421_v4, %v8407_v40  ;;  %v8409_v18 = vmul.f32 %v10281_v54, %v15409_v11 }
 0x4bd   :  { %v8674_v47 = vmax.f32 %v8546_v33, 0.0  ;;  %v8548_v62 = vadd.f32 %v15412_v3, %v8408_v6 }
 0x4be   :  { %v8675_v52 = vmax.f32 %v8547_v15, 0.0  ;;  %v8549_v21 = vadd.f32 %v15421_v4, %v8409_v18  ;;  %v8109_v19 = vpop.f32.mrb[20].mxu0 }
 0x4bf   :  { %v8676_v7 = vmax.f32 %v8548_v62, 0.0  ;;  %v10282_v55 = vadd.f32 %v8109_v19, %v15181_v22  ;;  %v8111_v43 = vpop.f32.mrb[21].mxu0 }
 0x4c0   :  { %v10174_v63 = vpack.c.bf16 %v8675_v52, %v8674_v47  ;;  %v8677_v10 = vmax.f32 %v8549_v21, 0.0  ;;  %v10283_v25 = vadd.f32 %v8111_v43, %v15183_v23  ;;  %v8113_v50 = vpop.f32.mrb[22].mxu0 }
 0x4c1   :  { %v8410_v58 = vmul.f32 %v10282_v55, %v15407_v57  ;;  %v10284_v13 = vadd.f32 %v8113_v50, %v15191_v26  ;;  %v8115_v2 = vpop.f32.mrb[23].mxu0 }
 0x4c2   :  { %9178 = vst [vmem:[%s15985_s4 + $0x40] sm:$0xff] %v10174_v63  ;;  %v10175_v9 = vpack.c.bf16 %v8677_v10, %v8676_v7  ;;  %v8411_v59 = vmul.f32 %v10283_v25, %v15409_v11  ;;  %v10285_v22 = vadd.f32 %v8115_v2, %v15199_v29 }
 0x4c3   :  { %v8550_v53 = vadd.f32 %v15412_v3, %v8410_v58  ;;  %v8412_v5 = vmul.f32 %v10284_v13, %v15407_v57 }
 0x4c4   :  { %9179 = vst [vmem:[%s15985_s4 + $0x48] sm:$0xff] %v10175_v9  ;;  %v8551_v23 = vadd.f32 %v15421_v4, %v8411_v59  ;;  %v8413_v26 = vmul.f32 %v10285_v22, %v15409_v11 }
 0x4c5   :  { %v8678_v61 = vmax.f32 %v8550_v53, 0.0  ;;  %v8552_v51 = vadd.f32 %v15412_v3, %v8412_v5 }
 0x4c6   :  { %v8679_v27 = vmax.f32 %v8551_v23, 0.0  ;;  %v8553_v35 = vadd.f32 %v15421_v4, %v8413_v26  ;;  %v8119_v20 = vpop.f32.mrb[24].mxu0 }
 0x4c7   :  { %v8680_v29 = vmax.f32 %v8552_v51, 0.0  ;;  %v10286_v44 = vadd.f32 %v8119_v20, %v15201_v30  ;;  %v8121_v46 = vpop.f32.mrb[25].mxu0 }
 0x4c8   :  { %v10176_v36 = vpack.c.bf16 %v8679_v27, %v8678_v61  ;;  %v8681_v41 = vmax.f32 %v8553_v35, 0.0  ;;  %v10287_v14 = vadd.f32 %v8121_v46, %v15203_v31  ;;  %v8123_v40 = vpop.f32.mrb[26].mxu0 }
 0x4c9   :  { %v8414_v54 = vmul.f32 %v10286_v44, %v15407_v57  ;;  %v10288_v33 = vadd.f32 %v8123_v40, %v15211_v34  ;;  %v8125_v6 = vpop.f32.mrb[27].mxu0 }
 0x4ca   :  { %9180 = vst [vmem:[%s15985_s4 + $0x50] sm:$0xff] %v10176_v36  ;;  %v10177_v15 = vpack.c.bf16 %v8681_v41, %v8680_v29  ;;  %v8415_v18 = vmul.f32 %v10287_v14, %v15409_v11  ;;  %v10289_v30 = vadd.f32 %v8125_v6, %v15219_v37 }
 0x4cb   :  { %v8554_v47 = vadd.f32 %v15412_v3, %v8414_v54  ;;  %v8416_v62 = vmul.f32 %v10288_v33, %v15407_v57 }
 0x4cc   :  { %9181 = vst [vmem:[%s15985_s4 + $0x58] sm:$0xff] %v10177_v15  ;;  %v8555_v31 = vadd.f32 %v15421_v4, %v8415_v18  ;;  %v8417_v34 = vmul.f32 %v10289_v30, %v15409_v11 }
 0x4cd   :  { %v8682_v52 = vmax.f32 %v8554_v47, 0.0  ;;  %v8556_v21 = vadd.f32 %v15412_v3, %v8416_v62 }
 0x4ce   :  { %v8683_v19 = vmax.f32 %v8555_v31, 0.0  ;;  %v8557_v7 = vadd.f32 %v15421_v4, %v8417_v34  ;;  %v8129_v55 = vpop.f32.mrb[28].mxu0 }
 0x4cf   :  { %v8684_v37 = vmax.f32 %v8556_v21, 0.0  ;;  %v10290_v43 = vadd.f32 %v8129_v55, %v15221_v38  ;;  %v8131_v63 = vpop.f32.mrb[29].mxu0 }
 0x4d0   :  { %v10178_v10 = vpack.c.bf16 %v8683_v19, %v8682_v52  ;;  %v8685_v25 = vmax.f32 %v8557_v7, 0.0  ;;  %v10291_v50 = vadd.f32 %v8131_v63, %v15223_v39  ;;  %v8133_v58 = vpop.f32.mrb[30].mxu0 }
 0x4d1   :  { %v8418_v13 = vmul.f32 %v10290_v43, %v15407_v57  ;;  %v10292_v2 = vadd.f32 %v8133_v58, %v15231_v42  ;;  %v8135_v9 = vpop.f32.mrb[31].mxu0 }
 0x4d2   :  { %9182 = vst [vmem:[%s15985_s4 + $0x60] sm:$0xff] %v10178_v10  ;;  %v10179_v59 = vpack.c.bf16 %v8685_v25, %v8684_v37  ;;  %v8419_v22 = vmul.f32 %v10291_v50, %v15409_v11  ;;  %v10293_v38 = vadd.f32 %v8135_v9, %v15239_v45 }
 0x4d3   :  { %v8558_v53 = vadd.f32 %v15412_v3, %v8418_v13  ;;  %v8420_v5 = vmul.f32 %v10292_v2, %v15407_v57 }
 0x4d4   :  { %9183 = vst [vmem:[%s15985_s4 + $0x68] sm:$0xff] %v10179_v59  ;;  %v8559_v39 = vadd.f32 %v15421_v4, %v8419_v22  ;;  %v8421_v42 = vmul.f32 %v10293_v38, %v15409_v11 }
 0x4d5   :  { %v8686_v23 = vmax.f32 %v8558_v53, 0.0  ;;  %v8560_v26 = vadd.f32 %v15412_v3, %v8420_v5 }
 0x4d6   :  { %v8687_v61 = vmax.f32 %v8559_v39, 0.0  ;;  %v8561_v51 = vadd.f32 %v15421_v4, %v8421_v42  ;;  %v8139_v27 = vpop.f32.mrb[32].mxu0 }
 0x4d7   :  { %v8688_v45 = vmax.f32 %v8560_v26, 0.0  ;;  %v10294_v35 = vadd.f32 %v8139_v27, %v15241_v48  ;;  %v8141_v20 = vpop.f32.mrb[33].mxu0 }
 0x4d8   :  { %v10180_v29 = vpack.c.bf16 %v8687_v61, %v8686_v23  ;;  %v8689_v44 = vmax.f32 %v8561_v51, 0.0  ;;  %v10295_v46 = vadd.f32 %v8141_v20, %v15243_v49  ;;  %v8143_v36 = vpop.f32.mrb[34].mxu0 }
 0x4d9   :  { %v8422_v41 = vmul.f32 %v10294_v35, %v15407_v57  ;;  %v10296_v14 = vadd.f32 %v8143_v36, %v15251_v56  ;;  %v8145_v40 = vpop.f32.mrb[35].mxu0 }
 0x4da   :  { %9184 = vst [vmem:[%s15985_s4 + $0x70] sm:$0xff] %v10180_v29  ;;  %v10181_v54 = vpack.c.bf16 %v8689_v44, %v8688_v45  ;;  %v8423_v33 = vmul.f32 %v10295_v46, %v15409_v11  ;;  %v10297_v48 = vadd.f32 %v8145_v40, %v15259_v60 }
 0x4db   :  { %v8562_v6 = vadd.f32 %v15412_v3, %v8422_v41  ;;  %v8424_v15 = vmul.f32 %v10296_v14, %v15407_v57 }
 0x4dc   :  { %9185 = vst [vmem:[%s15985_s4 + $0x78] sm:$0xff] %v10181_v54  ;;  %v8563_v49 = vadd.f32 %v15421_v4, %v8423_v33  ;;  %v8425_v56 = vmul.f32 %v10297_v48, %v15409_v11  ;;  %v16005_v48 = vld [vmem:[#allocation2_spill] sm:$0xff] }
 0x4dd   :  { %v8690_v18 = vmax.f32 %v8562_v6, 0.0  ;;  %v8564_v30 = vadd.f32 %v15412_v3, %v8424_v15 }
 0x4de   :  { %v8691_v47 = vmax.f32 %v8563_v49, 0.0  ;;  %v8565_v62 = vadd.f32 %v15421_v4, %v8425_v56  ;;  %v8149_v31 = vpop.f32.mrb[36].mxu0  ;;  %v16006_v56 = vld [vmem:[#allocation3_spill] sm:$0xff] }
 0x4df   :  { %v8692_v60 = vmax.f32 %v8564_v30, 0.0  ;;  %v10298_v34 = vadd.f32 %v8149_v31, %v15261_v0  ;;  %v8151_v52 = vpop.f32.mrb[37].mxu0  ;;  %v16007_v31 = vld [vmem:[#allocation4_spill] sm:$0xff] }
 0x4e0   :  { %v10182_v21 = vpack.c.bf16 %v8691_v47, %v8690_v18  ;;  %v8693_v19 = vmax.f32 %v8565_v62, 0.0  ;;  %v10299_v7 = vadd.f32 %v8151_v52, %v15263_v1  ;;  %v8153_v55 = vpop.f32.mrb[38].mxu0 }
 0x4e1   :  { %v8426_v37 = vmul.f32 %v10298_v34, %v15407_v57  ;;  %v10300_v43 = vadd.f32 %v8153_v55, %v15271_v8  ;;  %v8155_v63 = vpop.f32.mrb[39].mxu0 }
 0x4e2   :  { %9186 = vst [vmem:[%s15985_s4 + $0x80] sm:$0xff] %v10182_v21  ;;  %v10183_v10 = vpack.c.bf16 %v8693_v19, %v8692_v60  ;;  %v8427_v25 = vmul.f32 %v10299_v7, %v15409_v11  ;;  %v10301_v0 = vadd.f32 %v8155_v63, %v15279_v12 }
 0x4e3   :  { %v8566_v50 = vadd.f32 %v15412_v3, %v8426_v37  ;;  %v8428_v58 = vmul.f32 %v10300_v43, %v15407_v57 }
 0x4e4   :  { %9187 = vst [vmem:[%s15985_s4 + $0x88] sm:$0xff] %v10183_v10  ;;  %v8567_v1 = vadd.f32 %v15421_v4, %v8427_v25  ;;  %v8429_v8 = vmul.f32 %v10301_v0, %v15409_v11  ;;  %v16008_v10 = vld [vmem:[#allocation5_spill] sm:$0xff] }
 0x4e5   :  { %v8694_v13 = vmax.f32 %v8566_v50, 0.0  ;;  %v8568_v2 = vadd.f32 %v15412_v3, %v8428_v58 }
 0x4e6   :  { %v8695_v9 = vmax.f32 %v8567_v1, 0.0  ;;  %v8569_v59 = vadd.f32 %v15421_v4, %v8429_v8  ;;  %v8159_v22 = vpop.f32.mrb[40].mxu0  ;;  %v16009_v1 = vld [vmem:[#allocation6_spill] sm:$0xff] }
 0x4e7   :  { %v8696_v12 = vmax.f32 %v8568_v2, 0.0  ;;  %v10302_v38 = vadd.f32 %v8159_v22, %v15281_v16  ;;  %v8161_v53 = vpop.f32.mrb[41].mxu0 }
 0x4e8   :  { %v10184_v5 = vpack.c.bf16 %v8695_v9, %v8694_v13  ;;  %v8697_v39 = vmax.f32 %v8569_v59, 0.0  ;;  %v10303_v42 = vadd.f32 %v8161_v53, %v15283_v17  ;;  %v8163_v23 = vpop.f32.mrb[42].mxu0  ;;  %v16010_v9 = vld [vmem:[#allocation7_spill] sm:$0xff]  ;;  %v16011_v53 = vld [vmem:[#allocation8_spill] sm:$0xff] }
 0x4e9   :  { %v8430_v26 = vmul.f32 %v10302_v38, %v15407_v57  ;;  %v10304_v61 = vadd.f32 %v8163_v23, %v15291_v24  ;;  %v8165_v51 = vpop.f32.mrb[43].mxu0 }
 0x4ea   :  { %9188 = vst [vmem:[%s15985_s4 + $0x90] sm:$0xff] %v10184_v5  ;;  %v10185_v27 = vpack.c.bf16 %v8697_v39, %v8696_v12  ;;  %v8431_v45 = vmul.f32 %v10303_v42, %v15409_v11  ;;  %v10305_v16 = vadd.f32 %v8165_v51, %v15299_v28 }
 0x4eb   :  { %v8570_v35 = vadd.f32 %v15412_v3, %v8430_v26  ;;  %v8432_v20 = vmul.f32 %v10304_v61, %v15407_v57 }
 0x4ec   :  { %9189 = vst [vmem:[%s15985_s4 + $0x98] sm:$0xff] %v10185_v27  ;;  %v8571_v17 = vadd.f32 %v15421_v4, %v8431_v45  ;;  %v8433_v24 = vmul.f32 %v10305_v16, %v15409_v11 }
 0x4ed   :  { %v8698_v29 = vmax.f32 %v8570_v35, 0.0  ;;  %v8572_v44 = vadd.f32 %v15412_v3, %v8432_v20  ;;  %v16012_v20 = vld [vmem:[#allocation9_spill] sm:$0xff] }
 0x4ee   :  { %v8699_v46 = vmax.f32 %v8571_v17, 0.0  ;;  %v8573_v36 = vadd.f32 %v15421_v4, %v8433_v24  ;;  %v8169_v41 = vpop.f32.mrb[44].mxu0 }
 0x4ef   :  { %v8700_v28 = vmax.f32 %v8572_v44, 0.0  ;;  %v10306_v14 = vadd.f32 %v8169_v41, %v15301_v32  ;;  %v8171_v40 = vpop.f32.mrb[45].mxu0 }
 0x4f0   :  { %v10186_v54 = vpack.c.bf16 %v8699_v46, %v8698_v29  ;;  %v8701_v33 = vmax.f32 %v8573_v36, 0.0  ;;  %v10307_v6 = vadd.f32 %v8171_v40, %v16005_v48  ;;  %v8173_v15 = vpop.f32.mrb[46].mxu0  ;;  %v16013_v46 = vld [vmem:[#allocation10_spill] sm:$0xff] }
 0x4f1   :  { %v8434_v49 = vmul.f32 %v10306_v14, %v15407_v57  ;;  %v10308_v18 = vadd.f32 %v8173_v15, %v16006_v56  ;;  %v8175_v30 = vpop.f32.mrb[47].mxu0  ;;  %v16014_v14 = vld [vmem:[#allocation11_spill] sm:$0xff] }
 0x4f2   :  { %9190 = vst [vmem:[%s15985_s4 + $0xa0] sm:$0xff] %v10186_v54  ;;  %v10187_v47 = vpack.c.bf16 %v8701_v33, %v8700_v28  ;;  %v8435_v62 = vmul.f32 %v10307_v6, %v15409_v11  ;;  %v10309_v32 = vadd.f32 %v8175_v30, %v16007_v31  ;;  %v16015_v6 = vld [vmem:[#allocation12_spill] sm:$0xff] }
 0x4f3   :  { %v8574_v60 = vadd.f32 %v15412_v3, %v8434_v49  ;;  %v8436_v34 = vmul.f32 %v10308_v18, %v15407_v57 }
 0x4f4   :  { %9191 = vst [vmem:[%s15985_s4 + $0xa8] sm:$0xff] %v10187_v47  ;;  %v8575_v52 = vadd.f32 %v15421_v4, %v8435_v62  ;;  %v8437_v21 = vmul.f32 %v10309_v32, %v15409_v11 }
 0x4f5   :  { %v8702_v19 = vmax.f32 %v8574_v60, 0.0  ;;  %v8576_v7 = vadd.f32 %v15412_v3, %v8436_v34 }
 0x4f6   :  { %v8703_v55 = vmax.f32 %v8575_v52, 0.0  ;;  %v8577_v37 = vadd.f32 %v15421_v4, %v8437_v21  ;;  %v8179_v43 = vpop.f32.mrb[48].mxu0  ;;  %v16016_v52 = vld [vmem:[#allocation13_spill] sm:$0xff] }
 0x4f7   :  { %v8704_v63 = vmax.f32 %v8576_v7, 0.0  ;;  %v10310_v25 = vadd.f32 %v8179_v43, %v16008_v10  ;;  %v8181_v0 = vpop.f32.mrb[49].mxu0 }
 0x4f8   :  { %v10188_v50 = vpack.c.bf16 %v8703_v55, %v8702_v19  ;;  %v8705_v58 = vmax.f32 %v8577_v37, 0.0  ;;  %v10311_v8 = vadd.f32 %v8181_v0, %v16009_v1  ;;  %v8183_v13 = vpop.f32.mrb[50].mxu0  ;;  %v16017_v37 = vld [vmem:[#allocation14_spill] sm:$0xff] }
 0x4f9   :  { %v8438_v2 = vmul.f32 %v10310_v25, %v15407_v57  ;;  %v10312_v59 = vadd.f32 %v8183_v13, %v16010_v9  ;;  %v8185_v22 = vpop.f32.mrb[51].mxu0  ;;  %v16018_v25 = vld [vmem:[#allocation15_spill] sm:$0xff] }
 0x4fa   :  { %9192 = vst [vmem:[%s15985_s4 + $0xb0] sm:$0xff] %v10188_v50  ;;  %v10189_v12 = vpack.c.bf16 %v8705_v58, %v8704_v63  ;;  %v8439_v38 = vmul.f32 %v10311_v8, %v15409_v11  ;;  %v10313_v5 = vadd.f32 %v8185_v22, %v16011_v53  ;;  %v16019_v8 = vld [vmem:[#allocation16_spill] sm:$0xff] }
 0x4fb   :  { %v8578_v39 = vadd.f32 %v15412_v3, %v8438_v2  ;;  %v8440_v42 = vmul.f32 %v10312_v59, %v15407_v57 }
 0x4fc   :  { %9193 = vst [vmem:[%s15985_s4 + $0xb8] sm:$0xff] %v10189_v12  ;;  %v8579_v23 = vadd.f32 %v15421_v4, %v8439_v38  ;;  %v8441_v26 = vmul.f32 %v10313_v5, %v15409_v11 }
 0x4fd   :  { %v8706_v61 = vmax.f32 %v8578_v39, 0.0  ;;  %v8580_v51 = vadd.f32 %v15412_v3, %v8440_v42 }
 0x4fe   :  { %v8707_v27 = vmax.f32 %v8579_v23, 0.0  ;;  %v8581_v45 = vadd.f32 %v15421_v4, %v8441_v26  ;;  %v8189_v16 = vpop.f32.mrb[52].mxu0  ;;  %v16020_v23 = vld [vmem:[#allocation17_spill] sm:$0xff] }
 0x4ff   :  { %v8708_v35 = vmax.f32 %v8580_v51, 0.0  ;;  %v10314_v17 = vadd.f32 %v8189_v16, %v16012_v20  ;;  %v8191_v24 = vpop.f32.mrb[53].mxu0 }
 0x500   :  { %v10190_v29 = vpack.c.bf16 %v8707_v27, %v8706_v61  ;;  %v8709_v44 = vmax.f32 %v8581_v45, 0.0  ;;  %v10315_v36 = vadd.f32 %v8191_v24, %v16013_v46  ;;  %v8193_v41 = vpop.f32.mrb[54].mxu0  ;;  %v16021_v45 = vld [vmem:[#allocation18_spill] sm:$0xff] }
 0x501   :  { %v8442_v28 = vmul.f32 %v10314_v17, %v15407_v57  ;;  %v10316_v40 = vadd.f32 %v8193_v41, %v16014_v14  ;;  %v8195_v54 = vpop.f32.mrb[55].mxu0  ;;  %v16022_v17 = vld [vmem:[#allocation19_spill] sm:$0xff] }
 0x502   :  { %9194 = vst [vmem:[%s15985_s4 + $0xc0] sm:$0xff] %v10190_v29  ;;  %v10191_v33 = vpack.c.bf16 %v8709_v44, %v8708_v35  ;;  %v8443_v48 = vmul.f32 %v10315_v36, %v15409_v11  ;;  %v10317_v15 = vadd.f32 %v8195_v54, %v16015_v6  ;;  %v16023_v36 = vld [vmem:[#allocation20_spill] sm:$0xff] }
 0x503   :  { %v8582_v49 = vadd.f32 %v15412_v3, %v8442_v28  ;;  %v8444_v56 = vmul.f32 %v10316_v40, %v15407_v57 }
 0x504   :  { %9195 = vst [vmem:[%s15985_s4 + $0xc8] sm:$0xff] %v10191_v33  ;;  %v8583_v18 = vadd.f32 %v15421_v4, %v8443_v48  ;;  %v8445_v30 = vmul.f32 %v10317_v15, %v15409_v11 }
 0x505   :  { %v8710_v47 = vmax.f32 %v8582_v49, 0.0  ;;  %v8584_v62 = vadd.f32 %v15412_v3, %v8444_v56 }
 0x506   :  { %v8711_v31 = vmax.f32 %v8583_v18, 0.0  ;;  %v8585_v32 = vadd.f32 %v15421_v4, %v8445_v30  ;;  %v8199_v60 = vpop.f32.mrb[56].mxu0 }
 0x507   :  { %v8712_v34 = vmax.f32 %v8584_v62, 0.0  ;;  %v10318_v21 = vadd.f32 %v8199_v60, %v16016_v52  ;;  %v8201_v19 = vpop.f32.mrb[57].mxu0 }
 0x508   :  { %v10192_v7 = vpack.c.bf16 %v8711_v31, %v8710_v47  ;;  %v8713_v55 = vmax.f32 %v8585_v32, 0.0  ;;  %v10319_v43 = vadd.f32 %v8201_v19, %v16017_v37  ;;  %v8203_v63 = vpop.f32.mrb[58].mxu0 }
 0x509   :  { %v8446_v10 = vmul.f32 %v10318_v21, %v15407_v57  ;;  %v10320_v0 = vadd.f32 %v8203_v63, %v16018_v25  ;;  %v8205_v50 = vpop.f32.mrb[59].mxu0 }
 0x50a   :  { %9196 = vst [vmem:[%s15985_s4 + $0xd0] sm:$0xff] %v10192_v7  ;;  %v10193_v58 = vpack.c.bf16 %v8713_v55, %v8712_v34  ;;  %v8447_v1 = vmul.f32 %v10319_v43, %v15409_v11  ;;  %v10321_v13 = vadd.f32 %v8205_v50, %v16019_v8 }
 0x50b   :  { %v8586_v2 = vadd.f32 %v15412_v3, %v8446_v10  ;;  %v8448_v9 = vmul.f32 %v10320_v0, %v15407_v57 }
 0x50c   :  { %9197 = vst [vmem:[%s15985_s4 + $0xd8] sm:$0xff] %v10193_v58  ;;  %v8587_v59 = vadd.f32 %v15421_v4, %v8447_v1  ;;  %v8449_v22 = vmul.f32 %v10321_v13, %v15409_v11 }
 0x50d   :  { %v8714_v12 = vmax.f32 %v8586_v2, 0.0  ;;  %v8588_v38 = vadd.f32 %v15412_v3, %v8448_v9 }
 0x50e   :  { %v8715_v53 = vmax.f32 %v8587_v59, 0.0  ;;  %v8589_v5 = vadd.f32 %v15421_v4, %v8449_v22  ;;  %v8209_v39 = vpop.f32.mrb[60].mxu0 }
 0x50f   :  { %v8716_v42 = vmax.f32 %v8588_v38, 0.0  ;;  %v10322_v26 = vadd.f32 %v8209_v39, %v16020_v23  ;;  %v8211_v61 = vpop.f32.mrb[61].mxu0 }
 0x510   :  { %v10194_v51 = vpack.c.bf16 %v8715_v53, %v8714_v12  ;;  %v8717_v27 = vmax.f32 %v8589_v5, 0.0  ;;  %v10323_v16 = vadd.f32 %v8211_v61, %v16021_v45  ;;  %v8213_v35 = vpop.f32.mrb[62].mxu0 }
 0x511   :  { %v8450_v20 = vmul.f32 %v10322_v26, %v15407_v57  ;;  %v10324_v24 = vadd.f32 %v8213_v35, %v16022_v17  ;;  %v8215_v29 = vpop.f32.mrb[63].mxu0 }
 0x512   :  { %9198 = vst [vmem:[%s15985_s4 + $0xe0] sm:$0xff] %v10194_v51  ;;  %v10195_v44 = vpack.c.bf16 %v8717_v27, %v8716_v42  ;;  %v8451_v46 = vmul.f32 %v10323_v16, %v15409_v11  ;;  %v10325_v41 = vadd.f32 %v8215_v29, %v16023_v36 }
 0x513   :  { %v8590_v28 = vadd.f32 %v15412_v3, %v8450_v20  ;;  %v8452_v14 = vmul.f32 %v10324_v24, %v15407_v57 }
 0x514   :  { %9199 = vst [vmem:[%s15985_s4 + $0xe8] sm:$0xff] %v10195_v44  ;;  %v8591_v40 = vadd.f32 %v15421_v4, %v8451_v46  ;;  %v8453_v54 = vmul.f32 %v10325_v41, %v15409_v11 }
 0x515   :  { %v8718_v33 = vmax.f32 %v8590_v28, 0.0  ;;  %v8592_v48 = vadd.f32 %v15412_v3, %v8452_v14  ;;  %v6807_v49 = vpop.f32.mrb[64].mxu1 }
 0x516   :  { %v8719_v6 = vmax.f32 %v8591_v40, 0.0  ;;  %v8593_v15 = vadd.f32 %v15421_v4, %v8453_v54  ;;  %v8219_v56 = vpop.f32.mrb[64].mxu0  ;;  %v6809_v47 = vpop.f32.mrb[65].mxu1 }
 0x517   :  { %v8720_v18 = vmax.f32 %v8592_v48, 0.0  ;;  %v10326_v30 = vadd.f32 %v8219_v56, %v6807_v49  ;;  %v8221_v62 = vpop.f32.mrb[65].mxu0  ;;  %v6811_v34 = vpop.f32.mrb[66].mxu1 }
 0x518   :  { %v10196_v31 = vpack.c.bf16 %v8719_v6, %v8718_v33  ;;  %v8721_v32 = vmax.f32 %v8593_v15, 0.0  ;;  %v10327_v60 = vadd.f32 %v8221_v62, %v6809_v47  ;;  %v8223_v52 = vpop.f32.mrb[66].mxu0  ;;  %v6813_v7 = vpop.f32.mrb[67].mxu1 }
 0x519   :  { %v8454_v21 = vmul.f32 %v10326_v30, %v15407_v57  ;;  %v10328_v19 = vadd.f32 %v8223_v52, %v6811_v34  ;;  %v8225_v55 = vpop.f32.mrb[67].mxu0 }
 0x51a   :  { %9200 = vst [vmem:[%s15985_s4 + $0xf0] sm:$0xff] %v10196_v31  ;;  %v10197_v37 = vpack.c.bf16 %v8721_v32, %v8720_v18  ;;  %v8455_v43 = vmul.f32 %v10327_v60, %v15409_v11  ;;  %v10329_v63 = vadd.f32 %v8225_v55, %v6813_v7 }
 0x51b   :  { %v8594_v10 = vadd.f32 %v15412_v3, %v8454_v21  ;;  %v8456_v25 = vmul.f32 %v10328_v19, %v15407_v57 }
 0x51c   :  { %9201 = vst [vmem:[%s15985_s4 + $0xf8] sm:$0xff] %v10197_v37  ;;  %v8595_v0 = vadd.f32 %v15421_v4, %v8455_v43  ;;  %v8457_v50 = vmul.f32 %v10329_v63, %v15409_v11 }
 0x51d   :  { %v8722_v58 = vmax.f32 %v8594_v10, 0.0  ;;  %v8596_v1 = vadd.f32 %v15412_v3, %v8456_v25  ;;  %v6817_v2 = vpop.f32.mrb[68].mxu1 }
 0x51e   :  { %v8723_v8 = vmax.f32 %v8595_v0, 0.0  ;;  %v8597_v13 = vadd.f32 %v15421_v4, %v8457_v50  ;;  %v8229_v9 = vpop.f32.mrb[68].mxu0  ;;  %v6819_v12 = vpop.f32.mrb[69].mxu1 }
 0x51f   :  { %v8724_v59 = vmax.f32 %v8596_v1, 0.0  ;;  %v10330_v22 = vadd.f32 %v8229_v9, %v6817_v2  ;;  %v8231_v38 = vpop.f32.mrb[69].mxu0  ;;  %v6821_v42 = vpop.f32.mrb[70].mxu1 }
 0x520   :  { %v10198_v53 = vpack.c.bf16 %v8723_v8, %v8722_v58  ;;  %v8725_v5 = vmax.f32 %v8597_v13, 0.0  ;;  %v10331_v39 = vadd.f32 %v8231_v38, %v6819_v12  ;;  %v8233_v23 = vpop.f32.mrb[70].mxu0  ;;  %v6823_v51 = vpop.f32.mrb[71].mxu1 }
 0x521   :  { %v8458_v26 = vmul.f32 %v10330_v22, %v15407_v57  ;;  %v10332_v61 = vadd.f32 %v8233_v23, %v6821_v42  ;;  %v8235_v27 = vpop.f32.mrb[71].mxu0 }
 0x522   :  { %9202 = vst [vmem:[%s15985_s4 + $0x100] sm:$0xff] %v10198_v53  ;;  %v10199_v45 = vpack.c.bf16 %v8725_v5, %v8724_v59  ;;  %v8459_v16 = vmul.f32 %v10331_v39, %v15409_v11  ;;  %v10333_v35 = vadd.f32 %v8235_v27, %v6823_v51 }
 0x523   :  { %v8598_v20 = vadd.f32 %v15412_v3, %v8458_v26  ;;  %v8460_v17 = vmul.f32 %v10332_v61, %v15407_v57 }
 0x524   :  { %9203 = vst [vmem:[%s15985_s4 + $0x108] sm:$0xff] %v10199_v45  ;;  %v8599_v24 = vadd.f32 %v15421_v4, %v8459_v16  ;;  %v8461_v29 = vmul.f32 %v10333_v35, %v15409_v11 }
 0x525   :  { %v8726_v44 = vmax.f32 %v8598_v20, 0.0  ;;  %v8600_v46 = vadd.f32 %v15412_v3, %v8460_v17  ;;  %v6827_v28 = vpop.f32.mrb[72].mxu1 }
 0x526   :  { %v8727_v36 = vmax.f32 %v8599_v24, 0.0  ;;  %v8601_v41 = vadd.f32 %v15421_v4, %v8461_v29  ;;  %v8239_v14 = vpop.f32.mrb[72].mxu0  ;;  %v6829_v33 = vpop.f32.mrb[73].mxu1 }
 0x527   :  { %v8728_v40 = vmax.f32 %v8600_v46, 0.0  ;;  %v10334_v54 = vadd.f32 %v8239_v14, %v6827_v28  ;;  %v8241_v48 = vpop.f32.mrb[73].mxu0  ;;  %v6831_v56 = vpop.f32.mrb[74].mxu1 }
 0x528   :  { %v10200_v6 = vpack.c.bf16 %v8727_v36, %v8726_v44  ;;  %v8729_v15 = vmax.f32 %v8601_v41, 0.0  ;;  %v10335_v49 = vadd.f32 %v8241_v48, %v6829_v33  ;;  %v8243_v18 = vpop.f32.mrb[74].mxu0  ;;  %v6833_v62 = vpop.f32.mrb[75].mxu1 }
 0x529   :  { %v8462_v30 = vmul.f32 %v10334_v54, %v15407_v57  ;;  %v10336_v47 = vadd.f32 %v8243_v18, %v6831_v56  ;;  %v8245_v31 = vpop.f32.mrb[75].mxu0 }
 0x52a   :  { %9204 = vst [vmem:[%s15985_s4 + $0x110] sm:$0xff] %v10200_v6  ;;  %v10201_v32 = vpack.c.bf16 %v8729_v15, %v8728_v40  ;;  %v8463_v60 = vmul.f32 %v10335_v49, %v15409_v11  ;;  %v10337_v34 = vadd.f32 %v8245_v31, %v6833_v62 }
 0x52b   :  { %v8602_v52 = vadd.f32 %v15412_v3, %v8462_v30  ;;  %v8464_v21 = vmul.f32 %v10336_v47, %v15407_v57 }
 0x52c   :  { %9205 = vst [vmem:[%s15985_s4 + $0x118] sm:$0xff] %v10201_v32  ;;  %v8603_v19 = vadd.f32 %v15421_v4, %v8463_v60  ;;  %v8465_v7 = vmul.f32 %v10337_v34, %v15409_v11 }
 0x52d   :  { %v8730_v55 = vmax.f32 %v8602_v52, 0.0  ;;  %v8604_v37 = vadd.f32 %v15412_v3, %v8464_v21  ;;  %v6837_v10 = vpop.f32.mrb[76].mxu1 }
 0x52e   :  { %v8731_v43 = vmax.f32 %v8603_v19, 0.0  ;;  %v8605_v63 = vadd.f32 %v15421_v4, %v8465_v7  ;;  %v8249_v25 = vpop.f32.mrb[76].mxu0  ;;  %v6839_v58 = vpop.f32.mrb[77].mxu1 }
 0x52f   :  { %v8732_v0 = vmax.f32 %v8604_v37, 0.0  ;;  %v10338_v50 = vadd.f32 %v8249_v25, %v6837_v10  ;;  %v8251_v1 = vpop.f32.mrb[77].mxu0  ;;  %v6841_v9 = vpop.f32.mrb[78].mxu1 }
 0x530   :  { %v10202_v8 = vpack.c.bf16 %v8731_v43, %v8730_v55  ;;  %v8733_v13 = vmax.f32 %v8605_v63, 0.0  ;;  %v10339_v2 = vadd.f32 %v8251_v1, %v6839_v58  ;;  %v8253_v59 = vpop.f32.mrb[78].mxu0  ;;  %v6843_v38 = vpop.f32.mrb[79].mxu1 }
 0x531   :  { %v8466_v22 = vmul.f32 %v10338_v50, %v15407_v57  ;;  %v10340_v12 = vadd.f32 %v8253_v59, %v6841_v9  ;;  %v8255_v53 = vpop.f32.mrb[79].mxu0 }
 0x532   :  { %9206 = vst [vmem:[%s15985_s4 + $0x120] sm:$0xff] %v10202_v8  ;;  %v10203_v5 = vpack.c.bf16 %v8733_v13, %v8732_v0  ;;  %v8467_v39 = vmul.f32 %v10339_v2, %v15409_v11  ;;  %v10341_v42 = vadd.f32 %v8255_v53, %v6843_v38 }
 0x533   :  { %v8606_v23 = vadd.f32 %v15412_v3, %v8466_v22  ;;  %v8468_v26 = vmul.f32 %v10340_v12, %v15407_v57 }
 0x534   :  { %9207 = vst [vmem:[%s15985_s4 + $0x128] sm:$0xff] %v10203_v5  ;;  %v8607_v61 = vadd.f32 %v15421_v4, %v8467_v39  ;;  %v8469_v51 = vmul.f32 %v10341_v42, %v15409_v11 }
 0x535   :  { %v8734_v27 = vmax.f32 %v8606_v23, 0.0  ;;  %v8608_v45 = vadd.f32 %v15412_v3, %v8468_v26  ;;  %v6847_v20 = vpop.f32.mrb[80].mxu1 }
 0x536   :  { %v8735_v16 = vmax.f32 %v8607_v61, 0.0  ;;  %v8609_v35 = vadd.f32 %v15421_v4, %v8469_v51  ;;  %v8259_v17 = vpop.f32.mrb[80].mxu0  ;;  %v6849_v44 = vpop.f32.mrb[81].mxu1 }
 0x537   :  { %v8736_v24 = vmax.f32 %v8608_v45, 0.0  ;;  %v10342_v29 = vadd.f32 %v8259_v17, %v6847_v20  ;;  %v8261_v46 = vpop.f32.mrb[81].mxu0  ;;  %v6851_v14 = vpop.f32.mrb[82].mxu1 }
 0x538   :  { %v10204_v36 = vpack.c.bf16 %v8735_v16, %v8734_v27  ;;  %v8737_v41 = vmax.f32 %v8609_v35, 0.0  ;;  %v10343_v28 = vadd.f32 %v8261_v46, %v6849_v44  ;;  %v8263_v40 = vpop.f32.mrb[82].mxu0  ;;  %v6853_v48 = vpop.f32.mrb[83].mxu1 }
 0x539   :  { %v8470_v54 = vmul.f32 %v10342_v29, %v15407_v57  ;;  %v10344_v33 = vadd.f32 %v8263_v40, %v6851_v14  ;;  %v8265_v6 = vpop.f32.mrb[83].mxu0 }
 0x53a   :  { %9208 = vst [vmem:[%s15985_s4 + $0x130] sm:$0xff] %v10204_v36  ;;  %v10205_v15 = vpack.c.bf16 %v8737_v41, %v8736_v24  ;;  %v8471_v49 = vmul.f32 %v10343_v28, %v15409_v11  ;;  %v10345_v56 = vadd.f32 %v8265_v6, %v6853_v48 }
 0x53b   :  { %v8610_v18 = vadd.f32 %v15412_v3, %v8470_v54  ;;  %v8472_v30 = vmul.f32 %v10344_v33, %v15407_v57 }
 0x53c   :  { %9209 = vst [vmem:[%s15985_s4 + $0x138] sm:$0xff] %v10205_v15  ;;  %v8611_v47 = vadd.f32 %v15421_v4, %v8471_v49  ;;  %v8473_v62 = vmul.f32 %v10345_v56, %v15409_v11 }
 0x53d   :  { %v8738_v31 = vmax.f32 %v8610_v18, 0.0  ;;  %v8612_v32 = vadd.f32 %v15412_v3, %v8472_v30  ;;  %v6857_v52 = vpop.f32.mrb[84].mxu1 }
 0x53e   :  { %v8739_v60 = vmax.f32 %v8611_v47, 0.0  ;;  %v8613_v34 = vadd.f32 %v15421_v4, %v8473_v62  ;;  %v8269_v21 = vpop.f32.mrb[84].mxu0  ;;  %v6859_v55 = vpop.f32.mrb[85].mxu1 }
 0x53f   :  { %v8740_v19 = vmax.f32 %v8612_v32, 0.0  ;;  %v10346_v7 = vadd.f32 %v8269_v21, %v6857_v52  ;;  %v8271_v37 = vpop.f32.mrb[85].mxu0  ;;  %v6861_v25 = vpop.f32.mrb[86].mxu1 }
 0x540   :  { %v10206_v43 = vpack.c.bf16 %v8739_v60, %v8738_v31  ;;  %v8741_v63 = vmax.f32 %v8613_v34, 0.0  ;;  %v10347_v10 = vadd.f32 %v8271_v37, %v6859_v55  ;;  %v8273_v0 = vpop.f32.mrb[86].mxu0  ;;  %v6863_v1 = vpop.f32.mrb[87].mxu1 }
 0x541   :  { %v8474_v50 = vmul.f32 %v10346_v7, %v15407_v57  ;;  %v10348_v58 = vadd.f32 %v8273_v0, %v6861_v25  ;;  %v8275_v8 = vpop.f32.mrb[87].mxu0 }
 0x542   :  { %9210 = vst [vmem:[%s15985_s4 + $0x140] sm:$0xff] %v10206_v43  ;;  %v10207_v13 = vpack.c.bf16 %v8741_v63, %v8740_v19  ;;  %v8475_v2 = vmul.f32 %v10347_v10, %v15409_v11  ;;  %v10349_v9 = vadd.f32 %v8275_v8, %v6863_v1 }
 0x543   :  { %v8614_v59 = vadd.f32 %v15412_v3, %v8474_v50  ;;  %v8476_v22 = vmul.f32 %v10348_v58, %v15407_v57 }
 0x544   :  { %9211 = vst [vmem:[%s15985_s4 + $0x148] sm:$0xff] %v10207_v13  ;;  %v8615_v12 = vadd.f32 %v15421_v4, %v8475_v2  ;;  %v8477_v38 = vmul.f32 %v10349_v9, %v15409_v11 }
 0x545   :  { %v8742_v53 = vmax.f32 %v8614_v59, 0.0  ;;  %v8616_v5 = vadd.f32 %v15412_v3, %v8476_v22  ;;  %v6867_v23 = vpop.f32.mrb[88].mxu1 }
 0x546   :  { %v8743_v39 = vmax.f32 %v8615_v12, 0.0  ;;  %v8617_v42 = vadd.f32 %v15421_v4, %v8477_v38  ;;  %v8279_v26 = vpop.f32.mrb[88].mxu0  ;;  %v6869_v27 = vpop.f32.mrb[89].mxu1 }
 0x547   :  { %v8744_v61 = vmax.f32 %v8616_v5, 0.0  ;;  %v10350_v51 = vadd.f32 %v8279_v26, %v6867_v23  ;;  %v8281_v45 = vpop.f32.mrb[89].mxu0  ;;  %v6871_v17 = vpop.f32.mrb[90].mxu1 }
 0x548   :  { %v10208_v16 = vpack.c.bf16 %v8743_v39, %v8742_v53  ;;  %v8745_v35 = vmax.f32 %v8617_v42, 0.0  ;;  %v10351_v20 = vadd.f32 %v8281_v45, %v6869_v27  ;;  %v8283_v24 = vpop.f32.mrb[90].mxu0  ;;  %v6873_v46 = vpop.f32.mrb[91].mxu1 }
 0x549   :  { %v8478_v29 = vmul.f32 %v10350_v51, %v15407_v57  ;;  %v10352_v44 = vadd.f32 %v8283_v24, %v6871_v17  ;;  %v8285_v36 = vpop.f32.mrb[91].mxu0 }
 0x54a   :  { %9212 = vst [vmem:[%s15985_s4 + $0x150] sm:$0xff] %v10208_v16  ;;  %v10209_v41 = vpack.c.bf16 %v8745_v35, %v8744_v61  ;;  %v8479_v28 = vmul.f32 %v10351_v20, %v15409_v11  ;;  %v10353_v14 = vadd.f32 %v8285_v36, %v6873_v46 }
 0x54b   :  { %v8618_v40 = vadd.f32 %v15412_v3, %v8478_v29  ;;  %v8480_v54 = vmul.f32 %v10352_v44, %v15407_v57 }
 0x54c   :  { %9213 = vst [vmem:[%s15985_s4 + $0x158] sm:$0xff] %v10209_v41  ;;  %v8619_v33 = vadd.f32 %v15421_v4, %v8479_v28  ;;  %v8481_v48 = vmul.f32 %v10353_v14, %v15409_v11 }
 0x54d   :  { %v8746_v6 = vmax.f32 %v8618_v40, 0.0  ;;  %v8620_v15 = vadd.f32 %v15412_v3, %v8480_v54  ;;  %v6877_v18 = vpop.f32.mrb[92].mxu1 }
 0x54e   :  { %v8747_v49 = vmax.f32 %v8619_v33, 0.0  ;;  %v8621_v56 = vadd.f32 %v15421_v4, %v8481_v48  ;;  %v8289_v30 = vpop.f32.mrb[92].mxu0  ;;  %v6879_v31 = vpop.f32.mrb[93].mxu1 }
 0x54f   :  { %v8748_v47 = vmax.f32 %v8620_v15, 0.0  ;;  %v10354_v62 = vadd.f32 %v8289_v30, %v6877_v18  ;;  %v8291_v32 = vpop.f32.mrb[93].mxu0  ;;  %v6881_v21 = vpop.f32.mrb[94].mxu1 }
 0x550   :  { %v10210_v60 = vpack.c.bf16 %v8747_v49, %v8746_v6  ;;  %v8749_v34 = vmax.f32 %v8621_v56, 0.0  ;;  %v10355_v52 = vadd.f32 %v8291_v32, %v6879_v31  ;;  %v8293_v19 = vpop.f32.mrb[94].mxu0  ;;  %v6883_v37 = vpop.f32.mrb[95].mxu1 }
 0x551   :  { %v8482_v7 = vmul.f32 %v10354_v62, %v15407_v57  ;;  %v10356_v55 = vadd.f32 %v8293_v19, %v6881_v21  ;;  %v8295_v43 = vpop.f32.mrb[95].mxu0 }
 0x552   :  { %9214 = vst [vmem:[%s15985_s4 + $0x160] sm:$0xff] %v10210_v60  ;;  %v10211_v63 = vpack.c.bf16 %v8749_v34, %v8748_v47  ;;  %v8483_v10 = vmul.f32 %v10355_v52, %v15409_v11  ;;  %v10357_v25 = vadd.f32 %v8295_v43, %v6883_v37 }
 0x553   :  { %v8622_v0 = vadd.f32 %v15412_v3, %v8482_v7  ;;  %v8484_v50 = vmul.f32 %v10356_v55, %v15407_v57 }
 0x554   :  { %9215 = vst [vmem:[%s15985_s4 + $0x168] sm:$0xff] %v10211_v63  ;;  %v8623_v58 = vadd.f32 %v15421_v4, %v8483_v10  ;;  %v8485_v1 = vmul.f32 %v10357_v25, %v15409_v11 }
 0x555   :  { %v8750_v8 = vmax.f32 %v8622_v0, 0.0  ;;  %v8624_v13 = vadd.f32 %v15412_v3, %v8484_v50  ;;  %v6887_v59 = vpop.f32.mrb[96].mxu1 }
 0x556   :  { %v8751_v2 = vmax.f32 %v8623_v58, 0.0  ;;  %v8625_v9 = vadd.f32 %v15421_v4, %v8485_v1  ;;  %v8299_v22 = vpop.f32.mrb[96].mxu0  ;;  %v6889_v53 = vpop.f32.mrb[97].mxu1 }
 0x557   :  { %v8752_v12 = vmax.f32 %v8624_v13, 0.0  ;;  %v10358_v38 = vadd.f32 %v8299_v22, %v6887_v59  ;;  %v8301_v5 = vpop.f32.mrb[97].mxu0  ;;  %v6891_v26 = vpop.f32.mrb[98].mxu1 }
 0x558   :  { %v10212_v39 = vpack.c.bf16 %v8751_v2, %v8750_v8  ;;  %v8753_v42 = vmax.f32 %v8625_v9, 0.0  ;;  %v10359_v23 = vadd.f32 %v8301_v5, %v6889_v53  ;;  %v8303_v61 = vpop.f32.mrb[98].mxu0  ;;  %v6893_v45 = vpop.f32.mrb[99].mxu1 }
 0x559   :  { %v8486_v51 = vmul.f32 %v10358_v38, %v15407_v57  ;;  %v10360_v27 = vadd.f32 %v8303_v61, %v6891_v26  ;;  %v8305_v16 = vpop.f32.mrb[99].mxu0 }
 0x55a   :  { %9216 = vst [vmem:[%s15985_s4 + $0x170] sm:$0xff] %v10212_v39  ;;  %v10213_v35 = vpack.c.bf16 %v8753_v42, %v8752_v12  ;;  %v8487_v20 = vmul.f32 %v10359_v23, %v15409_v11  ;;  %v10361_v17 = vadd.f32 %v8305_v16, %v6893_v45 }
 0x55b   :  { %v8626_v24 = vadd.f32 %v15412_v3, %v8486_v51  ;;  %v8488_v29 = vmul.f32 %v10360_v27, %v15407_v57 }
 0x55c   :  { %9217 = vst [vmem:[%s15985_s4 + $0x178] sm:$0xff] %v10213_v35  ;;  %v8627_v44 = vadd.f32 %v15421_v4, %v8487_v20  ;;  %v8489_v46 = vmul.f32 %v10361_v17, %v15409_v11 }
 0x55d   :  { %v8754_v36 = vmax.f32 %v8626_v24, 0.0  ;;  %v8628_v41 = vadd.f32 %v15412_v3, %v8488_v29  ;;  %v6897_v40 = vpop.f32.mrb[100].mxu1 }
 0x55e   :  { %v8755_v28 = vmax.f32 %v8627_v44, 0.0  ;;  %v8629_v14 = vadd.f32 %v15421_v4, %v8489_v46  ;;  %v8309_v54 = vpop.f32.mrb[100].mxu0  ;;  %v6899_v6 = vpop.f32.mrb[101].mxu1 }
 0x55f   :  { %v8756_v33 = vmax.f32 %v8628_v41, 0.0  ;;  %v10362_v48 = vadd.f32 %v8309_v54, %v6897_v40  ;;  %v8311_v15 = vpop.f32.mrb[101].mxu0  ;;  %v6901_v30 = vpop.f32.mrb[102].mxu1 }
 0x560   :  { %v10214_v49 = vpack.c.bf16 %v8755_v28, %v8754_v36  ;;  %v8757_v56 = vmax.f32 %v8629_v14, 0.0  ;;  %v10363_v18 = vadd.f32 %v8311_v15, %v6899_v6  ;;  %v8313_v47 = vpop.f32.mrb[102].mxu0  ;;  %v6903_v32 = vpop.f32.mrb[103].mxu1 }
 0x561   :  { %v8490_v62 = vmul.f32 %v10362_v48, %v15407_v57  ;;  %v10364_v31 = vadd.f32 %v8313_v47, %v6901_v30  ;;  %v8315_v60 = vpop.f32.mrb[103].mxu0 }
 0x562   :  { %9218 = vst [vmem:[%s15985_s4 + $0x180] sm:$0xff] %v10214_v49  ;;  %v10215_v34 = vpack.c.bf16 %v8757_v56, %v8756_v33  ;;  %v8491_v52 = vmul.f32 %v10363_v18, %v15409_v11  ;;  %v10365_v21 = vadd.f32 %v8315_v60, %v6903_v32 }
 0x563   :  { %v8630_v19 = vadd.f32 %v15412_v3, %v8490_v62  ;;  %v8492_v7 = vmul.f32 %v10364_v31, %v15407_v57 }
 0x564   :  { %9219 = vst [vmem:[%s15985_s4 + $0x188] sm:$0xff] %v10215_v34  ;;  %v8631_v55 = vadd.f32 %v15421_v4, %v8491_v52  ;;  %v8493_v37 = vmul.f32 %v10365_v21, %v15409_v11 }
 0x565   :  { %v8758_v43 = vmax.f32 %v8630_v19, 0.0  ;;  %v8632_v63 = vadd.f32 %v15412_v3, %v8492_v7  ;;  %v6907_v0 = vpop.f32.mrb[104].mxu1 }
 0x566   :  { %v8759_v10 = vmax.f32 %v8631_v55, 0.0  ;;  %v8633_v25 = vadd.f32 %v15421_v4, %v8493_v37  ;;  %v8319_v50 = vpop.f32.mrb[104].mxu0  ;;  %v6909_v8 = vpop.f32.mrb[105].mxu1 }
 0x567   :  { %v8760_v58 = vmax.f32 %v8632_v63, 0.0  ;;  %v10366_v1 = vadd.f32 %v8319_v50, %v6907_v0  ;;  %v8321_v13 = vpop.f32.mrb[105].mxu0  ;;  %v6911_v22 = vpop.f32.mrb[106].mxu1 }
 0x568   :  { %v10216_v2 = vpack.c.bf16 %v8759_v10, %v8758_v43  ;;  %v8761_v9 = vmax.f32 %v8633_v25, 0.0  ;;  %v10367_v59 = vadd.f32 %v8321_v13, %v6909_v8  ;;  %v8323_v12 = vpop.f32.mrb[106].mxu0  ;;  %v6913_v5 = vpop.f32.mrb[107].mxu1 }
 0x569   :  { %v8494_v38 = vmul.f32 %v10366_v1, %v15407_v57  ;;  %v10368_v53 = vadd.f32 %v8323_v12, %v6911_v22  ;;  %v8325_v39 = vpop.f32.mrb[107].mxu0 }
 0x56a   :  { %9220 = vst [vmem:[%s15985_s4 + $0x190] sm:$0xff] %v10216_v2  ;;  %v10217_v42 = vpack.c.bf16 %v8761_v9, %v8760_v58  ;;  %v8495_v23 = vmul.f32 %v10367_v59, %v15409_v11  ;;  %v10369_v26 = vadd.f32 %v8325_v39, %v6913_v5 }
 0x56b   :  { %v8634_v61 = vadd.f32 %v15412_v3, %v8494_v38  ;;  %v8496_v51 = vmul.f32 %v10368_v53, %v15407_v57 }
 0x56c   :  { %9221 = vst [vmem:[%s15985_s4 + $0x198] sm:$0xff] %v10217_v42  ;;  %v8635_v27 = vadd.f32 %v15421_v4, %v8495_v23  ;;  %v8497_v45 = vmul.f32 %v10369_v26, %v15409_v11 }
 0x56d   :  { %v8762_v16 = vmax.f32 %v8634_v61, 0.0  ;;  %v8636_v35 = vadd.f32 %v15412_v3, %v8496_v51  ;;  %v6917_v24 = vpop.f32.mrb[108].mxu1 }
 0x56e   :  { %v8763_v20 = vmax.f32 %v8635_v27, 0.0  ;;  %v8637_v17 = vadd.f32 %v15421_v4, %v8497_v45  ;;  %v8329_v29 = vpop.f32.mrb[108].mxu0  ;;  %v6919_v36 = vpop.f32.mrb[109].mxu1 }
 0x56f   :  { %v8764_v44 = vmax.f32 %v8636_v35, 0.0  ;;  %v10370_v46 = vadd.f32 %v8329_v29, %v6917_v24  ;;  %v8331_v41 = vpop.f32.mrb[109].mxu0  ;;  %v6921_v54 = vpop.f32.mrb[110].mxu1 }
 0x570   :  { %v10218_v28 = vpack.c.bf16 %v8763_v20, %v8762_v16  ;;  %v8765_v14 = vmax.f32 %v8637_v17, 0.0  ;;  %v10371_v40 = vadd.f32 %v8331_v41, %v6919_v36  ;;  %v8333_v33 = vpop.f32.mrb[110].mxu0  ;;  %v6923_v15 = vpop.f32.mrb[111].mxu1 }
 0x571   :  { %v8498_v48 = vmul.f32 %v10370_v46, %v15407_v57  ;;  %v10372_v6 = vadd.f32 %v8333_v33, %v6921_v54  ;;  %v8335_v49 = vpop.f32.mrb[111].mxu0 }
 0x572   :  { %9222 = vst [vmem:[%s15985_s4 + $0x1a0] sm:$0xff] %v10218_v28  ;;  %v10219_v56 = vpack.c.bf16 %v8765_v14, %v8764_v44  ;;  %v8499_v18 = vmul.f32 %v10371_v40, %v15409_v11  ;;  %v10373_v30 = vadd.f32 %v8335_v49, %v6923_v15 }
 0x573   :  { %v8638_v47 = vadd.f32 %v15412_v3, %v8498_v48  ;;  %v8500_v62 = vmul.f32 %v10372_v6, %v15407_v57 }
 0x574   :  { %9223 = vst [vmem:[%s15985_s4 + $0x1a8] sm:$0xff] %v10219_v56  ;;  %v8639_v31 = vadd.f32 %v15421_v4, %v8499_v18  ;;  %v8501_v32 = vmul.f32 %v10373_v30, %v15409_v11 }
 0x575   :  { %v8766_v60 = vmax.f32 %v8638_v47, 0.0  ;;  %v8640_v34 = vadd.f32 %v15412_v3, %v8500_v62  ;;  %v6927_v19 = vpop.f32.mrb[112].mxu1 }
 0x576   :  { %v8767_v52 = vmax.f32 %v8639_v31, 0.0  ;;  %v8641_v21 = vadd.f32 %v15421_v4, %v8501_v32  ;;  %v8339_v7 = vpop.f32.mrb[112].mxu0  ;;  %v6929_v43 = vpop.f32.mrb[113].mxu1 }
 0x577   :  { %v8768_v55 = vmax.f32 %v8640_v34, 0.0  ;;  %v10374_v37 = vadd.f32 %v8339_v7, %v6927_v19  ;;  %v8341_v63 = vpop.f32.mrb[113].mxu0  ;;  %v6931_v50 = vpop.f32.mrb[114].mxu1 }
 0x578   :  { %v10220_v10 = vpack.c.bf16 %v8767_v52, %v8766_v60  ;;  %v8769_v25 = vmax.f32 %v8641_v21, 0.0  ;;  %v10375_v0 = vadd.f32 %v8341_v63, %v6929_v43  ;;  %v8343_v58 = vpop.f32.mrb[114].mxu0  ;;  %v6933_v13 = vpop.f32.mrb[115].mxu1 }
 0x579   :  { %v8502_v1 = vmul.f32 %v10374_v37, %v15407_v57  ;;  %v10376_v8 = vadd.f32 %v8343_v58, %v6931_v50  ;;  %v8345_v2 = vpop.f32.mrb[115].mxu0 }
 0x57a   :  { %9224 = vst [vmem:[%s15985_s4 + $0x1b0] sm:$0xff] %v10220_v10  ;;  %v10221_v9 = vpack.c.bf16 %v8769_v25, %v8768_v55  ;;  %v8503_v59 = vmul.f32 %v10375_v0, %v15409_v11  ;;  %v10377_v22 = vadd.f32 %v8345_v2, %v6933_v13 }
 0x57b   :  { %v8642_v12 = vadd.f32 %v15412_v3, %v8502_v1  ;;  %v8504_v38 = vmul.f32 %v10376_v8, %v15407_v57 }
 0x57c   :  { %9225 = vst [vmem:[%s15985_s4 + $0x1b8] sm:$0xff] %v10221_v9  ;;  %v8643_v53 = vadd.f32 %v15421_v4, %v8503_v59  ;;  %v8505_v5 = vmul.f32 %v10377_v22, %v15409_v11 }
 0x57d   :  { %v8770_v39 = vmax.f32 %v8642_v12, 0.0  ;;  %v8644_v42 = vadd.f32 %v15412_v3, %v8504_v38  ;;  %v6937_v61 = vpop.f32.mrb[116].mxu1 }
 0x57e   :  { %v8771_v23 = vmax.f32 %v8643_v53, 0.0  ;;  %v8645_v26 = vadd.f32 %v15421_v4, %v8505_v5  ;;  %v8349_v51 = vpop.f32.mrb[116].mxu0  ;;  %v6939_v16 = vpop.f32.mrb[117].mxu1 }
 0x57f   :  { %v8772_v27 = vmax.f32 %v8644_v42, 0.0  ;;  %v10378_v45 = vadd.f32 %v8349_v51, %v6937_v61  ;;  %v8351_v35 = vpop.f32.mrb[117].mxu0  ;;  %v6941_v29 = vpop.f32.mrb[118].mxu1 }
 0x580   :  { %v10222_v20 = vpack.c.bf16 %v8771_v23, %v8770_v39  ;;  %v8773_v17 = vmax.f32 %v8645_v26, 0.0  ;;  %v10379_v24 = vadd.f32 %v8351_v35, %v6939_v16  ;;  %v8353_v44 = vpop.f32.mrb[118].mxu0  ;;  %v6943_v41 = vpop.f32.mrb[119].mxu1 }
 0x581   :  { %v8506_v46 = vmul.f32 %v10378_v45, %v15407_v57  ;;  %v10380_v36 = vadd.f32 %v8353_v44, %v6941_v29  ;;  %v8355_v28 = vpop.f32.mrb[119].mxu0 }
 0x582   :  { %9226 = vst [vmem:[%s15985_s4 + $0x1c0] sm:$0xff] %v10222_v20  ;;  %v10223_v14 = vpack.c.bf16 %v8773_v17, %v8772_v27  ;;  %v8507_v40 = vmul.f32 %v10379_v24, %v15409_v11  ;;  %v10381_v54 = vadd.f32 %v8355_v28, %v6943_v41 }
 0x583   :  { %v8646_v33 = vadd.f32 %v15412_v3, %v8506_v46  ;;  %v8508_v48 = vmul.f32 %v10380_v36, %v15407_v57 }
 0x584   :  { %9227 = vst [vmem:[%s15985_s4 + $0x1c8] sm:$0xff] %v10223_v14  ;;  %v8647_v6 = vadd.f32 %v15421_v4, %v8507_v40  ;;  %v8509_v15 = vmul.f32 %v10381_v54, %v15409_v11 }
 0x585   :  { %v8774_v49 = vmax.f32 %v8646_v33, 0.0  ;;  %v8648_v56 = vadd.f32 %v15412_v3, %v8508_v48  ;;  %v6947_v47 = vpop.f32.mrb[120].mxu1 }
 0x586   :  { %v8775_v18 = vmax.f32 %v8647_v6, 0.0  ;;  %v8649_v30 = vadd.f32 %v15421_v4, %v8509_v15  ;;  %v8359_v62 = vpop.f32.mrb[120].mxu0  ;;  %v6949_v60 = vpop.f32.mrb[121].mxu1 }
 0x587   :  { %v8776_v31 = vmax.f32 %v8648_v56, 0.0  ;;  %v10382_v32 = vadd.f32 %v8359_v62, %v6947_v47  ;;  %v8361_v34 = vpop.f32.mrb[121].mxu0  ;;  %v6951_v7 = vpop.f32.mrb[122].mxu1 }
 0x588   :  { %v10224_v52 = vpack.c.bf16 %v8775_v18, %v8774_v49  ;;  %v8777_v21 = vmax.f32 %v8649_v30, 0.0  ;;  %v10383_v19 = vadd.f32 %v8361_v34, %v6949_v60  ;;  %v8363_v55 = vpop.f32.mrb[122].mxu0  ;;  %v6953_v63 = vpop.f32.mrb[123].mxu1 }
 0x589   :  { %v8510_v37 = vmul.f32 %v10382_v32, %v15407_v57  ;;  %v10384_v43 = vadd.f32 %v8363_v55, %v6951_v7  ;;  %v8365_v10 = vpop.f32.mrb[123].mxu0 }
 0x58a   :  { %9228 = vst [vmem:[%s15985_s4 + $0x1d0] sm:$0xff] %v10224_v52  ;;  %v10225_v25 = vpack.c.bf16 %v8777_v21, %v8776_v31  ;;  %v8511_v0 = vmul.f32 %v10383_v19, %v15409_v11  ;;  %v10385_v50 = vadd.f32 %v8365_v10, %v6953_v63 }
 0x58b   :  { %v8650_v58 = vadd.f32 %v15412_v3, %v8510_v37  ;;  %v8512_v1 = vmul.f32 %v10384_v43, %v15407_v57 }
 0x58c   :  { %9229 = vst [vmem:[%s15985_s4 + $0x1d8] sm:$0xff] %v10225_v25  ;;  %v8651_v8 = vadd.f32 %v15421_v4, %v8511_v0  ;;  %v8513_v13 = vmul.f32 %v10385_v50, %v15409_v11 }
 0x58d   :  { %v8778_v2 = vmax.f32 %v8650_v58, 0.0  ;;  %v8652_v9 = vadd.f32 %v15412_v3, %v8512_v1  ;;  %v6957_v12 = vpop.f32.mrb[124].mxu1 }
 0x58e   :  { %v8779_v59 = vmax.f32 %v8651_v8, 0.0  ;;  %v8653_v22 = vadd.f32 %v15421_v4, %v8513_v13  ;;  %v8369_v38 = vpop.f32.mrb[124].mxu0  ;;  %v6959_v39 = vpop.f32.mrb[125].mxu1 }
 0x58f   :  { %v8780_v53 = vmax.f32 %v8652_v9, 0.0  ;;  %v10386_v5 = vadd.f32 %v8369_v38, %v6957_v12  ;;  %v8371_v42 = vpop.f32.mrb[125].mxu0  ;;  %v6961_v51 = vpop.f32.mrb[126].mxu1 }
 0x590   :  { %v10226_v23 = vpack.c.bf16 %v8779_v59, %v8778_v2  ;;  %v8781_v26 = vmax.f32 %v8653_v22, 0.0  ;;  %v10387_v61 = vadd.f32 %v8371_v42, %v6959_v39  ;;  %v8373_v27 = vpop.f32.mrb[126].mxu0  ;;  %v6963_v35 = vpop.f32.mrb[127].mxu1 }
 0x591   :  { %v8514_v45 = vmul.f32 %v10386_v5, %v15407_v57  ;;  %v10388_v16 = vadd.f32 %v8373_v27, %v6961_v51  ;;  %v8375_v20 = vpop.f32.mrb[127].mxu0 }
 0x592   :  { %9230 = vst [vmem:[%s15985_s4 + $0x1e0] sm:$0xff] %v10226_v23  ;;  %v10227_v17 = vpack.c.bf16 %v8781_v26, %v8780_v53  ;;  %v8515_v24 = vmul.f32 %v10387_v61, %v15409_v11  ;;  %v10389_v29 = vadd.f32 %v8375_v20, %v6963_v35 }
 0x593   :  { %v8654_v44 = vadd.f32 %v15412_v3, %v8514_v45  ;;  %v8516_v46 = vmul.f32 %v10388_v16, %v15407_v57 }
 0x594   :  { %9231 = vst [vmem:[%s15985_s4 + $0x1e8] sm:$0xff] %v10227_v17  ;;  %v8655_v36 = vadd.f32 %v15421_v4, %v8515_v24  ;;  %v8517_v41 = vmul.f32 %v10389_v29, %v15409_v11 }
 0x595   :  { %v8782_v28 = vmax.f32 %v8654_v44, 0.0  ;;  %v8656_v14 = vadd.f32 %v15412_v3, %v8516_v46 }
 0x596   :  { %v8783_v40 = vmax.f32 %v8655_v36, 0.0  ;;  %v8657_v54 = vadd.f32 %v15421_v4, %v8517_v41 }
 0x597   :  { %v8784_v33 = vmax.f32 %v8656_v14, 0.0 }
 0x598   :  { %v10228_v48 = vpack.c.bf16 %v8783_v40, %v8782_v28  ;;  %v8785_v6 = vmax.f32 %v8657_v54, 0.0 }
 0x59a   :  { %9232 = vst [vmem:[%s15985_s4 + $0x1f0] sm:$0xff] %v10228_v48  ;;  %v10229_v57 = vpack.c.bf16 %v8785_v6, %v8784_v33 }
 0x59c   :  { %9233 = vst [vmem:[%s15985_s4 + $0x1f8] sm:$0xff] %v10229_v57 }

// kernel: spotlight_detection_head.8
= control target key start
LH: loop header
LB: loop body
LE: loop exit
PB: predicated region body
PF: predicated region fallthrough
CT: control target
= control target key end

     0   :  { %v266_v34 = vlaneseq  ;;  %s542_s1 = inlined_call_operand.vmem [shape: bf16[256,256], index: 1, kind: input, shape index: {}]   ;;  %s543_s0 = inlined_call_operand.vmem [shape: bf16[16,256], index: 0, kind: input, shape index: {}]   ;;  %s544_s2 = inlined_call_operand.vmem [shape: f32[1,256], index: 2, kind: input, shape index: {}]   ;;  %s545_s3 = inlined_call_operand.vmem [shape: f32[1,256], index: 3, kind: input, shape index: {}]   ;;  %s546_s4 = inlined_call_operand.vmem [shape: bf16[16,256], index: 4, kind: output, shape index: {}]  }
   0x1   :  { %v352_v0 = vld [vmem:[%s542_s1 + $0x4] ss:$8 sps:$4 sm:$0xff]   ;;  %v354_v1 = vld [vmem:[%s542_s1] ss:$8 sps:$4 sm:$0xff]   ;;  %v355_v2 = vld [vmem:[%s542_s1 + $0x14] ss:$8 sps:$4 sm:$0xff]  }
   0x2   :  { %221 = vmatprep.subr.bf16.mxu0 %v352_v0  ;;  %v357_v3 = vld [vmem:[%s542_s1 + $0x10] ss:$8 sps:$4 sm:$0xff]   ;;  %v358_v4 = vld [vmem:[%s542_s1 + $0x24] ss:$8 sps:$4 sm:$0xff]   ;;  %v360_v5 = vld [vmem:[%s542_s1 + $0x20] ss:$8 sps:$4 sm:$0xff]  }
   0x3   :  { %222 = vmatpush1.bf16.msra.mxu0 %v354_v1  ;;  %v361_v6 = vld [vmem:[%s542_s1 + $0x34] ss:$8 sps:$4 sm:$0xff]   ;;  %v363_v7 = vld [vmem:[%s542_s1 + $0x30] ss:$8 sps:$4 sm:$0xff]   ;;  %v364_v8 = vld [vmem:[%s542_s1 + $0x44] ss:$8 sps:$4 sm:$0xff]  }
   0x4   :  { %223 = vmatprep.subr.bf16.mxu0 %v355_v2  ;;  %v366_v9 = vld [vmem:[%s542_s1 + $0x40] ss:$8 sps:$4 sm:$0xff]   ;;  %v367_v10 = vld [vmem:[%s542_s1 + $0x54] ss:$8 sps:$4 sm:$0xff]   ;;  %v369_v11 = vld [vmem:[%s542_s1 + $0x50] ss:$8 sps:$4 sm:$0xff]  }
   0x5   :  { %v370_v12 = vld [vmem:[%s542_s1 + $0x64] ss:$8 sps:$4 sm:$0xff]   ;;  %v372_v14 = vld [vmem:[%s542_s1 + $0x60] ss:$8 sps:$4 sm:$0xff]   ;;  %v373_v15 = vld [vmem:[%s542_s1 + $0x74] ss:$8 sps:$4 sm:$0xff]  }
   0x6   :  { %v402_v13 = vld [vmem:[%s543_s0 + $0x4] ss:$8 sps:$4 sm:$0xff]   ;;  %v375_v16 = vld [vmem:[%s542_s1 + $0x70] ss:$8 sps:$4 sm:$0xff]   ;;  %v378_v18 = vld [vmem:[%s542_s1 + $0x80] ss:$8 sps:$4 sm:$0xff]  }
   0x7   :  { %224 = vmatpush1.bf16.msra.mxu0 %v357_v3  ;;  %253 = vmatprep.mubr.bf16.mxu0 %v402_v13  ;;  %v376_v17 = vld [vmem:[%s542_s1 + $0x84] ss:$8 sps:$4 sm:$0xff]   ;;  %v379_v19 = vld [vmem:[%s542_s1 + $0x94] ss:$8 sps:$4 sm:$0xff]   ;;  %v381_v20 = vld [vmem:[%s542_s1 + $0x90] ss:$8 sps:$4 sm:$0xff]  }
   0x8   :  { %225 = vmatprep.subr.bf16.mxu0 %v358_v4  ;;  %v382_v21 = vld [vmem:[%s542_s1 + $0xa4] ss:$8 sps:$4 sm:$0xff]   ;;  %v384_v22 = vld [vmem:[%s542_s1 + $0xa0] ss:$8 sps:$4 sm:$0xff]   ;;  %v385_v23 = vld [vmem:[%s542_s1 + $0xb4] ss:$8 sps:$4 sm:$0xff]  }
   0x9   :  { %v387_v24 = vld [vmem:[%s542_s1 + $0xb0] ss:$8 sps:$4 sm:$0xff]   ;;  %v388_v25 = vld [vmem:[%s542_s1 + $0xc4] ss:$8 sps:$4 sm:$0xff]   ;;  %v390_v26 = vld [vmem:[%s542_s1 + $0xc0] ss:$8 sps:$4 sm:$0xff]  }
   0xa   :  { %v391_v27 = vld [vmem:[%s542_s1 + $0xd4] ss:$8 sps:$4 sm:$0xff]   ;;  %v393_v28 = vld [vmem:[%s542_s1 + $0xd0] ss:$8 sps:$4 sm:$0xff]   ;;  %v394_v29 = vld [vmem:[%s542_s1 + $0xe4] ss:$8 sps:$4 sm:$0xff]  }
   0xb   :  { %226 = vmatpush1.bf16.msra.mxu0 %v360_v5  ;;  %v396_v30 = vld [vmem:[%s542_s1 + $0xe0] ss:$8 sps:$4 sm:$0xff]   ;;  %v397_v31 = vld [vmem:[%s542_s1 + $0xf4] ss:$8 sps:$4 sm:$0xff]   ;;  %v399_v32 = vld [vmem:[%s542_s1 + $0xf0] ss:$8 sps:$4 sm:$0xff]  }
   0xc   :  { %227 = vmatprep.subr.bf16.mxu0 %v361_v6  ;;  %v400_v33 = vld [vmem:[%s543_s0] ss:$8 sps:$4 sm:$0xff]   ;;  %v267_v35 = vshrl.u32 %v266_v34, 7 }
   0xd   :  { %v264_v37 = vld [vmem:[%s544_s2] sm:$0x3] }
   0xe   :  { %v268_v36 = vsub.s32 0, %v267_v35  ;;  %v272_v38 = vsub.s32 1, %v267_v35  ;;  %v280_v39 = vld [vmem:[%s545_s3] sm:$0x3] }
   0xf   :  { %228 = vmatpush1.bf16.msra.mxu0 %v363_v7 }
  0x10   :  { %229 = vmatprep.subr.bf16.mxu0 %v364_v8  ;;  %v269_v40 = vrot.slane %v264_v37, %v268_v36  ;;  %v273_v41 = vrot.slane %v264_v37, %v272_v38  ;;  %v285_v42 = vrot.slane %v280_v39, %v268_v36  ;;  %v289_v44 = vrot.slane %v280_v39, %v272_v38 }
  0x13   :  { %230 = vmatpush1.bf16.msra.mxu0 %v366_v9 }
  0x14   :  { %231 = vmatprep.subr.bf16.mxu0 %v367_v10 }
  0x17   :  { %232 = vmatpush1.bf16.msra.mxu0 %v369_v11 }
  0x18   :  { %233 = vmatprep.subr.bf16.mxu0 %v370_v12 }
  0x1b   :  { %234 = vmatpush1.bf16.msra.mxu0 %v372_v14 }
  0x1c   :  { %235 = vmatprep.subr.bf16.mxu0 %v373_v15 }
  0x1f   :  { %236 = vmatpush1.bf16.msra.mxu0 %v375_v16 }
  0x20   :  { %237 = vmatprep.subr.bf16.mxu0 %v376_v17 }
  0x23   :  { %238 = vmatpush1.bf16.msra.mxu0 %v378_v18 }
  0x24   :  { %239 = vmatprep.subr.bf16.mxu0 %v379_v19 }
  0x27   :  { %240 = vmatpush1.bf16.msra.mxu0 %v381_v20 }
  0x28   :  { %241 = vmatprep.subr.bf16.mxu0 %v382_v21 }
  0x2b   :  { %242 = vmatpush1.bf16.msra.mxu0 %v384_v22 }
  0x2c   :  { %243 = vmatprep.subr.bf16.mxu0 %v385_v23 }
  0x2f   :  { %244 = vmatpush1.bf16.msra.mxu0 %v387_v24 }
  0x30   :  { %245 = vmatprep.subr.bf16.mxu0 %v388_v25 }
  0x33   :  { %246 = vmatpush1.bf16.msra.mxu0 %v390_v26 }
  0x34   :  { %247 = vmatprep.subr.bf16.mxu0 %v391_v27 }
  0x37   :  { %248 = vmatpush1.bf16.msra.mxu0 %v393_v28 }
  0x38   :  { %249 = vmatprep.subr.bf16.mxu0 %v394_v29 }
  0x3b   :  { %250 = vmatpush1.bf16.msra.mxu0 %v396_v30 }
  0x3c   :  { %251 = vmatprep.subr.bf16.mxu0 %v397_v31 }
  0x3f   :  { %252 = vmatpush1.bf16.msra.mxu0 %v399_v32 }
  0x42   :  { %254 = vmatmul.mubr.bf16.vlgmr.msra.gmra.mrb[0].mxu0 %v400_v33 }
 0x115   :  { %v255_v43 = vpop.f32.mrb[0].mxu0 }
 0x116   :  { %v276_v45 = vmul.f32 %v269_v40, %v255_v43  ;;  %v257_v46 = vpop.f32.mrb[1].mxu0 }
 0x117   :  { %v277_v47 = vmul.f32 %v273_v41, %v257_v46  ;;  %v259_v48 = vpop.f32.mrb[2].mxu0 }
 0x118   :  { %v292_v49 = vadd.f32 %v285_v42, %v276_v45  ;;  %v278_v50 = vmul.f32 %v269_v40, %v259_v48  ;;  %v261_v51 = vpop.f32.mrb[3].mxu0 }
 0x119   :  { %v293_v52 = vadd.f32 %v289_v44, %v277_v47  ;;  %v279_v53 = vmul.f32 %v273_v41, %v261_v51 }
 0x11a   :  { %v294_v54 = vadd.f32 %v285_v42, %v278_v50 }
 0x11b   :  { %v350_v55 = vpack.c.bf16 %v293_v52, %v292_v49  ;;  %v295_v56 = vadd.f32 %v289_v44, %v279_v53 }
 0x11d   :  { %308 = vst [vmem:[%s546_s4] sm:$0xff] %v350_v55  ;;  %v351_v57 = vpack.c.bf16 %v295_v56, %v294_v54 }
 0x11f   :  { %309 = vst [vmem:[%s546_s4 + $0x8] sm:$0xff] %v351_v57 }

// kernel: spotlight_detection_head.10
= control target key start
LH: loop header
LB: loop body
LE: loop exit
PB: predicated region body
PF: predicated region fallthrough
CT: control target
= control target key end

     0   :  { %s1211_s15 = smov 0   ;;  %s1315_s0 = inlined_call_operand.vmem [shape: bf16[16,256], index: 0, kind: input, shape index: {}]   ;;  %s1316_s1 = inlined_call_operand.vmem [shape: bf16[2,256,512], index: 1, kind: input, shape index: {}]   ;;  %s1317_s2 = inlined_call_operand.vmem [shape: f32[2,16,256], index: 2, kind: output, shape index: {0}]   ;;  %s1318_s3 = inlined_call_operand.vmem [shape: f32[2,16,256], index: 3, kind: output, shape index: {1}]   ;;  %s1319_s4 = inlined_call_operand.vmem [shape: f32[2,16,16], index: 4, kind: output, shape index: {2}]  }
   0x1 LB: > { %s966_s16 = sadd.s32 4294967295, %s1184_s15   ;;  %p970_p0 = scmp.ge.s32.totalorder %s1184_s15, 1  ;;  %s1184_s15 = sphi %s1211_s15, %s15_s15  }
   0x2   : > { %p167_p1 = scmp.lt.s32.totalorder %s1184_s15, 3 }
   0x4   : > { %p168_p2 = pnand %p970_p0, %p167_p1 }
   0x5   : > { %p203_p3 = scmp.lt.s32.totalorder (!%p168_p2), %s966_s16, 1  ;;  %v1113_v0 = vld [vmem:[%s1315_s0 + $0x4] ss:$8 sps:$4 sm:$0xff] (!%p168_p2)   ;;  %v1111_v33 = vld [vmem:[%s1315_s0] ss:$8 sps:$4 sm:$0xff] (!%p168_p2)   ;;  %vm842_vm0 = vcmask (!%p168_p2), 130048  }
   0x6   : > { %171 = sbr.rel (%p168_p2) target bundleno = 1069 (0x42d), region = 28  ;;  %491 = vmatprep.mubr.bf16.mxu0 (!%p168_p2), %v1113_v0 }
   0xd   : > { %s1321_s16 = smov (!%p203_p3, %s966_s16), 1 }
   0xe   : > { %s1047_s19 = sshll.u32 %s1321_s16, 9  ;;  %s1048_s25 = sshll.u32 %s1321_s16, 5 }
   0xf   : > { %s1228_s22 = scalar_lea.vmem %s1316_s1, %s1047_s19  ;;  %s217_s28 = scalar_lea.vmem %s1318_s3, %s1048_s25 }
  0x10   : > { %v1063_v1 = vld [vmem:[%s1228_s22 + $0x4] ss:$16 sps:$4 sm:$0xff]   ;;  %v1065_v2 = vld [vmem:[%s1228_s22] ss:$16 sps:$4 sm:$0xff]   ;;  %v1114_v44 = vld [vmem:[%s1228_s22 + $0xc] ss:$16 sps:$4 sm:$0xff]   ;;  %s212_s5 = scalar_lea.vmem %s1317_s2, %s1048_s25 }
  0x11   : > { %459 = vmatprep.subr.bf16.mxu0 %v1063_v1  ;;  %v1066_v3 = vld [vmem:[%s1228_s22 + $0x24] ss:$16 sps:$4 sm:$0xff]   ;;  %v1068_v4 = vld [vmem:[%s1228_s22 + $0x20] ss:$16 sps:$4 sm:$0xff]   ;;  %v1116_v45 = vld [vmem:[%s1228_s22 + $0x8] ss:$16 sps:$4 sm:$0xff]   ;;  %698 = vmatprep.subr.bf16.mxu1 %v1114_v44 }
  0x12   : > { %460 = vmatpush1.bf16.xpose.msra.mxu0 %v1065_v2  ;;  %v1069_v5 = vld [vmem:[%s1228_s22 + $0x44] ss:$16 sps:$4 sm:$0xff]   ;;  %v1071_v6 = vld [vmem:[%s1228_s22 + $0x40] ss:$16 sps:$4 sm:$0xff]   ;;  %v1117_v46 = vld [vmem:[%s1228_s22 + $0x2c] ss:$16 sps:$4 sm:$0xff]   ;;  %699 = vmatpush1.bf16.msra.mxu1 %v1116_v45 }
  0x13   : > { %461 = vmatprep.subr.bf16.mxu0 %v1066_v3  ;;  %v1072_v7 = vld [vmem:[%s1228_s22 + $0x64] ss:$16 sps:$4 sm:$0xff]   ;;  %v1074_v8 = vld [vmem:[%s1228_s22 + $0x60] ss:$16 sps:$4 sm:$0xff]   ;;  %v1119_v47 = vld [vmem:[%s1228_s22 + $0x28] ss:$16 sps:$4 sm:$0xff]   ;;  %700 = vmatprep.subr.bf16.mxu1 %v1117_v46 }
  0x14   : > { %v1075_v9 = vld [vmem:[%s1228_s22 + $0x84] ss:$16 sps:$4 sm:$0xff]   ;;  %v1077_v10 = vld [vmem:[%s1228_s22 + $0x80] ss:$16 sps:$4 sm:$0xff]   ;;  %v1120_v48 = vld [vmem:[%s1228_s22 + $0x4c] ss:$16 sps:$4 sm:$0xff]  }
  0x15   : > { %v1078_v11 = vld [vmem:[%s1228_s22 + $0xa4] ss:$16 sps:$4 sm:$0xff]   ;;  %v1080_v12 = vld [vmem:[%s1228_s22 + $0xa0] ss:$16 sps:$4 sm:$0xff]   ;;  %v1122_v49 = vld [vmem:[%s1228_s22 + $0x48] ss:$16 sps:$4 sm:$0xff]  }
  0x16   : > { %v1081_v13 = vld [vmem:[%s1228_s22 + $0xc4] ss:$16 sps:$4 sm:$0xff]   ;;  %v1083_v14 = vld [vmem:[%s1228_s22 + $0xc0] ss:$16 sps:$4 sm:$0xff]   ;;  %701 = vmatpush1.bf16.msra.mxu1 %v1119_v47  ;;  %v1123_v50 = vld [vmem:[%s1228_s22 + $0x6c] ss:$16 sps:$4 sm:$0xff]  }
  0x17   : > { %v1084_v15 = vld [vmem:[%s1228_s22 + $0xe4] ss:$16 sps:$4 sm:$0xff]   ;;  %v1086_v16 = vld [vmem:[%s1228_s22 + $0xe0] ss:$16 sps:$4 sm:$0xff]   ;;  %702 = vmatprep.subr.bf16.mxu1 %v1120_v48  ;;  %v1125_v51 = vld [vmem:[%s1228_s22 + $0x68] ss:$16 sps:$4 sm:$0xff]  }
  0x18   : > { %v1087_v17 = vld [vmem:[%s1228_s22 + $0x104] ss:$16 sps:$4 sm:$0xff]   ;;  %v1089_v18 = vld [vmem:[%s1228_s22 + $0x100] ss:$16 sps:$4 sm:$0xff]   ;;  %v1126_v52 = vld [vmem:[%s1228_s22 + $0x8c] ss:$16 sps:$4 sm:$0xff]  }
  0x19   : > { %v1090_v19 = vld [vmem:[%s1228_s22 + $0x124] ss:$16 sps:$4 sm:$0xff]   ;;  %v1092_v20 = vld [vmem:[%s1228_s22 + $0x120] ss:$16 sps:$4 sm:$0xff]   ;;  %v1128_v53 = vld [vmem:[%s1228_s22 + $0x88] ss:$16 sps:$4 sm:$0xff]  }
  0x1a   : > { %462 = vmatpush1.bf16.xpose.msra.mxu0 %v1068_v4  ;;  %v1093_v21 = vld [vmem:[%s1228_s22 + $0x144] ss:$16 sps:$4 sm:$0xff]   ;;  %v1095_v22 = vld [vmem:[%s1228_s22 + $0x140] ss:$16 sps:$4 sm:$0xff]   ;;  %703 = vmatpush1.bf16.msra.mxu1 %v1122_v49  ;;  %v1129_v54 = vld [vmem:[%s1228_s22 + $0xac] ss:$16 sps:$4 sm:$0xff]  }
  0x1b   : > { %463 = vmatprep.subr.bf16.mxu0 %v1069_v5  ;;  %v1096_v23 = vld [vmem:[%s1228_s22 + $0x164] ss:$16 sps:$4 sm:$0xff]   ;;  %v1098_v24 = vld [vmem:[%s1228_s22 + $0x160] ss:$16 sps:$4 sm:$0xff]   ;;  %704 = vmatprep.subr.bf16.mxu1 %v1123_v50  ;;  %v1131_v55 = vld [vmem:[%s1228_s22 + $0xa8] ss:$16 sps:$4 sm:$0xff]  }
  0x1c   : > { %v1099_v25 = vld [vmem:[%s1228_s22 + $0x184] ss:$16 sps:$4 sm:$0xff]   ;;  %v1101_v26 = vld [vmem:[%s1228_s22 + $0x180] ss:$16 sps:$4 sm:$0xff]   ;;  %v1132_v56 = vld [vmem:[%s1228_s22 + $0xcc] ss:$16 sps:$4 sm:$0xff]  }
  0x1d   : > { %v1102_v27 = vld [vmem:[%s1228_s22 + $0x1a4] ss:$16 sps:$4 sm:$0xff]   ;;  %v1104_v28 = vld [vmem:[%s1228_s22 + $0x1a0] ss:$16 sps:$4 sm:$0xff]   ;;  %v1134_v57 = vld [vmem:[%s1228_s22 + $0xc8] ss:$16 sps:$4 sm:$0xff]  }
  0x1e   : > { %v1105_v29 = vld [vmem:[%s1228_s22 + $0x1c4] ss:$16 sps:$4 sm:$0xff]   ;;  %v1107_v30 = vld [vmem:[%s1228_s22 + $0x1c0] ss:$16 sps:$4 sm:$0xff]   ;;  %705 = vmatpush1.bf16.msra.mxu1 %v1125_v51  ;;  %v1135_v58 = vld [vmem:[%s1228_s22 + $0xec] ss:$16 sps:$4 sm:$0xff]  }
  0x1f   : > { %v1108_v31 = vld [vmem:[%s1228_s22 + $0x1e4] ss:$16 sps:$4 sm:$0xff]   ;;  %v1110_v32 = vld [vmem:[%s1228_s22 + $0x1e0] ss:$16 sps:$4 sm:$0xff]   ;;  %706 = vmatprep.subr.bf16.mxu1 %v1126_v52  ;;  %v1137_v59 = vld [vmem:[%s1228_s22 + $0xe8] ss:$16 sps:$4 sm:$0xff]  }
  0x20   : > { %v1138_v60 = vld [vmem:[%s1228_s22 + $0x10c] ss:$16 sps:$4 sm:$0xff]   ;;  %v1140_v61 = vld [vmem:[%s1228_s22 + $0x108] ss:$16 sps:$4 sm:$0xff]   ;;  %s1050_s6 = sshll.u32 %s1321_s16, 4 }
  0x21   : > { %v1141_v62 = vld [vmem:[%s1228_s22 + $0x12c] ss:$16 sps:$4 sm:$0xff]   ;;  %v1143_v63 = vld [vmem:[%s1228_s22 + $0x128] ss:$16 sps:$4 sm:$0xff]   ;;  %s222_s9 = scalar_lea.vmem %s1319_s4, %s1050_s6 }
  0x22   : > { %464 = vmatpush1.bf16.xpose.msra.mxu0 %v1071_v6  ;;  %707 = vmatpush1.bf16.msra.mxu1 %v1128_v53  ;;  %v1144_v0 = vld [vmem:[%s1228_s22 + $0x14c] ss:$16 sps:$4 sm:$0xff]   ;;  %v1146_v1 = vld [vmem:[%s1228_s22 + $0x148] ss:$16 sps:$4 sm:$0xff]  }
  0x23   : > { %465 = vmatprep.subr.bf16.mxu0 %v1072_v7  ;;  %708 = vmatprep.subr.bf16.mxu1 %v1129_v54 }
  0x26   : > { %709 = vmatpush1.bf16.msra.mxu1 %v1131_v55 }
  0x27   : > { %710 = vmatprep.subr.bf16.mxu1 %v1132_v56 }
  0x2a   : > { %466 = vmatpush1.bf16.xpose.msra.mxu0 %v1074_v8  ;;  %711 = vmatpush1.bf16.msra.mxu1 %v1134_v57 }
  0x2b   : > { %467 = vmatprep.subr.bf16.mxu0 %v1075_v9  ;;  %712 = vmatprep.subr.bf16.mxu1 %v1135_v58 }
  0x2e   : > { %713 = vmatpush1.bf16.msra.mxu1 %v1137_v59 }
  0x2f   : > { %714 = vmatprep.subr.bf16.mxu1 %v1138_v60 }
  0x32   : > { %468 = vmatpush1.bf16.xpose.msra.mxu0 %v1077_v10  ;;  %715 = vmatpush1.bf16.msra.mxu1 %v1140_v61 }
  0x33   : > { %469 = vmatprep.subr.bf16.mxu0 %v1078_v11  ;;  %716 = vmatprep.subr.bf16.mxu1 %v1141_v62 }
  0x36   : > { %717 = vmatpush1.bf16.msra.mxu1 %v1143_v63 }
  0x37   : > { %718 = vmatprep.subr.bf16.mxu1 %v1144_v0 }
  0x3a   : > { %470 = vmatpush1.bf16.xpose.msra.mxu0 %v1080_v12  ;;  %719 = vmatpush1.bf16.msra.mxu1 %v1146_v1 }
  0x3b   : > { %471 = vmatprep.subr.bf16.mxu0 %v1081_v13 }
  0x42   : > { %472 = vmatpush1.bf16.xpose.msra.mxu0 %v1083_v14 }
  0x43   : > { %473 = vmatprep.subr.bf16.mxu0 %v1084_v15 }
  0x4a   : > { %474 = vmatpush1.bf16.xpose.msra.mxu0 %v1086_v16 }
  0x4b   : > { %475 = vmatprep.subr.bf16.mxu0 %v1087_v17 }
  0x52   : > { %476 = vmatpush1.bf16.xpose.msra.mxu0 %v1089_v18  ;;  %v1147_v18 = vld [vmem:[%s1228_s22 + $0x16c] ss:$16 sps:$4 sm:$0xff]  }
  0x53   : > { %477 = vmatprep.subr.bf16.mxu0 %v1090_v19  ;;  %v1149_v19 = vld [vmem:[%s1228_s22 + $0x168] ss:$16 sps:$4 sm:$0xff]   ;;  %720 = vmatprep.subr.bf16.mxu1 %v1147_v18 }
  0x54   : > { %721 = vmatpush1.bf16.msra.mxu1 %v1149_v19 }
  0x5a   : > { %478 = vmatpush1.bf16.xpose.msra.mxu0 %v1092_v20  ;;  %v1150_v20 = vld [vmem:[%s1228_s22 + $0x18c] ss:$16 sps:$4 sm:$0xff]  }
  0x5b   : > { %479 = vmatprep.subr.bf16.mxu0 %v1093_v21  ;;  %v1152_v21 = vld [vmem:[%s1228_s22 + $0x188] ss:$16 sps:$4 sm:$0xff]   ;;  %722 = vmatprep.subr.bf16.mxu1 %v1150_v20 }
  0x5c   : > { %723 = vmatpush1.bf16.msra.mxu1 %v1152_v21 }
  0x62   : > { %480 = vmatpush1.bf16.xpose.msra.mxu0 %v1095_v22  ;;  %v1153_v22 = vld [vmem:[%s1228_s22 + $0x1ac] ss:$16 sps:$4 sm:$0xff]  }
  0x63   : > { %481 = vmatprep.subr.bf16.mxu0 %v1096_v23  ;;  %v1155_v23 = vld [vmem:[%s1228_s22 + $0x1a8] ss:$16 sps:$4 sm:$0xff]   ;;  %724 = vmatprep.subr.bf16.mxu1 %v1153_v22 }
  0x64   : > { %725 = vmatpush1.bf16.msra.mxu1 %v1155_v23 }
  0x6a   : > { %482 = vmatpush1.bf16.xpose.msra.mxu0 %v1098_v24  ;;  %v1156_v24 = vld [vmem:[%s1228_s22 + $0x1cc] ss:$16 sps:$4 sm:$0xff]  }
  0x6b   : > { %483 = vmatprep.subr.bf16.mxu0 %v1099_v25  ;;  %v1158_v25 = vld [vmem:[%s1228_s22 + $0x1c8] ss:$16 sps:$4 sm:$0xff]   ;;  %726 = vmatprep.subr.bf16.mxu1 %v1156_v24 }
  0x6c   : > { %727 = vmatpush1.bf16.msra.mxu1 %v1158_v25 }
  0x72   : > { %484 = vmatpush1.bf16.xpose.msra.mxu0 %v1101_v26  ;;  %v1159_v26 = vld [vmem:[%s1228_s22 + $0x1ec] ss:$16 sps:$4 sm:$0xff]  }
  0x73   : > { %485 = vmatprep.subr.bf16.mxu0 %v1102_v27  ;;  %v1161_v27 = vld [vmem:[%s1228_s22 + $0x1e8] ss:$16 sps:$4 sm:$0xff]   ;;  %728 = vmatprep.subr.bf16.mxu1 %v1159_v26 }
  0x74   : > { %729 = vmatpush1.bf16.msra.mxu1 %v1161_v27 }
  0x7a   : > { %486 = vmatpush1.bf16.xpose.msra.mxu0 %v1104_v28 }
  0x7b   : > { %487 = vmatprep.subr.bf16.mxu0 %v1105_v29 }
  0x82   : > { %488 = vmatpush1.bf16.xpose.msra.mxu0 %v1107_v30 }
  0x83   : > { %489 = vmatprep.subr.bf16.mxu0 %v1108_v31 }
  0x8a   : > { %490 = vmatpush1.bf16.xpose.msra.mxu0 %v1110_v32 }
  0x91   : > { %492 = vmatmul.mubr.bf16.vlgmr.msra.gmra.mrb[0].mxu0 %v1111_v33 }
 0x164   : > { %v493_v34 = vpop.f32.mrb[0].mxu0 }
 0x165   : > { %v502_v35 = vmul.f32 0.0625, %v493_v34  ;;  %v495_v36 = vpop.f32.mrb[1].mxu0 }
 0x166   : > { %v503_v37 = vmul.f32 0.0625, %v495_v36  ;;  %v497_v38 = vpop.f32.mrb[2].mxu0 }
 0x167   : > { %v499_v39 = vpop.f32.mrb[3].mxu0  ;;  %v504_v40 = vmul.f32 0.0625, %v497_v38 }
 0x168   : > { %v505_v41 = vmul.f32 0.0625, %v499_v39  ;;  %v506_v42 = vmax.f32 %v502_v35, %v503_v37 }
 0x16a   : > { %507 = vmax.xlane.f32.xlu0 %v506_v42  ;;  %v509_v43 = vmax.f32 %v504_v40, %v505_v41 }
 0x16e   : > { %510 = vmax.xlane.f32.xlu0 %v509_v43 }
 0x1f7   : > { %v508_v2 = vpop.xlane.xlu0 %507 }
 0x1f8   : > { %v512_v3 = vsub.f32 %v502_v35, %v508_v2  ;;  %v513_v4 = vsub.f32 %v503_v37, %v508_v2 }
 0x1fa   : > { %v516_v5 = vmul.f32 1.442695, %v512_v3  ;;  %v518_v6 = vmul.f32 1.442695, %v513_v4 }
 0x1fb   : > { %v511_v7 = vpop.xlane.xlu0 %510 }
 0x1fc   : > { %1162 = vpow2.f32 %v516_v5  ;;  %v514_v8 = vsub.f32 %v504_v40, %v511_v7  ;;  %v515_v9 = vsub.f32 %v505_v41, %v511_v7 }
 0x1fd   : > { %1164 = vpow2.f32 %v518_v6 }
 0x1fe   : > { %v520_v10 = vmul.f32 1.442695, %v514_v8  ;;  %v522_v11 = vmul.f32 1.442695, %v515_v9 }
 0x200   : > { %1166 = vpow2.f32 %v520_v10 }
 0x201   : > { %1168 = vpow2.f32 %v522_v11 }
 0x206   : > { %v1163_v12 = vpop.eup %1162 }
 0x207   : > { %v1165_v13 = vpop.eup %1164 }
 0x208   : > { %v524_v14 = vadd.f32 %v1165_v13, %v1163_v12 }
 0x20a   : > { %v1167_v15 = vpop.eup %1166  ;;  %525 = vadd.xlane.f32.xlu1 %v524_v14 }
 0x20b   : > { %v1169_v16 = vpop.eup %1168 }
 0x20c   : > { %v527_v17 = vadd.f32 %v1169_v16, %v1167_v15 }
 0x20e   : > { %528 = vadd.xlane.f32.xlu1 %v527_v17 }
 0x297   : > { %v526_v28 = vpop.xlane.xlu1 %525 }
 0x298   : > { %1170 = vrcp.f32 %v526_v28 }
 0x29b   : > { %v529_v29 = vpop.xlane.xlu1 %528 }
 0x29c   : > { %1172 = vrcp.f32 %v529_v29 }
 0x2a2   : > { %v1171_v30 = vpop.eup %1170 }
 0x2a3   : > { %v532_v31 = vmul.f32 %v1171_v30, %v1163_v12  ;;  %v533_v32 = vmul.f32 %v1171_v30, %v1165_v13 }
 0x2a5   : > { %v741_v33 = vmul.f32 %v532_v31, %v532_v31  ;;  %v742_v34 = vmul.f32 %v533_v32, %v533_v32  ;;  %838 = vst [vmem:[%s217_s28] sm:$0xff] %v532_v31  ;;  %839 = vst [vmem:[%s217_s28 + $0x8] sm:$0xff] %v533_v32 }
 0x2a6   : > { %v1173_v35 = vpop.eup %1172 }
 0x2a7   : > { %v534_v36 = vmul.f32 %v1173_v35, %v1167_v15  ;;  %v745_v37 = vadd.f32 %v742_v34, %v741_v33  ;;  %v535_v38 = vmul.f32 %v1173_v35, %v1169_v16 }
 0x2a9   : > { %746 = vadd.xlane.f32.xlu0 %v745_v37  ;;  %v537_v39 = vpack.c.bf16 %v535_v38, %v533_v32  ;;  %v536_v40 = vpack.c.bf16 %v534_v36, %v532_v31  ;;  %v743_v41 = vmul.f32 %v534_v36, %v534_v36  ;;  %v744_v42 = vmul.f32 %v535_v38, %v535_v38 }
 0x2aa   : > { %840 = vst [vmem:[%s217_s28 + $0x10] sm:$0xff] %v534_v36  ;;  %841 = vst [vmem:[%s217_s28 + $0x18] sm:$0xff] %v535_v38 }
 0x2ab   : > { %730 = vmatprep.mubr.bf16.mxu1 %v537_v39  ;;  %v748_v43 = vadd.f32 %v744_v42, %v743_v41 }
 0x2ac   : > { %731 = vmatmul.mubr.bf16.vlgmr.msra.gmra.mrb[0].mxu1 %v536_v40 }
 0x2ad   : > { %749 = vadd.xlane.f32.xlu1 %v748_v43 }
 0x336   : > { %v747_v44 = vpop.xlane.xlu0 %746 }
 0x337   : > { %v751_v45 = vadd.f32 1e-06, %v747_v44 }
 0x339   : > { %1174 = vrsqrt.f32 %v751_v45 }
 0x33a   : > { %v750_v46 = vpop.xlane.xlu1 %749 }
 0x33b   : > { %v752_v47 = vadd.f32 1e-06, %v750_v46 }
 0x33d   : > { %1176 = vrsqrt.f32 %v752_v47 }
 0x343   : > { %v1175_v48 = vpop.eup %1174 }
 0x344   : > { %v756_v49 = vmul.f32 %v1175_v48, %v533_v32  ;;  %v755_v52 = vmul.f32 %v1175_v48, %v532_v31 }
 0x346   : > { %823 = vmatprep.mubr.f32.mxu1 %v756_v49 }
 0x347   : > { %v1177_v50 = vpop.eup %1176 }
 0x348   : > { %v758_v51 = vmul.f32 %v1177_v50, %v535_v38  ;;  %v757_v53 = vmul.f32 %v1177_v50, %v534_v36 }
 0x34a   : > { %v1051_v54 = vpack.c.bf16 %v758_v51, %v756_v49  ;;  %v1053_v55 = vpack.c.bf16 %v757_v53, %v755_v52 }
 0x34c   : > { %1052 = vmatprep.subr.bf16.mxu1 %v1051_v54 }
 0x34d   : > { %1054 = vmatpush1.bf16.xpose.msra.mxu1 %v1053_v55 }
 0x354   : > { %824 = vmatmul.mubr.f32.vlgmr.msra.gmra.mrb[4].mxu1 %v755_v52 }
 0x355   : > { %828 = vmatprep.mubr.f32.mxu1 %v758_v51 }
 0x358   : > { %829 = vmatmul.mubr.f32.gmra.mrb[6].mxu1 %v757_v53 }
 0x37f   : > { %v732_v56 = vpop.f32.mrb[0].mxu1 }
 0x380   : > { %834 = vst [vmem:[%s212_s5] sm:$0xff] %v732_v56  ;;  %v734_v57 = vpop.f32.mrb[1].mxu1 }
 0x381   : > { %835 = vst [vmem:[%s212_s5 + $0x8] sm:$0xff] %v734_v57  ;;  %v736_v58 = vpop.f32.mrb[2].mxu1 }
 0x382   : > { %836 = vst [vmem:[%s212_s5 + $0x10] sm:$0xff] %v736_v58  ;;  %v738_v59 = vpop.f32.mrb[3].mxu1 }
 0x383   : > { %837 = vst [vmem:[%s212_s5 + $0x18] sm:$0xff] %v738_v59 }
 0x427   : > { %v825_v60 = vpop.f32.mrb[4].mxu1 }
 0x428   : > { %843 = vst.msk [vmem:[%s222_s9] sm:$0xff] %vm842_vm0, %v825_v60  ;;  %v827_v61 = vpop.f32.mrb[5].mxu1 }
 0x42b   : > { %v830_v62 = vpop.f32.mrb[6].mxu1 }
 0x42c   : > { %844 = vst.msk [vmem:[%s222_s9 + $0x8] sm:$0xff] %vm842_vm0, %v830_v62  ;;  %v832_v63 = vpop.f32.mrb[7].mxu1 }
 0x42d PF: > { %s15_s15 = sadd.s32 1, %s1184_s15  }
 0x42e   : > { %p12_p4 = scmp.ge.s32.totalorder %s15_s15, 4  }
 0x430   :  { %14 = sbr.rel (!%p12_p4) target bundleno = 1 (0x1), region = 82 }

// kernel: spotlight_detection_head.11
= control target key start
LH: loop header
LB: loop body
LE: loop exit
PB: predicated region body
PF: predicated region fallthrough
CT: control target
= control target key end

     0   :  { %v97_v44 = vlaneseq  ;;  %s2751_s1 = inlined_call_operand.vmem [shape: bf16[256,256], index: 1, kind: input, shape index: {}]   ;;  %s2752_s0 = inlined_call_operand.vmem [shape: f32[32,256], index: 0, kind: input, shape index: {}]   ;;  %s2753_s2 = inlined_call_operand.vmem [shape: f32[1,256], index: 2, kind: input, shape index: {}]   ;;  %s2754_s5 = inlined_call_operand.vmem [shape: bf16[256,128], index: 5, kind: input, shape index: {}]   ;;  %s2755_s7 = inlined_call_operand.vmem [shape: bf16[256,128], index: 7, kind: input, shape index: {}]   ;;  %s2756_s3 = inlined_call_operand.vmem [shape: f32[1,256], index: 3, kind: input, shape index: {}]   ;;  %s2757_s4 = inlined_call_operand.vmem [shape: f32[1,256], index: 4, kind: input, shape index: {}]   ;;  %s2758_s11 = inlined_call_operand.vmem [shape: bf16[256,256], index: 11, kind: input, shape index: {}]   ;;  %s2759_s6 = inlined_call_operand.vmem [shape: f32[1,128], index: 6, kind: input, shape index: {}]   ;;  %s2760_s8 = inlined_call_operand.vmem [shape: f32[1,128], index: 8, kind: input, shape index: {}]   ;;  %s2761_s13 = inlined_call_operand.vmem [shape: bf16[512,128], index: 13, kind: input, shape index: {}]   ;;  %s2762_s12 = inlined_call_operand.vmem [shape: f32[1,256], index: 12, kind: input, shape index: {}]   ;;  %s2763_s9 = inlined_call_operand.vmem [shape: f32[1,128], index: 9, kind: input, shape index: {}]   ;;  %s2764_s10 = inlined_call_operand.vmem [shape: f32[1,128], index: 10, kind: input, shape index: {}]   ;;  %s2765_s14 = inlined_call_operand.vmem [shape: f32[1,128], index: 14, kind: input, shape index: {}]   ;;  %s2766_s15 = inlined_call_operand.vmem [shape: f32[32,128], index: 15, kind: output, shape index: {}]  }
   0x1   :  { %v1876_v0 = vld [vmem:[%s2751_s1 + $0x4] ss:$8 sps:$4 sm:$0xff]   ;;  %v1878_v1 = vld [vmem:[%s2751_s1] ss:$8 sps:$4 sm:$0xff]   ;;  %v1879_v2 = vld [vmem:[%s2751_s1 + $0x14] ss:$8 sps:$4 sm:$0xff]  }
   0x2   :  { %267 = vmatprep.subr.bf16.mxu0 %v1876_v0  ;;  %v1881_v3 = vld [vmem:[%s2751_s1 + $0x10] ss:$8 sps:$4 sm:$0xff]   ;;  %v1882_v4 = vld [vmem:[%s2751_s1 + $0x24] ss:$8 sps:$4 sm:$0xff]   ;;  %v1884_v5 = vld [vmem:[%s2751_s1 + $0x20] ss:$8 sps:$4 sm:$0xff]  }
   0x3   :  { %268 = vmatpush1.bf16.msra.mxu0 %v1878_v1  ;;  %v1885_v6 = vld [vmem:[%s2751_s1 + $0x34] ss:$8 sps:$4 sm:$0xff]   ;;  %v1887_v7 = vld [vmem:[%s2751_s1 + $0x30] ss:$8 sps:$4 sm:$0xff]   ;;  %v1888_v8 = vld [vmem:[%s2751_s1 + $0x44] ss:$8 sps:$4 sm:$0xff]  }
   0x4   :  { %269 = vmatprep.subr.bf16.mxu0 %v1879_v2  ;;  %v1890_v9 = vld [vmem:[%s2751_s1 + $0x40] ss:$8 sps:$4 sm:$0xff]   ;;  %v1891_v10 = vld [vmem:[%s2751_s1 + $0x54] ss:$8 sps:$4 sm:$0xff]   ;;  %v1893_v11 = vld [vmem:[%s2751_s1 + $0x50] ss:$8 sps:$4 sm:$0xff]  }
   0x5   :  { %v1894_v12 = vld [vmem:[%s2751_s1 + $0x64] ss:$8 sps:$4 sm:$0xff]   ;;  %v54_v14 = vld [vmem:[%s2752_s0 + $0x18] sm:$0xff]  ;;  %v1896_v16 = vld [vmem:[%s2751_s1 + $0x60] ss:$8 sps:$4 sm:$0xff]   ;;  %v98_v45 = vshrl.u32 %v97_v44, 7 }
   0x6   :  { %v52_v13 = vld [vmem:[%s2752_s0 + $0x8] sm:$0xff]  ;;  %v1897_v17 = vld [vmem:[%s2751_s1 + $0x74] ss:$8 sps:$4 sm:$0xff]   ;;  %v1899_v18 = vld [vmem:[%s2751_s1 + $0x70] ss:$8 sps:$4 sm:$0xff]  }
   0x7   :  { %270 = vmatpush1.bf16.msra.mxu0 %v1881_v3  ;;  %v2177_v15 = vpack.c.bf16 %v54_v14, %v52_v13  ;;  %v1900_v19 = vld [vmem:[%s2751_s1 + $0x84] ss:$8 sps:$4 sm:$0xff]   ;;  %v1902_v20 = vld [vmem:[%s2751_s1 + $0x80] ss:$8 sps:$4 sm:$0xff]   ;;  %v1903_v21 = vld [vmem:[%s2751_s1 + $0x94] ss:$8 sps:$4 sm:$0xff]  }
   0x8   :  { %271 = vmatprep.subr.bf16.mxu0 %v1882_v4  ;;  %v1905_v22 = vld [vmem:[%s2751_s1 + $0x90] ss:$8 sps:$4 sm:$0xff]   ;;  %v1906_v23 = vld [vmem:[%s2751_s1 + $0xa4] ss:$8 sps:$4 sm:$0xff]   ;;  %v1908_v24 = vld [vmem:[%s2751_s1 + $0xa0] ss:$8 sps:$4 sm:$0xff]  }
   0x9   :  { %299 = vmatprep.mubr.bf16.mxu0 %v2177_v15  ;;  %v1909_v25 = vld [vmem:[%s2751_s1 + $0xb4] ss:$8 sps:$4 sm:$0xff]   ;;  %v1911_v26 = vld [vmem:[%s2751_s1 + $0xb0] ss:$8 sps:$4 sm:$0xff]   ;;  %v1912_v27 = vld [vmem:[%s2751_s1 + $0xc4] ss:$8 sps:$4 sm:$0xff]  }
   0xa   :  { %v1914_v28 = vld [vmem:[%s2751_s1 + $0xc0] ss:$8 sps:$4 sm:$0xff]   ;;  %v1915_v29 = vld [vmem:[%s2751_s1 + $0xd4] ss:$8 sps:$4 sm:$0xff]   ;;  %v1917_v30 = vld [vmem:[%s2751_s1 + $0xd0] ss:$8 sps:$4 sm:$0xff]  }
   0xb   :  { %272 = vmatpush1.bf16.msra.mxu0 %v1884_v5  ;;  %v1918_v31 = vld [vmem:[%s2751_s1 + $0xe4] ss:$8 sps:$4 sm:$0xff]   ;;  %v1920_v32 = vld [vmem:[%s2751_s1 + $0xe0] ss:$8 sps:$4 sm:$0xff]   ;;  %v1921_v33 = vld [vmem:[%s2751_s1 + $0xf4] ss:$8 sps:$4 sm:$0xff]  }
   0xc   :  { %273 = vmatprep.subr.bf16.mxu0 %v1885_v6  ;;  %v1923_v34 = vld [vmem:[%s2751_s1 + $0xf0] ss:$8 sps:$4 sm:$0xff]   ;;  %v51_v35 = vld [vmem:[%s2752_s0] sm:$0xff]  ;;  %v56_v37 = vld [vmem:[%s2752_s0 + $0x28] sm:$0xff]  ;;  %v2265_v46 = vsub.s32 0, %v98_v45  ;;  %v2270_v48 = vsub.s32 1, %v98_v45 }
   0xd   :  { %v53_v36 = vld [vmem:[%s2752_s0 + $0x10] sm:$0xff]  ;;  %v58_v38 = vld [vmem:[%s2752_s0 + $0x38] sm:$0xff]  ;;  %v55_v41 = vld [vmem:[%s2752_s0 + $0x20] sm:$0xff] }
   0xe   :  { %v2249_v39 = vpack.c.bf16 %v53_v36, %v51_v35  ;;  %v2251_v40 = vpack.c.bf16 %v58_v38, %v56_v37  ;;  %v57_v42 = vld [vmem:[%s2752_s0 + $0x30] sm:$0xff]  ;;  %v95_v47 = vld [vmem:[%s2753_s2] sm:$0x3]  ;;  %v1926_v38 = vld [vmem:[%s2754_s5 + $0x48] sm:$0xff]  }
   0xf   :  { %274 = vmatpush1.bf16.msra.mxu0 %v1887_v7  ;;  %v2261_v43 = vpack.c.bf16 %v57_v42, %v55_v41  ;;  %v100_v49 = vrot.slane %v95_v47, %v2265_v46  ;;  %v104_v50 = vrot.slane %v95_v47, %v2270_v48  ;;  %v1924_v7 = vld [vmem:[%s2754_s5 + $0x40] sm:$0xff]   ;;  %v1927_v41 = vld [vmem:[%s2754_s5 + $0x8] sm:$0xff]   ;;  %v1928_v42 = vld [vmem:[%s2754_s5 + $0x50] sm:$0xff]  }
  0x10   :  { %275 = vmatprep.subr.bf16.mxu0 %v1888_v8  ;;  %v1925_v8 = vld [vmem:[%s2754_s5] sm:$0xff]   ;;  %1712 = vmatprep.subr.bf16.mxu1 %v1924_v7  ;;  %v1929_v44 = vld [vmem:[%s2754_s5 + $0x10] sm:$0xff]   ;;  %v1930_v45 = vld [vmem:[%s2754_s5 + $0x58] sm:$0xff]  }
  0x11   :  { %1713 = vmatpush3.bf16.msra.mxu1 %v1925_v8  ;;  %v1931_v47 = vld [vmem:[%s2754_s5 + $0x18] sm:$0xff]   ;;  %v405_v8 = vld [vmem:[%s2757_s4] sm:$0x3] }
  0x12   :  { %1714 = vmatprep.subr.bf16.mxu1 %v1926_v38 }
  0x13   :  { %276 = vmatpush1.bf16.msra.mxu0 %v1890_v9 }
  0x14   :  { %277 = vmatprep.subr.bf16.mxu0 %v1891_v10 }
  0x15   :  { %1715 = vmatpush3.bf16.msra.mxu1 %v1927_v41 }
  0x16   :  { %1716 = vmatprep.subr.bf16.mxu1 %v1928_v42 }
  0x17   :  { %278 = vmatpush1.bf16.msra.mxu0 %v1893_v11 }
  0x18   :  { %279 = vmatprep.subr.bf16.mxu0 %v1894_v12 }
  0x19   :  { %1717 = vmatpush3.bf16.msra.mxu1 %v1929_v44 }
  0x1a   :  { %1718 = vmatprep.subr.bf16.mxu1 %v1930_v45 }
  0x1b   :  { %280 = vmatpush1.bf16.msra.mxu0 %v1896_v16 }
  0x1c   :  { %281 = vmatprep.subr.bf16.mxu0 %v1897_v17 }
  0x1d   :  { %1719 = vmatpush3.bf16.msra.mxu1 %v1931_v47  ;;  %v1941_v47 = vld [vmem:[%s2755_s7] sm:$0xff]  }
  0x1f   :  { %282 = vmatpush1.bf16.msra.mxu0 %v1899_v18 }
  0x20   :  { %283 = vmatprep.subr.bf16.mxu0 %v1900_v19 }
  0x23   :  { %284 = vmatpush1.bf16.msra.mxu0 %v1902_v20 }
  0x24   :  { %285 = vmatprep.subr.bf16.mxu0 %v1903_v21 }
  0x27   :  { %286 = vmatpush1.bf16.msra.mxu0 %v1905_v22 }
  0x28   :  { %287 = vmatprep.subr.bf16.mxu0 %v1906_v23 }
  0x2b   :  { %288 = vmatpush1.bf16.msra.mxu0 %v1908_v24 }
  0x2c   :  { %289 = vmatprep.subr.bf16.mxu0 %v1909_v25 }
  0x2f   :  { %290 = vmatpush1.bf16.msra.mxu0 %v1911_v26 }
  0x30   :  { %291 = vmatprep.subr.bf16.mxu0 %v1912_v27 }
  0x33   :  { %292 = vmatpush1.bf16.msra.mxu0 %v1914_v28 }
  0x34   :  { %293 = vmatprep.subr.bf16.mxu0 %v1915_v29 }
  0x37   :  { %294 = vmatpush1.bf16.msra.mxu0 %v1917_v30 }
  0x38   :  { %295 = vmatprep.subr.bf16.mxu0 %v1918_v31 }
  0x3b   :  { %296 = vmatpush1.bf16.msra.mxu0 %v1920_v32 }
  0x3c   :  { %297 = vmatprep.subr.bf16.mxu0 %v1921_v33 }
  0x3f   :  { %298 = vmatpush1.bf16.msra.mxu0 %v1923_v34 }
  0x42   :  { %300 = vmatmul.mubr.bf16.vlgmr.msra.gmra.mrb[0].mxu0 %v2249_v39 }
  0x43   :  { %309 = vmatprep.mubr.bf16.mxu0 %v2251_v40 }
  0x4a   :  { %310 = vmatmul.mubr.bf16.gmra.mrb[4].mxu0 %v2261_v43 }
  0x4b   :  { %1116 = vmatprep.mubr.bf16.mxu0 %v2177_v15 }
 0x115   :  { %v301_v51 = vpop.f32.mrb[0].mxu0 }
 0x116   :  { %v302_v52 = vadd.f32 %v301_v51, %v100_v49  ;;  %v303_v53 = vpop.f32.mrb[1].mxu0  ;;  %v1934_v51 = vld [vmem:[%s2754_s5 + $0x68] sm:$0xff]  }
 0x117   :  { %v304_v54 = vadd.f32 %v303_v53, %v104_v50  ;;  %v305_v55 = vpop.f32.mrb[2].mxu0  ;;  %v1936_v53 = vld [vmem:[%s2754_s5 + $0x70] sm:$0xff]  }
 0x118   :  { %v307_v56 = vpop.f32.mrb[3].mxu0  ;;  %v306_v57 = vadd.f32 %v305_v55, %v100_v49  ;;  %v1938_v55 = vld [vmem:[%s2754_s5 + $0x78] sm:$0xff]  }
 0x119   :  { %v308_v58 = vadd.f32 %v307_v56, %v104_v50  ;;  %v320_v59 = vadd.f32 %v304_v54, %v302_v52  ;;  %v1939_v56 = vld [vmem:[%s2754_s5 + $0x38] sm:$0xff]  }
 0x11b   :  { %321 = vadd.xlane.f32.xlu0 %v320_v59  ;;  %v323_v61 = vadd.f32 %v308_v58, %v306_v57 }
 0x11d   :  { %v311_v60 = vpop.f32.mrb[4].mxu0 }
 0x11e   :  { %v312_v62 = vadd.f32 %v311_v60, %v100_v49  ;;  %v313_v63 = vpop.f32.mrb[5].mxu0 }
 0x11f   :  { %v314_v0 = vadd.f32 %v313_v63, %v104_v50  ;;  %324 = vadd.xlane.f32.xlu0 %v323_v61  ;;  %v315_v1 = vpop.f32.mrb[6].mxu0 }
 0x120   :  { %v316_v2 = vadd.f32 %v315_v1, %v100_v49  ;;  %v317_v3 = vpop.f32.mrb[7].mxu0  ;;  %v1932_v49 = vld [vmem:[%s2754_s5 + $0x60] sm:$0xff]  }
 0x121   :  { %v318_v4 = vadd.f32 %v317_v3, %v104_v50  ;;  %v326_v5 = vadd.f32 %v314_v0, %v312_v62  ;;  %v1933_v50 = vld [vmem:[%s2754_s5 + $0x20] sm:$0xff]   ;;  %1720 = vmatprep.subr.bf16.mxu1 %v1932_v49 }
 0x122   :  { %1721 = vmatpush3.bf16.msra.mxu1 %v1933_v50  ;;  %v385_v3 = vld [vmem:[%s2756_s3] sm:$0x3] }
 0x123   :  { %327 = vadd.xlane.f32.xlu1 %v326_v5  ;;  %v329_v6 = vadd.f32 %v318_v4, %v316_v2  ;;  %1722 = vmatprep.subr.bf16.mxu1 %v1934_v51  ;;  %v394_v7 = vrot.slane %v385_v3, %v2270_v48 }
 0x127   :  { %330 = vadd.xlane.f32.xlu1 %v329_v6  ;;  %v390_v6 = vrot.slane %v385_v3, %v2265_v46  ;;  %v1950_v3 = vld [vmem:[%s2755_s7 + $0x68] sm:$0xff]  }
 0x1a8   :  { %v322_v9 = vpop.xlane.xlu0 %321 }
 0x1a9   :  { %v333_v10 = vmul.f32 0.00390625, %v322_v9 }
 0x1ab   :  { %v2280_v11 = vsub.f32 %v302_v52, %v333_v10  ;;  %v2282_v12 = vsub.f32 %v304_v54, %v333_v10  ;;  %v1935_v52 = vld [vmem:[%s2754_s5 + $0x28] sm:$0xff]   ;;  %v1937_v54 = vld [vmem:[%s2754_s5 + $0x30] sm:$0xff]  }
 0x1ac   :  { %v325_v13 = vpop.xlane.xlu0 %324  ;;  %1723 = vmatpush3.bf16.msra.mxu1 %v1935_v52 }
 0x1ad   :  { %v334_v14 = vmul.f32 0.00390625, %v325_v13  ;;  %v345_v16 = vmul.f32 %v2280_v11, %v2280_v11  ;;  %v346_v17 = vmul.f32 %v2282_v12, %v2282_v12  ;;  %1724 = vmatprep.subr.bf16.mxu1 %v1936_v53 }
 0x1af   :  { %v2288_v18 = vsub.f32 %v306_v57, %v334_v14  ;;  %v2290_v19 = vsub.f32 %v308_v58, %v334_v14  ;;  %v353_v20 = vadd.f32 %v346_v17, %v345_v16  ;;  %v1940_v57 = vld [vmem:[%s2755_s7 + $0x40] sm:$0xff]   ;;  %v414_v16 = vrot.slane %v405_v8, %v2270_v48 }
 0x1b0   :  { %v328_v21 = vpop.xlane.xlu1 %327  ;;  %1725 = vmatpush3.bf16.msra.mxu1 %v1937_v54  ;;  %v1943_v54 = vld [vmem:[%s2755_s7 + $0x8] sm:$0xff]  }
 0x1b1   :  { %v335_v22 = vmul.f32 0.00390625, %v328_v21  ;;  %354 = vadd.xlane.f32.xlu0 %v353_v20  ;;  %v347_v23 = vmul.f32 %v2288_v18, %v2288_v18  ;;  %v348_v24 = vmul.f32 %v2290_v19, %v2290_v19  ;;  %1726 = vmatprep.subr.bf16.mxu1 %v1938_v55  ;;  %v410_v20 = vrot.slane %v405_v8, %v2265_v46  ;;  %v1956_v8 = vld [vmem:[%s2758_s11] ss:$8 sps:$4 sm:$0xff]  }
 0x1b3   :  { %v2296_v25 = vsub.f32 %v312_v62, %v335_v22  ;;  %v2298_v26 = vsub.f32 %v314_v0, %v335_v22  ;;  %v356_v27 = vadd.f32 %v348_v24, %v347_v23 }
 0x1b4   :  { %v331_v28 = vpop.xlane.xlu1 %330  ;;  %1727 = vmatpush3.bf16.msra.mxu1 %v1939_v56 }
 0x1b5   :  { %v336_v29 = vmul.f32 0.00390625, %v331_v28  ;;  %357 = vadd.xlane.f32.xlu1 %v356_v27  ;;  %v349_v30 = vmul.f32 %v2296_v25, %v2296_v25  ;;  %v350_v31 = vmul.f32 %v2298_v26, %v2298_v26  ;;  %1740 = vmatprep.subr.bf16.mxu1 %v1940_v57 }
 0x1b7   :  { %v2304_v32 = vsub.f32 %v316_v2, %v336_v29  ;;  %v2306_v33 = vsub.f32 %v318_v4, %v336_v29  ;;  %v359_v34 = vadd.f32 %v350_v31, %v349_v30 }
 0x1b9   :  { %360 = vadd.xlane.f32.xlu0 %v359_v34  ;;  %v351_v35 = vmul.f32 %v2304_v32, %v2304_v32  ;;  %v352_v36 = vmul.f32 %v2306_v33, %v2306_v33 }
 0x1bb   :  { %v362_v37 = vadd.f32 %v352_v36, %v351_v35 }
 0x1bd   :  { %363 = vadd.xlane.f32.xlu1 %v362_v37 }
 0x23e   :  { %v355_v58 = vpop.xlane.xlu0 %354 }
 0x23f   :  { %v365_v59 = vmul.f32 0.00390625, %v355_v58 }
 0x241   :  { %v369_v60 = vadd.f32 1e-05, %v365_v59 }
 0x242   :  { %v358_v61 = vpop.xlane.xlu1 %357 }
 0x243   :  { %2036 = vrsqrt.f32 %v369_v60  ;;  %v366_v62 = vmul.f32 0.00390625, %v358_v61  ;;  %v1945_v61 = vld [vmem:[%s2755_s7 + $0x10] sm:$0xff]  }
 0x245   :  { %v370_v63 = vadd.f32 1e-05, %v366_v62 }
 0x246   :  { %v361_v0 = vpop.xlane.xlu0 %360 }
 0x247   :  { %2038 = vrsqrt.f32 %v370_v63  ;;  %v367_v1 = vmul.f32 0.00390625, %v361_v0  ;;  %v1946_v63 = vld [vmem:[%s2755_s7 + $0x58] sm:$0xff]  }
 0x248   :  { %v1947_v0 = vld [vmem:[%s2755_s7 + $0x18] sm:$0xff]  }
 0x249   :  { %v371_v2 = vadd.f32 1e-05, %v367_v1  ;;  %v1948_v1 = vld [vmem:[%s2755_s7 + $0x60] sm:$0xff]  }
 0x24a   :  { %v364_v4 = vpop.xlane.xlu1 %363 }
 0x24b   :  { %2040 = vrsqrt.f32 %v371_v2  ;;  %v368_v5 = vmul.f32 0.00390625, %v364_v4  ;;  %v1949_v2 = vld [vmem:[%s2755_s7 + $0x20] sm:$0xff]   ;;  %v1952_v4 = vld [vmem:[%s2755_s7 + $0x70] sm:$0xff]  }
 0x24d   :  { %v2037_v9 = vpop.eup %2036  ;;  %v372_v10 = vadd.f32 1e-05, %v368_v5  ;;  %v1953_v5 = vld [vmem:[%s2755_s7 + $0x30] sm:$0xff]  }
 0x24e   :  { %v378_v13 = vmul.f32 %v2037_v9, %v2282_v12  ;;  %v377_v14 = vmul.f32 %v2037_v9, %v2280_v11  ;;  %v1958_v9 = vld [vmem:[%s2758_s11 + $0x4] ss:$8 sps:$4 sm:$0xff]  }
 0x24f   :  { %2042 = vrsqrt.f32 %v372_v10  ;;  %v1961_v10 = vld [vmem:[%s2758_s11 + $0x14] ss:$8 sps:$4 sm:$0xff]   ;;  %1084 = vmatprep.subr.bf16.mxu0 %v1958_v9 }
 0x250   :  { %v398_v17 = vmul.f32 %v394_v7, %v378_v13  ;;  %v397_v21 = vmul.f32 %v390_v6, %v377_v14  ;;  %1085 = vmatpush1.bf16.msra.mxu0 %v1956_v8  ;;  %v1959_v13 = vld [vmem:[%s2758_s11 + $0x10] ss:$8 sps:$4 sm:$0xff]   ;;  %v1964_v14 = vld [vmem:[%s2758_s11 + $0x24] ss:$8 sps:$4 sm:$0xff]  }
 0x251   :  { %v2039_v22 = vpop.eup %2038  ;;  %1086 = vmatprep.subr.bf16.mxu0 %v1961_v10 }
 0x252   :  { %v380_v23 = vmul.f32 %v2039_v22, %v2290_v19  ;;  %v379_v24 = vmul.f32 %v2039_v22, %v2288_v18  ;;  %v418_v27 = vadd.f32 %v414_v16, %v398_v17  ;;  %v417_v30 = vadd.f32 %v410_v20, %v397_v21  ;;  %v1967_v17 = vld [vmem:[%s2758_s11 + $0x34] ss:$8 sps:$4 sm:$0xff]   ;;  %v1970_v21 = vld [vmem:[%s2758_s11 + $0x44] ss:$8 sps:$4 sm:$0xff]   ;;  %v1968_v22 = vld [vmem:[%s2758_s11 + $0x40] ss:$8 sps:$4 sm:$0xff]  }
 0x254   :  { %v400_v28 = vmul.f32 %v394_v7, %v380_v23  ;;  %v399_v29 = vmul.f32 %v390_v6, %v379_v24  ;;  %v426_v36 = vmax.f32 %v418_v27, 0.0  ;;  %v425_v38 = vmax.f32 %v417_v30, 0.0  ;;  %1087 = vmatpush1.bf16.msra.mxu0 %v1959_v13  ;;  %v1973_v23 = vld [vmem:[%s2758_s11 + $0x54] ss:$8 sps:$4 sm:$0xff]   ;;  %v1971_v24 = vld [vmem:[%s2758_s11 + $0x50] ss:$8 sps:$4 sm:$0xff]  }
 0x255   :  { %v2041_v31 = vpop.eup %2040  ;;  %1088 = vmatprep.subr.bf16.mxu0 %v1964_v14  ;;  %v1976_v27 = vld [vmem:[%s2758_s11 + $0x64] ss:$8 sps:$4 sm:$0xff]   ;;  %v1977_v30 = vld [vmem:[%s2758_s11 + $0x70] ss:$8 sps:$4 sm:$0xff]  }
 0x256   :  { %v420_v12 = vadd.f32 %v414_v16, %v400_v28  ;;  %v419_v34 = vadd.f32 %v410_v20, %v399_v29  ;;  %v382_v11 = vmul.f32 %v2041_v31, %v2298_v26  ;;  %v381_v35 = vmul.f32 %v2041_v31, %v2296_v25  ;;  %v1942_v26 = vld [vmem:[%s2755_s7 + $0x48] sm:$0xff]   ;;  %v1979_v29 = vld [vmem:[%s2758_s11 + $0x74] ss:$8 sps:$4 sm:$0xff]  }
 0x257   :  { %v1974_v28 = vld [vmem:[%s2758_s11 + $0x60] ss:$8 sps:$4 sm:$0xff]   ;;  %v1982_v31 = vld [vmem:[%s2758_s11 + $0x84] ss:$8 sps:$4 sm:$0xff]  }
 0x258   :  { %v428_v37 = vmax.f32 %v420_v12, 0.0  ;;  %v427_v41 = vmax.f32 %v419_v34, 0.0  ;;  %v402_v42 = vmul.f32 %v394_v7, %v382_v11  ;;  %v401_v19 = vmul.f32 %v390_v6, %v381_v35  ;;  %v1980_v12 = vld [vmem:[%s2758_s11 + $0x80] ss:$8 sps:$4 sm:$0xff]   ;;  %v1985_v34 = vld [vmem:[%s2758_s11 + $0x94] ss:$8 sps:$4 sm:$0xff]  }
 0x259   :  { %v2043_v44 = vpop.eup %2042  ;;  %v1983_v11 = vld [vmem:[%s2758_s11 + $0x90] ss:$8 sps:$4 sm:$0xff]   ;;  %v1988_v35 = vld [vmem:[%s2758_s11 + $0xa4] ss:$8 sps:$4 sm:$0xff]  }
 0x25a   :  { %v434_v45 = vpack.c.bf16 %v428_v37, %v426_v36  ;;  %v433_v18 = vpack.c.bf16 %v427_v41, %v425_v38  ;;  %v384_v49 = vmul.f32 %v2043_v44, %v2306_v33  ;;  %v383_v25 = vmul.f32 %v2043_v44, %v2304_v32  ;;  %v1944_v33 = vld [vmem:[%s2755_s7 + $0x50] sm:$0xff]   ;;  %v1986_v36 = vld [vmem:[%s2758_s11 + $0xa0] ss:$8 sps:$4 sm:$0xff]   ;;  %v1994_v41 = vld [vmem:[%s2758_s11 + $0xc4] ss:$8 sps:$4 sm:$0xff]  }
 0x25b   :  { %v422_v51 = vadd.f32 %v414_v16, %v402_v42  ;;  %v421_v53 = vadd.f32 %v410_v20, %v401_v19  ;;  %v1991_v37 = vld [vmem:[%s2758_s11 + $0xb4] ss:$8 sps:$4 sm:$0xff]   ;;  %v1989_v38 = vld [vmem:[%s2758_s11 + $0xb0] ss:$8 sps:$4 sm:$0xff]   ;;  %v1992_v42 = vld [vmem:[%s2758_s11 + $0xc0] ss:$8 sps:$4 sm:$0xff]  }
 0x25c   :  { %604 = vmatprep.mubr.bf16.mxu1 %v434_v45  ;;  %v404_v50 = vmul.f32 %v394_v7, %v384_v49  ;;  %v403_v52 = vmul.f32 %v390_v6, %v383_v25  ;;  %v1954_v6 = vld [vmem:[%s2755_s7 + $0x78] sm:$0xff]   ;;  %v2000_v45 = vld [vmem:[%s2758_s11 + $0xe4] ss:$8 sps:$4 sm:$0xff]   ;;  %v1611_v25 = vld [vmem:[%s2759_s6] ss:$0 sm:$0xff] }
 0x25d   :  { %605 = vmatmul.mubr.bf16.vlgmr.msra.gmra.mrb[0].mxu1 %v433_v18  ;;  %v430_v57 = vmax.f32 %v422_v51, 0.0  ;;  %v429_v58 = vmax.f32 %v421_v53, 0.0  ;;  %v1955_v7 = vld [vmem:[%s2755_s7 + $0x38] sm:$0xff]   ;;  %v1998_v18 = vld [vmem:[%s2758_s11 + $0xe0] ss:$8 sps:$4 sm:$0xff]  }
 0x25e   :  { %1741 = vmatpush3.bf16.msra.mxu1 %v1941_v47  ;;  %v424_v55 = vadd.f32 %v414_v16, %v404_v50  ;;  %v423_v56 = vadd.f32 %v410_v20, %v403_v52  ;;  %v1962_v16 = vld [vmem:[%s2758_s11 + $0x20] ss:$8 sps:$4 sm:$0xff]   ;;  %v1965_v20 = vld [vmem:[%s2758_s11 + $0x30] ss:$8 sps:$4 sm:$0xff]   ;;  %v1997_v44 = vld [vmem:[%s2758_s11 + $0xd4] ss:$8 sps:$4 sm:$0xff]  }
 0x25f   :  { %1742 = vmatprep.subr.bf16.mxu1 %v1942_v26  ;;  %1089 = vmatpush1.bf16.msra.mxu0 %v1962_v16  ;;  %v1995_v19 = vld [vmem:[%s2758_s11 + $0xd0] ss:$8 sps:$4 sm:$0xff]   ;;  %v2003_v47 = vld [vmem:[%s2758_s11 + $0xf4] ss:$8 sps:$4 sm:$0xff]  }
 0x260   :  { %v432_v32 = vmax.f32 %v424_v55, 0.0  ;;  %v431_v59 = vmax.f32 %v423_v56, 0.0  ;;  %1090 = vmatprep.subr.bf16.mxu0 %v1967_v17  ;;  %v2001_v49 = vld [vmem:[%s2758_s11 + $0xf0] ss:$8 sps:$4 sm:$0xff]  }
 0x262   :  { %1743 = vmatpush3.bf16.msra.mxu1 %v1943_v54  ;;  %v436_v60 = vpack.c.bf16 %v432_v32, %v430_v57  ;;  %v435_v62 = vpack.c.bf16 %v431_v59, %v429_v58 }
 0x263   :  { %1744 = vmatprep.subr.bf16.mxu1 %v1944_v33  ;;  %1091 = vmatpush1.bf16.msra.mxu0 %v1965_v20 }
 0x264   :  { %612 = vmatprep.mubr.bf16.mxu1 %v436_v60  ;;  %1092 = vmatprep.subr.bf16.mxu0 %v1970_v21 }
 0x265   :  { %613 = vmatmul.mubr.bf16.gmra.mrb[4].mxu1 %v435_v62 }
 0x266   :  { %1745 = vmatpush3.bf16.msra.mxu1 %v1945_v61  ;;  %792 = vmatprep.mubr.bf16.mxu1 %v2177_v15  ;;  %v1951_v15 = vld [vmem:[%s2755_s7 + $0x28] sm:$0xff]  }
 0x267   :  { %1746 = vmatprep.subr.bf16.mxu1 %v1946_v63  ;;  %1093 = vmatpush1.bf16.msra.mxu0 %v1968_v22 }
 0x268   :  { %1094 = vmatprep.subr.bf16.mxu0 %v1973_v23 }
 0x26a   :  { %1747 = vmatpush3.bf16.msra.mxu1 %v1947_v0 }
 0x26b   :  { %1748 = vmatprep.subr.bf16.mxu1 %v1948_v1  ;;  %1095 = vmatpush1.bf16.msra.mxu0 %v1971_v24 }
 0x26c   :  { %1096 = vmatprep.subr.bf16.mxu0 %v1976_v27 }
 0x26e   :  { %1749 = vmatpush3.bf16.msra.mxu1 %v1949_v2 }
 0x26f   :  { %1750 = vmatprep.subr.bf16.mxu1 %v1950_v3  ;;  %1097 = vmatpush1.bf16.msra.mxu0 %v1974_v28 }
 0x270   :  { %1098 = vmatprep.subr.bf16.mxu0 %v1979_v29 }
 0x272   :  { %1751 = vmatpush3.bf16.msra.mxu1 %v1951_v15  ;;  %v1628_v15 = vld [vmem:[%s2760_s8] ss:$0 sm:$0xff] }
 0x273   :  { %1752 = vmatprep.subr.bf16.mxu1 %v1952_v4  ;;  %1099 = vmatpush1.bf16.msra.mxu0 %v1977_v30 }
 0x274   :  { %1100 = vmatprep.subr.bf16.mxu0 %v1982_v31 }
 0x276   :  { %1753 = vmatpush3.bf16.msra.mxu1 %v1953_v5 }
 0x277   :  { %1754 = vmatprep.subr.bf16.mxu1 %v1954_v6  ;;  %1101 = vmatpush1.bf16.msra.mxu0 %v1980_v12 }
 0x278   :  { %1102 = vmatprep.subr.bf16.mxu0 %v1985_v34 }
 0x27a   :  { %1755 = vmatpush3.bf16.msra.mxu1 %v1955_v7 }
 0x27b   :  { %1103 = vmatpush1.bf16.msra.mxu0 %v1983_v11 }
 0x27c   :  { %1104 = vmatprep.subr.bf16.mxu0 %v1988_v35 }
 0x27d   :  { %793 = vmatmul.mubr.bf16.vlgmr.msra.gmra.mrb[8].mxu1 %v2249_v39 }
 0x27e   :  { %800 = vmatprep.mubr.bf16.mxu1 %v2251_v40 }
 0x27f   :  { %1105 = vmatpush1.bf16.msra.mxu0 %v1986_v36 }
 0x280   :  { %1106 = vmatprep.subr.bf16.mxu0 %v1991_v37 }
 0x283   :  { %1107 = vmatpush1.bf16.msra.mxu0 %v1989_v38 }
 0x284   :  { %1108 = vmatprep.subr.bf16.mxu0 %v1994_v41 }
 0x285   :  { %801 = vmatmul.mubr.bf16.gmra.mrb[12].mxu1 %v2261_v43 }
 0x287   :  { %1109 = vmatpush1.bf16.msra.mxu0 %v1992_v42 }
 0x288   :  { %1110 = vmatprep.subr.bf16.mxu0 %v1997_v44  ;;  %v2004_v44 = vld [vmem:[%s2761_s13 + $0x40] sm:$0xff]  }
 0x289   :  { %1816 = vmatprep.subr.bf16.mxu1 %v2004_v44 }
 0x28a   :  { %1817 = vmatpush3.bf16.msra.mxu1 %v2004_v44 }
 0x28b   :  { %1111 = vmatpush1.bf16.msra.mxu0 %v1995_v19  ;;  %v2005_v19 = vld [vmem:[%s2761_s13 + $0x48] sm:$0xff]  }
 0x28c   :  { %1112 = vmatprep.subr.bf16.mxu0 %v2000_v45  ;;  %1818 = vmatprep.subr.bf16.mxu1 %v2005_v19  ;;  %v2006_v45 = vld [vmem:[%s2761_s13 + $0x50] sm:$0xff]  }
 0x28e   :  { %1819 = vmatpush3.bf16.msra.mxu1 %v2005_v19 }
 0x28f   :  { %1113 = vmatpush1.bf16.msra.mxu0 %v1998_v18  ;;  %1820 = vmatprep.subr.bf16.mxu1 %v2006_v45  ;;  %v2007_v18 = vld [vmem:[%s2761_s13 + $0x58] sm:$0xff]  }
 0x290   :  { %1114 = vmatprep.subr.bf16.mxu0 %v2003_v47  ;;  %v2008_v47 = vld [vmem:[%s2761_s13 + $0x60] sm:$0xff]  }
 0x292   :  { %1821 = vmatpush3.bf16.msra.mxu1 %v2006_v45 }
 0x293   :  { %1115 = vmatpush1.bf16.msra.mxu0 %v2001_v49  ;;  %1822 = vmatprep.subr.bf16.mxu1 %v2007_v18  ;;  %v2009_v49 = vld [vmem:[%s2761_s13 + $0x68] sm:$0xff]  }
 0x296   :  { %1117 = vmatmul.mubr.bf16.vlgmr.msra.gmra.mrb[8].mxu0 %v2249_v39  ;;  %1823 = vmatpush3.bf16.msra.mxu1 %v2007_v18 }
 0x297   :  { %1126 = vmatprep.mubr.bf16.mxu0 %v2251_v40  ;;  %1824 = vmatprep.subr.bf16.mxu1 %v2008_v47 }
 0x29a   :  { %1825 = vmatpush3.bf16.msra.mxu1 %v2008_v47 }
 0x29b   :  { %1826 = vmatprep.subr.bf16.mxu1 %v2009_v49 }
 0x29e   :  { %1127 = vmatmul.mubr.bf16.gmra.mrb[12].mxu0 %v2261_v43  ;;  %1827 = vmatpush3.bf16.msra.mxu1 %v2009_v49 }
 0x330   :  { %v1728_v26 = vpop.f32.mrb[0].mxu1 }
 0x331   :  { %v1729_v50 = vpop.f32.mrb[1].mxu1 }
 0x332   :  { %v1730_v51 = vadd.f32 %v1729_v50, %v1728_v26  ;;  %v1731_v52 = vpop.f32.mrb[2].mxu1  ;;  %v2010_v26 = vld [vmem:[%s2761_s13 + $0x70] sm:$0xff]   ;;  %v2576_v50 = vld [vmem:[%s2761_s13 + $0xc0] sm:$0xff]  }
 0x333   :  { %v1732_v53 = vpop.f32.mrb[3].mxu1  ;;  %1828 = vmatprep.subr.bf16.mxu1 %v2010_v26  ;;  %1788 = vmatprep.subr.bf16.mxu0 %v2576_v50 }
 0x334   :  { %v607_v54 = vadd.f32 %v1730_v51, %v1611_v25  ;;  %v1733_v55 = vadd.f32 %v1732_v53, %v1731_v52  ;;  %1829 = vmatpush3.bf16.msra.mxu1 %v2010_v26  ;;  %v2581_v51 = vld [vmem:[%s2761_s13 + $0x80] sm:$0xff]   ;;  %v2594_v53 = vld [vmem:[%s2761_s13 + $0xc8] sm:$0xff]  }
 0x335   :  { %v2586_v52 = vld [vmem:[%s2761_s13] sm:$0xff]   ;;  %1789 = vmatpush3.bf16.msra.mxu0 %v2581_v51 }
 0x336   :  { %v610_v33 = vadd.f32 %v1733_v55, %v1611_v25  ;;  %v621_v56 = vmax.f32 %v607_v54, 0.0  ;;  %v2599_v54 = vld [vmem:[%s2761_s13 + $0x88] sm:$0xff]   ;;  %1790 = vmatprep.subr.bf16.mxu0 %v2594_v53  ;;  %v2606_v55 = vld [vmem:[%s2761_s13 + $0xd0] sm:$0xff]  }
 0x338   :  { %v622_v57 = vmax.f32 %v610_v33, 0.0  ;;  %v1734_v32 = vpop.f32.mrb[4].mxu1  ;;  %v2611_v33 = vld [vmem:[%s2761_s13 + $0x90] sm:$0xff]  }
 0x339   :  { %v1735_v39 = vpop.f32.mrb[5].mxu1  ;;  %1791 = vmatpush3.bf16.msra.mxu0 %v2599_v54 }
 0x33a   :  { %v1736_v58 = vadd.f32 %v1735_v39, %v1734_v32  ;;  %v1737_v40 = vpop.f32.mrb[6].mxu1  ;;  %v2526_v59 = vpack.c.bf16 %v622_v57, %v621_v56  ;;  %1792 = vmatprep.subr.bf16.mxu0 %v2606_v55  ;;  %v2618_v56 = vld [vmem:[%s2761_s13 + $0xd8] sm:$0xff]   ;;  %v2630_v32 = vld [vmem:[%s2761_s13 + $0xe0] sm:$0xff]  }
 0x33b   :  { %v1738_v43 = vpop.f32.mrb[7].mxu1  ;;  %v2623_v57 = vld [vmem:[%s2761_s13 + $0x98] sm:$0xff]   ;;  %v2635_v39 = vld [vmem:[%s2761_s13 + $0xa0] sm:$0xff]  }
 0x33c   :  { %v615_v60 = vadd.f32 %v1736_v58, %v1611_v25  ;;  %v1739_v61 = vadd.f32 %v1738_v43, %v1737_v40  ;;  %v2642_v58 = vld [vmem:[%s2761_s13 + $0xe8] sm:$0xff]  }
 0x33d   :  { %1793 = vmatpush3.bf16.msra.mxu0 %v2611_v33  ;;  %v2647_v43 = vld [vmem:[%s2761_s13 + $0xa8] sm:$0xff]  }
 0x33e   :  { %v618_v62 = vadd.f32 %v1739_v61, %v1611_v25  ;;  %v623_v63 = vmax.f32 %v615_v60, 0.0  ;;  %v2011_v25 = vld [vmem:[%s2761_s13 + $0x78] sm:$0xff]   ;;  %1794 = vmatprep.subr.bf16.mxu0 %v2618_v56  ;;  %v912_v60 = vld [vmem:[%s2762_s12] sm:$0x3] }
 0x33f   :  { %1830 = vmatprep.subr.bf16.mxu1 %v2011_v25 }
 0x340   :  { %v624_v0 = vmax.f32 %v618_v62, 0.0  ;;  %1831 = vmatpush3.bf16.msra.mxu1 %v2011_v25  ;;  %v917_v62 = vrot.slane %v912_v60, %v2265_v46 }
 0x341   :  { %1836 = vmatprep.subr.bf16.mxu1 %v2586_v52  ;;  %1795 = vmatpush3.bf16.msra.mxu0 %v2623_v57 }
 0x342   :  { %v2528_v1 = vpack.c.bf16 %v624_v0, %v623_v63  ;;  %1796 = vmatprep.subr.bf16.mxu0 %v2630_v32  ;;  %v921_v63 = vrot.slane %v912_v60, %v2270_v48 }
 0x345   :  { %1797 = vmatpush3.bf16.msra.mxu0 %v2635_v39 }
 0x346   :  { %1798 = vmatprep.subr.bf16.mxu0 %v2642_v58 }
 0x349   :  { %1799 = vmatpush3.bf16.msra.mxu0 %v2647_v43 }
 0x350   :  { %v1756_v2 = vpop.f32.mrb[8].mxu1 }
 0x351   :  { %v1757_v3 = vpop.f32.mrb[9].mxu1 }
 0x352   :  { %v1758_v4 = vadd.f32 %v1757_v3, %v1756_v2  ;;  %v1759_v5 = vpop.f32.mrb[10].mxu1  ;;  %v2659_v2 = vld [vmem:[%s2761_s13 + $0xf0] sm:$0xff]  }
 0x353   :  { %v1760_v6 = vpop.f32.mrb[11].mxu1  ;;  %1800 = vmatprep.subr.bf16.mxu0 %v2659_v2 }
 0x354   :  { %v1761_v7 = vadd.f32 %v1760_v6, %v1759_v5  ;;  %v795_v8 = vadd.f32 %v1758_v4, %v1628_v15  ;;  %v2664_v6 = vld [vmem:[%s2761_s13 + $0xb0] sm:$0xff]  }
 0x355   :  { %1801 = vmatpush3.bf16.msra.mxu0 %v2664_v6 }
 0x356   :  { %809 = vadd.xlane.f32.xlu0 %v795_v8  ;;  %v798_v9 = vadd.f32 %v1761_v7, %v1628_v15 }
 0x358   :  { %v1762_v10 = vpop.f32.mrb[12].mxu1  ;;  %811 = vadd.xlane.f32.xlu1 %v798_v9 }
 0x359   :  { %v1763_v13 = vpop.f32.mrb[13].mxu1 }
 0x35a   :  { %v1764_v14 = vadd.f32 %v1763_v13, %v1762_v10  ;;  %v1765_v16 = vpop.f32.mrb[14].mxu1  ;;  %v2671_v10 = vld [vmem:[%s2761_s13 + $0xf8] sm:$0xff]  }
 0x35b   :  { %v1766_v17 = vpop.f32.mrb[15].mxu1  ;;  %1802 = vmatprep.subr.bf16.mxu0 %v2671_v10 }
 0x35c   :  { %v1767_v20 = vadd.f32 %v1766_v17, %v1765_v16  ;;  %v803_v21 = vadd.f32 %v1764_v14, %v1628_v15  ;;  %v2676_v14 = vld [vmem:[%s2761_s13 + $0xb8] sm:$0xff]  }
 0x35d   :  { %1803 = vmatpush3.bf16.msra.mxu0 %v2676_v14 }
 0x35e   :  { %813 = vadd.xlane.f32.xlu0 %v803_v21  ;;  %v806_v22 = vadd.f32 %v1767_v20, %v1628_v15 }
 0x360   :  { %815 = vadd.xlane.f32.xlu1 %v806_v22 }
 0x369   :  { %v1118_v40 = vpop.f32.mrb[8].mxu0 }
 0x36a   :  { %v1120_v61 = vpop.f32.mrb[9].mxu0  ;;  %v1119_v3 = vadd.f32 %v1118_v40, %v917_v62 }
 0x36b   :  { %v1122_v0 = vpop.f32.mrb[10].mxu0  ;;  %v1121_v15 = vadd.f32 %v1120_v61, %v921_v63 }
 0x36c   :  { %v1123_v4 = vadd.f32 %v1122_v0, %v917_v62  ;;  %v1124_v5 = vpop.f32.mrb[11].mxu0  ;;  %v1137_v7 = vmax.f32 %v1119_v3, 0.0  ;;  %v1646_v3 = vld [vmem:[%s2764_s10] ss:$0 sm:$0xff] }
 0x36d   :  { %v1125_v46 = vadd.f32 %v1124_v5, %v921_v63  ;;  %v1138_v48 = vmax.f32 %v1121_v15, 0.0 }
 0x371   :  { %v1128_v17 = vpop.f32.mrb[12].mxu0 }
 0x372   :  { %v1129_v20 = vadd.f32 %v1128_v17, %v917_v62 }
 0x3e3   :  { %v810_v23 = vpop.xlane.xlu0 %809 }
 0x3e4   :  { %v818_v24 = vmul.f32 0.0078125, %v810_v23 }
 0x3e5   :  { %v812_v27 = vpop.xlane.xlu1 %811 }
 0x3e6   :  { %v2533_v28 = vsub.f32 %v795_v8, %v818_v24  ;;  %v819_v29 = vmul.f32 0.0078125, %v812_v27  ;;  %v1139_v8 = vmax.f32 %v1123_v4, 0.0  ;;  %v1141_v24 = vmax.f32 %v1129_v20, 0.0 }
 0x3e8   :  { %v2535_v30 = vsub.f32 %v798_v9, %v819_v29  ;;  %v826_v31 = vmul.f32 %v2533_v28, %v2533_v28  ;;  %v1140_v9 = vmax.f32 %v1125_v46, 0.0  ;;  %v1407_v13 = vpack.c.bf16 %v1139_v8, %v1137_v7 }
 0x3ea   :  { %830 = vadd.xlane.f32.xlu0 %v826_v31  ;;  %v827_v12 = vmul.f32 %v2535_v30, %v2535_v30  ;;  %v1408_v16 = vpack.c.bf16 %v1140_v9, %v1138_v48 }
 0x3eb   :  { %v814_v34 = vpop.xlane.xlu0 %813 }
 0x3ec   :  { %v820_v11 = vmul.f32 0.0078125, %v814_v34  ;;  %832 = vadd.xlane.f32.xlu1 %v827_v12  ;;  %1539 = vmatprep.mubr.bf16.mxu0 %v1408_v16 }
 0x3ed   :  { %v816_v35 = vpop.xlane.xlu1 %815  ;;  %1540 = vmatmul.mubr.bf16.vlgmr.msra.gmra.mrb[16].mxu0 %v1407_v13 }
 0x3ee   :  { %v2541_v36 = vsub.f32 %v803_v21, %v820_v11  ;;  %v821_v37 = vmul.f32 0.0078125, %v816_v35  ;;  %v1130_v21 = vpop.f32.mrb[13].mxu0 }
 0x3ef   :  { %v1132_v23 = vpop.f32.mrb[14].mxu0 }
 0x3f0   :  { %v2543_v38 = vsub.f32 %v806_v22, %v821_v37  ;;  %v828_v41 = vmul.f32 %v2541_v36, %v2541_v36  ;;  %v1131_v22 = vadd.f32 %v1130_v21, %v921_v63  ;;  %v1133_v27 = vadd.f32 %v1132_v23, %v917_v62  ;;  %v1134_v29 = vpop.f32.mrb[15].mxu0  ;;  %v1645_v62 = vld [vmem:[%s2763_s9] ss:$0 sm:$0xff] }
 0x3f1   :  { %v1135_v12 = vadd.f32 %v1134_v29, %v921_v63  ;;  %v2017_v29 = vld [vmem:[%s2761_s13 + $0x8] sm:$0xff]  }
 0x3f2   :  { %834 = vadd.xlane.f32.xlu0 %v828_v41  ;;  %v829_v42 = vmul.f32 %v2543_v38, %v2543_v38  ;;  %v1142_v31 = vmax.f32 %v1131_v22, 0.0  ;;  %v1143_v34 = vmax.f32 %v1133_v27, 0.0 }
 0x3f3   :  { %v1144_v11 = vmax.f32 %v1135_v12, 0.0  ;;  %v2035_v12 = vld [vmem:[%s2761_s13 + $0x38] sm:$0xff]  }
 0x3f4   :  { %836 = vadd.xlane.f32.xlu1 %v829_v42  ;;  %v2680_v35 = vpack.c.bf16 %v1143_v34, %v1141_v24 }
 0x3f5   :  { %v2682_v37 = vpack.c.bf16 %v1144_v11, %v1142_v31  ;;  %v2026_v31 = vld [vmem:[%s2761_s13 + $0x20] sm:$0xff]  }
 0x477   :  { %v831_v41 = vpop.xlane.xlu0 %830 }
 0x478   :  { %v838_v42 = vmul.f32 0.0078125, %v831_v41 }
 0x479   :  { %v833_v44 = vpop.xlane.xlu1 %832 }
 0x47a   :  { %v842_v19 = vadd.f32 1e-05, %v838_v42  ;;  %v839_v45 = vmul.f32 0.0078125, %v833_v44 }
 0x47c   :  { %2044 = vrsqrt.f32 %v842_v19  ;;  %v843_v18 = vadd.f32 1e-05, %v839_v45 }
 0x47e   :  { %2046 = vrsqrt.f32 %v843_v18 }
 0x47f   :  { %v835_v47 = vpop.xlane.xlu0 %834 }
 0x480   :  { %v840_v49 = vmul.f32 0.0078125, %v835_v47 }
 0x481   :  { %v837_v26 = vpop.xlane.xlu1 %836 }
 0x482   :  { %v844_v25 = vadd.f32 1e-05, %v840_v49  ;;  %v841_v40 = vmul.f32 0.0078125, %v837_v26 }
 0x484   :  { %2048 = vrsqrt.f32 %v844_v25  ;;  %v845_v60 = vadd.f32 1e-05, %v841_v40 }
 0x486   :  { %v2045_v61 = vpop.eup %2044  ;;  %2050 = vrsqrt.f32 %v845_v60 }
 0x487   :  { %v850_v63 = vmul.f32 %v2045_v61, %v2533_v28 }
 0x488   :  { %v2047_v0 = vpop.eup %2046 }
 0x489   :  { %v851_v15 = vmul.f32 %v2047_v0, %v2535_v30  ;;  %v861_v4 = vmul.f32 %v1645_v62, %v850_v63 }
 0x48b   :  { %v862_v5 = vmul.f32 %v1645_v62, %v851_v15  ;;  %v872_v46 = vadd.f32 %v1646_v3, %v861_v4 }
 0x48d   :  { %v873_v7 = vadd.f32 %v1646_v3, %v862_v5  ;;  %v876_v9 = vmax.f32 %v872_v46, 0.0 }
 0x48e   :  { %v2049_v48 = vpop.eup %2048 }
 0x48f   :  { %v852_v8 = vmul.f32 %v2049_v48, %v2541_v36  ;;  %v877_v13 = vmax.f32 %v873_v7, 0.0  ;;  %v2020_v36 = vld [vmem:[%s2761_s13 + $0x10] sm:$0xff]  }
 0x490   :  { %v2051_v16 = vpop.eup %2050 }
 0x491   :  { %v853_v17 = vmul.f32 %v2051_v16, %v2543_v38  ;;  %v1211_v28 = vpack.c.bf16 %v877_v13, %v876_v9  ;;  %v863_v20 = vmul.f32 %v1645_v62, %v852_v8  ;;  %v2023_v38 = vld [vmem:[%s2761_s13 + $0x18] sm:$0xff]  }
 0x493   :  { %1832 = vmatprep.mubr.bf16.mxu1 %v1211_v28  ;;  %v864_v21 = vmul.f32 %v1645_v62, %v853_v17  ;;  %v874_v22 = vadd.f32 %v1646_v3, %v863_v20 }
 0x495   :  { %v875_v23 = vadd.f32 %v1646_v3, %v864_v21  ;;  %v878_v24 = vmax.f32 %v874_v22, 0.0 }
 0x497   :  { %v879_v30 = vmax.f32 %v875_v23, 0.0 }
 0x499   :  { %v1212_v27 = vpack.c.bf16 %v879_v30, %v878_v24 }
 0x49b   :  { %1833 = vmatmul.mubr.bf16.vlgmr.msra.gmra.mrb[16].mxu1 %v1212_v27 }
 0x49c   :  { %1837 = vmatpush3.bf16.msra.mxu1 %v2586_v52  ;;  %1852 = vmatprep.mubr.bf16.mxu1 %v2526_v59  ;;  %v2029_v59 = vld [vmem:[%s2761_s13 + $0x28] sm:$0xff]   ;;  %v2032_v52 = vld [vmem:[%s2761_s13 + $0x30] sm:$0xff]  }
 0x49d   :  { %1838 = vmatprep.subr.bf16.mxu1 %v2017_v29 }
 0x4a0   :  { %1839 = vmatpush3.bf16.msra.mxu1 %v2017_v29 }
 0x4a1   :  { %1840 = vmatprep.subr.bf16.mxu1 %v2020_v36 }
 0x4a4   :  { %1841 = vmatpush3.bf16.msra.mxu1 %v2020_v36 }
 0x4a5   :  { %1842 = vmatprep.subr.bf16.mxu1 %v2023_v38 }
 0x4a8   :  { %1843 = vmatpush3.bf16.msra.mxu1 %v2023_v38 }
 0x4a9   :  { %1844 = vmatprep.subr.bf16.mxu1 %v2026_v31 }
 0x4ac   :  { %1845 = vmatpush3.bf16.msra.mxu1 %v2026_v31 }
 0x4ad   :  { %1846 = vmatprep.subr.bf16.mxu1 %v2029_v59 }
 0x4b0   :  { %1847 = vmatpush3.bf16.msra.mxu1 %v2029_v59 }
 0x4b1   :  { %1848 = vmatprep.subr.bf16.mxu1 %v2032_v52 }
 0x4b4   :  { %1849 = vmatpush3.bf16.msra.mxu1 %v2032_v52 }
 0x4b5   :  { %1850 = vmatprep.subr.bf16.mxu1 %v2035_v12 }
 0x4b8   :  { %1851 = vmatpush3.bf16.msra.mxu1 %v2035_v12 }
 0x4b9   :  { %1856 = vmatprep.subr.bf16.mxu1 %v2576_v50 }
 0x4bb   :  { %1853 = vmatmul.mubr.bf16.vlgmr.msra.gmra.mrb[16].mxu1 %v2528_v1 }
 0x4bc   :  { %1864 = vmatpush3.bf16.msra.mxu1 %v2581_v51  ;;  %1547 = vmatprep.mubr.bf16.mxu1 %v2682_v37 }
 0x4bd   :  { %1857 = vmatprep.subr.bf16.mxu1 %v2594_v53 }
 0x4c0   :  { %1865 = vmatpush3.bf16.msra.mxu1 %v2599_v54  ;;  %v1804_v1 = vpop.f32.mrb[16].mxu0 }
 0x4c1   :  { %1858 = vmatprep.subr.bf16.mxu1 %v2606_v55  ;;  %v1805_v50 = vpop.f32.mrb[17].mxu0 }
 0x4c2   :  { %v1806_v51 = vadd.f32 %v1805_v50, %v1804_v1  ;;  %v1807_v53 = vpop.f32.mrb[18].mxu0 }
 0x4c3   :  { %v1808_v54 = vpop.f32.mrb[19].mxu0 }
 0x4c4   :  { %1866 = vmatpush3.bf16.msra.mxu1 %v2611_v33  ;;  %v1809_v55 = vadd.f32 %v1808_v54, %v1807_v53 }
 0x4c5   :  { %1859 = vmatprep.subr.bf16.mxu1 %v2618_v56 }
 0x4c8   :  { %1867 = vmatpush3.bf16.msra.mxu1 %v2623_v57  ;;  %v1711_v57 = vld [vmem:[%s2765_s14] ss:$0 sm:$0xff] }
 0x4c9   :  { %1860 = vmatprep.subr.bf16.mxu1 %v2630_v32 }
 0x4cc   :  { %1868 = vmatpush3.bf16.msra.mxu1 %v2635_v39 }
 0x4cd   :  { %1861 = vmatprep.subr.bf16.mxu1 %v2642_v58 }
 0x4d0   :  { %1869 = vmatpush3.bf16.msra.mxu1 %v2647_v43 }
 0x4d1   :  { %1862 = vmatprep.subr.bf16.mxu1 %v2659_v2 }
 0x4d4   :  { %1870 = vmatpush3.bf16.msra.mxu1 %v2664_v6 }
 0x4d5   :  { %1863 = vmatprep.subr.bf16.mxu1 %v2671_v10 }
 0x4d8   :  { %1871 = vmatpush3.bf16.msra.mxu1 %v2676_v14 }
 0x4db   :  { %1548 = vmatmul.mubr.bf16.vlgmr.msra.gmra.mrb[20].mxu1 %v2680_v35 }
 0x58e   :  { %v1854_v33 = vpop.f32.mrb[16].mxu1 }
 0x58f   :  { %v1392_v56 = vpop.f32.mrb[17].mxu1 }
 0x590   :  { %v1556_v32 = vadd.f32 %v1806_v51, %v1392_v56  ;;  %v1855_v39 = vpop.f32.mrb[18].mxu1 }
 0x591   :  { %v1395_v58 = vpop.f32.mrb[19].mxu1 }
 0x592   :  { %v1567_v43 = vadd.f32 %v1711_v57, %v1556_v32  ;;  %v1557_v2 = vadd.f32 %v1809_v55, %v1395_v58 }
 0x594   :  { %1571 = vst [vmem:[%s2766_s15] sm:$0xff] %v1567_v43  ;;  %v1568_v6 = vadd.f32 %v1711_v57, %v1557_v2 }
 0x596   :  { %1572 = vst [vmem:[%s2766_s15 + $0x8] sm:$0xff] %v1568_v6 }
 0x5ae   :  { %v1810_v10 = vpop.f32.mrb[20].mxu1 }
 0x5af   :  { %v1811_v14 = vpop.f32.mrb[21].mxu1 }
 0x5b0   :  { %v1812_v34 = vadd.f32 %v1811_v14, %v1810_v10  ;;  %v1813_v11 = vpop.f32.mrb[22].mxu1 }
 0x5b1   :  { %v1814_v35 = vpop.f32.mrb[23].mxu1 }
 0x5b2   :  { %v1558_v37 = vadd.f32 %v1854_v33, %v1812_v34  ;;  %v1815_v41 = vadd.f32 %v1814_v35, %v1813_v11 }
 0x5b4   :  { %v1569_v42 = vadd.f32 %v1711_v57, %v1558_v37  ;;  %v1559_v44 = vadd.f32 %v1855_v39, %v1815_v41 }
 0x5b6   :  { %1573 = vst [vmem:[%s2766_s15 + $0x10] sm:$0xff] %v1569_v42  ;;  %v1570_v19 = vadd.f32 %v1711_v57, %v1559_v44 }
 0x5b8   :  { %1574 = vst [vmem:[%s2766_s15 + $0x18] sm:$0xff] %v1570_v19 }

</bundles_post_ra>
